<compile_context>
chip_gen: v7x
topology: tpu7x:2x2x1
jax: 0.10.0
libtpu: 0.0.40
codegen_flags: <defaults>
</compile_context>

<pallas_src>
import jax
import jax.numpy as jnp
from jax import lax
from jax.experimental import pallas as pl
from jax.experimental.pallas import tpu as pltpu

LANE_PAD = 8                       # aligned left padding of the W axis in the VMEM scratch
VMEM_LIMIT = 48 * 1024 * 1024      # explicit scoped-VMEM limit (headroom on v7x 64 MiB)


# ----------------------------------------------------------------------------
# Kernel 1: ConvTranspose2d(k=2, s=2) as one MXU matmul per (batch, row-parity)
# Output layout (N, Hin, 2, Win, 2*Cout), last dim ordered (dj, cout): the
# wrapper pixel shuffle is then a *pure reshape* (i, di, j, dj, c) -> (2i+di, 2j+dj, c).
# ----------------------------------------------------------------------------
def deconv2x2_kernel(x_ref, wt_ref, bt_ref, o_ref):
    # x_ref : (1, Hin, Win, Cin)   bf16
    # wt_ref: (1, Cin, 2*Cout)     bf16, this row-parity's taps, columns (dj, cout)
    # bt_ref: (1, 2*Cout)          f32 bias tiled over dj
    # o_ref : (1, Hin, 1, Win, 2*Cout) bf16
    _, hin, win, cin = x_ref.shape
    xf = x_ref[0].reshape(hin * win, cin)
    y = jnp.dot(xf, wt_ref[0], preferred_element_type=jnp.float32)
    y = y + bt_ref[...]
    o_ref[0, :, 0, :, :] = y.reshape(hin, win, -1).astype(o_ref.dtype)


# ----------------------------------------------------------------------------
# Shared helpers for the 3x3 conv kernels
# ----------------------------------------------------------------------------
def _fill_padded(pad_ref, src_ref):
    """Zero the scratch and copy one image into its interior (SAME pad in VMEM)."""
    h, w = src_ref.shape[1], src_ref.shape[2]
    pad_ref[...] = jnp.zeros(pad_ref.shape, pad_ref.dtype)
    pad_ref[1:h + 1, LANE_PAD:LANE_PAD + w, :] = src_ref[0]


def _conv3x3_accum(pad_ref, w_ref, row0, th, w, acc):
    """Accumulate 9 shifted matmuls for one TILE_H-row output strip."""
    cin = pad_ref.shape[-1]
    for dy in range(3):
        for dx in range(3):
            patch = pad_ref[pl.ds(row0 + dy, th),
                            LANE_PAD - 1 + dx:LANE_PAD - 1 + dx + w, :]
            acc = acc + jnp.dot(patch.reshape(th * w, cin), w_ref[dy * 3 + dx],
                                preferred_element_type=jnp.float32)
    return acc


# ----------------------------------------------------------------------------
# Kernel 2: fused "cat([skip, up]) -> Conv3x3(pad=1) -> BN -> ReLU"
# (split-K over the concat boundary; padding staged in VMEM; row-strip output)
# ----------------------------------------------------------------------------
def concat_conv3x3_bn_relu_kernel(skip_ref, up_ref, wsk_ref, wup_ref,
                                  sc_ref, of_ref, o_ref, pad_s, pad_u):
    t = pl.program_id(1)
    _, th, w, cout = o_ref.shape

    @pl.when(t == 0)          # once per image: stage both padded inputs in VMEM
    def _():
        _fill_padded(pad_s, skip_ref)
        _fill_padded(pad_u, up_ref)

    row0 = pl.multiple_of(t * th, th)
    acc = jnp.zeros((th * w, cout), jnp.float32)
    acc = _conv3x3_accum(pad_s, wsk_ref, row0, th, w, acc)   # skip half of the concat
    acc = _conv3x3_accum(pad_u, wup_ref, row0, th, w, acc)   # upsampled half
    y = jnp.maximum(acc * sc_ref[...] + of_ref[...], 0.0)    # f32 epilogue (v5e-safe)
    o_ref[0] = y.reshape(th, w, cout).astype(o_ref.dtype)


# ----------------------------------------------------------------------------
# Kernel 3: fused Conv3x3(pad=1) -> BN -> ReLU (single input, second DoubleConv conv)
# ----------------------------------------------------------------------------
def conv3x3_bn_relu_kernel(x_ref, w_ref, sc_ref, of_ref, o_ref, pad_x):
    t = pl.program_id(1)
    _, th, w, cout = o_ref.shape

    @pl.when(t == 0)
    def _():
        _fill_padded(pad_x, x_ref)

    row0 = pl.multiple_of(t * th, th)
    acc = jnp.zeros((th * w, cout), jnp.float32)
    acc = _conv3x3_accum(pad_x, w_ref, row0, th, w, acc)
    y = jnp.maximum(acc * sc_ref[...] + of_ref[...], 0.0)
    o_ref[0] = y.reshape(th, w, cout).astype(o_ref.dtype)


# ----------------------------------------------------------------------------
# Wrappers (pallas_call + layout glue)
# ----------------------------------------------------------------------------
def _row_tile(h, tile_h):
    return tile_h if h % tile_h == 0 else h


def transposed_conv2x2(x, wt_k, bt2, cout):
    """ConvTranspose2d(k=2, s=2). x: (N, Hin, Win, Cin) bf16 -> (N, 2Hin, 2Win, Cout) bf16."""
    n, hin, win, cin = x.shape
    y = pl.pallas_call(
        deconv2x2_kernel,
        out_shape=jax.ShapeDtypeStruct((n, hin, 2, win, 2 * cout), jnp.bfloat16),
        grid=(n, 2),
        in_specs=[
            pl.BlockSpec((1, hin, win, cin), lambda b, d: (b, 0, 0, 0)),
            pl.BlockSpec((1, cin, 2 * cout), lambda b, d: (d, 0, 0)),
            pl.BlockSpec((1, 2 * cout), lambda b, d: (0, 0)),
        ],
        out_specs=pl.BlockSpec((1, hin, 1, win, 2 * cout),
                               lambda b, d: (b, 0, d, 0, 0)),
        compiler_params=pltpu.CompilerParams(
            dimension_semantics=("parallel", "parallel"),
            vmem_limit_bytes=VMEM_LIMIT),
    )(x, wt_k, bt2)
    # pixel shuffle == contiguous reshape (b, i, di, j, (dj, c)) -> (b, 2i+di, 2j+dj, c)
    return y.reshape(n, 2 * hin, 2 * win, cout)


def concat_conv3x3_bn_relu(skip, up, w_skip, w_up, scale, offset, out_dtype, tile_h):
    n, h, w, cs = skip.shape
    cu = up.shape[3]
    cout = w_skip.shape[-1]
    th = _row_tile(h, tile_h)
    return pl.pallas_call(
        concat_conv3x3_bn_relu_kernel,
        out_shape=jax.ShapeDtypeStruct((n, h, w, cout), out_dtype),
        grid=(n, h // th),
        in_specs=[
            pl.BlockSpec((1, h, w, cs), lambda b, t: (b, 0, 0, 0)),
            pl.BlockSpec((1, h, w, cu), lambda b, t: (b, 0, 0, 0)),
            pl.BlockSpec((9, cs, cout), lambda b, t: (0, 0, 0)),
            pl.BlockSpec((9, cu, cout), lambda b, t: (0, 0, 0)),
            pl.BlockSpec((1, cout), lambda b, t: (0, 0)),
            pl.BlockSpec((1, cout), lambda b, t: (0, 0)),
        ],
        out_specs=pl.BlockSpec((1, th, w, cout), lambda b, t: (b, t, 0, 0)),
        scratch_shapes=[
            pltpu.VMEM((h + 2, w + LANE_PAD + 8, cs), jnp.bfloat16),
            pltpu.VMEM((h + 2, w + LANE_PAD + 8, cu), jnp.bfloat16),
        ],
        compiler_params=pltpu.CompilerParams(
            dimension_semantics=("parallel", "arbitrary"),
            vmem_limit_bytes=VMEM_LIMIT),
    )(skip, up, w_skip, w_up, scale, offset)


def conv3x3_bn_relu(x, w_k, scale, offset, out_dtype, tile_h):
    n, h, w, cin = x.shape
    cout = w_k.shape[-1]
    th = _row_tile(h, tile_h)
    return pl.pallas_call(
        conv3x3_bn_relu_kernel,
        out_shape=jax.ShapeDtypeStruct((n, h, w, cout), out_dtype),
        grid=(n, h // th),
        in_specs=[
            pl.BlockSpec((1, h, w, cin), lambda b, t: (b, 0, 0, 0)),
            pl.BlockSpec((9, cin, cout), lambda b, t: (0, 0, 0)),
            pl.BlockSpec((1, cout), lambda b, t: (0, 0)),
            pl.BlockSpec((1, cout), lambda b, t: (0, 0)),
        ],
        out_specs=pl.BlockSpec((1, th, w, cout), lambda b, t: (b, t, 0, 0)),
        scratch_shapes=[pltpu.VMEM((h + 2, w + LANE_PAD + 8, cin), jnp.bfloat16)],
        compiler_params=pltpu.CompilerParams(
            dimension_semantics=("parallel", "arbitrary"),
            vmem_limit_bytes=VMEM_LIMIT),
    )(x, w_k, scale, offset)


def up_forward(x_nchw, skip_nchw, p, tile_h=8):
    """Forward pass of Up (bilinear=False), NCHW in / NCHW out."""
    # NCHW -> NHWC; single bf16 cast for all activations (f32 accumulation in-kernel)
    x = jnp.transpose(x_nchw, (0, 2, 3, 1)).astype(jnp.bfloat16)
    skip = jnp.transpose(skip_nchw, (0, 2, 3, 1)).astype(jnp.bfloat16)
    cout = p["s1"].shape[1]

    up = transposed_conv2x2(x, p["wt_k"], p["bt2"], cout)          # (N, 2H, 2W, Cout) bf16

    # pad to skip's spatial size if they differ (same convention as F.pad)
    dh = skip.shape[1] - up.shape[1]
    dw = skip.shape[2] - up.shape[2]
    if dh != 0 or dw != 0:
        assert dh >= 0 and dw >= 0, "skip must be at least as large as upsampled x"
        up = jnp.pad(up, ((0, 0), (dh // 2, dh - dh // 2),
                          (dw // 2, dw - dw // 2), (0, 0)))

    # cat([skip, up], channel) + Conv3x3 + BN + ReLU, fused (no HBM concat tensor)
    h = concat_conv3x3_bn_relu(skip, up, p["w1s_k"], p["w1u_k"],
                               p["s1"], p["o1"], jnp.bfloat16, tile_h)
    # TODO(synk): Dropout(p) omitted (eval-mode identity; no PRNG masking).
    h = conv3x3_bn_relu(h, p["w2_k"], p["s2"], p["o2"], jnp.float32, tile_h)
    return jnp.transpose(h, (0, 3, 1, 2))                          # -> NCHW f32


# ----------------------------------------------------------------------------
# Deterministic parameter construction (PyTorch layouts -> kernel layouts)
# ----------------------------------------------------------------------------
def make_params(key, in_ch, out_ch):
    ks = jax.random.split(key, 16)
    eps = 1e-5
    f32, bf16 = jnp.float32, jnp.bfloat16

    def bn(kg, kb, km, kv, c):
        gamma = 1.0 + 0.1 * jax.random.normal(kg, (c,), f32)
        beta = 0.1 * jax.random.normal(kb, (c,), f32)
        rmean = 0.1 * jax.random.normal(km, (c,), f32)
        rvar = 1.0 + 0.1 * jnp.abs(jax.random.normal(kv, (c,), f32))
        return gamma, beta, rmean, rvar

    # ConvTranspose2d weight: (in_ch, out_ch, 2, 2); Conv2d weights: (out, in, 3, 3)
    wt_pt = 0.1 * jax.random.normal(ks[0], (in_ch, out_ch, 2, 2), f32)
    bt = 0.1 * jax.random.normal(ks[1], (out_ch,), f32)
    w1_pt = 0.03 * jax.random.normal(ks[2], (out_ch, 2 * out_ch, 3, 3), f32)
    b1 = 0.1 * jax.random.normal(ks[3], (out_ch,), f32)
    w2_pt = 0.05 * jax.random.normal(ks[4], (out_ch, out_ch, 3, 3), f32)
    b2 = 0.1 * jax.random.normal(ks[5], (out_ch,), f32)
    g1, be1, rm1, rv1 = bn(ks[6], ks[7], ks[8], ks[9], out_ch)
    g2, be2, rm2, rv2 = bn(ks[10], ks[11], ks[12], ks[13], out_ch)

    # fold conv bias + eval-mode BatchNorm into (scale, offset), kept in f32
    s1 = g1 / jnp.sqrt(rv1 + eps)
    o1 = (b1 - rm1) * s1 + be1
    s2 = g2 / jnp.sqrt(rv2 + eps)
    o2 = (b2 - rm2) * s2 + be2

    params = {
        # kernel layouts (matmul weights in bf16; bias / BN folded terms in f32)
        "wt_k": jnp.transpose(wt_pt, (2, 0, 3, 1))
                   .reshape(2, in_ch, 2 * out_ch).astype(bf16),     # (di, Cin, (dj, Cout))
        "bt2": jnp.tile(bt, 2).reshape(1, 2 * out_ch),
        "w1s_k": jnp.transpose(w1_pt[:, :out_ch], (2, 3, 1, 0))
                    .reshape(9, out_ch, out_ch).astype(bf16),        # skip half of concat
        "w1u_k": jnp.transpose(w1_pt[:, out_ch:], (2, 3, 1, 0))
                    .reshape(9, out_ch, out_ch).astype(bf16),        # upsampled half
        "s1": s1.reshape(1, out_ch), "o1": o1.reshape(1, out_ch),
        "w2_k": jnp.transpose(w2_pt, (2, 3, 1, 0))
                   .reshape(9, out_ch, out_ch).astype(bf16),
        "s2": s2.reshape(1, out_ch), "o2": o2.reshape(1, out_ch),
        # pytorch layouts (for the independent pure-JAX reference)
        "wt_pt": wt_pt, "bt": bt, "w1_pt": w1_pt, "w2_pt": w2_pt,
        "b1": b1, "b2": b2,
        "bn1": (g1, be1, rm1, rv1), "bn2": (g2, be2, rm2, rv2),
    }
    return params


# ----------------------------------------------------------------------------
# Pure-JAX reference (independent code path) for verification.
# It uses the same bf16-quantized inputs/weights but keeps activations in f32,
# so the only expected differences are intermediate bf16 activation rounding.
# ----------------------------------------------------------------------------
def ref_forward(x_nchw, skip_nchw, p):
    eps = 1e-5
    q = lambda a: a.astype(jnp.bfloat16).astype(jnp.float32)
    x = q(jnp.transpose(x_nchw, (0, 2, 3, 1)))
    skip = q(jnp.transpose(skip_nchw, (0, 2, 3, 1)))
    n, hin, win, _ = x.shape
    cout = p["bt"].shape[0]

    wt_r = q(jnp.transpose(p["wt_pt"], (0, 2, 3, 1)))   # (Cin, 2, 2, Cout)
    up = jnp.einsum("nijc,cdeo->nidjeo", x, wt_r)
    up = up.reshape(n, 2 * hin, 2 * win, cout) + p["bt"]

    cat = jnp.concatenate([skip, up], axis=-1)

    def conv_bn_relu(h, w_pt, b, bn):
        g, be, rm, rv = bn
        w = q(jnp.transpose(w_pt, (2, 3, 1, 0)))        # HWIO
        y = lax.conv_general_dilated(h, w, (1, 1), "SAME",
                                     dimension_numbers=("NHWC", "HWIO", "NHWC"))
        y = y + b
        y = (y - rm) / jnp.sqrt(rv + eps) * g + be
        return jnp.maximum(y, 0.0)

    h = conv_bn_relu(cat, p["w1_pt"], p["b1"], p["bn1"])
    h = conv_bn_relu(h, p["w2_pt"], p["b2"], p["bn2"])
    return jnp.transpose(h, (0, 3, 1, 2))


# ----------------------------------------------------------------------------
if __name__ == "__main__":
    # Real UNet decoder channel counts (multiples of 128 -> lane-dense stores,
    # fully fed MXU columns), small spatial size.
    N, in_ch, out_ch = 2, 256, 128
    Hin = Win = 8                      # decoder feature map
    Hs = Ws = 2 * Hin                  # skip connection spatial size

    key = jax.random.PRNGKey(0)
    kx, ksk, kp = jax.random.split(key, 3)
    x = jax.random.normal(kx, (N, in_ch, Hin, Win), jnp.float32)      # NCHW
    skip = jax.random.normal(ksk, (N, out_ch, Hs, Ws), jnp.float32)   # NCHW
    params = make_params(kp, in_ch, out_ch)

    out = jax.block_until_ready(jax.jit(up_forward)(x, skip, params))
    ref = jax.block_until_ready(ref_forward(x, skip, params))

    assert out.shape == (N, out_ch, Hs, Ws), out.shape
    max_err = float(jnp.max(jnp.abs(out - ref)))
    # bf16 activations (f32 accumulation) -> loosened tolerance vs. f32 reference
    assert jnp.allclose(out, ref, rtol=2e-2, atol=1e-1), max_err

    print("KERNEL_OK")
</pallas_src>

<mosaic_0001>
module attributes {stable_mosaic.version = 11 : i64} {
  func.func @deconv2x2_kernel(%arg0: i32, %arg1: i32, %arg2: memref<1x8x8x256xbf16, #tpu.memory_space<vmem>>, %arg3: memref<1x256x256xbf16, #tpu.memory_space<vmem>>, %arg4: memref<1x256xf32, #tpu.memory_space<vmem>>, %arg5: memref<1x8x1x8x256xbf16, #tpu.memory_space<vmem>>) attributes {dimension_semantics = [#tpu.dimension_semantics<parallel>, #tpu.dimension_semantics<parallel>], iteration_bounds = array<i64: 2, 2>, scalar_prefetch = 0 : i64, scratch_operands = 0 : i64, tpu.core_type = #tpu.core_type<tc>, window_params = [{transform_indices = @transform_0, window_bounds = array<i64: 1, 8, 8, 256>}, {transform_indices = @transform_1, window_bounds = array<i64: 1, 256, 256>}, {pipeline_mode = #tpu.pipeline_mode<synchronous>, transform_indices = @transform_2, window_bounds = array<i64: 1, 256>}, {transform_indices = @transform_3, window_bounds = array<i64: 1, 8, 1, 8, 256>}]} {
    %c0 = arith.constant 0 : index
    %c0_0 = arith.constant 0 : index
    %c0_1 = arith.constant 0 : index
    %c0_2 = arith.constant 0 : index
    %0 = vector.load %arg2[%c0, %c0_0, %c0_1, %c0_2] : memref<1x8x8x256xbf16, #tpu.memory_space<vmem>>, vector<1x8x8x256xbf16>
    %1 = vector.shape_cast %0 : vector<1x8x8x256xbf16> to vector<8x8x256xbf16>
    %2 = vector.shape_cast %1 : vector<8x8x256xbf16> to vector<64x256xbf16>
    %c0_3 = arith.constant 0 : index
    %c0_4 = arith.constant 0 : index
    %c0_5 = arith.constant 0 : index
    %3 = vector.load %arg3[%c0_3, %c0_4, %c0_5] : memref<1x256x256xbf16, #tpu.memory_space<vmem>>, vector<1x256x256xbf16>
    %4 = vector.shape_cast %3 : vector<1x256x256xbf16> to vector<256x256xbf16>
    %cst = arith.constant dense<0.000000e+00> : vector<64x256xf32>
    %5 = tpu.matmul %2, %4, %cst {dimension_numbers = #tpu.dot_dimension_numbers<[1], [0], [0], [1], [0, 0, 1, 1], [], []>} : vector<64x256xbf16>, vector<256x256xbf16>, vector<64x256xf32> -> vector<64x256xf32>
    %c0_6 = arith.constant 0 : index
    %c0_7 = arith.constant 0 : index
    %6 = vector.load %arg4[%c0_6, %c0_7] : memref<1x256xf32, #tpu.memory_space<vmem>>, vector<1x256xf32>
    %7 = vector.broadcast %6 : vector<1x256xf32> to vector<64x256xf32>
    %8 = arith.addf %5, %7 : vector<64x256xf32>
    %9 = vector.shape_cast %8 : vector<64x256xf32> to vector<8x8x256xf32>
    %10 = arith.truncf %9 : vector<8x8x256xf32> to vector<8x8x256xbf16>
    %c0_8 = arith.constant 0 : index
    %c0_9 = arith.constant 0 : index
    %c0_10 = arith.constant 0 : index
    %c0_11 = arith.constant 0 : index
    %c0_12 = arith.constant 0 : index
    %11 = vector.load %arg5[%c0_8, %c0_9, %c0_10, %c0_11, %c0_12] : memref<1x8x1x8x256xbf16, #tpu.memory_space<vmem>>, vector<1x8x1x8x256xbf16>
    %12 = vector.shape_cast %11 : vector<1x8x1x8x256xbf16> to vector<8x8x256xbf16>
    %13 = vector.shape_cast %10 : vector<8x8x256xbf16> to vector<1x8x1x8x256xbf16>
    tpu.vector_store %arg5[%c0_8, %c0_9, %c0_10, %c0_11, %c0_12], %13 {strides = array<i32>} : memref<1x8x1x8x256xbf16, #tpu.memory_space<vmem>>, vector<1x8x1x8x256xbf16>,
    return
  }
  func.func @transform_0(%arg0: i32, %arg1: i32) -> (i32, i32, i32, i32) {
    %c0_i32 = arith.constant 0 : i32
    %c0_i32_0 = arith.constant 0 : i32
    %c0_i32_1 = arith.constant 0 : i32
    %c0_i32_2 = arith.constant 0 : i32
    return %arg0, %c0_i32, %c0_i32_0, %c0_i32_1 : i32, i32, i32, i32
  }
  func.func @transform_1(%arg0: i32, %arg1: i32) -> (i32, i32, i32) {
    %c0_i32 = arith.constant 0 : i32
    %c0_i32_0 = arith.constant 0 : i32
    %c0_i32_1 = arith.constant 0 : i32
    return %arg1, %c0_i32, %c0_i32_0 : i32, i32, i32
  }
  func.func @transform_2(%arg0: i32, %arg1: i32) -> (i32, i32) {
    %c0_i32 = arith.constant 0 : i32
    %c0_i32_0 = arith.constant 0 : i32
    %c0_i32_1 = arith.constant 0 : i32
    return %c0_i32, %c0_i32_0 : i32, i32
  }
  func.func @transform_3(%arg0: i32, %arg1: i32) -> (i32, i32, i32, i32, i32) {
    %c0_i32 = arith.constant 0 : i32
    %c0_i32_0 = arith.constant 0 : i32
    %c0_i32_1 = arith.constant 0 : i32
    %c0_i32_2 = arith.constant 0 : i32
    return %arg0, %c0_i32, %arg1, %c0_i32_0, %c0_i32_1 : i32, i32, i32, i32, i32
  }
}

module attributes {stable_mosaic.version = 11 : i64} {
  func.func @concat_conv3x3_bn_relu_kernel(%arg0: i32, %arg1: i32, %arg2: memref<1x16x16x128xbf16, #tpu.memory_space<vmem>>, %arg3: memref<1x16x16x128xbf16, #tpu.memory_space<vmem>>, %arg4: memref<9x128x128xbf16, #tpu.memory_space<vmem>>, %arg5: memref<9x128x128xbf16, #tpu.memory_space<vmem>>, %arg6: memref<1x128xf32, #tpu.memory_space<vmem>>, %arg7: memref<1x128xf32, #tpu.memory_space<vmem>>, %arg8: memref<1x8x16x128xbf16, #tpu.memory_space<vmem>>, %arg9: memref<18x32x128xbf16, #tpu.memory_space<vmem>>, %arg10: memref<18x32x128xbf16, #tpu.memory_space<vmem>>) attributes {dimension_semantics = [#tpu.dimension_semantics<parallel>, #tpu.dimension_semantics<arbitrary>], iteration_bounds = array<i64: 2, 2>, scalar_prefetch = 0 : i64, scratch_operands = 2 : i64, tpu.core_type = #tpu.core_type<tc>, window_params = [{transform_indices = @transform_0, window_bounds = array<i64: 1, 16, 16, 128>}, {transform_indices = @transform_1, window_bounds = array<i64: 1, 16, 16, 128>}, {pipeline_mode = #tpu.pipeline_mode<synchronous>, transform_indices = @transform_2, window_bounds = array<i64: 9, 128, 128>}, {pipeline_mode = #tpu.pipeline_mode<synchronous>, transform_indices = @transform_3, window_bounds = array<i64: 9, 128, 128>}, {pipeline_mode = #tpu.pipeline_mode<synchronous>, transform_indices = @transform_4, window_bounds = array<i64: 1, 128>}, {pipeline_mode = #tpu.pipeline_mode<synchronous>, transform_indices = @transform_5, window_bounds = array<i64: 1, 128>}, {transform_indices = @transform_6, window_bounds = array<i64: 1, 8, 16, 128>}]} {
    %c0_i32 = arith.constant 0 : i32
    %0 = arith.cmpi eq, %arg1, %c0_i32 : i32
    %1 = arith.extui %0 : i1 to i32
    %c0_i32_0 = arith.constant 0 : i32
    %2 = arith.cmpi ne, %1, %c0_i32_0 : i32
    scf.if %2 {
      %cst_124 = arith.constant 0.000000e+00 : bf16
      %163 = vector.broadcast %cst_124 : bf16 to vector<18x32x128xbf16>
      %c0_125 = arith.constant 0 : index
      %c0_126 = arith.constant 0 : index
      %c0_127 = arith.constant 0 : index
      %164 = vector.load %arg9[%c0_125, %c0_126, %c0_127] : memref<18x32x128xbf16, #tpu.memory_space<vmem>>, vector<18x32x128xbf16>
      tpu.vector_store %arg9[%c0_125, %c0_126, %c0_127], %163 {strides = array<i32>} : memref<18x32x128xbf16, #tpu.memory_space<vmem>>, vector<18x32x128xbf16>,
      %c0_128 = arith.constant 0 : index
      %c0_129 = arith.constant 0 : index
      %c0_130 = arith.constant 0 : index
      %c0_131 = arith.constant 0 : index
      %165 = vector.load %arg2[%c0_128, %c0_129, %c0_130, %c0_131] : memref<1x16x16x128xbf16, #tpu.memory_space<vmem>>, vector<1x16x16x128xbf16>
      %166 = vector.shape_cast %165 : vector<1x16x16x128xbf16> to vector<16x16x128xbf16>
      %c1_132 = arith.constant 1 : index
      %c8_133 = arith.constant 8 : index
      %c0_134 = arith.constant 0 : index
      %167 = vector.load %arg9[%c1_132, %c8_133, %c0_134] : memref<18x32x128xbf16, #tpu.memory_space<vmem>>, vector<16x16x128xbf16>
      tpu.vector_store %arg9[%c1_132, %c8_133, %c0_134], %166 {strides = array<i32>} : memref<18x32x128xbf16, #tpu.memory_space<vmem>>, vector<16x16x128xbf16>,
      %cst_135 = arith.constant 0.000000e+00 : bf16
      %168 = vector.broadcast %cst_135 : bf16 to vector<18x32x128xbf16>
      %c0_136 = arith.constant 0 : index
      %c0_137 = arith.constant 0 : index
      %c0_138 = arith.constant 0 : index
      %169 = vector.load %arg10[%c0_136, %c0_137, %c0_138] : memref<18x32x128xbf16, #tpu.memory_space<vmem>>, vector<18x32x128xbf16>
      tpu.vector_store %arg10[%c0_136, %c0_137, %c0_138], %168 {strides = array<i32>} : memref<18x32x128xbf16, #tpu.memory_space<vmem>>, vector<18x32x128xbf16>,
      %c0_139 = arith.constant 0 : index
      %c0_140 = arith.constant 0 : index
      %c0_141 = arith.constant 0 : index
      %c0_142 = arith.constant 0 : index
      %170 = vector.load %arg3[%c0_139, %c0_140, %c0_141, %c0_142] : memref<1x16x16x128xbf16, #tpu.memory_space<vmem>>, vector<1x16x16x128xbf16>
      %171 = vector.shape_cast %170 : vector<1x16x16x128xbf16> to vector<16x16x128xbf16>
      %c1_143 = arith.constant 1 : index
      %c8_144 = arith.constant 8 : index
      %c0_145 = arith.constant 0 : index
      %172 = vector.load %arg10[%c1_143, %c8_144, %c0_145] : memref<18x32x128xbf16, #tpu.memory_space<vmem>>, vector<16x16x128xbf16>
      tpu.vector_store %arg10[%c1_143, %c8_144, %c0_145], %171 {strides = array<i32>} : memref<18x32x128xbf16, #tpu.memory_space<vmem>>, vector<16x16x128xbf16>,
    } else {
    }
    %c8_i32 = arith.constant 8 : i32
    %3 = arith.muli %arg1, %c8_i32 : i32
    %4 = tpu.assume_multiple %3, 8 : i32
    %cst = arith.constant 0.000000e+00 : f32
    %5 = vector.broadcast %cst : f32 to vector<128x128xf32>
    %c0_i32_1 = arith.constant 0 : i32
    %6 = arith.addi %4, %c0_i32_1 : i32
    %7 = arith.index_cast %6 : i32 to index
    %c7 = arith.constant 7 : index
    %c0 = arith.constant 0 : index
    %8 = vector.load %arg9[%7, %c7, %c0] : memref<18x32x128xbf16, #tpu.memory_space<vmem>>, vector<8x16x128xbf16>
    %9 = vector.shape_cast %8 : vector<8x16x128xbf16> to vector<128x128xbf16>
    %c0_2 = arith.constant 0 : index
    %c0_3 = arith.constant 0 : index
    %c0_4 = arith.constant 0 : index
    %10 = vector.load %arg4[%c0_2, %c0_3, %c0_4] : memref<9x128x128xbf16, #tpu.memory_space<vmem>>, vector<1x128x128xbf16>
    %11 = vector.shape_cast %10 : vector<1x128x128xbf16> to vector<128x128xbf16>
    %cst_5 = arith.constant dense<0.000000e+00> : vector<128x128xf32>
    %12 = tpu.matmul %9, %11, %cst_5 {dimension_numbers = #tpu.dot_dimension_numbers<[1], [0], [0], [1], [0, 0, 1, 1], [], []>} : vector<128x128xbf16>, vector<128x128xbf16>, vector<128x128xf32> -> vector<128x128xf32>
    %13 = arith.addf %5, %12 : vector<128x128xf32>
    %c0_i32_6 = arith.constant 0 : i32
    %14 = arith.addi %4, %c0_i32_6 : i32
    %15 = arith.index_cast %14 : i32 to index
    %c8 = arith.constant 8 : index
    %c0_7 = arith.constant 0 : index
    %16 = vector.load %arg9[%15, %c8, %c0_7] : memref<18x32x128xbf16, #tpu.memory_space<vmem>>, vector<8x16x128xbf16>
    %17 = vector.shape_cast %16 : vector<8x16x128xbf16> to vector<128x128xbf16>
    %c1 = arith.constant 1 : index
    %c0_8 = arith.constant 0 : index
    %c0_9 = arith.constant 0 : index
    %18 = vector.load %arg4[%c1, %c0_8, %c0_9] : memref<9x128x128xbf16, #tpu.memory_space<vmem>>, vector<1x128x128xbf16>
    %19 = vector.shape_cast %18 : vector<1x128x128xbf16> to vector<128x128xbf16>
    %cst_10 = arith.constant dense<0.000000e+00> : vector<128x128xf32>
    %20 = tpu.matmul %17, %19, %cst_10 {dimension_numbers = #tpu.dot_dimension_numbers<[1], [0], [0], [1], [0, 0, 1, 1], [], []>} : vector<128x128xbf16>, vector<128x128xbf16>, vector<128x128xf32> -> vector<128x128xf32>
    %21 = arith.addf %13, %20 : vector<128x128xf32>
    %c0_i32_11 = arith.constant 0 : i32
    %22 = arith.addi %4, %c0_i32_11 : i32
    %23 = arith.index_cast %22 : i32 to index
    %c9 = arith.constant 9 : index
    %c0_12 = arith.constant 0 : index
    %24 = vector.load %arg9[%23, %c9, %c0_12] : memref<18x32x128xbf16, #tpu.memory_space<vmem>>, vector<8x16x128xbf16>
    %25 = vector.shape_cast %24 : vector<8x16x128xbf16> to vector<128x128xbf16>
    %c2 = arith.constant 2 : index
    %c0_13 = arith.constant 0 : index
    %c0_14 = arith.constant 0 : index
    %26 = vector.load %arg4[%c2, %c0_13, %c0_14] : memref<9x128x128xbf16, #tpu.memory_space<vmem>>, vector<1x128x128xbf16>
    %27 = vector.shape_cast %26 : vector<1x128x128xbf16> to vector<128x128xbf16>
    %cst_15 = arith.constant dense<0.000000e+00> : vector<128x128xf32>
    %28 = tpu.matmul %25, %27, %cst_15 {dimension_numbers = #tpu.dot_dimension_numbers<[1], [0], [0], [1], [0, 0, 1, 1], [], []>} : vector<128x128xbf16>, vector<128x128xbf16>, vector<128x128xf32> -> vector<128x128xf32>
    %29 = arith.addf %21, %28 : vector<128x128xf32>
    %c1_i32 = arith.constant 1 : i32
    %30 = arith.addi %4, %c1_i32 : i32
    %31 = arith.index_cast %30 : i32 to index
    %c7_16 = arith.constant 7 : index
    %c0_17 = arith.constant 0 : index
    %32 = vector.load %arg9[%31, %c7_16, %c0_17] : memref<18x32x128xbf16, #tpu.memory_space<vmem>>, vector<8x16x128xbf16>
    %33 = vector.shape_cast %32 : vector<8x16x128xbf16> to vector<128x128xbf16>
    %c3 = arith.constant 3 : index
    %c0_18 = arith.constant 0 : index
    %c0_19 = arith.constant 0 : index
    %34 = vector.load %arg4[%c3, %c0_18, %c0_19] : memref<9x128x128xbf16, #tpu.memory_space<vmem>>, vector<1x128x128xbf16>
    %35 = vector.shape_cast %34 : vector<1x128x128xbf16> to vector<128x128xbf16>
    %cst_20 = arith.constant dense<0.000000e+00> : vector<128x128xf32>
    %36 = tpu.matmul %33, %35, %cst_20 {dimension_numbers = #tpu.dot_dimension_numbers<[1], [0], [0], [1], [0, 0, 1, 1], [], []>} : vector<128x128xbf16>, vector<128x128xbf16>, vector<128x128xf32> -> vector<128x128xf32>
    %37 = arith.addf %29, %36 : vector<128x128xf32>
    %c1_i32_21 = arith.constant 1 : i32
    %38 = arith.addi %4, %c1_i32_21 : i32
    %39 = arith.index_cast %38 : i32 to index
    %c8_22 = arith.constant 8 : index
    %c0_23 = arith.constant 0 : index
    %40 = vector.load %arg9[%39, %c8_22, %c0_23] : memref<18x32x128xbf16, #tpu.memory_space<vmem>>, vector<8x16x128xbf16>
    %41 = vector.shape_cast %40 : vector<8x16x128xbf16> to vector<128x128xbf16>
    %c4 = arith.constant 4 : index
    %c0_24 = arith.constant 0 : index
    %c0_25 = arith.constant 0 : index
    %42 = vector.load %arg4[%c4, %c0_24, %c0_25] : memref<9x128x128xbf16, #tpu.memory_space<vmem>>, vector<1x128x128xbf16>
    %43 = vector.shape_cast %42 : vector<1x128x128xbf16> to vector<128x128xbf16>
    %cst_26 = arith.constant dense<0.000000e+00> : vector<128x128xf32>
    %44 = tpu.matmul %41, %43, %cst_26 {dimension_numbers = #tpu.dot_dimension_numbers<[1], [0], [0], [1], [0, 0, 1, 1], [], []>} : vector<128x128xbf16>, vector<128x128xbf16>, vector<128x128xf32> -> vector<128x128xf32>
    %45 = arith.addf %37, %44 : vector<128x128xf32>
    %c1_i32_27 = arith.constant 1 : i32
    %46 = arith.addi %4, %c1_i32_27 : i32
    %47 = arith.index_cast %46 : i32 to index
    %c9_28 = arith.constant 9 : index
    %c0_29 = arith.constant 0 : index
    %48 = vector.load %arg9[%47, %c9_28, %c0_29] : memref<18x32x128xbf16, #tpu.memory_space<vmem>>, vector<8x16x128xbf16>
    %49 = vector.shape_cast %48 : vector<8x16x128xbf16> to vector<128x128xbf16>
    %c5 = arith.constant 5 : index
    %c0_30 = arith.constant 0 : index
    %c0_31 = arith.constant 0 : index
    %50 = vector.load %arg4[%c5, %c0_30, %c0_31] : memref<9x128x128xbf16, #tpu.memory_space<vmem>>, vector<1x128x128xbf16>
    %51 = vector.shape_cast %50 : vector<1x128x128xbf16> to vector<128x128xbf16>
    %cst_32 = arith.constant dense<0.000000e+00> : vector<128x128xf32>
    %52 = tpu.matmul %49, %51, %cst_32 {dimension_numbers = #tpu.dot_dimension_numbers<[1], [0], [0], [1], [0, 0, 1, 1], [], []>} : vector<128x128xbf16>, vector<128x128xbf16>, vector<128x128xf32> -> vector<128x128xf32>
    %53 = arith.addf %45, %52 : vector<128x128xf32>
    %c2_i32 = arith.constant 2 : i32
    %54 = arith.addi %4, %c2_i32 : i32
    %55 = arith.index_cast %54 : i32 to index
    %c7_33 = arith.constant 7 : index
    %c0_34 = arith.constant 0 : index
    %56 = vector.load %arg9[%55, %c7_33, %c0_34] : memref<18x32x128xbf16, #tpu.memory_space<vmem>>, vector<8x16x128xbf16>
    %57 = vector.shape_cast %56 : vector<8x16x128xbf16> to vector<128x128xbf16>
    %c6 = arith.constant 6 : index
    %c0_35 = arith.constant 0 : index
    %c0_36 = arith.constant 0 : index
    %58 = vector.load %arg4[%c6, %c0_35, %c0_36] : memref<9x128x128xbf16, #tpu.memory_space<vmem>>, vector<1x128x128xbf16>
    %59 = vector.shape_cast %58 : vector<1x128x128xbf16> to vector<128x128xbf16>
    %cst_37 = arith.constant dense<0.000000e+00> : vector<128x128xf32>
    %60 = tpu.matmul %57, %59, %cst_37 {dimension_numbers = #tpu.dot_dimension_numbers<[1], [0], [0], [1], [0, 0, 1, 1], [], []>} : vector<128x128xbf16>, vector<128x128xbf16>, vector<128x128xf32> -> vector<128x128xf32>
    %61 = arith.addf %53, %60 : vector<128x128xf32>
    %c2_i32_38 = arith.constant 2 : i32
    %62 = arith.addi %4, %c2_i32_38 : i32
    %63 = arith.index_cast %62 : i32 to index
    %c8_39 = arith.constant 8 : index
    %c0_40 = arith.constant 0 : index
    %64 = vector.load %arg9[%63, %c8_39, %c0_40] : memref<18x32x128xbf16, #tpu.memory_space<vmem>>, vector<8x16x128xbf16>
    %65 = vector.shape_cast %64 : vector<8x16x128xbf16> to vector<128x128xbf16>
    %c7_41 = arith.constant 7 : index
    %c0_42 = arith.constant 0 : index
    %c0_43 = arith.constant 0 : index
    %66 = vector.load %arg4[%c7_41, %c0_42, %c0_43] : memref<9x128x128xbf16, #tpu.memory_space<vmem>>, vector<1x128x128xbf16>
    %67 = vector.shape_cast %66 : vector<1x128x128xbf16> to vector<128x128xbf16>
    %cst_44 = arith.constant dense<0.000000e+00> : vector<128x128xf32>
    %68 = tpu.matmul %65, %67, %cst_44 {dimension_numbers = #tpu.dot_dimension_numbers<[1], [0], [0], [1], [0, 0, 1, 1], [], []>} : vector<128x128xbf16>, vector<128x128xbf16>, vector<128x128xf32> -> vector<128x128xf32>
    %69 = arith.addf %61, %68 : vector<128x128xf32>
    %c2_i32_45 = arith.constant 2 : i32
    %70 = arith.addi %4, %c2_i32_45 : i32
    %71 = arith.index_cast %70 : i32 to index
    %c9_46 = arith.constant 9 : index
    %c0_47 = arith.constant 0 : index
    %72 = vector.load %arg9[%71, %c9_46, %c0_47] : memref<18x32x128xbf16, #tpu.memory_space<vmem>>, vector<8x16x128xbf16>
    %73 = vector.shape_cast %72 : vector<8x16x128xbf16> to vector<128x128xbf16>
    %c8_48 = arith.constant 8 : index
    %c0_49 = arith.constant 0 : index
    %c0_50 = arith.constant 0 : index
    %74 = vector.load %arg4[%c8_48, %c0_49, %c0_50] : memref<9x128x128xbf16, #tpu.memory_space<vmem>>, vector<1x128x128xbf16>
    %75 = vector.shape_cast %74 : vector<1x128x128xbf16> to vector<128x128xbf16>
    %cst_51 = arith.constant dense<0.000000e+00> : vector<128x128xf32>
    %76 = tpu.matmul %73, %75, %cst_51 {dimension_numbers = #tpu.dot_dimension_numbers<[1], [0], [0], [1], [0, 0, 1, 1], [], []>} : vector<128x128xbf16>, vector<128x128xbf16>, vector<128x128xf32> -> vector<128x128xf32>
    %77 = arith.addf %69, %76 : vector<128x128xf32>
    %c0_i32_52 = arith.constant 0 : i32
    %78 = arith.addi %4, %c0_i32_52 : i32
    %79 = arith.index_cast %78 : i32 to index
    %c7_53 = arith.constant 7 : index
    %c0_54 = arith.constant 0 : index
    %80 = vector.load %arg10[%79, %c7_53, %c0_54] : memref<18x32x128xbf16, #tpu.memory_space<vmem>>, vector<8x16x128xbf16>
    %81 = vector.shape_cast %80 : vector<8x16x128xbf16> to vector<128x128xbf16>
    %c0_55 = arith.constant 0 : index
    %c0_56 = arith.constant 0 : index
    %c0_57 = arith.constant 0 : index
    %82 = vector.load %arg5[%c0_55, %c0_56, %c0_57] : memref<9x128x128xbf16, #tpu.memory_space<vmem>>, vector<1x128x128xbf16>
    %83 = vector.shape_cast %82 : vector<1x128x128xbf16> to vector<128x128xbf16>
    %cst_58 = arith.constant dense<0.000000e+00> : vector<128x128xf32>
    %84 = tpu.matmul %81, %83, %cst_58 {dimension_numbers = #tpu.dot_dimension_numbers<[1], [0], [0], [1], [0, 0, 1, 1], [], []>} : vector<128x128xbf16>, vector<128x128xbf16>, vector<128x128xf32> -> vector<128x128xf32>
    %85 = arith.addf %77, %84 : vector<128x128xf32>
    %c0_i32_59 = arith.constant 0 : i32
    %86 = arith.addi %4, %c0_i32_59 : i32
    %87 = arith.index_cast %86 : i32 to index
    %c8_60 = arith.constant 8 : index
    %c0_61 = arith.constant 0 : index
    %88 = vector.load %arg10[%87, %c8_60, %c0_61] : memref<18x32x128xbf16, #tpu.memory_space<vmem>>, vector<8x16x128xbf16>
    %89 = vector.shape_cast %88 : vector<8x16x128xbf16> to vector<128x128xbf16>
    %c1_62 = arith.constant 1 : index
    %c0_63 = arith.constant 0 : index
    %c0_64 = arith.constant 0 : index
    %90 = vector.load %arg5[%c1_62, %c0_63, %c0_64] : memref<9x128x128xbf16, #tpu.memory_space<vmem>>, vector<1x128x128xbf16>
    %91 = vector.shape_cast %90 : vector<1x128x128xbf16> to vector<128x128xbf16>
    %cst_65 = arith.constant dense<0.000000e+00> : vector<128x128xf32>
    %92 = tpu.matmul %89, %91, %cst_65 {dimension_numbers = #tpu.dot_dimension_numbers<[1], [0], [0], [1], [0, 0, 1, 1], [], []>} : vector<128x128xbf16>, vector<128x128xbf16>, vector<128x128xf32> -> vector<128x128xf32>
    %93 = arith.addf %85, %92 : vector<128x128xf32>
    %c0_i32_66 = arith.constant 0 : i32
    %94 = arith.addi %4, %c0_i32_66 : i32
    %95 = arith.index_cast %94 : i32 to index
    %c9_67 = arith.constant 9 : index
    %c0_68 = arith.constant 0 : index
    %96 = vector.load %arg10[%95, %c9_67, %c0_68] : memref<18x32x128xbf16, #tpu.memory_space<vmem>>, vector<8x16x128xbf16>
    %97 = vector.shape_cast %96 : vector<8x16x128xbf16> to vector<128x128xbf16>
    %c2_69 = arith.constant 2 : index
    %c0_70 = arith.constant 0 : index
    %c0_71 = arith.constant 0 : index
    %98 = vector.load %arg5[%c2_69, %c0_70, %c0_71] : memref<9x128x128xbf16, #tpu.memory_space<vmem>>, vector<1x128x128xbf16>
    %99 = vector.shape_cast %98 : vector<1x128x128xbf16> to vector<128x128xbf16>
    %cst_72 = arith.constant dense<0.000000e+00> : vector<128x128xf32>
    %100 = tpu.matmul %97, %99, %cst_72 {dimension_numbers = #tpu.dot_dimension_numbers<[1], [0], [0], [1], [0, 0, 1, 1], [], []>} : vector<128x128xbf16>, vector<128x128xbf16>, vector<128x128xf32> -> vector<128x128xf32>
    %101 = arith.addf %93, %100 : vector<128x128xf32>
    %c1_i32_73 = arith.constant 1 : i32
    %102 = arith.addi %4, %c1_i32_73 : i32
    %103 = arith.index_cast %102 : i32 to index
    %c7_74 = arith.constant 7 : index
    %c0_75 = arith.constant 0 : index
    %104 = vector.load %arg10[%103, %c7_74, %c0_75] : memref<18x32x128xbf16, #tpu.memory_space<vmem>>, vector<8x16x128xbf16>
    %105 = vector.shape_cast %104 : vector<8x16x128xbf16> to vector<128x128xbf16>
    %c3_76 = arith.constant 3 : index
    %c0_77 = arith.constant 0 : index
    %c0_78 = arith.constant 0 : index
    %106 = vector.load %arg5[%c3_76, %c0_77, %c0_78] : memref<9x128x128xbf16, #tpu.memory_space<vmem>>, vector<1x128x128xbf16>
    %107 = vector.shape_cast %106 : vector<1x128x128xbf16> to vector<128x128xbf16>
    %cst_79 = arith.constant dense<0.000000e+00> : vector<128x128xf32>
    %108 = tpu.matmul %105, %107, %cst_79 {dimension_numbers = #tpu.dot_dimension_numbers<[1], [0], [0], [1], [0, 0, 1, 1], [], []>} : vector<128x128xbf16>, vector<128x128xbf16>, vector<128x128xf32> -> vector<128x128xf32>
    %109 = arith.addf %101, %108 : vector<128x128xf32>
    %c1_i32_80 = arith.constant 1 : i32
    %110 = arith.addi %4, %c1_i32_80 : i32
    %111 = arith.index_cast %110 : i32 to index
    %c8_81 = arith.constant 8 : index
    %c0_82 = arith.constant 0 : index
    %112 = vector.load %arg10[%111, %c8_81, %c0_82] : memref<18x32x128xbf16, #tpu.memory_space<vmem>>, vector<8x16x128xbf16>
    %113 = vector.shape_cast %112 : vector<8x16x128xbf16> to vector<128x128xbf16>
    %c4_83 = arith.constant 4 : index
    %c0_84 = arith.constant 0 : index
    %c0_85 = arith.constant 0 : index
    %114 = vector.load %arg5[%c4_83, %c0_84, %c0_85] : memref<9x128x128xbf16, #tpu.memory_space<vmem>>, vector<1x128x128xbf16>
    %115 = vector.shape_cast %114 : vector<1x128x128xbf16> to vector<128x128xbf16>
    %cst_86 = arith.constant dense<0.000000e+00> : vector<128x128xf32>
    %116 = tpu.matmul %113, %115, %cst_86 {dimension_numbers = #tpu.dot_dimension_numbers<[1], [0], [0], [1], [0, 0, 1, 1], [], []>} : vector<128x128xbf16>, vector<128x128xbf16>, vector<128x128xf32> -> vector<128x128xf32>
    %117 = arith.addf %109, %116 : vector<128x128xf32>
    %c1_i32_87 = arith.constant 1 : i32
    %118 = arith.addi %4, %c1_i32_87 : i32
    %119 = arith.index_cast %118 : i32 to index
    %c9_88 = arith.constant 9 : index
    %c0_89 = arith.constant 0 : index
    %120 = vector.load %arg10[%119, %c9_88, %c0_89] : memref<18x32x128xbf16, #tpu.memory_space<vmem>>, vector<8x16x128xbf16>
    %121 = vector.shape_cast %120 : vector<8x16x128xbf16> to vector<128x128xbf16>
    %c5_90 = arith.constant 5 : index
    %c0_91 = arith.constant 0 : index
    %c0_92 = arith.constant 0 : index
    %122 = vector.load %arg5[%c5_90, %c0_91, %c0_92] : memref<9x128x128xbf16, #tpu.memory_space<vmem>>, vector<1x128x128xbf16>
    %123 = vector.shape_cast %122 : vector<1x128x128xbf16> to vector<128x128xbf16>
    %cst_93 = arith.constant dense<0.000000e+00> : vector<128x128xf32>
    %124 = tpu.matmul %121, %123, %cst_93 {dimension_numbers = #tpu.dot_dimension_numbers<[1], [0], [0], [1], [0, 0, 1, 1], [], []>} : vector<128x128xbf16>, vector<128x128xbf16>, vector<128x128xf32> -> vector<128x128xf32>
    %125 = arith.addf %117, %124 : vector<128x128xf32>
    %c2_i32_94 = arith.constant 2 : i32
    %126 = arith.addi %4, %c2_i32_94 : i32
    %127 = arith.index_cast %126 : i32 to index
    %c7_95 = arith.constant 7 : index
    %c0_96 = arith.constant 0 : index
    %128 = vector.load %arg10[%127, %c7_95, %c0_96] : memref<18x32x128xbf16, #tpu.memory_space<vmem>>, vector<8x16x128xbf16>
    %129 = vector.shape_cast %128 : vector<8x16x128xbf16> to vector<128x128xbf16>
    %c6_97 = arith.constant 6 : index
    %c0_98 = arith.constant 0 : index
    %c0_99 = arith.constant 0 : index
    %130 = vector.load %arg5[%c6_97, %c0_98, %c0_99] : memref<9x128x128xbf16, #tpu.memory_space<vmem>>, vector<1x128x128xbf16>
    %131 = vector.shape_cast %130 : vector<1x128x128xbf16> to vector<128x128xbf16>
    %cst_100 = arith.constant dense<0.000000e+00> : vector<128x128xf32>
    %132 = tpu.matmul %129, %131, %cst_100 {dimension_numbers = #tpu.dot_dimension_numbers<[1], [0], [0], [1], [0, 0, 1, 1], [], []>} : vector<128x128xbf16>, vector<128x128xbf16>, vector<128x128xf32> -> vector<128x128xf32>
    %133 = arith.addf %125, %132 : vector<128x128xf32>
    %c2_i32_101 = arith.constant 2 : i32
    %134 = arith.addi %4, %c2_i32_101 : i32
    %135 = arith.index_cast %134 : i32 to index
    %c8_102 = arith.constant 8 : index
    %c0_103 = arith.constant 0 : index
    %136 = vector.load %arg10[%135, %c8_102, %c0_103] : memref<18x32x128xbf16, #tpu.memory_space<vmem>>, vector<8x16x128xbf16>
    %137 = vector.shape_cast %136 : vector<8x16x128xbf16> to vector<128x128xbf16>
    %c7_104 = arith.constant 7 : index
    %c0_105 = arith.constant 0 : index
    %c0_106 = arith.constant 0 : index
    %138 = vector.load %arg5[%c7_104, %c0_105, %c0_106] : memref<9x128x128xbf16, #tpu.memory_space<vmem>>, vector<1x128x128xbf16>
    %139 = vector.shape_cast %138 : vector<1x128x128xbf16> to vector<128x128xbf16>
    %cst_107 = arith.constant dense<0.000000e+00> : vector<128x128xf32>
    %140 = tpu.matmul %137, %139, %cst_107 {dimension_numbers = #tpu.dot_dimension_numbers<[1], [0], [0], [1], [0, 0, 1, 1], [], []>} : vector<128x128xbf16>, vector<128x128xbf16>, vector<128x128xf32> -> vector<128x128xf32>
    %141 = arith.addf %133, %140 : vector<128x128xf32>
    %c2_i32_108 = arith.constant 2 : i32
    %142 = arith.addi %4, %c2_i32_108 : i32
    %143 = arith.index_cast %142 : i32 to index
    %c9_109 = arith.constant 9 : index
    %c0_110 = arith.constant 0 : index
    %144 = vector.load %arg10[%143, %c9_109, %c0_110] : memref<18x32x128xbf16, #tpu.memory_space<vmem>>, vector<8x16x128xbf16>
    %145 = vector.shape_cast %144 : vector<8x16x128xbf16> to vector<128x128xbf16>
    %c8_111 = arith.constant 8 : index
    %c0_112 = arith.constant 0 : index
    %c0_113 = arith.constant 0 : index
    %146 = vector.load %arg5[%c8_111, %c0_112, %c0_113] : memref<9x128x128xbf16, #tpu.memory_space<vmem>>, vector<1x128x128xbf16>
    %147 = vector.shape_cast %146 : vector<1x128x128xbf16> to vector<128x128xbf16>
    %cst_114 = arith.constant dense<0.000000e+00> : vector<128x128xf32>
    %148 = tpu.matmul %145, %147, %cst_114 {dimension_numbers = #tpu.dot_dimension_numbers<[1], [0], [0], [1], [0, 0, 1, 1], [], []>} : vector<128x128xbf16>, vector<128x128xbf16>, vector<128x128xf32> -> vector<128x128xf32>
    %149 = arith.addf %141, %148 : vector<128x128xf32>
    %c0_115 = arith.constant 0 : index
    %c0_116 = arith.constant 0 : index
    %150 = vector.load %arg6[%c0_115, %c0_116] : memref<1x128xf32, #tpu.memory_space<vmem>>, vector<1x128xf32>
    %151 = vector.broadcast %150 : vector<1x128xf32> to vector<128x128xf32>
    %152 = arith.mulf %149, %151 : vector<128x128xf32>
    %c0_117 = arith.constant 0 : index
    %c0_118 = arith.constant 0 : index
    %153 = vector.load %arg7[%c0_117, %c0_118] : memref<1x128xf32, #tpu.memory_space<vmem>>, vector<1x128xf32>
    %154 = vector.broadcast %153 : vector<1x128xf32> to vector<128x128xf32>
    %155 = arith.addf %152, %154 : vector<128x128xf32>
    %cst_119 = arith.constant 0.000000e+00 : f32
    %156 = vector.broadcast %cst_119 : f32 to vector<128x128xf32>
    %157 = arith.maximumf %155, %156 : vector<128x128xf32>
    %158 = vector.shape_cast %157 : vector<128x128xf32> to vector<8x16x128xf32>
    %159 = arith.truncf %158 : vector<8x16x128xf32> to vector<8x16x128xbf16>
    %c0_120 = arith.constant 0 : index
    %c0_121 = arith.constant 0 : index
    %c0_122 = arith.constant 0 : index
    %c0_123 = arith.constant 0 : index
    %160 = vector.load %arg8[%c0_120, %c0_121, %c0_122, %c0_123] : memref<1x8x16x128xbf16, #tpu.memory_space<vmem>>, vector<1x8x16x128xbf16>
    %161 = vector.shape_cast %160 : vector<1x8x16x128xbf16> to vector<8x16x128xbf16>
    %162 = vector.shape_cast %159 : vector<8x16x128xbf16> to vector<1x8x16x128xbf16>
    tpu.vector_store %arg8[%c0_120, %c0_121, %c0_122, %c0_123], %162 {strides = array<i32>} : memref<1x8x16x128xbf16, #tpu.memory_space<vmem>>, vector<1x8x16x128xbf16>,
    return
  }
  func.func @transform_0(%arg0: i32, %arg1: i32) -> (i32, i32, i32, i32) {
    %c0_i32 = arith.constant 0 : i32
    %c0_i32_0 = arith.constant 0 : i32
    %c0_i32_1 = arith.constant 0 : i32
    %c0_i32_2 = arith.constant 0 : i32
    return %arg0, %c0_i32, %c0_i32_0, %c0_i32_1 : i32, i32, i32, i32
  }
  func.func @transform_1(%arg0: i32, %arg1: i32) -> (i32, i32, i32, i32) {
    %c0_i32 = arith.constant 0 : i32
    %c0_i32_0 = arith.constant 0 : i32
    %c0_i32_1 = arith.constant 0 : i32
    %c0_i32_2 = arith.constant 0 : i32
    return %arg0, %c0_i32, %c0_i32_0, %c0_i32_1 : i32, i32, i32, i32
  }
  func.func @transform_2(%arg0: i32, %arg1: i32) -> (i32, i32, i32) {
    %c0_i32 = arith.constant 0 : i32
    %c0_i32_0 = arith.constant 0 : i32
    %c0_i32_1 = arith.constant 0 : i32
    %c0_i32_2 = arith.constant 0 : i32
    return %c0_i32, %c0_i32_0, %c0_i32_1 : i32, i32, i32
  }
  func.func @transform_3(%arg0: i32, %arg1: i32) -> (i32, i32, i32) {
    %c0_i32 = arith.constant 0 : i32
    %c0_i32_0 = arith.constant 0 : i32
    %c0_i32_1 = arith.constant 0 : i32
    %c0_i32_2 = arith.constant 0 : i32
    return %c0_i32, %c0_i32_0, %c0_i32_1 : i32, i32, i32
  }
  func.func @transform_4(%arg0: i32, %arg1: i32) -> (i32, i32) {
    %c0_i32 = arith.constant 0 : i32
    %c0_i32_0 = arith.constant 0 : i32
    %c0_i32_1 = arith.constant 0 : i32
    return %c0_i32, %c0_i32_0 : i32, i32
  }
  func.func @transform_5(%arg0: i32, %arg1: i32) -> (i32, i32) {
    %c0_i32 = arith.constant 0 : i32
    %c0_i32_0 = arith.constant 0 : i32
    %c0_i32_1 = arith.constant 0 : i32
    return %c0_i32, %c0_i32_0 : i32, i32
  }
  func.func @transform_6(%arg0: i32, %arg1: i32) -> (i32, i32, i32, i32) {
    %c0_i32 = arith.constant 0 : i32
    %c0_i32_0 = arith.constant 0 : i32
    %c0_i32_1 = arith.constant 0 : i32
    return %arg0, %arg1, %c0_i32, %c0_i32_0 : i32, i32, i32, i32
  }
}

module attributes {stable_mosaic.version = 11 : i64} {
  func.func @conv3x3_bn_relu_kernel(%arg0: i32, %arg1: i32, %arg2: memref<1x16x16x128xbf16, #tpu.memory_space<vmem>>, %arg3: memref<9x128x128xbf16, #tpu.memory_space<vmem>>, %arg4: memref<1x128xf32, #tpu.memory_space<vmem>>, %arg5: memref<1x128xf32, #tpu.memory_space<vmem>>, %arg6: memref<1x8x16x128xf32, #tpu.memory_space<vmem>>, %arg7: memref<18x32x128xbf16, #tpu.memory_space<vmem>>) attributes {dimension_semantics = [#tpu.dimension_semantics<parallel>, #tpu.dimension_semantics<arbitrary>], iteration_bounds = array<i64: 2, 2>, scalar_prefetch = 0 : i64, scratch_operands = 1 : i64, tpu.core_type = #tpu.core_type<tc>, window_params = [{transform_indices = @transform_0, window_bounds = array<i64: 1, 16, 16, 128>}, {pipeline_mode = #tpu.pipeline_mode<synchronous>, transform_indices = @transform_1, window_bounds = array<i64: 9, 128, 128>}, {pipeline_mode = #tpu.pipeline_mode<synchronous>, transform_indices = @transform_2, window_bounds = array<i64: 1, 128>}, {pipeline_mode = #tpu.pipeline_mode<synchronous>, transform_indices = @transform_3, window_bounds = array<i64: 1, 128>}, {transform_indices = @transform_4, window_bounds = array<i64: 1, 8, 16, 128>}]} {
    %c0_i32 = arith.constant 0 : i32
    %0 = arith.cmpi eq, %arg1, %c0_i32 : i32
    %1 = arith.extui %0 : i1 to i32
    %c0_i32_0 = arith.constant 0 : i32
    %2 = arith.cmpi ne, %1, %c0_i32_0 : i32
    scf.if %2 {
      %cst_61 = arith.constant 0.000000e+00 : bf16
      %90 = vector.broadcast %cst_61 : bf16 to vector<18x32x128xbf16>
      %c0_62 = arith.constant 0 : index
      %c0_63 = arith.constant 0 : index
      %c0_64 = arith.constant 0 : index
      %91 = vector.load %arg7[%c0_62, %c0_63, %c0_64] : memref<18x32x128xbf16, #tpu.memory_space<vmem>>, vector<18x32x128xbf16>
      tpu.vector_store %arg7[%c0_62, %c0_63, %c0_64], %90 {strides = array<i32>} : memref<18x32x128xbf16, #tpu.memory_space<vmem>>, vector<18x32x128xbf16>,
      %c0_65 = arith.constant 0 : index
      %c0_66 = arith.constant 0 : index
      %c0_67 = arith.constant 0 : index
      %c0_68 = arith.constant 0 : index
      %92 = vector.load %arg2[%c0_65, %c0_66, %c0_67, %c0_68] : memref<1x16x16x128xbf16, #tpu.memory_space<vmem>>, vector<1x16x16x128xbf16>
      %93 = vector.shape_cast %92 : vector<1x16x16x128xbf16> to vector<16x16x128xbf16>
      %c1_69 = arith.constant 1 : index
      %c8_70 = arith.constant 8 : index
      %c0_71 = arith.constant 0 : index
      %94 = vector.load %arg7[%c1_69, %c8_70, %c0_71] : memref<18x32x128xbf16, #tpu.memory_space<vmem>>, vector<16x16x128xbf16>
      tpu.vector_store %arg7[%c1_69, %c8_70, %c0_71], %93 {strides = array<i32>} : memref<18x32x128xbf16, #tpu.memory_space<vmem>>, vector<16x16x128xbf16>,
    } else {
    }
    %c8_i32 = arith.constant 8 : i32
    %3 = arith.muli %arg1, %c8_i32 : i32
    %4 = tpu.assume_multiple %3, 8 : i32
    %cst = arith.constant 0.000000e+00 : f32
    %5 = vector.broadcast %cst : f32 to vector<128x128xf32>
    %c0_i32_1 = arith.constant 0 : i32
    %6 = arith.addi %4, %c0_i32_1 : i32
    %7 = arith.index_cast %6 : i32 to index
    %c7 = arith.constant 7 : index
    %c0 = arith.constant 0 : index
    %8 = vector.load %arg7[%7, %c7, %c0] : memref<18x32x128xbf16, #tpu.memory_space<vmem>>, vector<8x16x128xbf16>
    %9 = vector.shape_cast %8 : vector<8x16x128xbf16> to vector<128x128xbf16>
    %c0_2 = arith.constant 0 : index
    %c0_3 = arith.constant 0 : index
    %c0_4 = arith.constant 0 : index
    %10 = vector.load %arg3[%c0_2, %c0_3, %c0_4] : memref<9x128x128xbf16, #tpu.memory_space<vmem>>, vector<1x128x128xbf16>
    %11 = vector.shape_cast %10 : vector<1x128x128xbf16> to vector<128x128xbf16>
    %cst_5 = arith.constant dense<0.000000e+00> : vector<128x128xf32>
    %12 = tpu.matmul %9, %11, %cst_5 {dimension_numbers = #tpu.dot_dimension_numbers<[1], [0], [0], [1], [0, 0, 1, 1], [], []>} : vector<128x128xbf16>, vector<128x128xbf16>, vector<128x128xf32> -> vector<128x128xf32>
    %13 = arith.addf %5, %12 : vector<128x128xf32>
    %c0_i32_6 = arith.constant 0 : i32
    %14 = arith.addi %4, %c0_i32_6 : i32
    %15 = arith.index_cast %14 : i32 to index
    %c8 = arith.constant 8 : index
    %c0_7 = arith.constant 0 : index
    %16 = vector.load %arg7[%15, %c8, %c0_7] : memref<18x32x128xbf16, #tpu.memory_space<vmem>>, vector<8x16x128xbf16>
    %17 = vector.shape_cast %16 : vector<8x16x128xbf16> to vector<128x128xbf16>
    %c1 = arith.constant 1 : index
    %c0_8 = arith.constant 0 : index
    %c0_9 = arith.constant 0 : index
    %18 = vector.load %arg3[%c1, %c0_8, %c0_9] : memref<9x128x128xbf16, #tpu.memory_space<vmem>>, vector<1x128x128xbf16>
    %19 = vector.shape_cast %18 : vector<1x128x128xbf16> to vector<128x128xbf16>
    %cst_10 = arith.constant dense<0.000000e+00> : vector<128x128xf32>
    %20 = tpu.matmul %17, %19, %cst_10 {dimension_numbers = #tpu.dot_dimension_numbers<[1], [0], [0], [1], [0, 0, 1, 1], [], []>} : vector<128x128xbf16>, vector<128x128xbf16>, vector<128x128xf32> -> vector<128x128xf32>
    %21 = arith.addf %13, %20 : vector<128x128xf32>
    %c0_i32_11 = arith.constant 0 : i32
    %22 = arith.addi %4, %c0_i32_11 : i32
    %23 = arith.index_cast %22 : i32 to index
    %c9 = arith.constant 9 : index
    %c0_12 = arith.constant 0 : index
    %24 = vector.load %arg7[%23, %c9, %c0_12] : memref<18x32x128xbf16, #tpu.memory_space<vmem>>, vector<8x16x128xbf16>
    %25 = vector.shape_cast %24 : vector<8x16x128xbf16> to vector<128x128xbf16>
    %c2 = arith.constant 2 : index
    %c0_13 = arith.constant 0 : index
    %c0_14 = arith.constant 0 : index
    %26 = vector.load %arg3[%c2, %c0_13, %c0_14] : memref<9x128x128xbf16, #tpu.memory_space<vmem>>, vector<1x128x128xbf16>
    %27 = vector.shape_cast %26 : vector<1x128x128xbf16> to vector<128x128xbf16>
    %cst_15 = arith.constant dense<0.000000e+00> : vector<128x128xf32>
    %28 = tpu.matmul %25, %27, %cst_15 {dimension_numbers = #tpu.dot_dimension_numbers<[1], [0], [0], [1], [0, 0, 1, 1], [], []>} : vector<128x128xbf16>, vector<128x128xbf16>, vector<128x128xf32> -> vector<128x128xf32>
    %29 = arith.addf %21, %28 : vector<128x128xf32>
    %c1_i32 = arith.constant 1 : i32
    %30 = arith.addi %4, %c1_i32 : i32
    %31 = arith.index_cast %30 : i32 to index
    %c7_16 = arith.constant 7 : index
    %c0_17 = arith.constant 0 : index
    %32 = vector.load %arg7[%31, %c7_16, %c0_17] : memref<18x32x128xbf16, #tpu.memory_space<vmem>>, vector<8x16x128xbf16>
    %33 = vector.shape_cast %32 : vector<8x16x128xbf16> to vector<128x128xbf16>
    %c3 = arith.constant 3 : index
    %c0_18 = arith.constant 0 : index
    %c0_19 = arith.constant 0 : index
    %34 = vector.load %arg3[%c3, %c0_18, %c0_19] : memref<9x128x128xbf16, #tpu.memory_space<vmem>>, vector<1x128x128xbf16>
    %35 = vector.shape_cast %34 : vector<1x128x128xbf16> to vector<128x128xbf16>
    %cst_20 = arith.constant dense<0.000000e+00> : vector<128x128xf32>
    %36 = tpu.matmul %33, %35, %cst_20 {dimension_numbers = #tpu.dot_dimension_numbers<[1], [0], [0], [1], [0, 0, 1, 1], [], []>} : vector<128x128xbf16>, vector<128x128xbf16>, vector<128x128xf32> -> vector<128x128xf32>
    %37 = arith.addf %29, %36 : vector<128x128xf32>
    %c1_i32_21 = arith.constant 1 : i32
    %38 = arith.addi %4, %c1_i32_21 : i32
    %39 = arith.index_cast %38 : i32 to index
    %c8_22 = arith.constant 8 : index
    %c0_23 = arith.constant 0 : index
    %40 = vector.load %arg7[%39, %c8_22, %c0_23] : memref<18x32x128xbf16, #tpu.memory_space<vmem>>, vector<8x16x128xbf16>
    %41 = vector.shape_cast %40 : vector<8x16x128xbf16> to vector<128x128xbf16>
    %c4 = arith.constant 4 : index
    %c0_24 = arith.constant 0 : index
    %c0_25 = arith.constant 0 : index
    %42 = vector.load %arg3[%c4, %c0_24, %c0_25] : memref<9x128x128xbf16, #tpu.memory_space<vmem>>, vector<1x128x128xbf16>
    %43 = vector.shape_cast %42 : vector<1x128x128xbf16> to vector<128x128xbf16>
    %cst_26 = arith.constant dense<0.000000e+00> : vector<128x128xf32>
    %44 = tpu.matmul %41, %43, %cst_26 {dimension_numbers = #tpu.dot_dimension_numbers<[1], [0], [0], [1], [0, 0, 1, 1], [], []>} : vector<128x128xbf16>, vector<128x128xbf16>, vector<128x128xf32> -> vector<128x128xf32>
    %45 = arith.addf %37, %44 : vector<128x128xf32>
    %c1_i32_27 = arith.constant 1 : i32
    %46 = arith.addi %4, %c1_i32_27 : i32
    %47 = arith.index_cast %46 : i32 to index
    %c9_28 = arith.constant 9 : index
    %c0_29 = arith.constant 0 : index
    %48 = vector.load %arg7[%47, %c9_28, %c0_29] : memref<18x32x128xbf16, #tpu.memory_space<vmem>>, vector<8x16x128xbf16>
    %49 = vector.shape_cast %48 : vector<8x16x128xbf16> to vector<128x128xbf16>
    %c5 = arith.constant 5 : index
    %c0_30 = arith.constant 0 : index
    %c0_31 = arith.constant 0 : index
    %50 = vector.load %arg3[%c5, %c0_30, %c0_31] : memref<9x128x128xbf16, #tpu.memory_space<vmem>>, vector<1x128x128xbf16>
    %51 = vector.shape_cast %50 : vector<1x128x128xbf16> to vector<128x128xbf16>
    %cst_32 = arith.constant dense<0.000000e+00> : vector<128x128xf32>
    %52 = tpu.matmul %49, %51, %cst_32 {dimension_numbers = #tpu.dot_dimension_numbers<[1], [0], [0], [1], [0, 0, 1, 1], [], []>} : vector<128x128xbf16>, vector<128x128xbf16>, vector<128x128xf32> -> vector<128x128xf32>
    %53 = arith.addf %45, %52 : vector<128x128xf32>
    %c2_i32 = arith.constant 2 : i32
    %54 = arith.addi %4, %c2_i32 : i32
    %55 = arith.index_cast %54 : i32 to index
    %c7_33 = arith.constant 7 : index
    %c0_34 = arith.constant 0 : index
    %56 = vector.load %arg7[%55, %c7_33, %c0_34] : memref<18x32x128xbf16, #tpu.memory_space<vmem>>, vector<8x16x128xbf16>
    %57 = vector.shape_cast %56 : vector<8x16x128xbf16> to vector<128x128xbf16>
    %c6 = arith.constant 6 : index
    %c0_35 = arith.constant 0 : index
    %c0_36 = arith.constant 0 : index
    %58 = vector.load %arg3[%c6, %c0_35, %c0_36] : memref<9x128x128xbf16, #tpu.memory_space<vmem>>, vector<1x128x128xbf16>
    %59 = vector.shape_cast %58 : vector<1x128x128xbf16> to vector<128x128xbf16>
    %cst_37 = arith.constant dense<0.000000e+00> : vector<128x128xf32>
    %60 = tpu.matmul %57, %59, %cst_37 {dimension_numbers = #tpu.dot_dimension_numbers<[1], [0], [0], [1], [0, 0, 1, 1], [], []>} : vector<128x128xbf16>, vector<128x128xbf16>, vector<128x128xf32> -> vector<128x128xf32>
    %61 = arith.addf %53, %60 : vector<128x128xf32>
    %c2_i32_38 = arith.constant 2 : i32
    %62 = arith.addi %4, %c2_i32_38 : i32
    %63 = arith.index_cast %62 : i32 to index
    %c8_39 = arith.constant 8 : index
    %c0_40 = arith.constant 0 : index
    %64 = vector.load %arg7[%63, %c8_39, %c0_40] : memref<18x32x128xbf16, #tpu.memory_space<vmem>>, vector<8x16x128xbf16>
    %65 = vector.shape_cast %64 : vector<8x16x128xbf16> to vector<128x128xbf16>
    %c7_41 = arith.constant 7 : index
    %c0_42 = arith.constant 0 : index
    %c0_43 = arith.constant 0 : index
    %66 = vector.load %arg3[%c7_41, %c0_42, %c0_43] : memref<9x128x128xbf16, #tpu.memory_space<vmem>>, vector<1x128x128xbf16>
    %67 = vector.shape_cast %66 : vector<1x128x128xbf16> to vector<128x128xbf16>
    %cst_44 = arith.constant dense<0.000000e+00> : vector<128x128xf32>
    %68 = tpu.matmul %65, %67, %cst_44 {dimension_numbers = #tpu.dot_dimension_numbers<[1], [0], [0], [1], [0, 0, 1, 1], [], []>} : vector<128x128xbf16>, vector<128x128xbf16>, vector<128x128xf32> -> vector<128x128xf32>
    %69 = arith.addf %61, %68 : vector<128x128xf32>
    %c2_i32_45 = arith.constant 2 : i32
    %70 = arith.addi %4, %c2_i32_45 : i32
    %71 = arith.index_cast %70 : i32 to index
    %c9_46 = arith.constant 9 : index
    %c0_47 = arith.constant 0 : index
    %72 = vector.load %arg7[%71, %c9_46, %c0_47] : memref<18x32x128xbf16, #tpu.memory_space<vmem>>, vector<8x16x128xbf16>
    %73 = vector.shape_cast %72 : vector<8x16x128xbf16> to vector<128x128xbf16>
    %c8_48 = arith.constant 8 : index
    %c0_49 = arith.constant 0 : index
    %c0_50 = arith.constant 0 : index
    %74 = vector.load %arg3[%c8_48, %c0_49, %c0_50] : memref<9x128x128xbf16, #tpu.memory_space<vmem>>, vector<1x128x128xbf16>
    %75 = vector.shape_cast %74 : vector<1x128x128xbf16> to vector<128x128xbf16>
    %cst_51 = arith.constant dense<0.000000e+00> : vector<128x128xf32>
    %76 = tpu.matmul %73, %75, %cst_51 {dimension_numbers = #tpu.dot_dimension_numbers<[1], [0], [0], [1], [0, 0, 1, 1], [], []>} : vector<128x128xbf16>, vector<128x128xbf16>, vector<128x128xf32> -> vector<128x128xf32>
    %77 = arith.addf %69, %76 : vector<128x128xf32>
    %c0_52 = arith.constant 0 : index
    %c0_53 = arith.constant 0 : index
    %78 = vector.load %arg4[%c0_52, %c0_53] : memref<1x128xf32, #tpu.memory_space<vmem>>, vector<1x128xf32>
    %79 = vector.broadcast %78 : vector<1x128xf32> to vector<128x128xf32>
    %80 = arith.mulf %77, %79 : vector<128x128xf32>
    %c0_54 = arith.constant 0 : index
    %c0_55 = arith.constant 0 : index
    %81 = vector.load %arg5[%c0_54, %c0_55] : memref<1x128xf32, #tpu.memory_space<vmem>>, vector<1x128xf32>
    %82 = vector.broadcast %81 : vector<1x128xf32> to vector<128x128xf32>
    %83 = arith.addf %80, %82 : vector<128x128xf32>
    %cst_56 = arith.constant 0.000000e+00 : f32
    %84 = vector.broadcast %cst_56 : f32 to vector<128x128xf32>
    %85 = arith.maximumf %83, %84 : vector<128x128xf32>
    %86 = vector.shape_cast %85 : vector<128x128xf32> to vector<8x16x128xf32>
    %c0_57 = arith.constant 0 : index
    %c0_58 = arith.constant 0 : index
    %c0_59 = arith.constant 0 : index
    %c0_60 = arith.constant 0 : index
    %87 = vector.load %arg6[%c0_57, %c0_58, %c0_59, %c0_60] : memref<1x8x16x128xf32, #tpu.memory_space<vmem>>, vector<1x8x16x128xf32>
    %88 = vector.shape_cast %87 : vector<1x8x16x128xf32> to vector<8x16x128xf32>
    %89 = vector.shape_cast %86 : vector<8x16x128xf32> to vector<1x8x16x128xf32>
    tpu.vector_store %arg6[%c0_57, %c0_58, %c0_59, %c0_60], %89 {strides = array<i32>} : memref<1x8x16x128xf32, #tpu.memory_space<vmem>>, vector<1x8x16x128xf32>,
    return
  }
  func.func @transform_0(%arg0: i32, %arg1: i32) -> (i32, i32, i32, i32) {
    %c0_i32 = arith.constant 0 : i32
    %c0_i32_0 = arith.constant 0 : i32
    %c0_i32_1 = arith.constant 0 : i32
    %c0_i32_2 = arith.constant 0 : i32
    return %arg0, %c0_i32, %c0_i32_0, %c0_i32_1 : i32, i32, i32, i32
  }
  func.func @transform_1(%arg0: i32, %arg1: i32) -> (i32, i32, i32) {
    %c0_i32 = arith.constant 0 : i32
    %c0_i32_0 = arith.constant 0 : i32
    %c0_i32_1 = arith.constant 0 : i32
    %c0_i32_2 = arith.constant 0 : i32
    return %c0_i32, %c0_i32_0, %c0_i32_1 : i32, i32, i32
  }
  func.func @transform_2(%arg0: i32, %arg1: i32) -> (i32, i32) {
    %c0_i32 = arith.constant 0 : i32
    %c0_i32_0 = arith.constant 0 : i32
    %c0_i32_1 = arith.constant 0 : i32
    return %c0_i32, %c0_i32_0 : i32, i32
  }
  func.func @transform_3(%arg0: i32, %arg1: i32) -> (i32, i32) {
    %c0_i32 = arith.constant 0 : i32
    %c0_i32_0 = arith.constant 0 : i32
    %c0_i32_1 = arith.constant 0 : i32
    return %c0_i32, %c0_i32_0 : i32, i32
  }
  func.func @transform_4(%arg0: i32, %arg1: i32) -> (i32, i32, i32, i32) {
    %c0_i32 = arith.constant 0 : i32
    %c0_i32_0 = arith.constant 0 : i32
    %c0_i32_1 = arith.constant 0 : i32
    return %arg0, %arg1, %c0_i32, %c0_i32_0 : i32, i32, i32, i32
  }
}

</mosaic_0001>

<bundles_post_ra>
// kernel: up_forward.3
= control target key start
LH: loop header
LB: loop body
LE: loop exit
PB: predicated region body
PF: predicated region fallthrough
CT: control target
= control target key end

     0   :  { %8 = vsyncpa [#allocation3], 0  ;;  %s1417_s0 = inlined_call_operand.vmem [shape: bf16[2,8,8,256], index: 0, kind: input, shape index: {}]   ;;  %s1418_s1 = inlined_call_operand.hbm [shape: bf16[2,256,256], index: 1, kind: input, shape index: {}]   ;;  %s1419_s2 = inlined_call_operand.vmem [shape: f32[1,256], index: 2, kind: input, shape index: {}]   ;;  %s1420_s3 = inlined_call_operand.vmem [shape: bf16[2,8,2,8,256], index: 3, kind: output, shape index: {}]  }
   0x1   :  { %10 = vsyncpa [#allocation3 + $0x1], 0  ;;  %s1170_s12 = smov 0   ;;  %s1172_s13 = smov 0  }
   0x2   :  { %s1174_s14 = smov 0   ;;  %s1176_s15 = smov 0  }
   0x3   :  { %s1178_s16 = smov 0   ;;  %s1180_s17 = smov 0  }
   0x4   :  { %s1182_s18 = smov 0   ;;  %s1184_s19 = smov 0  }
   0x5   :  { %s1186_s20 = smov 0   ;;  %s1188_s21 = smov 0  }
   0x6 LB: > { %s776_s22 = sadd.s32 4294967295, %s1145_s21   ;;  %s25_s23 = sadd.s32 1, %s1137_s19  ;;  %s1145_s21 = sphi %s1188_s21, %s16_s21   ;;  %s1141_s20 = sphi %s1186_s20, %s1435_s20   ;;  %s1137_s19 = sphi %s1184_s19, %s1434_s19   ;;  %s1133_s18 = sphi %s1182_s18, %s1433_s18   ;;  %s1129_s17 = sphi %s1180_s17, %s1432_s17   ;;  %s1125_s16 = sphi %s1178_s16, %s1431_s16   ;;  %s1121_s15 = sphi %s1176_s15, %s1430_s15   ;;  %s1117_s14 = sphi %s1174_s14, %s1429_s14   ;;  %s1113_s13 = sphi %s1172_s13, %s1428_s13   ;;  %s1109_s12 = sphi %s1170_s12, %s1427_s12  }
   0x7   : > { %p26_p0 = scmp.ge.s32.totalorder %s25_s23, 2  ;;  %s28_s24 = sadd.s32 1, %s1141_s20 }
   0x8   : > { %s61_s25 = sadd.s32 1, %s1125_s16  ;;  %p68_p1 = scmp.ne.s32.totalorder %s1125_s16, %s1121_s15 }
   0x9   : > { %s1437_s23 = smov (%p26_p0, %s25_s23), 0  ;;  %s1439_s24 = smov (!%p26_p0, %s28_s24), %s1141_s20 }
   0xa   : > { %s58_s26 = ssub.s32 %s1137_s19, %s1437_s23  ;;  %p69_p2 = scmp.eq.s32.totalorder %s1145_s21, 0 }
   0xb   : > { %p30_p3 = scmp.ge.s32.totalorder %s1439_s24, 2  ;;  %p59_p4 = scmp.eq.s32.totalorder %s58_s26, 0 }
   0xc   : > { %p1230_p5 = por %p69_p2, %p68_p1  ;;  %p74_p6 = scmp.ne.s32.totalorder %s1121_s15, %s1117_s14 }
   0xd   : > { %s1441_s24 = smov (%p30_p3, %s1439_s24), 0  ;;  %p75_p7 = scmp.eq.s32.totalorder %s776_s22, 0 }
   0xe   : > { %s1238_s28 = scalar_select %p59_p4, %s1125_s16, %s61_s25  }
   0xf   : > { %s105_s29 = ssub.s32 %s1141_s20, %s1441_s24  ;;  %s110_s4 = sadd.s32 1, %s1113_s13 }
  0x10   : > { %s107_s30 = sor.u32 %s105_s29, %s58_s26  ;;  %p1243_p8 = por %p75_p7, %p74_p6 }
  0x11   : > { %p108_p9 = scmp.eq.s32.totalorder %s107_s30, 0  ;;  %p120_p10 = scmp.ne.s32.totalorder %s1113_s13, %s1109_s12 }
  0x12   : > { %p121_p11 = scmp.eq.s32.totalorder %s776_s22, 3  ;;  %p890_p13 = scmp.lt.s32.totalorder %s1145_s21, 4 }
  0x13   : > { %s1250_s6 = scalar_select %p108_p9, %s1113_s13, %s110_s4  }
  0x14   : > { %p1252_p12 = por %p121_p11, %p120_p10  ;;  %s158_s8 = sand.u32 1, %s1125_s16  }
  0x15   : > { %s780_s9 = sshll.u32 %s158_s8, 8  ;;  %s842_s10 = sshll.u32 %s1137_s19, 12 }
  0x16   : > { %s1423_s7 = scalar_select %p1252_p12, 1, 0 }
  0x17   : > { %s1262_s25 = scalar_lea.hbm %s1418_s1, %s842_s10  ;;  %s162_s22 = scalar_lea.vmem [#allocation2], %s780_s9 }
  0x18   : > { %s169_s26 = sshll.u32 %s162_s22, 4  ;;  %p1268_p0 = pnand %p890_p13, %p1230_p5  ;;  %s1264_s26 = int_to_ptr.vmem [resolvable:$true] %s169_s26 }
  0x19   : > { %s1273_s30 = scalar_lea.sflag [#allocation3], %s158_s8  ;;  %s1033_s4 = scalar_lea.hbm %s1262_s25, 4096 }
  0x1a   : > { %p1034_p2 = scmp.ne.s32.totalorder %s1262_s25, %s1033_s4  ;;  %p1035_p3 = pneg %p1268_p0 }
  0x1b   : > { %s1038_s27 = scalar_lea.hbm %s1418_s1, 8192  ;;  %p1039_p5 = scmp.lt.u32.totalorder %s1262_s25, %s1418_s1 }
  0x1c   : > { %p1036_p4 = pnand %p1035_p3, %p1034_p2  ;;  %p1040_p7 = scmp.lt.u32.totalorder %s1038_s27, %s1033_s4 }
  0x1d   : > { %p1042_p10 = scmp.lt.u32.totalorder %s1033_s4, %s1262_s25 }
  0x1e   : > { %p1037_p6 = pneg %p1036_p4  ;;  %p1041_p9 = por %p1040_p7, %p1039_p5 }
  0x20   : > { %p1043_p11 = por %p1042_p10, %p1041_p9 }
  0x22   : > { %p1044_p13 = pnand %p1043_p11, %p1037_p6 }
  0x24   : > { %1047 = shalt.err (!%p1044_p13)
}
  0x25   : > { %s1048_s8 = scalar_lea.vmem %s1264_s26, 4096  ;;  %s1147_s22 = smov [#allocation2]  }
  0x26   : > { %p1049_p2 = scmp.ne.s32.totalorder %s1264_s26, %s1048_s8  ;;  %s1053_s9 = sshll.u32 %s1147_s22, 4  ;;  %s1054_s9 = int_to_ptr.vmem [resolvable:$false] %s1053_s9 }
  0x27   : > { %s1055_s10 = scalar_lea.vmem %s1054_s9, 8192  ;;  %p1056_p12 = scmp.lt.s32.totalorder %s1264_s26, %s1054_s9 }
  0x28   : > { %p1051_p4 = pnand %p1049_p2, %p1035_p3  ;;  %p1057_p5 = scmp.lt.s32.totalorder %s1055_s10, %s1048_s8 }
  0x2a   : > { %p1052_p1 = pneg %p1051_p4  ;;  %p1058_p7 = por %p1057_p5, %p1056_p12 }
  0x2c   : > { %p1059_p9 = pnand %p1058_p7, %p1052_p1 }
  0x2e   : > { %1062 = shalt.err (!%p1059_p9)
}
  0x2f   : > { %s1148_s4 = smov 128   ;;  %s1149_s27 = smov 8  }
  0x30   : > { %889 = dma.hbm_to_vmem [thread:$0]  (!%p1268_p0), %s1262_s25, 4096, %s1264_s26, %s1273_s30, %s1148_s4, %s1148_s4, %s1149_s27  }
  0x31   : > { %p177_p3 = scmp.lt.s32.totalorder %s1145_s21, 5  ;;  %p1425_p6 = scmp.ge.s32.totalorder %s1145_s21, 1 }
  0x33   : > { %p178_p10 = pnand %p1425_p6, %p177_p3 }
  0x34   : > { %s183_s11 = sand.u32 (!%p178_p10), 1, %s1121_s15  }
  0x35   : > { %181 = sbr.rel (%p178_p10) target bundleno = 363 (0x16b), region = 32  ;;  %s784_s14 = sshll.u32 (!%p178_p10), %s183_s11, 8 }
  0x36   : > { %s184_s8 = scalar_lea.sflag (!%p178_p10), [#allocation3], %s183_s11  ;;  %s1305_s22 = scalar_lea.vmem (!%p178_p10), [#allocation2], %s784_s14 }
  0x3c   : > { %1104 = dma.done.wait (%p1243_p8), %s184_s8, 4096  }
  0x3d   : > { %1106 = vsyncadd (%p1243_p8), %s184_s8, 4294963200  ;;  %v973_v0 = vld [vmem:[%s1305_s22 + $0x4] ss:$8 sps:$4 sm:$0xff]   ;;  %v975_v1 = vld [vmem:[%s1305_s22] ss:$8 sps:$4 sm:$0xff]   ;;  %p214_p8 = scmp.lt.s32.totalorder %s1133_s18, 1  ;;  %v261_v40 = vlaneseq }
  0x3e   : > { %471 = vmatprep.subr.bf16.mxu0 %v973_v0  ;;  %852 = vmatprep.subr.bf16.mxu1 %v973_v0  ;;  %v976_v2 = vld [vmem:[%s1305_s22 + $0x14] ss:$8 sps:$4 sm:$0xff]   ;;  %v978_v3 = vld [vmem:[%s1305_s22 + $0x10] ss:$8 sps:$4 sm:$0xff]   ;;  %v979_v4 = vld [vmem:[%s1305_s22 + $0x24] ss:$8 sps:$4 sm:$0xff]  }
  0x3f   : > { %472 = vmatpush1.bf16.msra.mxu0 %v975_v1  ;;  %868 = vmatpush1.bf16.msra.mxu1 %v975_v1  ;;  %v981_v5 = vld [vmem:[%s1305_s22 + $0x20] ss:$8 sps:$4 sm:$0xff]   ;;  %v982_v6 = vld [vmem:[%s1305_s22 + $0x34] ss:$8 sps:$4 sm:$0xff]   ;;  %v984_v7 = vld [vmem:[%s1305_s22 + $0x30] ss:$8 sps:$4 sm:$0xff]  }
  0x40   : > { %473 = vmatprep.subr.bf16.mxu0 %v976_v2  ;;  %853 = vmatprep.subr.bf16.mxu1 %v976_v2  ;;  %v985_v8 = vld [vmem:[%s1305_s22 + $0x44] ss:$8 sps:$4 sm:$0xff]   ;;  %s215_s5 = scalar_select %p214_p8, %s1133_s18, 1  ;;  %v987_v9 = vld [vmem:[%s1305_s22 + $0x40] ss:$8 sps:$4 sm:$0xff]   ;;  %v262_v41 = vshrl.u32 %v261_v40, 7 }
  0x41   : > { %v988_v10 = vld [vmem:[%s1305_s22 + $0x54] ss:$8 sps:$4 sm:$0xff]   ;;  %v990_v11 = vld [vmem:[%s1305_s22 + $0x50] ss:$8 sps:$4 sm:$0xff]   ;;  %v991_v12 = vld [vmem:[%s1305_s22 + $0x64] ss:$8 sps:$4 sm:$0xff]  }
  0x42   : > { %s843_s25 = sshll.u32 %s215_s5, 6  ;;  %v993_v14 = vld [vmem:[%s1305_s22 + $0x60] ss:$8 sps:$4 sm:$0xff]   ;;  %v994_v16 = vld [vmem:[%s1305_s22 + $0x74] ss:$8 sps:$4 sm:$0xff]   ;;  %v263_v42 = vsub.s32 0, %v262_v41 }
  0x43   : > { %474 = vmatpush1.bf16.msra.mxu0 %v978_v3  ;;  %869 = vmatpush1.bf16.msra.mxu1 %v978_v3  ;;  %s1328_s30 = scalar_lea.vmem %s1417_s0, %s843_s25  ;;  %v996_v17 = vld [vmem:[%s1305_s22 + $0x70] ss:$8 sps:$4 sm:$0xff]   ;;  %v997_v18 = vld [vmem:[%s1305_s22 + $0x84] ss:$8 sps:$4 sm:$0xff]   ;;  %v999_v19 = vld [vmem:[%s1305_s22 + $0x80] ss:$8 sps:$4 sm:$0xff]  }
  0x44   : > { %475 = vmatprep.subr.bf16.mxu0 %v979_v4  ;;  %854 = vmatprep.subr.bf16.mxu1 %v979_v4  ;;  %v1023_v13 = vld [vmem:[%s1328_s30 + $0x4] ss:$8 sps:$4 sm:$0xff]   ;;  %v1000_v20 = vld [vmem:[%s1305_s22 + $0x94] ss:$8 sps:$4 sm:$0xff]   ;;  %v1002_v21 = vld [vmem:[%s1305_s22 + $0x90] ss:$8 sps:$4 sm:$0xff]  }
  0x45   : > { %v1026_v15 = vld [vmem:[%s1328_s30 + $0x24] ss:$8 sps:$4 sm:$0xff]   ;;  %503 = vmatprep.mubr.bf16.mxu0 %v1023_v13  ;;  %v1005_v23 = vld [vmem:[%s1305_s22 + $0xa0] ss:$8 sps:$4 sm:$0xff]   ;;  %v1006_v24 = vld [vmem:[%s1305_s22 + $0xb4] ss:$8 sps:$4 sm:$0xff]  }
  0x46   : > { %523 = vmatprep.mubr.bf16.mxu1 %v1026_v15  ;;  %v1003_v22 = vld [vmem:[%s1305_s22 + $0xa4] ss:$8 sps:$4 sm:$0xff]   ;;  %v1008_v25 = vld [vmem:[%s1305_s22 + $0xb0] ss:$8 sps:$4 sm:$0xff]   ;;  %v1011_v27 = vld [vmem:[%s1305_s22 + $0xc0] ss:$8 sps:$4 sm:$0xff]  }
  0x47   : > { %476 = vmatpush1.bf16.msra.mxu0 %v981_v5  ;;  %870 = vmatpush1.bf16.msra.mxu1 %v981_v5  ;;  %v1009_v26 = vld [vmem:[%s1305_s22 + $0xc4] ss:$8 sps:$4 sm:$0xff]   ;;  %v1012_v28 = vld [vmem:[%s1305_s22 + $0xd4] ss:$8 sps:$4 sm:$0xff]   ;;  %v1014_v29 = vld [vmem:[%s1305_s22 + $0xd0] ss:$8 sps:$4 sm:$0xff]  }
  0x48   : > { %477 = vmatprep.subr.bf16.mxu0 %v982_v6  ;;  %855 = vmatprep.subr.bf16.mxu1 %v982_v6  ;;  %v1015_v30 = vld [vmem:[%s1305_s22 + $0xe4] ss:$8 sps:$4 sm:$0xff]   ;;  %v1017_v31 = vld [vmem:[%s1305_s22 + $0xe0] ss:$8 sps:$4 sm:$0xff]   ;;  %v1018_v32 = vld [vmem:[%s1305_s22 + $0xf4] ss:$8 sps:$4 sm:$0xff]  }
  0x49   : > { %v1020_v33 = vld [vmem:[%s1305_s22 + $0xf0] ss:$8 sps:$4 sm:$0xff]   ;;  %v1021_v34 = vld [vmem:[%s1328_s30] ss:$8 sps:$4 sm:$0xff]   ;;  %v1027_v36 = vld [vmem:[%s1328_s30 + $0x14] ss:$8 sps:$4 sm:$0xff]  }
  0x4a   : > { %v1024_v35 = vld [vmem:[%s1328_s30 + $0x20] ss:$8 sps:$4 sm:$0xff]   ;;  %v1029_v37 = vld [vmem:[%s1328_s30 + $0x34] ss:$8 sps:$4 sm:$0xff]   ;;  %v1031_v38 = vld [vmem:[%s1328_s30 + $0x10] ss:$8 sps:$4 sm:$0xff]  }
  0x4b   : > { %478 = vmatpush1.bf16.msra.mxu0 %v984_v7  ;;  %871 = vmatpush1.bf16.msra.mxu1 %v984_v7  ;;  %v1032_v39 = vld [vmem:[%s1328_s30 + $0x30] ss:$8 sps:$4 sm:$0xff]   ;;  %v259_v43 = vld [vmem:[%s1419_s2] sm:$0x3]  ;;  %v267_v44 = vsub.s32 1, %v262_v41  ;;  %s211_s4 = sand.u32 1, %s1109_s12  }
  0x4c   : > { %479 = vmatprep.subr.bf16.mxu0 %v985_v8  ;;  %856 = vmatprep.subr.bf16.mxu1 %v985_v8  ;;  %v264_v45 = vrot.slane %v259_v43, %v263_v42  ;;  %s785_s27 = sshll.u32 %s211_s4, 6  ;;  %p1426_p12 = scmp.ne.s32.totalorder %s1423_s7, 0 }
  0x4d   : > { %v268_v46 = vrot.slane %v259_v43, %v267_v44  ;;  %s1362_s12 = scalar_lea.vmem [#allocation4], %s785_s27  ;;  %s837_s11 = sshll.u32 (%p1426_p12), %s1129_s17, 1 }
  0x4e   : > { %s838_s14 = sshll.u32 (%p1426_p12), %s1133_s18, 5 }
  0x4f   : > { %480 = vmatpush1.bf16.msra.mxu0 %v987_v9  ;;  %872 = vmatpush1.bf16.msra.mxu1 %v987_v9  ;;  %s625_s8 = sadd.s32 (%p1426_p12), %s838_s14, %s837_s11 }
  0x50   : > { %481 = vmatprep.subr.bf16.mxu0 %v988_v10  ;;  %857 = vmatprep.subr.bf16.mxu1 %v988_v10  ;;  %s839_s7 = sshll.u32 (%p1426_p12), %s625_s8, 2 }
  0x51   : > { %s627_s25 = scalar_lea.vmem (%p1426_p12), %s1420_s3, %s839_s7 }
  0x53   : > { %482 = vmatpush1.bf16.msra.mxu0 %v990_v11  ;;  %873 = vmatpush1.bf16.msra.mxu1 %v990_v11 }
  0x54   : > { %483 = vmatprep.subr.bf16.mxu0 %v991_v12  ;;  %858 = vmatprep.subr.bf16.mxu1 %v991_v12 }
  0x57   : > { %484 = vmatpush1.bf16.msra.mxu0 %v993_v14  ;;  %874 = vmatpush1.bf16.msra.mxu1 %v993_v14 }
  0x58   : > { %485 = vmatprep.subr.bf16.mxu0 %v994_v16  ;;  %859 = vmatprep.subr.bf16.mxu1 %v994_v16 }
  0x5b   : > { %486 = vmatpush1.bf16.msra.mxu0 %v996_v17  ;;  %875 = vmatpush1.bf16.msra.mxu1 %v996_v17 }
  0x5c   : > { %487 = vmatprep.subr.bf16.mxu0 %v997_v18  ;;  %860 = vmatprep.subr.bf16.mxu1 %v997_v18 }
  0x5f   : > { %488 = vmatpush1.bf16.msra.mxu0 %v999_v19  ;;  %876 = vmatpush1.bf16.msra.mxu1 %v999_v19 }
  0x60   : > { %489 = vmatprep.subr.bf16.mxu0 %v1000_v20  ;;  %861 = vmatprep.subr.bf16.mxu1 %v1000_v20 }
  0x63   : > { %490 = vmatpush1.bf16.msra.mxu0 %v1002_v21  ;;  %877 = vmatpush1.bf16.msra.mxu1 %v1002_v21 }
  0x64   : > { %491 = vmatprep.subr.bf16.mxu0 %v1003_v22  ;;  %862 = vmatprep.subr.bf16.mxu1 %v1003_v22 }
  0x67   : > { %492 = vmatpush1.bf16.msra.mxu0 %v1005_v23  ;;  %878 = vmatpush1.bf16.msra.mxu1 %v1005_v23 }
  0x68   : > { %493 = vmatprep.subr.bf16.mxu0 %v1006_v24  ;;  %863 = vmatprep.subr.bf16.mxu1 %v1006_v24 }
  0x6b   : > { %494 = vmatpush1.bf16.msra.mxu0 %v1008_v25  ;;  %879 = vmatpush1.bf16.msra.mxu1 %v1008_v25 }
  0x6c   : > { %495 = vmatprep.subr.bf16.mxu0 %v1009_v26  ;;  %864 = vmatprep.subr.bf16.mxu1 %v1009_v26 }
  0x6f   : > { %496 = vmatpush1.bf16.msra.mxu0 %v1011_v27  ;;  %880 = vmatpush1.bf16.msra.mxu1 %v1011_v27 }
  0x70   : > { %497 = vmatprep.subr.bf16.mxu0 %v1012_v28  ;;  %865 = vmatprep.subr.bf16.mxu1 %v1012_v28 }
  0x73   : > { %498 = vmatpush1.bf16.msra.mxu0 %v1014_v29  ;;  %881 = vmatpush1.bf16.msra.mxu1 %v1014_v29 }
  0x74   : > { %499 = vmatprep.subr.bf16.mxu0 %v1015_v30  ;;  %866 = vmatprep.subr.bf16.mxu1 %v1015_v30 }
  0x77   : > { %500 = vmatpush1.bf16.msra.mxu0 %v1017_v31  ;;  %882 = vmatpush1.bf16.msra.mxu1 %v1017_v31 }
  0x78   : > { %501 = vmatprep.subr.bf16.mxu0 %v1018_v32  ;;  %867 = vmatprep.subr.bf16.mxu1 %v1018_v32 }
  0x7b   : > { %502 = vmatpush1.bf16.msra.mxu0 %v1020_v33  ;;  %883 = vmatpush1.bf16.msra.mxu1 %v1020_v33 }
  0x7e   : > { %504 = vmatmul.mubr.bf16.vlgmr.msra.gmra.mrb[0].mxu0 %v1021_v34  ;;  %524 = vmatmul.mubr.bf16.vlgmr.msra.gmra.mrb[0].mxu1 %v1024_v35 }
  0x7f   : > { %513 = vmatprep.mubr.bf16.mxu0 %v1027_v36  ;;  %533 = vmatprep.mubr.bf16.mxu1 %v1029_v37 }
  0x86   : > { %514 = vmatmul.mubr.bf16.gmra.mrb[4].mxu0 %v1031_v38  ;;  %534 = vmatmul.mubr.bf16.gmra.mrb[4].mxu1 %v1032_v39 }
 0x151   : > { %v505_v47 = vpop.f32.mrb[0].mxu0  ;;  %v525_v48 = vpop.f32.mrb[0].mxu1 }
 0x152   : > { %v506_v49 = vadd.f32 %v505_v47, %v264_v45  ;;  %v526_v50 = vadd.f32 %v525_v48, %v264_v45  ;;  %v507_v51 = vpop.f32.mrb[1].mxu0  ;;  %v527_v52 = vpop.f32.mrb[1].mxu1 }
 0x153   : > { %v508_v53 = vadd.f32 %v507_v51, %v268_v46  ;;  %v528_v54 = vadd.f32 %v527_v52, %v268_v46  ;;  %v509_v55 = vpop.f32.mrb[2].mxu0  ;;  %v529_v56 = vpop.f32.mrb[2].mxu1 }
 0x154   : > { %v510_v57 = vadd.f32 %v509_v55, %v264_v45  ;;  %v530_v58 = vadd.f32 %v529_v56, %v264_v45  ;;  %v511_v59 = vpop.f32.mrb[3].mxu0  ;;  %v531_v60 = vpop.f32.mrb[3].mxu1 }
 0x155   : > { %v844_v61 = vpack.c.bf16 %v508_v53, %v506_v49  ;;  %v848_v62 = vpack.c.bf16 %v528_v54, %v526_v50  ;;  %v512_v63 = vadd.f32 %v511_v59, %v268_v46  ;;  %v532_v0 = vadd.f32 %v531_v60, %v268_v46 }
 0x157   : > { %608 = vst [vmem:[%s1362_s12] sm:$0xff] %v844_v61  ;;  %612 = vst [vmem:[%s1362_s12 + $0x20] sm:$0xff] %v848_v62  ;;  %v845_v1 = vpack.c.bf16 %v512_v63, %v510_v57  ;;  %v849_v2 = vpack.c.bf16 %v532_v0, %v530_v58 }
 0x159   : > { %609 = vst [vmem:[%s1362_s12 + $0x8] sm:$0xff] %v845_v1  ;;  %613 = vst [vmem:[%s1362_s12 + $0x28] sm:$0xff] %v849_v2  ;;  %v515_v3 = vpop.f32.mrb[4].mxu0  ;;  %v535_v4 = vpop.f32.mrb[4].mxu1 }
 0x15a   : > { %v516_v5 = vadd.f32 %v515_v3, %v264_v45  ;;  %v536_v6 = vadd.f32 %v535_v4, %v264_v45  ;;  %v517_v7 = vpop.f32.mrb[5].mxu0  ;;  %v537_v8 = vpop.f32.mrb[5].mxu1 }
 0x15b   : > { %v518_v9 = vadd.f32 %v517_v7, %v268_v46  ;;  %v538_v10 = vadd.f32 %v537_v8, %v268_v46  ;;  %v519_v11 = vpop.f32.mrb[6].mxu0  ;;  %v539_v12 = vpop.f32.mrb[6].mxu1  ;;  %622 = sbr.rel (!%p1426_p12) target bundleno = 363 (0x16b), region = 40 }
 0x15c   : > { %v520_v13 = vadd.f32 %v519_v11, %v264_v45  ;;  %v540_v14 = vadd.f32 %v539_v12, %v264_v45  ;;  %v521_v15 = vpop.f32.mrb[7].mxu0  ;;  %v541_v16 = vpop.f32.mrb[7].mxu1 }
 0x15d   : > { %v846_v17 = vpack.c.bf16 %v518_v9, %v516_v5  ;;  %v850_v18 = vpack.c.bf16 %v538_v10, %v536_v6  ;;  %v522_v19 = vadd.f32 %v521_v15, %v268_v46  ;;  %v542_v20 = vadd.f32 %v541_v16, %v268_v46 }
 0x15e   : > { %v669_v23 = vld [vmem:[%s1362_s12] sm:$0xff] (%p1426_p12) }
 0x15f   : > { %610 = vst [vmem:[%s1362_s12 + $0x10] sm:$0xff] %v846_v17  ;;  %614 = vst [vmem:[%s1362_s12 + $0x30] sm:$0xff] %v850_v18  ;;  %v847_v21 = vpack.c.bf16 %v522_v19, %v520_v13  ;;  %v851_v22 = vpack.c.bf16 %v542_v20, %v540_v14  ;;  %v677_v27 = vld [vmem:[%s1362_s12 + $0x20] sm:$0xff] (%p1426_p12) }
 0x160   : > { %v671_v24 = vld [vmem:[%s1362_s12 + $0x8] sm:$0xff] (%p1426_p12)  ;;  %670 = vst [vmem:[%s627_s25] sm:$0xff] (%p1426_p12), %v669_v23  ;;  %678 = vst [vmem:[%s627_s25 + $0x40] sm:$0xff] (%p1426_p12), %v677_v27 }
 0x161   : > { %611 = vst [vmem:[%s1362_s12 + $0x18] sm:$0xff] %v847_v21  ;;  %615 = vst [vmem:[%s1362_s12 + $0x38] sm:$0xff] %v851_v22  ;;  %v679_v28 = vld [vmem:[%s1362_s12 + $0x28] sm:$0xff] (%p1426_p12) }
 0x162   : > { %672 = vst [vmem:[%s627_s25 + $0x10] sm:$0xff] %v671_v24  ;;  %680 = vst [vmem:[%s627_s25 + $0x50] sm:$0xff] %v679_v28 }
 0x166   : > { %v673_v25 = vld [vmem:[%s1362_s12 + $0x10] sm:$0xff] }
 0x167   : > { %v681_v29 = vld [vmem:[%s1362_s12 + $0x30] sm:$0xff]  ;;  %674 = vst [vmem:[%s627_s25 + $0x20] sm:$0xff] %v673_v25 }
 0x168   : > { %v675_v26 = vld [vmem:[%s1362_s12 + $0x18] sm:$0xff]  ;;  %682 = vst [vmem:[%s627_s25 + $0x60] sm:$0xff] %v681_v29 }
 0x169   : > { %v683_v30 = vld [vmem:[%s1362_s12 + $0x38] sm:$0xff]  ;;  %676 = vst [vmem:[%s627_s25 + $0x30] sm:$0xff] %v675_v26 }
 0x16a   : > { %684 = vst [vmem:[%s627_s25 + $0x70] sm:$0xff] %v683_v30 }
 0x16b PF: > { %s16_s21 = sadd.s32 1, %s1145_s21   ;;  %s1427_s12 = smov %s1113_s13 }
 0x16c   : > { %p13_p0 = scmp.ge.s32.totalorder %s16_s21, 6   ;;  %s1428_s13 = smov %s1250_s6 }
 0x16d   : > { %s1429_s14 = smov %s1121_s15  ;;  %s1430_s15 = smov %s1125_s16 }
 0x16e   : > { %s1431_s16 = smov %s1238_s28  ;;  %s1432_s17 = smov %s1137_s19 }
 0x16f   : > { %s1433_s18 = smov %s1141_s20  ;;  %s1434_s19 = smov %s1437_s23 }
 0x170   : > { %s1435_s20 = smov %s1441_s24  ;;  %15 = sbr.rel (!%p13_p0) target bundleno = 6 (0x6), region = 113 }
 0x177   :  { %700 = vsyncpa [#allocation3], 1 }
 0x178   :  { %702 = vsyncpa [#allocation3 + $0x1], 1 }

// kernel: up_forward.5
= control target key start
LH: loop header
LB: loop body
LE: loop exit
PB: predicated region body
PF: predicated region fallthrough
CT: control target
= control target key end

     0   :  { %9 = vsyncpa [#allocation4], 0  ;;  %s5426_s0 = inlined_call_operand.vmem [shape: bf16[2,16,16,128], index: 0, kind: input, shape index: {}]   ;;  %s5427_s1 = inlined_call_operand.vmem [shape: bf16[9,128,128], index: 1, kind: input, shape index: {}]   ;;  %s5428_s2 = inlined_call_operand.vmem [shape: f32[1,128], index: 2, kind: input, shape index: {}]   ;;  %s5429_s3 = inlined_call_operand.vmem [shape: f32[1,128], index: 3, kind: input, shape index: {}]   ;;  %s5430_s4 = inlined_call_operand.hbm [shape: f32[2,16,16,128], index: 4, kind: output, shape index: {}]  }
   0x1   :  { %11 = vsyncpa [#allocation4 + $0x1], 0  ;;  %s4532_s15 = smov 0   ;;  %s4534_s16 = smov 0  }
   0x2   :  { %s4536_s17 = smov 0   ;;  %s4538_s18 = smov 0  }
   0x3   :  { %s4540_s19 = smov 0   ;;  %s4542_s20 = smov 0  }
   0x4   :  { %s4544_s21 = smov 0   ;;  %s4546_s22 = smov 0  }
   0x5 LB: > { %s3314_s23 = sadd.s32 4294967295, %s4501_s22   ;;  %s3315_s24 = sadd.s32 4294967294, %s4501_s22   ;;  %s4501_s22 = sphi %s4546_s22, %s17_s22   ;;  %s4497_s21 = sphi %s4544_s21, %s5439_s21   ;;  %s4493_s20 = sphi %s4542_s20, %s5438_s20   ;;  %s4489_s19 = sphi %s4540_s19, %s5437_s19   ;;  %s4485_s18 = sphi %s4538_s18, %s5436_s18   ;;  %s4481_s17 = sphi %s4536_s17, %s5435_s17   ;;  %s4477_s16 = sphi %s4534_s16, %s5434_s16   ;;  %s4473_s15 = sphi %s4532_s15, %s5433_s15  }
   0x6   : > { %s26_s25 = sadd.s32 1, %s4493_s20  ;;  %s29_s26 = sadd.s32 1, %s4497_s21 }
   0x7   : > { %p27_p0 = scmp.ge.s32.totalorder %s26_s25, 2  ;;  %p137_p1 = scmp.ne.s32.totalorder %s4481_s17, %s4477_s16 }
   0x8   : > { %p138_p2 = scmp.eq.s32.totalorder %s3314_s23, 3  ;;  %p143_p5 = scmp.ne.s32.totalorder %s4477_s16, %s4473_s15 }
   0x9   : > { %s5441_s25 = smov (%p27_p0, %s26_s25), 0  ;;  %s5443_s26 = smov (!%p27_p0, %s29_s26), %s4497_s21 }
   0xa   : > { %s123_s27 = ssub.s32 %s4493_s20, %s5441_s25  ;;  %p4583_p3 = por %p138_p2, %p137_p1 }
   0xb   : > { %p31_p4 = scmp.ge.s32.totalorder %s5443_s26, 2  ;;  %p144_p6 = scmp.eq.s32.totalorder %s3315_s24, 3 }
   0xc   : > { %p3318_p7 = scmp.ge.s32.totalorder %s4501_s22, 1  ;;  %p179_p9 = scmp.lt.s32.totalorder %s4501_s22, 5 }
   0xd   : > { %s5445_s26 = smov (%p31_p4, %s5443_s26), 0  ;;  %p4592_p8 = por %p144_p6, %p143_p5 }
   0xe   : > { %s122_s30 = ssub.s32 %s4497_s21, %s5445_s26  ;;  %s127_s5 = sadd.s32 1, %s4481_s17 }
   0xf   : > { %s124_s6 = sor.u32 %s123_s27, %s122_s30  ;;  %p180_p10 = pnand %p3318_p7, %p179_p9 }
  0x10   : > { %p125_p11 = scmp.eq.s32.totalorder %s124_s6, 0  ;;  %s202_s8 = sand.u32 (!%p180_p10), 1, %s4477_s16  }
  0x11   : > { %183 = sbr.rel (%p180_p10) target bundleno = 478 (0x1de), region = 36  ;;  %p205_p12 = scmp.lt.s32.totalorder (!%p180_p10), %s4489_s19, 1 }
  0x12   : > { %s4601_s7 = scalar_select %p125_p11, %s4481_s17, %s127_s5  }
  0x13   : > { %s3319_s9 = sshll.u32 (!%p180_p10), %s202_s8, 7  ;;  %p3322_p13 = scmp.ne.s32.totalorder (!%p180_p10), %s4485_s18, 0 }
  0x14   : > { %s4613_s23 = scalar_lea.vmem (!%p180_p10), [#allocation3], %s3319_s9 }
  0x18   : > { %s206_s10 = scalar_select %p205_p12, %s4489_s19, 1 }
  0x19   : > { %215 = sbr.rel (%p3322_p13) target bundleno = 60 (0x3c), region = 40  ;;  %v4503_v1 = vmov (!%p3322_p13), 0  }
  0x1a   : > { %s3635_s11 = sshll.u32 %s206_s10, 7  ;;  %218 = vst [vmem:[#allocation2 + $0x10] sm:$0xff] (!%p3322_p13), %v4503_v1  ;;  %216 = vst [vmem:[#allocation2] sm:$0xff] (!%p3322_p13), %v4503_v1 }
  0x1b   : > { %s4611_s14 = scalar_lea.vmem %s5426_s0, %s3635_s11  ;;  %217 = vst [vmem:[#allocation2 + $0x8] sm:$0xff] (!%p3322_p13), %v4503_v1  ;;  %219 = vst [vmem:[#allocation2 + $0x18] sm:$0xff] (!%p3322_p13), %v4503_v1 }
  0x1c   : > { %v4291_v0 = vld [vmem:[%s4611_s14] ss:$0 sps:$4 sm:$0xff] (!%p3322_p13)   ;;  %220 = vst [vmem:[#allocation2 + $0x20] sm:$0xff] (!%p3322_p13), %v4503_v1  ;;  %221 = vst [vmem:[#allocation2 + $0x28] sm:$0xff] (!%p3322_p13), %v4503_v1  ;;  %v4292_v2 = vld [vmem:[%s4611_s14 + $0x4] ss:$0 sps:$4 sm:$0xff] (!%p3322_p13)  }
  0x1d   : > { %222 = vst [vmem:[#allocation2 + $0x30] sm:$0xff] (!%p3322_p13), %v4503_v1  ;;  %223 = vst [vmem:[#allocation2 + $0x38] sm:$0xff] (!%p3322_p13), %v4503_v1  ;;  %v4293_v3 = vld [vmem:[%s4611_s14 + $0x8] ss:$0 sps:$4 sm:$0xff] (!%p3322_p13)   ;;  %v4294_v4 = vld [vmem:[%s4611_s14 + $0xc] ss:$0 sps:$4 sm:$0xff] (!%p3322_p13)  }
  0x1e   : > { %224 = vst [vmem:[#allocation2 + $0x40] sm:$0xff] (!%p3322_p13), %v4503_v1  ;;  %225 = vst [vmem:[#allocation2 + $0x48] sm:$0xff] (!%p3322_p13), %v4503_v1  ;;  %v4295_v5 = vld [vmem:[%s4611_s14 + $0x10] ss:$0 sps:$4 sm:$0xff] (!%p3322_p13)   ;;  %v4296_v6 = vld [vmem:[%s4611_s14 + $0x14] ss:$0 sps:$4 sm:$0xff] (!%p3322_p13)  }
  0x1f   : > { %226 = vst [vmem:[#allocation2 + $0x50] sm:$0xff] (!%p3322_p13), %v4503_v1  ;;  %227 = vst [vmem:[#allocation2 + $0x58] sm:$0xff] (!%p3322_p13), %v4503_v1  ;;  %v4297_v7 = vld [vmem:[%s4611_s14 + $0x18] ss:$0 sps:$4 sm:$0xff] (!%p3322_p13)   ;;  %v4298_v8 = vld [vmem:[%s4611_s14 + $0x1c] ss:$0 sps:$4 sm:$0xff] (!%p3322_p13)  }
  0x20   : > { %228 = vst [vmem:[#allocation2 + $0x60] sm:$0xff] %v4503_v1  ;;  %229 = vst [vmem:[#allocation2 + $0x68] sm:$0xff] %v4503_v1  ;;  %v4299_v9 = vld [vmem:[%s4611_s14 + $0x20] ss:$0 sps:$4 sm:$0xff]   ;;  %v4300_v10 = vld [vmem:[%s4611_s14 + $0x24] ss:$0 sps:$4 sm:$0xff]  }
  0x21   : > { %230 = vst [vmem:[#allocation2 + $0x70] sm:$0xff] %v4503_v1  ;;  %231 = vst [vmem:[#allocation2 + $0x78] sm:$0xff] %v4503_v1  ;;  %v4301_v11 = vld [vmem:[%s4611_s14 + $0x28] ss:$0 sps:$4 sm:$0xff]   ;;  %v4302_v12 = vld [vmem:[%s4611_s14 + $0x2c] ss:$0 sps:$4 sm:$0xff]  }
  0x22   : > { %232 = vst [vmem:[#allocation2 + $0x80] sm:$0xff] %v4503_v1  ;;  %233 = vst [vmem:[#allocation2 + $0x88] sm:$0xff] %v4503_v1  ;;  %v4303_v13 = vld [vmem:[%s4611_s14 + $0x30] ss:$0 sps:$4 sm:$0xff]   ;;  %v4304_v14 = vld [vmem:[%s4611_s14 + $0x34] ss:$0 sps:$4 sm:$0xff]  }
  0x23   : > { %234 = vst [vmem:[#allocation2 + $0x90] sm:$0xff] %v4503_v1  ;;  %235 = vst [vmem:[#allocation2 + $0x98] sm:$0xff] %v4503_v1  ;;  %v4305_v15 = vld [vmem:[%s4611_s14 + $0x38] ss:$0 sps:$4 sm:$0xff]   ;;  %v4306_v16 = vld [vmem:[%s4611_s14 + $0x3c] ss:$0 sps:$4 sm:$0xff]  }
  0x24   : > { %236 = vst [vmem:[#allocation2 + $0xa0] sm:$0xff] %v4503_v1  ;;  %237 = vst [vmem:[#allocation2 + $0xa8] sm:$0xff] %v4503_v1  ;;  %v4307_v17 = vld [vmem:[%s4611_s14 + $0x40] ss:$0 sps:$4 sm:$0xff]   ;;  %v4308_v18 = vld [vmem:[%s4611_s14 + $0x44] ss:$0 sps:$4 sm:$0xff]  }
  0x25   : > { %238 = vst [vmem:[#allocation2 + $0xb0] sm:$0xff] %v4503_v1  ;;  %239 = vst [vmem:[#allocation2 + $0xb8] sm:$0xff] %v4503_v1  ;;  %v4309_v19 = vld [vmem:[%s4611_s14 + $0x48] ss:$0 sps:$4 sm:$0xff]   ;;  %v4310_v20 = vld [vmem:[%s4611_s14 + $0x4c] ss:$0 sps:$4 sm:$0xff]  }
  0x26   : > { %240 = vst [vmem:[#allocation2 + $0xc0] sm:$0xff] %v4503_v1  ;;  %241 = vst [vmem:[#allocation2 + $0xc8] sm:$0xff] %v4503_v1  ;;  %v4311_v21 = vld [vmem:[%s4611_s14 + $0x50] ss:$0 sps:$4 sm:$0xff]   ;;  %v4312_v22 = vld [vmem:[%s4611_s14 + $0x54] ss:$0 sps:$4 sm:$0xff]  }
  0x27   : > { %242 = vst [vmem:[#allocation2 + $0xd0] sm:$0xff] %v4503_v1  ;;  %243 = vst [vmem:[#allocation2 + $0xd8] sm:$0xff] %v4503_v1  ;;  %v4313_v23 = vld [vmem:[%s4611_s14 + $0x58] ss:$0 sps:$4 sm:$0xff]   ;;  %v4314_v24 = vld [vmem:[%s4611_s14 + $0x5c] ss:$0 sps:$4 sm:$0xff]  }
  0x28   : > { %244 = vst [vmem:[#allocation2 + $0xe0] sm:$0xff] %v4503_v1  ;;  %245 = vst [vmem:[#allocation2 + $0xe8] sm:$0xff] %v4503_v1  ;;  %v4315_v25 = vld [vmem:[%s4611_s14 + $0x60] ss:$0 sps:$4 sm:$0xff]   ;;  %v4316_v26 = vld [vmem:[%s4611_s14 + $0x64] ss:$0 sps:$4 sm:$0xff]  }
  0x29   : > { %246 = vst [vmem:[#allocation2 + $0xf0] sm:$0xff] %v4503_v1  ;;  %247 = vst [vmem:[#allocation2 + $0xf8] sm:$0xff] %v4503_v1  ;;  %v4317_v27 = vld [vmem:[%s4611_s14 + $0x68] ss:$0 sps:$4 sm:$0xff]   ;;  %v4318_v28 = vld [vmem:[%s4611_s14 + $0x6c] ss:$0 sps:$4 sm:$0xff]  }
  0x2a   : > { %248 = vst [vmem:[#allocation2 + $0x100] sm:$0xff] %v4503_v1  ;;  %249 = vst [vmem:[#allocation2 + $0x108] sm:$0xff] %v4503_v1  ;;  %v4319_v29 = vld [vmem:[%s4611_s14 + $0x70] ss:$0 sps:$4 sm:$0xff]   ;;  %v4320_v30 = vld [vmem:[%s4611_s14 + $0x74] ss:$0 sps:$4 sm:$0xff]  }
  0x2b   : > { %250 = vst [vmem:[#allocation2 + $0x110] sm:$0xff] %v4503_v1  ;;  %251 = vst [vmem:[#allocation2 + $0x118] sm:$0xff] %v4503_v1  ;;  %v4321_v31 = vld [vmem:[%s4611_s14 + $0x78] ss:$0 sps:$4 sm:$0xff]   ;;  %v4322_v32 = vld [vmem:[%s4611_s14 + $0x7c] ss:$0 sps:$4 sm:$0xff]  }
  0x2c   : > { %413 = vst [vmem:[#allocation2 + $0x10] sm:$0xf0] %v4291_v0  ;;  %414 = vst [vmem:[#allocation2 + $0x18] sm:$0xf] %v4292_v2 }
  0x2d   : > { %415 = vst [vmem:[#allocation2 + $0x20] sm:$0xf0] %v4293_v3  ;;  %416 = vst [vmem:[#allocation2 + $0x28] sm:$0xf] %v4294_v4 }
  0x2e   : > { %417 = vst [vmem:[#allocation2 + $0x30] sm:$0xf0] %v4295_v5  ;;  %418 = vst [vmem:[#allocation2 + $0x38] sm:$0xf] %v4296_v6 }
  0x2f   : > { %419 = vst [vmem:[#allocation2 + $0x40] sm:$0xf0] %v4297_v7  ;;  %420 = vst [vmem:[#allocation2 + $0x48] sm:$0xf] %v4298_v8 }
  0x30   : > { %421 = vst [vmem:[#allocation2 + $0x50] sm:$0xf0] %v4299_v9  ;;  %422 = vst [vmem:[#allocation2 + $0x58] sm:$0xf] %v4300_v10 }
  0x31   : > { %423 = vst [vmem:[#allocation2 + $0x60] sm:$0xf0] %v4301_v11  ;;  %424 = vst [vmem:[#allocation2 + $0x68] sm:$0xf] %v4302_v12 }
  0x32   : > { %425 = vst [vmem:[#allocation2 + $0x70] sm:$0xf0] %v4303_v13  ;;  %426 = vst [vmem:[#allocation2 + $0x78] sm:$0xf] %v4304_v14 }
  0x33   : > { %427 = vst [vmem:[#allocation2 + $0x80] sm:$0xf0] %v4305_v15  ;;  %428 = vst [vmem:[#allocation2 + $0x88] sm:$0xf] %v4306_v16 }
  0x34   : > { %429 = vst [vmem:[#allocation2 + $0x90] sm:$0xf0] %v4307_v17  ;;  %430 = vst [vmem:[#allocation2 + $0x98] sm:$0xf] %v4308_v18 }
  0x35   : > { %431 = vst [vmem:[#allocation2 + $0xa0] sm:$0xf0] %v4309_v19  ;;  %432 = vst [vmem:[#allocation2 + $0xa8] sm:$0xf] %v4310_v20 }
  0x36   : > { %433 = vst [vmem:[#allocation2 + $0xb0] sm:$0xf0] %v4311_v21  ;;  %434 = vst [vmem:[#allocation2 + $0xb8] sm:$0xf] %v4312_v22 }
  0x37   : > { %435 = vst [vmem:[#allocation2 + $0xc0] sm:$0xf0] %v4313_v23  ;;  %436 = vst [vmem:[#allocation2 + $0xc8] sm:$0xf] %v4314_v24 }
  0x38   : > { %437 = vst [vmem:[#allocation2 + $0xd0] sm:$0xf0] %v4315_v25  ;;  %438 = vst [vmem:[#allocation2 + $0xd8] sm:$0xf] %v4316_v26 }
  0x39   : > { %439 = vst [vmem:[#allocation2 + $0xe0] sm:$0xf0] %v4317_v27  ;;  %440 = vst [vmem:[#allocation2 + $0xe8] sm:$0xf] %v4318_v28 }
  0x3a   : > { %441 = vst [vmem:[#allocation2 + $0xf0] sm:$0xf0] %v4319_v29  ;;  %442 = vst [vmem:[#allocation2 + $0xf8] sm:$0xf] %v4320_v30 }
  0x3b   : > { %443 = vst [vmem:[#allocation2 + $0x100] sm:$0xf0] %v4321_v31  ;;  %444 = vst [vmem:[#allocation2 + $0x108] sm:$0xf] %v4322_v32 }
  0x3c PF: > { %v4323_v33 = vld [vmem:[%s5427_s1 + $0x40] sm:$0xff]   ;;  %v4325_v35 = vld [vmem:[%s5427_s1 + $0x48] sm:$0xff]   ;;  %v4327_v37 = vld [vmem:[%s5427_s1 + $0x50] sm:$0xff]   ;;  %s3637_s9 = sshll.u32 %s4485_s18, 7  ;;  %vm650_vm0 = vcmask 1043456   ;;  %s3640_s11 = sshll.u32 %s4485_s18, 4 }
  0x3d   : > { %v4324_v34 = vld [vmem:[%s5427_s1 + $0x100] sm:$0xff]   ;;  %3785 = vmatprep.subr.bf16.mxu1 %v4323_v33  ;;  %v4326_v36 = vld [vmem:[%s5427_s1 + $0x108] sm:$0xff]   ;;  %v4328_v38 = vld [vmem:[%s5427_s1 + $0x110] sm:$0xff]   ;;  %s4682_s27 = scalar_lea.vmem [#allocation2], %s3637_s9  ;;  %vm465_vm1 = vsmask.f32 4352 }
  0x3e   : > { %3913 = vmatprep.subr.bf16.mxu0 %v4324_v34  ;;  %3786 = vmatpush3.bf16.msra.mxu1 %v4323_v33  ;;  %v4329_v39 = vld [vmem:[%s5427_s1 + $0x58] sm:$0xff]   ;;  %v4331_v41 = vld [vmem:[%s5427_s1 + $0x60] sm:$0xff]   ;;  %v4333_v43 = vld [vmem:[%s5427_s1 + $0x68] sm:$0xff]   ;;  %vm998_vm2 = vsmask.f32 3328  ;;  %s3631_s12 = sshll.u32 %s4489_s19, 5 }
  0x3f   : > { %3914 = vmatpush3.bf16.msra.mxu0 %v4324_v34  ;;  %3787 = vmatprep.subr.bf16.mxu1 %v4325_v35  ;;  %v4330_v40 = vld [vmem:[%s5427_s1 + $0x118] sm:$0xff]   ;;  %v4332_v42 = vld [vmem:[%s5427_s1 + $0x120] sm:$0xff]   ;;  %v4334_v47 = vld [vmem:[%s5427_s1 + $0x128] sm:$0xff]   ;;  %s3225_s18 = sadd.s32 %s3640_s11, %s3631_s12  ;;  %s3228_s13 = sshll.u32 %s4613_s23, 4  ;;  %s5365_s13 = int_to_ptr.vmem [resolvable:$true] %s3228_s13 }
  0x40   : > { %3915 = vmatprep.subr.bf16.mxu0 %v4326_v36  ;;  %v4335_v55 = vld [vmem:[%s5427_s1 + $0x70] sm:$0xff]   ;;  %v4337_v62 = vld [vmem:[%s5427_s1 + $0x78] sm:$0xff]   ;;  %v4339_v18 = vld [vmem:[%s5427_s1] sm:$0xff]   ;;  %s3632_s19 = sshll.u32 %s3225_s18, 7  ;;  %s5374_s5 = scalar_lea.sflag [#allocation4], %s202_s8 }
  0x41   : > { %v4336_v58 = vld [vmem:[%s5427_s1 + $0x130] sm:$0xff]   ;;  %v4338_v2 = vld [vmem:[%s5427_s1 + $0x138] sm:$0xff]   ;;  %v4340_v23 = vld [vmem:[%s5427_s1 + $0x140] sm:$0xff]   ;;  %s5363_s30 = scalar_lea.hbm %s5430_s4, %s3632_s19  ;;  %s4504_s6 = smov [#allocation3]  }
  0x42   : > { %3788 = vmatpush3.bf16.msra.mxu1 %v4325_v35  ;;  %v4685_v44 = vld [vmem:[%s4682_s27 + $0x8] sm:$0xf]  ;;  %v4688_v45 = vld [vmem:[%s4682_s27] sm:$0xf0]  ;;  %v3417_v46 = vld [vmem:[%s4682_s27 + $0x18] sm:$0xf] }
  0x43   : > { %3916 = vmatpush3.bf16.msra.mxu0 %v4326_v36  ;;  %3789 = vmatprep.subr.bf16.mxu1 %v4327_v37  ;;  %v651_v48 = vrot.slane %v4688_v45, 4  ;;  %v652_v49 = vrot.slane %v4685_v44, 4  ;;  %v4697_v50 = vld [vmem:[%s4682_s27 + $0x10] sm:$0xf0]  ;;  %v1688_v51 = vrot.slane %v3417_v46, 4  ;;  %v4341_v26 = vld [vmem:[%s5427_s1 + $0x8] sm:$0xff]  }
  0x44   : > { %3917 = vmatprep.subr.bf16.mxu0 %v4328_v38  ;;  %v1687_v52 = vrot.slane %v4697_v50, 4  ;;  %v627_v53 = vld [vmem:[%s4682_s27 + $0x10] sm:$0xf0]  ;;  %v452_v57 = vld [vmem:[%s4682_s27 + $0x18] sm:$0xf]  ;;  %v4342_v31 = vld [vmem:[%s5427_s1 + $0x148] sm:$0xff]  }
  0x45   : > { %v653_v54 = vsel %vm650_vm0, %v651_v48, %v652_v49  ;;  %v492_v59 = vshrl.u32 %v452_v57, 16  ;;  %v495_v60 = vshll.u32 %v452_v57, 16  ;;  %v654_v61 = vrot.slane %v627_v53, 4  ;;  %v3419_v1 = vld [vmem:[%s4682_s27 + $0x28] sm:$0xf]  ;;  %v4344_v48 = vld [vmem:[%s5427_s1 + $0x150] sm:$0xff]  }
  0x46   : > { %3790 = vmatpush3.bf16.msra.mxu1 %v4327_v37  ;;  %v1689_v56 = vsel %vm650_vm0, %v1687_v52, %v1688_v51  ;;  %3801 = vmatprep.mubr.bf16.mxu1 %v653_v54  ;;  %v1017_v63 = vshrl.u32 %v627_v53, 16  ;;  %v1020_v0 = vshll.u32 %v627_v53, 16  ;;  %v655_v3 = vrot.slane %v452_v57, 4  ;;  %v3457_v5 = vld [vmem:[%s4682_s27 + $0x20] sm:$0xf0]  ;;  %s4411_s9 = sshll.u32 %s4504_s6, 4  ;;  %s4412_s9 = int_to_ptr.vmem [resolvable:$false] %s4411_s9 }
  0x47   : > { %3918 = vmatpush3.bf16.msra.mxu0 %v4328_v38  ;;  %3791 = vmatprep.subr.bf16.mxu1 %v4329_v39  ;;  %v1367_v4 = vshrl.u32 %v3419_v1, 16  ;;  %v1370_v6 = vshll.u32 %v3419_v1, 16  ;;  %v1923_v7 = vshrl.u32 %v3457_v5, 16  ;;  %v4718_v8 = vrot.slane %v492_v59, 3  ;;  %v4727_v12 = vld [vmem:[%s4682_s27 + $0x28] sm:$0xf]  ;;  %p4414_p4 = scmp.lt.s32.totalorder %s5365_s13, %s4412_s9 }
  0x48   : > { %3919 = vmatprep.subr.bf16.mxu0 %v4330_v40  ;;  %3929 = vmatprep.mubr.bf16.mxu0 %v1689_v56  ;;  %v4720_v9 = vrot.slane %v495_v60, 4  ;;  %v4722_v10 = vrot.slane %v1017_v63, 4  ;;  %v4724_v11 = vrot.slane %v1020_v0, 5  ;;  %v4730_v13 = vld [vmem:[%s4682_s27 + $0x20] sm:$0xf0]  ;;  %v1690_v14 = vrot.slane %v3457_v5, 4 }
  0x49   : > { %v1691_v15 = vrot.slane %v3419_v1, 4  ;;  %v3421_v16 = vld [vmem:[%s4682_s27 + $0x38] sm:$0xf]  ;;  %v4734_v17 = vld [vmem:[%s4682_s27 + $0x30] sm:$0xf0]  ;;  %v4739_v19 = vrot.slane %v1367_v4, 3  ;;  %v656_v30 = vsel %vm650_vm0, %v654_v61, %v655_v3 }
  0x4a   : > { %3792 = vmatpush3.bf16.msra.mxu1 %v4329_v39  ;;  %v4741_v20 = vrot.slane %v1370_v6, 4  ;;  %v4743_v21 = vrot.slane %v1923_v7, 4  ;;  %v1926_v22 = vshll.u32 %v3457_v5, 16  ;;  %v657_v24 = vrot.slane %v4730_v13, 4  ;;  %v4755_v29 = vld [vmem:[%s4682_s27 + $0x38] sm:$0xf] }
  0x4b   : > { %3920 = vmatpush3.bf16.msra.mxu0 %v4330_v40  ;;  %3793 = vmatprep.subr.bf16.mxu1 %v4331_v41  ;;  %v658_v25 = vrot.slane %v4727_v12, 4  ;;  %v1693_v27 = vrot.slane %v4734_v17, 4  ;;  %v1694_v28 = vrot.slane %v3421_v16, 4  ;;  %v4762_v32 = vld [vmem:[%s4682_s27 + $0x30] sm:$0xf0]  ;;  %v1692_v33 = vsel %vm650_vm0, %v1690_v14, %v1691_v15  ;;  %v4345_v59 = vld [vmem:[%s5427_s1 + $0x18] sm:$0xff]  }
  0x4c   : > { %3921 = vmatprep.subr.bf16.mxu0 %v4332_v42  ;;  %v4766_v34 = vld [vmem:[%s4682_s27 + $0x40] sm:$0xf0]  ;;  %v3423_v35 = vld [vmem:[%s4682_s27 + $0x48] sm:$0xf]  ;;  %v4772_v37 = vrot.slane %v1926_v22, 5  ;;  %v660_v39 = vrot.slane %v4762_v32, 4 }
  0x4d   : > { %v4770_v36 = vld [vmem:[%s4682_s27 + $0x48] sm:$0xf]  ;;  %v659_v38 = vsel %vm650_vm0, %v657_v24, %v658_v25  ;;  %v4343_v40 = vld [vmem:[%s5427_s1 + $0x10] sm:$0xff]   ;;  %v661_v46 = vrot.slane %v4755_v29, 4  ;;  %v4791_v51 = vld [vmem:[%s4682_s27 + $0x58] sm:$0xf] }
  0x4e   : > { %3794 = vmatpush3.bf16.msra.mxu1 %v4331_v41  ;;  %v630_v41 = vld [vmem:[%s4682_s27 + $0x40] sm:$0xf0]  ;;  %v4788_v49 = vld [vmem:[%s4682_s27 + $0x50] sm:$0xf0]  ;;  %v1697_v52 = vrot.slane %v3423_v35, 4  ;;  %v664_v53 = vrot.slane %v4770_v36, 4 }
  0x4f   : > { %3922 = vmatpush3.bf16.msra.mxu0 %v4332_v42  ;;  %3795 = vmatprep.subr.bf16.mxu1 %v4333_v43  ;;  %v3425_v42 = vld [vmem:[%s4682_s27 + $0x58] sm:$0xf]  ;;  %v475_v54 = vshrl.u32 %v4685_v44, 16  ;;  %v663_v56 = vrot.slane %v630_v41, 4  ;;  %v1699_v60 = vrot.slane %v4788_v49, 4  ;;  %v667_v61 = vrot.slane %v4791_v51, 4 }
  0x50   : > { %3923 = vmatprep.subr.bf16.mxu0 %v4334_v47  ;;  %v1700_v57 = vrot.slane %v3425_v42, 4  ;;  %v4346_v63 = vld [vmem:[%s5427_s1 + $0x158] sm:$0xff]   ;;  %v4808_v0 = vld [vmem:[%s4682_s27 + $0x60] sm:$0xf0]  ;;  %v4822_v16 = vld [vmem:[%s4682_s27 + $0x70] sm:$0xf0] }
  0x51   : > { %v632_v3 = vld [vmem:[%s4682_s27 + $0x60] sm:$0xf0]  ;;  %v3429_v4 = vld [vmem:[%s4682_s27 + $0x78] sm:$0xf]  ;;  %v665_v5 = vsel %vm650_vm0, %v663_v56, %v664_v53  ;;  %v1702_v14 = vrot.slane %v4808_v0, 4  ;;  %v4350_v41 = vld [vmem:[%s5427_s1 + $0x168] sm:$0xff]   ;;  %v1373_v56 = vor.u32 %v4741_v20, %v4739_v19 }
  0x52   : > { %3796 = vmatpush3.bf16.msra.mxu1 %v4333_v43  ;;  %v1695_v43 = vsel %vm650_vm0, %v1693_v27, %v1694_v28  ;;  %v4347_v7 = vld [vmem:[%s5427_s1 + $0x20] sm:$0xff]   ;;  %v4830_v25 = vld [vmem:[%s4682_s27 + $0x78] sm:$0xf]  ;;  %v1705_v27 = vrot.slane %v4822_v16, 4  ;;  %v1706_v28 = vrot.slane %v3429_v4, 4  ;;  %s4413_s10 = scalar_lea.vmem %s4412_s9, 4096 }
  0x53   : > { %3924 = vmatpush3.bf16.msra.mxu0 %v4334_v47  ;;  %3797 = vmatprep.subr.bf16.mxu1 %v4335_v55  ;;  %v1696_v47 = vrot.slane %v4766_v34, 4  ;;  %v4348_v22 = vld [vmem:[%s5427_s1 + $0x160] sm:$0xff]  }
  0x54   : > { %3925 = vmatprep.subr.bf16.mxu0 %v4336_v58 }
  0x55   : > { %v1698_v1 = vsel %vm650_vm0, %v1696_v47, %v1697_v52  ;;  %v477_v52 = vrot.slane %v475_v54, 3  ;;  %v1906_v54 = vshrl.u32 %v4697_v50, 16 }
  0x56   : > { %3798 = vmatpush3.bf16.msra.mxu1 %v4335_v55  ;;  %v478_v55 = vshll.u32 %v4685_v44, 16  ;;  %v662_v44 = vsel %vm650_vm0, %v660_v39, %v661_v46  ;;  %v498_v39 = vor.u32 %v4720_v9, %v4718_v8  ;;  %v1023_v46 = vor.u32 %v4724_v11, %v4722_v10 }
  0x57   : > { %3926 = vmatpush3.bf16.msra.mxu0 %v4336_v58  ;;  %3799 = vmatprep.subr.bf16.mxu1 %v4337_v62  ;;  %v631_v58 = vld [vmem:[%s4682_s27 + $0x50] sm:$0xf0]  ;;  %v1940_v8 = vshrl.u32 %v4734_v17, 16  ;;  %v1943_v9 = vshll.u32 %v4734_v17, 16  ;;  %v4357_v17 = vld [vmem:[%s5427_s1 + $0x88] sm:$0xff]  }
  0x58   : > { %3927 = vmatprep.subr.bf16.mxu0 %v4338_v2  ;;  %v666_v6 = vrot.slane %v631_v58, 4  ;;  %v480_v53 = vrot.slane %v478_v55, 4  ;;  %v1909_v55 = vshll.u32 %v4697_v50, 16  ;;  %v4352_v50 = vld [vmem:[%s5427_s1 + $0x170] sm:$0xff]  }
  0x5a   : > { %3800 = vmatpush3.bf16.msra.mxu1 %v4337_v62  ;;  %v3427_v62 = vld [vmem:[%s4682_s27 + $0x68] sm:$0xf] }
  0x5b   : > { %3928 = vmatpush3.bf16.msra.mxu0 %v4338_v2  ;;  %3817 = vmatprep.subr.bf16.mxu1 %v4339_v18  ;;  %v4812_v2 = vld [vmem:[%s4682_s27 + $0x68] sm:$0xf]  ;;  %v1703_v15 = vrot.slane %v3427_v62, 4  ;;  %v3488_v62 = vld [vmem:[%s4682_s27 + $0x18] sm:$0x1f] }
  0x5c   : > { %3945 = vmatprep.subr.bf16.mxu0 %v4340_v23  ;;  %v670_v24 = vrot.slane %v4812_v2, 4  ;;  %v1917_v4 = vshll.u32 %v3488_v62, 16 }
  0x5d   : > { %3802 = vmatmul.mubr.bf16.vlgmr.msra.gmra.mrb[0].mxu1 %v656_v30  ;;  %v4837_v30 = vld [vmem:[%s4682_s27 + $0x88] sm:$0xf]  ;;  %v1704_v47 = vsel %vm650_vm0, %v1702_v14, %v1703_v15 }
  0x5e   : > { %3930 = vmatmul.mubr.bf16.vlgmr.msra.gmra.mrb[0].mxu0 %v1692_v33  ;;  %3818 = vmatpush3.bf16.msra.mxu1 %v4339_v18  ;;  %v1701_v18 = vsel %vm650_vm0, %v1699_v60, %v1700_v57  ;;  %v4349_v33 = vld [vmem:[%s5427_s1 + $0x28] sm:$0xff]   ;;  %v1707_v60 = vsel %vm650_vm0, %v1705_v27, %v1706_v28 }
  0x5f   : > { %3946 = vmatpush3.bf16.msra.mxu0 %v4340_v23  ;;  %3819 = vmatprep.subr.bf16.mxu1 %v4341_v26  ;;  %v669_v23 = vrot.slane %v632_v3, 4  ;;  %v1914_v3 = vshrl.u32 %v3488_v62, 16 }
  0x60   : > { %3947 = vmatprep.subr.bf16.mxu0 %v4342_v31  ;;  %3805 = vmatprep.mubr.bf16.mxu1 %v659_v38  ;;  %v673_v38 = vrot.slane %v4830_v25, 4 }
  0x61   : > { %3933 = vmatprep.mubr.bf16.mxu0 %v1695_v43  ;;  %v1709_v43 = vrot.slane %v4837_v30, 4 }
  0x62   : > { %3820 = vmatpush3.bf16.msra.mxu1 %v4341_v26  ;;  %v4833_v26 = vld [vmem:[%s4682_s27 + $0x70] sm:$0xf0] }
  0x63   : > { %3948 = vmatpush3.bf16.msra.mxu0 %v4342_v31  ;;  %3821 = vmatprep.subr.bf16.mxu1 %v4343_v40  ;;  %v4840_v31 = vld [vmem:[%s4682_s27 + $0x80] sm:$0xf0]  ;;  %v672_v35 = vrot.slane %v4833_v26, 4  ;;  %v3489_v26 = vld [vmem:[%s4682_s27 + $0x28] sm:$0x1f] }
  0x64   : > { %3949 = vmatprep.subr.bf16.mxu0 %v4344_v48  ;;  %v1708_v42 = vrot.slane %v4840_v31, 4 }
  0x65   : > { %3806 = vmatmul.mubr.bf16.gmra.mrb[4].mxu1 %v662_v44  ;;  %v451_v44 = vld [vmem:[%s4682_s27 + $0x10] sm:$0xf8] }
  0x66   : > { %3934 = vmatmul.mubr.bf16.gmra.mrb[4].mxu0 %v1698_v1  ;;  %3822 = vmatpush3.bf16.msra.mxu1 %v4343_v40  ;;  %v668_v40 = vsel %vm650_vm0, %v666_v6, %v667_v61  ;;  %v4351_v61 = vld [vmem:[%s5427_s1 + $0x30] sm:$0xff]   ;;  %v1911_v6 = vrot.slane %v1909_v55, 5  ;;  %v484_v14 = vshrl.u32 %v451_v44, 16  ;;  %v487_v15 = vshll.u32 %v451_v44, 16  ;;  %v3490_v44 = vld [vmem:[%s4682_s27 + $0x38] sm:$0x1f] }
  0x67   : > { %3950 = vmatpush3.bf16.msra.mxu0 %v4344_v48  ;;  %3823 = vmatprep.subr.bf16.mxu1 %v4345_v59  ;;  %v449_v48 = vld [vmem:[%s4682_s27] sm:$0xf8] }
  0x68   : > { %3951 = vmatprep.subr.bf16.mxu0 %v4346_v63  ;;  %3809 = vmatprep.mubr.bf16.mxu1 %v665_v5  ;;  %v467_v57 = vshrl.u32 %v449_v48, 16  ;;  %v470_v58 = vshll.u32 %v449_v48, 16  ;;  %v1908_v5 = vrot.slane %v1906_v54, 4  ;;  %v486_v28 = vrot.slane %v484_v14, 3  ;;  %v4354_v48 = vld [vmem:[%s5427_s1 + $0x178] sm:$0xff]  }
  0x69   : > { %3937 = vmatprep.mubr.bf16.mxu0 %v1701_v18  ;;  %v489_v30 = vrot.slane %v487_v15, 4  ;;  %v453_v54 = vld [vmem:[%s4682_s27 + $0x20] sm:$0xf8]  ;;  %v1942_v15 = vrot.slane %v1940_v8, 4 }
  0x6a   : > { %3824 = vmatpush3.bf16.msra.mxu1 %v4345_v59  ;;  %v671_v59 = vsel %vm650_vm0, %v669_v23, %v670_v24  ;;  %v472_v1 = vrot.slane %v470_v58, 4  ;;  %v481_v23 = vor.u32 %v480_v53, %v477_v52  ;;  %v1919_v24 = vrot.slane %v1917_v4, 5 }
  0x6b   : > { %3952 = vmatpush3.bf16.msra.mxu0 %v4346_v63  ;;  %3825 = vmatprep.subr.bf16.mxu1 %v4347_v7  ;;  %v469_v63 = vrot.slane %v467_v57, 3  ;;  %v1912_v27 = vor.u32 %v1911_v6, %v1908_v5  ;;  %v1929_v53 = vor.u32 %v4772_v37, %v4743_v21  ;;  %v1934_v57 = vshll.u32 %v3489_v26, 16 }
  0x6c   : > { %3953 = vmatprep.subr.bf16.mxu0 %v4348_v22  ;;  %v1710_v58 = vsel %vm650_vm0, %v1708_v42, %v1709_v43  ;;  %v512_v21 = vshll.u32 %v4727_v12, 16  ;;  %v501_v42 = vshrl.u32 %v453_v54, 16  ;;  %v504_v43 = vshll.u32 %v453_v54, 16 }
  0x6d   : > { %3810 = vmatmul.mubr.bf16.gmra.mrb[8].mxu1 %v668_v40  ;;  %v473_v18 = vor.u32 %v472_v1, %v469_v63  ;;  %v1931_v40 = vshrl.u32 %v3489_v26, 16  ;;  %v1936_v62 = vrot.slane %v1934_v57, 5  ;;  %v1948_v5 = vshrl.u32 %v3490_v44, 16 }
  0x6e   : > { %3938 = vmatmul.mubr.bf16.gmra.mrb[8].mxu0 %v1704_v47  ;;  %3826 = vmatpush3.bf16.msra.mxu1 %v4347_v7  ;;  %v1916_v7 = vrot.slane %v1914_v3, 4  ;;  %v674_v47 = vsel %vm650_vm0, %v672_v35, %v673_v38  ;;  %v514_v1 = vrot.slane %v512_v21, 4  ;;  %v503_v3 = vrot.slane %v501_v42, 3 }
  0x6f   : > { %3954 = vmatpush3.bf16.msra.mxu0 %v4348_v22  ;;  %3827 = vmatprep.subr.bf16.mxu1 %v4349_v33  ;;  %v4353_v22 = vld [vmem:[%s5427_s1 + $0x38] sm:$0xff]   ;;  %v482_v35 = vsel %vm465_vm1, %v473_v18, %v481_v23  ;;  %v506_v4 = vrot.slane %v504_v43, 4  ;;  %v1951_v6 = vshll.u32 %v3490_v44, 16  ;;  %v1945_v18 = vrot.slane %v1943_v9, 5  ;;  %v3491_v23 = vld [vmem:[%s4682_s27 + $0x48] sm:$0x1f] }
  0x70   : > { %3955 = vmatprep.subr.bf16.mxu0 %v4350_v41  ;;  %3813 = vmatprep.mubr.bf16.mxu1 %v671_v59  ;;  %v1920_v52 = vor.u32 %v1919_v24, %v1916_v7  ;;  %v490_v59 = vor.u32 %v489_v30, %v486_v28  ;;  %v543_v43 = vshrl.u32 %v4770_v36, 16  ;;  %v459_v9 = vld [vmem:[%s4682_s27 + $0x50] sm:$0xf8] }
  0x71   : > { %3941 = vmatprep.mubr.bf16.mxu0 %v1707_v60  ;;  %v1933_v60 = vrot.slane %v1931_v40, 4  ;;  %v507_v7 = vor.u32 %v506_v4, %v503_v3  ;;  %v1953_v24 = vrot.slane %v1951_v6, 5  ;;  %v1946_v28 = vor.u32 %v1945_v18, %v1942_v15 }
  0x72   : > { %3828 = vmatpush3.bf16.msra.mxu1 %v4349_v33  ;;  %v509_v33 = vshrl.u32 %v4727_v12, 16  ;;  %v1921_v38 = vsel %vm998_vm2, %v1912_v27, %v1920_v52  ;;  %v499_v37 = vsel %vm465_vm1, %v490_v59, %v498_v39  ;;  %v4356_v12 = vld [vmem:[%s5427_s1 + $0x180] sm:$0xff]   ;;  %v455_v39 = vld [vmem:[%s4682_s27 + $0x30] sm:$0xf8]  ;;  %v4358_v27 = vld [vmem:[%s5427_s1 + $0x188] sm:$0xff]   ;;  %v526_v40 = vshrl.u32 %v4755_v29, 16 }
  0x73   : > { %3956 = vmatpush3.bf16.msra.mxu0 %v4350_v41  ;;  %3829 = vmatprep.subr.bf16.mxu1 %v4351_v61  ;;  %v4355_v41 = vld [vmem:[%s5427_s1 + $0x80] sm:$0xff]   ;;  %v1937_v63 = vor.u32 %v1936_v62, %v1933_v60  ;;  %v518_v26 = vshrl.u32 %v455_v39, 16  ;;  %v521_v30 = vshll.u32 %v455_v39, 16  ;;  %v1968_v62 = vshll.u32 %v3491_v23, 16 }
  0x74   : > { %3957 = vmatprep.subr.bf16.mxu0 %v4352_v50  ;;  %v511_v55 = vrot.slane %v509_v33, 3  ;;  %v528_v59 = vrot.slane %v526_v40, 3  ;;  %v1960_v33 = vshll.u32 %v4766_v34, 16  ;;  %v545_v3 = vrot.slane %v543_v43, 3 }
  0x75   : > { %3814 = vmatmul.mubr.bf16.gmra.mrb[12].mxu1 %v674_v47  ;;  %v529_v47 = vshll.u32 %v4755_v29, 16  ;;  %v520_v57 = vrot.slane %v518_v26, 3  ;;  %v4359_v29 = vld [vmem:[%s5427_s1 + $0x90] sm:$0xff]   ;;  %v546_v4 = vshll.u32 %v4770_v36, 16  ;;  %v1977_v18 = vshll.u32 %v4788_v49, 16 }
  0x76   : > { %3942 = vmatmul.mubr.bf16.gmra.mrb[12].mxu0 %v1710_v58  ;;  %3830 = vmatpush3.bf16.msra.mxu1 %v4351_v61  ;;  %v1938_v61 = vsel %vm998_vm2, %v1929_v53, %v1937_v63  ;;  %v515_v14 = vor.u32 %v514_v1, %v511_v55  ;;  %v1957_v58 = vshrl.u32 %v4766_v34, 16  ;;  %v1962_v42 = vrot.slane %v1960_v33, 5  ;;  %v4360_v34 = vld [vmem:[%s5427_s1 + $0x190] sm:$0xff]   ;;  %v3492_v55 = vld [vmem:[%s4682_s27 + $0x58] sm:$0x1f] }
  0x77   : > { %3958 = vmatpush3.bf16.msra.mxu0 %v4352_v50  ;;  %3831 = vmatprep.subr.bf16.mxu1 %v4353_v22  ;;  %v1950_v50 = vrot.slane %v1948_v5, 4  ;;  %v531_v60 = vrot.slane %v529_v47, 4  ;;  %v1970_v63 = vrot.slane %v1968_v62, 5  ;;  %v548_v15 = vrot.slane %v546_v4, 4  ;;  %v461_v33 = vld [vmem:[%s4682_s27 + $0x60] sm:$0xf8] }
  0x78   : > { %3959 = vmatprep.subr.bf16.mxu0 %v4354_v48  ;;  %3833 = vmatprep.mubr.bf16.mxu1 %v482_v35  ;;  %v516_v52 = vsel %vm465_vm1, %v507_v7, %v515_v14  ;;  %v1974_v14 = vshrl.u32 %v4788_v49, 16  ;;  %v1985_v7 = vshll.u32 %v3492_v55, 16  ;;  %v552_v26 = vshrl.u32 %v459_v9, 16  ;;  %v4363_v62 = vld [vmem:[%s5427_s1 + $0xa0] sm:$0xff]  }
  0x79   : > { %3961 = vmatprep.mubr.bf16.mxu0 %v1921_v38  ;;  %v1954_v53 = vor.u32 %v1953_v24, %v1950_v50  ;;  %v1965_v38 = vshrl.u32 %v3491_v23, 16  ;;  %v532_v21 = vor.u32 %v531_v60, %v528_v59  ;;  %v1982_v23 = vshrl.u32 %v3492_v55, 16 }
  0x7a   : > { %3832 = vmatpush3.bf16.msra.mxu1 %v4353_v22  ;;  %v523_v22 = vrot.slane %v521_v30, 4  ;;  %v1976_v24 = vrot.slane %v1974_v14, 4  ;;  %v4362_v30 = vld [vmem:[%s5427_s1 + $0x198] sm:$0xff]   ;;  %v1979_v40 = vrot.slane %v1977_v18, 5  ;;  %v1987_v49 = vrot.slane %v1985_v7, 5 }
  0x7b   : > { %3960 = vmatpush3.bf16.msra.mxu0 %v4354_v48  ;;  %3849 = vmatprep.subr.bf16.mxu1 %v4355_v41  ;;  %v1955_v35 = vsel %vm998_vm2, %v1946_v28, %v1954_v53  ;;  %v1959_v48 = vrot.slane %v1957_v58, 4  ;;  %v1967_v44 = vrot.slane %v1965_v38, 4  ;;  %v3493_v28 = vld [vmem:[%s4682_s27 + $0x68] sm:$0x1f]  ;;  %v1984_v47 = vrot.slane %v1982_v23, 4 }
  0x7c   : > { %3977 = vmatprep.subr.bf16.mxu0 %v4356_v12  ;;  %v524_v54 = vor.u32 %v523_v22, %v520_v57  ;;  %v560_v53 = vshrl.u32 %v4791_v51, 16  ;;  %v563_v57 = vshll.u32 %v4791_v51, 16  ;;  %v1980_v22 = vor.u32 %v1979_v40, %v1976_v24 }
  0x7d   : > { %3834 = vmatmul.mubr.bf16.vlgmr.msra.gmra.mrb[0].mxu1 %v499_v37  ;;  %v457_v37 = vld [vmem:[%s4682_s27 + $0x40] sm:$0xf8]  ;;  %v1963_v39 = vor.u32 %v1962_v42, %v1959_v48  ;;  %v1971_v5 = vor.u32 %v1970_v63, %v1967_v44  ;;  %v1988_v59 = vor.u32 %v1987_v49, %v1984_v47  ;;  %v1991_v60 = vshrl.u32 %v4808_v0, 16 }
  0x7e   : > { %3962 = vmatmul.mubr.bf16.vlgmr.msra.gmra.mrb[0].mxu0 %v1938_v61  ;;  %3850 = vmatpush3.bf16.msra.mxu1 %v4355_v41  ;;  %v535_v1 = vshrl.u32 %v457_v37, 16  ;;  %v538_v8 = vshll.u32 %v457_v37, 16  ;;  %v533_v41 = vsel %vm465_vm1, %v524_v54, %v532_v21  ;;  %v562_v48 = vrot.slane %v560_v53, 3  ;;  %v3494_v37 = vld [vmem:[%s4682_s27 + $0x78] sm:$0x1f] }
  0x7f   : > { %3978 = vmatpush3.bf16.msra.mxu0 %v4356_v12  ;;  %3851 = vmatprep.subr.bf16.mxu1 %v4357_v17  ;;  %v4361_v12 = vld [vmem:[%s5427_s1 + $0x98] sm:$0xff]   ;;  %v1972_v36 = vsel %vm998_vm2, %v1963_v39, %v1971_v5  ;;  %v565_v38 = vrot.slane %v563_v57, 4  ;;  %v1994_v51 = vshll.u32 %v4808_v0, 16  ;;  %v1993_v54 = vrot.slane %v1991_v60, 4  ;;  %v4365_v0 = vld [vmem:[%s5427_s1 + $0xa8] sm:$0xff]  }
  0x80   : > { %3979 = vmatprep.subr.bf16.mxu0 %v4358_v27  ;;  %3837 = vmatprep.mubr.bf16.mxu1 %v516_v52  ;;  %v537_v6 = vrot.slane %v535_v1, 3  ;;  %v540_v61 = vrot.slane %v538_v8, 4  ;;  %v554_v52 = vrot.slane %v552_v26, 3  ;;  %v1999_v21 = vshrl.u32 %v3493_v28, 16  ;;  %v463_v39 = vld [vmem:[%s4682_s27 + $0x70] sm:$0xf8] }
  0x81   : > { %3965 = vmatprep.mubr.bf16.mxu0 %v1955_v35  ;;  %v2002_v42 = vshll.u32 %v3493_v28, 16  ;;  %v566_v55 = vor.u32 %v565_v38, %v562_v48  ;;  %v1996_v44 = vrot.slane %v1994_v51, 5  ;;  %v569_v63 = vshrl.u32 %v461_v33, 16  ;;  %v3495_v57 = vld [vmem:[%s4682_s27 + $0x88] sm:$0x1f] }
  0x82   : > { %3852 = vmatpush3.bf16.msra.mxu1 %v4357_v17  ;;  %v541_v50 = vor.u32 %v540_v61, %v537_v6  ;;  %v549_v17 = vor.u32 %v548_v15, %v545_v3  ;;  %v2001_v1 = vrot.slane %v1999_v21, 4  ;;  %v580_v6 = vshll.u32 %v4812_v2, 16  ;;  %v990_v48 = vld [vmem:[%s4682_s27 + $0x8] sm:$0x1f] }
  0x83   : > { %3980 = vmatpush3.bf16.msra.mxu0 %v4358_v27  ;;  %3853 = vmatprep.subr.bf16.mxu1 %v4359_v29  ;;  %v555_v27 = vshll.u32 %v459_v9, 16  ;;  %v2004_v8 = vrot.slane %v2002_v42, 5  ;;  %v572_v9 = vshll.u32 %v461_v33, 16  ;;  %v1997_v4 = vor.u32 %v1996_v44, %v1993_v54  ;;  %v4368_v33 = vld [vmem:[%s5427_s1 + $0x1b0] sm:$0xff]  }
  0x84   : > { %3981 = vmatprep.subr.bf16.mxu0 %v4360_v34  ;;  %v550_v58 = vsel %vm465_vm1, %v541_v50, %v549_v17  ;;  %v571_v5 = vrot.slane %v569_v63, 3  ;;  %v2008_v18 = vshrl.u32 %v4822_v16, 16  ;;  %v582_v23 = vrot.slane %v580_v6, 4 }
  0x85   : > { %3838 = vmatmul.mubr.bf16.gmra.mrb[4].mxu1 %v533_v41  ;;  %v557_v35 = vrot.slane %v555_v27, 4  ;;  %v577_v41 = vshrl.u32 %v4812_v2, 16  ;;  %v2005_v61 = vor.u32 %v2004_v8, %v2001_v1  ;;  %v574_v14 = vrot.slane %v572_v9, 4 }
  0x86   : > { %3966 = vmatmul.mubr.bf16.gmra.mrb[4].mxu0 %v1972_v36  ;;  %3854 = vmatpush3.bf16.msra.mxu1 %v4359_v29  ;;  %v1989_v29 = vsel %vm998_vm2, %v1980_v22, %v1988_v59  ;;  %v2011_v7 = vshll.u32 %v4822_v16, 16  ;;  %v2016_v36 = vshrl.u32 %v3494_v37, 16  ;;  %v2019_v50 = vshll.u32 %v3494_v37, 16  ;;  %v4367_v16 = vld [vmem:[%s5427_s1 + $0xb0] sm:$0xff]   ;;  %v4370_v37 = vld [vmem:[%s5427_s1 + $0x1b8] sm:$0xff]  }
  0x87   : > { %3982 = vmatpush3.bf16.msra.mxu0 %v4360_v34  ;;  %3855 = vmatprep.subr.bf16.mxu1 %v4361_v12  ;;  %v4364_v34 = vld [vmem:[%s5427_s1 + $0x1a0] sm:$0xff]   ;;  %v558_v43 = vor.u32 %v557_v35, %v554_v52  ;;  %v579_v15 = vrot.slane %v577_v41, 3  ;;  %v2006_v24 = vsel %vm998_vm2, %v1997_v4, %v2005_v61  ;;  %v575_v2 = vor.u32 %v574_v14, %v571_v5  ;;  %v4369_v35 = vld [vmem:[%s5427_s1 + $0xb8] sm:$0xff]   ;;  %v3524_v61 = vld [vmem:[%s4682_s27 + $0x30] sm:$0xf8] }
  0x88   : > { %3983 = vmatprep.subr.bf16.mxu0 %v4362_v30  ;;  %3841 = vmatprep.mubr.bf16.mxu1 %v550_v58  ;;  %v2010_v26 = vrot.slane %v2008_v18, 4  ;;  %v586_v28 = vshrl.u32 %v463_v39, 16  ;;  %v2013_v17 = vrot.slane %v2011_v7, 5  ;;  %v2018_v40 = vrot.slane %v2016_v36, 4  ;;  %v991_v41 = vld [vmem:[%s4682_s27 + $0x18] sm:$0x1f] }
  0x89   : > { %3969 = vmatprep.mubr.bf16.mxu0 %v1989_v29  ;;  %v567_v3 = vsel %vm465_vm1, %v558_v43, %v566_v55  ;;  %v2021_v47 = vrot.slane %v2019_v50, 5  ;;  %v589_v52 = vshll.u32 %v463_v39, 16  ;;  %v594_v27 = vshrl.u32 %v4830_v25, 16  ;;  %v3522_v29 = vld [vmem:[%s4682_s27 + $0x20] sm:$0xf8] }
  0x8a   : > { %3856 = vmatpush3.bf16.msra.mxu1 %v4361_v12  ;;  %v4366_v12 = vld [vmem:[%s5427_s1 + $0x1a8] sm:$0xff]   ;;  %v588_v49 = vrot.slane %v586_v28, 3  ;;  %v597_v53 = vshll.u32 %v4830_v25, 16  ;;  %v2014_v22 = vor.u32 %v2013_v17, %v2010_v26  ;;  %v2025_v60 = vshrl.u32 %v4840_v31, 16  ;;  %v4996_v39 = vld [vmem:[%s5427_s1 + $0xc0] sm:$0xff]  }
  0x8b   : > { %3984 = vmatpush3.bf16.msra.mxu0 %v4362_v30  ;;  %3857 = vmatprep.subr.bf16.mxu1 %v4363_v62  ;;  %v583_v30 = vor.u32 %v582_v23, %v579_v15  ;;  %v2022_v59 = vor.u32 %v2021_v47, %v2018_v40  ;;  %v591_v25 = vrot.slane %v589_v52, 4  ;;  %v596_v38 = vrot.slane %v594_v27, 3  ;;  %v5001_v18 = vld [vmem:[%s4682_s27 + $0x38] sm:$0xf]  ;;  %v5006_v23 = vld [vmem:[%s5427_s1 + $0x1c0] sm:$0xff]  }
  0x8c   : > { %3985 = vmatprep.subr.bf16.mxu0 %v4364_v34  ;;  %v2028_v51 = vshll.u32 %v4840_v31, 16  ;;  %v2027_v21 = vrot.slane %v2025_v60, 4  ;;  %v2033_v42 = vshrl.u32 %v3495_v57, 16  ;;  %v1000_v31 = vshrl.u32 %v4688_v45, 16  ;;  %v992_v60 = vld [vmem:[%s4682_s27 + $0x28] sm:$0x1f] }
  0x8d   : > { %3842 = vmatmul.mubr.bf16.gmra.mrb[8].mxu1 %v567_v3  ;;  %v584_v58 = vsel %vm465_vm1, %v575_v2, %v583_v30  ;;  %v2023_v54 = vsel %vm998_vm2, %v2014_v22, %v2022_v59  ;;  %v592_v43 = vor.u32 %v591_v25, %v588_v49  ;;  %v1003_v8 = vshll.u32 %v4688_v45, 16 }
  0x8e   : > { %3858 = vmatpush3.bf16.msra.mxu1 %v4363_v62  ;;  %3970 = vmatmul.mubr.bf16.gmra.mrb[8].mxu0 %v2006_v24  ;;  %v599_v62 = vrot.slane %v597_v53, 4  ;;  %v2030_v44 = vrot.slane %v2028_v51, 5  ;;  %v2035_v63 = vrot.slane %v2033_v42, 4  ;;  %v1008_v9 = vshrl.u32 %v990_v48, 16 }
  0x8f   : > { %3859 = vmatprep.subr.bf16.mxu1 %v4365_v0  ;;  %3986 = vmatpush3.bf16.msra.mxu0 %v4364_v34  ;;  %v2036_v34 = vshll.u32 %v3495_v57, 16  ;;  %v1002_v5 = vrot.slane %v1000_v31, 4  ;;  %v1011_v6 = vshll.u32 %v990_v48, 16  ;;  %v1005_v14 = vrot.slane %v1003_v8, 5 }
  0x90   : > { %3987 = vmatprep.subr.bf16.mxu0 %v4366_v12  ;;  %3845 = vmatprep.mubr.bf16.mxu1 %v584_v58  ;;  %v600_v55 = vor.u32 %v599_v62, %v596_v38  ;;  %v2031_v4 = vor.u32 %v2030_v44, %v2027_v21  ;;  %v1010_v45 = vrot.slane %v1008_v9, 4  ;;  %v2248_v15 = vshrl.u32 %v3522_v29, 16  ;;  %v993_v44 = vld [vmem:[%s4682_s27 + $0x38] sm:$0x1f] }
  0x91   : > { %3973 = vmatprep.mubr.bf16.mxu0 %v2023_v54  ;;  %v2038_v1 = vrot.slane %v2036_v34, 5  ;;  %v1013_v7 = vrot.slane %v1011_v6, 5  ;;  %v2251_v36 = vshll.u32 %v3522_v29, 16  ;;  %v1006_v26 = vor.u32 %v1005_v14, %v1002_v5  ;;  %v4373_v29 = vld [vmem:[%s5427_s1 + $0xc8] sm:$0xff]  }
  0x92   : > { %3860 = vmatpush3.bf16.msra.mxu1 %v4365_v0  ;;  %v4989_v0 = vld [vmem:[%s4682_s27 + $0x28] sm:$0xf]  ;;  %v601_v3 = vsel %vm465_vm1, %v592_v43, %v600_v55  ;;  %v2250_v28 = vrot.slane %v2248_v15, 3  ;;  %v1025_v30 = vshrl.u32 %v991_v41, 16  ;;  %v1028_v52 = vshll.u32 %v991_v41, 16 }
  0x93   : > { %3861 = vmatprep.subr.bf16.mxu1 %v4367_v16  ;;  %3988 = vmatpush3.bf16.msra.mxu0 %v4366_v12  ;;  %v2039_v12 = vor.u32 %v2038_v1, %v2035_v63  ;;  %v2256_v50 = vshrl.u32 %v4989_v0, 16  ;;  %v2259_v24 = vshll.u32 %v4989_v0, 16  ;;  %v1014_v17 = vor.u32 %v1013_v7, %v1010_v45  ;;  %v5025_v55 = vld [vmem:[%s4682_s27 + $0x48] sm:$0xf]  ;;  %v5038_v45 = vld [vmem:[%s4682_s27 + $0x58] sm:$0xf] }
  0x94   : > { %3989 = vmatprep.subr.bf16.mxu0 %v4368_v33  ;;  %v2253_v40 = vrot.slane %v2251_v36, 4  ;;  %v1027_v49 = vrot.slane %v1025_v30, 4  ;;  %v2265_v27 = vshrl.u32 %v3524_v61, 16  ;;  %v2268_v53 = vshll.u32 %v3524_v61, 16  ;;  %v4374_v5 = vld [vmem:[%s5427_s1 + $0x1c8] sm:$0xff]  }
  0x95   : > { %3846 = vmatmul.mubr.bf16.gmra.mrb[12].mxu1 %v601_v3  ;;  %v2040_v2 = vsel %vm998_vm2, %v2031_v4, %v2039_v12  ;;  %v2258_v47 = vrot.slane %v2256_v50, 3  ;;  %v1015_v57 = vsel %vm998_vm2, %v1006_v26, %v1014_v17  ;;  %v2273_v59 = vshrl.u32 %v5001_v18, 16  ;;  %v3528_v4 = vld [vmem:[%s4682_s27 + $0x50] sm:$0xf8] }
  0x96   : > { %3862 = vmatpush3.bf16.msra.mxu1 %v4367_v16  ;;  %3974 = vmatmul.mubr.bf16.gmra.mrb[12].mxu0 %v2040_v2  ;;  %v2261_v16 = vrot.slane %v2259_v24, 4  ;;  %v2254_v58 = vor.u32 %v2253_v40, %v2250_v28  ;;  %v2267_v48 = vrot.slane %v2265_v27, 3  ;;  %v2270_v25 = vrot.slane %v2268_v53, 4  ;;  %v4395_v50 = vld [vmem:[%s4682_s27 + $0x30] sm:$0xf0] }
  0x97   : > { %3863 = vmatprep.subr.bf16.mxu1 %v4369_v35  ;;  %3990 = vmatpush3.bf16.msra.mxu0 %v4368_v33  ;;  %v3526_v33 = vld [vmem:[%s4682_s27 + $0x40] sm:$0xf8]  ;;  %v2276_v38 = vshll.u32 %v5001_v18, 16  ;;  %v2275_v51 = vrot.slane %v2273_v59, 3  ;;  %v1034_v54 = vshrl.u32 %v4730_v13, 16  ;;  %v1037_v21 = vshll.u32 %v4730_v13, 16 }
  0x98   : > { %3991 = vmatprep.subr.bf16.mxu0 %v4370_v37  ;;  %v2262_v22 = vor.u32 %v2261_v16, %v2258_v47  ;;  %3865 = vmatprep.mubr.bf16.mxu1 %v1015_v57  ;;  %v2271_v34 = vor.u32 %v2270_v25, %v2267_v48  ;;  %v1042_v43 = vshrl.u32 %v992_v60, 16  ;;  %v1045_v1 = vshll.u32 %v992_v60, 16  ;;  %v4375_v26 = vld [vmem:[%s5427_s1 + $0xd0] sm:$0xff]   ;;  %v4377_v57 = vld [vmem:[%s5427_s1 + $0xd8] sm:$0xff]   ;;  %v3530_v25 = vld [vmem:[%s4682_s27 + $0x60] sm:$0xf8] }
  0x99   : > { %v1036_v31 = vrot.slane %v1034_v54, 4  ;;  %v1039_v63 = vrot.slane %v1037_v21, 5  ;;  %v2282_v8 = vshrl.u32 %v3526_v33, 16  ;;  %v2285_v3 = vshll.u32 %v3526_v33, 16  ;;  %v4378_v33 = vld [vmem:[%s5427_s1 + $0x1d8] sm:$0xff]  }
  0x9a   : > { %3864 = vmatpush3.bf16.msra.mxu1 %v4369_v35  ;;  %v1030_v35 = vrot.slane %v1028_v52, 5  ;;  %v2263_v62 = vsel %vm465_vm1, %v2254_v58, %v2262_v22  ;;  %v1044_v41 = vrot.slane %v1042_v43, 4  ;;  %v1047_v61 = vrot.slane %v1045_v1, 5  ;;  %v994_v58 = vld [vmem:[%s4682_s27 + $0x48] sm:$0x1f]  ;;  %v4379_v43 = vld [vmem:[%s5427_s1 + $0xe0] sm:$0xff]  }
  0x9b   : > { %3881 = vmatprep.subr.bf16.mxu1 %v4996_v39  ;;  %3992 = vmatpush3.bf16.msra.mxu0 %v4370_v37  ;;  %v2278_v37 = vrot.slane %v2276_v38, 4  ;;  %v1040_v6 = vor.u32 %v1039_v63, %v1036_v31  ;;  %v2284_v12 = vrot.slane %v2282_v8, 3  ;;  %v2290_v14 = vshrl.u32 %v5025_v55, 16  ;;  %v995_v8 = vld [vmem:[%s4682_s27 + $0x58] sm:$0x1f] }
  0x9c   : > { %4009 = vmatprep.subr.bf16.mxu0 %v5006_v23  ;;  %3993 = vmatprep.mubr.bf16.mxu0 %v2263_v62  ;;  %v1031_v42 = vor.u32 %v1030_v35, %v1027_v49  ;;  %v2287_v11 = vrot.slane %v2285_v3, 4  ;;  %v1051_v15 = vshrl.u32 %v4762_v32, 16  ;;  %v1048_v7 = vor.u32 %v1047_v61, %v1044_v41  ;;  %v4376_v49 = vld [vmem:[%s5427_s1 + $0x1d0] sm:$0xff]   ;;  %v4396_v35 = vld [vmem:[%s4682_s27 + $0x40] sm:$0xf0] }
  0x9d   : > { %v2279_v13 = vor.u32 %v2278_v37, %v2275_v51  ;;  %v2292_v36 = vrot.slane %v2290_v14, 3  ;;  %v1054_v24 = vshll.u32 %v4395_v50, 16  ;;  %v1059_v2 = vshrl.u32 %v993_v44, 16  ;;  %v5066_v37 = vld [vmem:[%s4682_s27 + $0x68] sm:$0xf] }
  0x9e   : > { %v1032_v9 = vsel %vm998_vm2, %v1023_v46, %v1031_v42  ;;  %v2293_v46 = vshll.u32 %v5025_v55, 16  ;;  %v2288_v28 = vor.u32 %v2287_v11, %v2284_v12  ;;  %v1053_v30 = vrot.slane %v1051_v15, 4 }
  0x9f   : > { %3866 = vmatmul.mubr.bf16.vlgmr.msra.gmra.mrb[0].mxu1 %v1032_v9  ;;  %v2280_v10 = vsel %vm465_vm1, %v2271_v34, %v2279_v13  ;;  %v1062_v17 = vshll.u32 %v993_v44, 16  ;;  %v1049_v32 = vsel %vm998_vm2, %v1040_v6, %v1048_v7  ;;  %v1056_v40 = vrot.slane %v1054_v24, 5  ;;  %v4397_v7 = vld [vmem:[%s4682_s27 + $0x50] sm:$0xf0] }
  0xa0   : > { %3882 = vmatpush3.bf16.msra.mxu1 %v4996_v39  ;;  %3994 = vmatmul.mubr.bf16.vlgmr.msra.gmra.mrb[0].mxu0 %v2280_v10  ;;  %v2295_v39 = vrot.slane %v2293_v46, 4  ;;  %v1061_v47 = vrot.slane %v1059_v2, 4  ;;  %v2299_v16 = vshrl.u32 %v3528_v4, 16  ;;  %v2302_v27 = vshll.u32 %v3528_v4, 16  ;;  %v3532_v4 = vld [vmem:[%s4682_s27 + $0x70] sm:$0xf8] }
  0xa1   : > { %3883 = vmatprep.subr.bf16.mxu1 %v4373_v29  ;;  %4010 = vmatpush3.bf16.msra.mxu0 %v5006_v23  ;;  %v1064_v52 = vrot.slane %v1062_v17, 5  ;;  %v2307_v53 = vshrl.u32 %v5038_v45, 16  ;;  %v1057_v22 = vor.u32 %v1056_v40, %v1053_v30  ;;  %v2310_v60 = vshll.u32 %v5038_v45, 16  ;;  %v5080_v10 = vld [vmem:[%s4682_s27 + $0x78] sm:$0xf] }
  0xa2   : > { %4011 = vmatprep.subr.bf16.mxu0 %v4374_v5  ;;  %3869 = vmatprep.mubr.bf16.mxu1 %v1049_v32  ;;  %v2296_v23 = vor.u32 %v2295_v39, %v2292_v36  ;;  %v2301_v59 = vrot.slane %v2299_v16, 3  ;;  %v1068_v48 = vshrl.u32 %v4396_v35, 16  ;;  %v2304_v51 = vrot.slane %v2302_v27, 4  ;;  %v4381_v32 = vld [vmem:[%s5427_s1 + $0xe8] sm:$0xff]  }
  0xa3   : > { %v1065_v62 = vor.u32 %v1064_v52, %v1061_v47  ;;  %v2312_v54 = vrot.slane %v2310_v60, 4  ;;  %v1071_v42 = vshll.u32 %v4396_v35, 16  ;;  %v1076_v34 = vshrl.u32 %v994_v58, 16  ;;  %v996_v52 = vld [vmem:[%s4682_s27 + $0x68] sm:$0x1f] }
  0xa4   : > { %3884 = vmatpush3.bf16.msra.mxu1 %v4373_v29  ;;  %v2297_v38 = vsel %vm465_vm1, %v2288_v28, %v2296_v23  ;;  %v2309_v29 = vrot.slane %v2307_v53, 3  ;;  %v1070_v21 = vrot.slane %v1068_v48, 4  ;;  %v2305_v31 = vor.u32 %v2304_v51, %v2301_v59  ;;  %v4382_v23 = vld [vmem:[%s5427_s1 + $0x1e8] sm:$0xff]  }
  0xa5   : > { %3885 = vmatprep.subr.bf16.mxu1 %v4375_v26  ;;  %4012 = vmatpush3.bf16.msra.mxu0 %v4374_v5  ;;  %v1066_v44 = vsel %vm998_vm2, %v1057_v22, %v1065_v62  ;;  %v1079_v63 = vshll.u32 %v994_v58, 16  ;;  %v2316_v1 = vshrl.u32 %v3530_v25, 16  ;;  %v1073_v13 = vrot.slane %v1071_v42, 5  ;;  %v4380_v5 = vld [vmem:[%s5427_s1 + $0x1e0] sm:$0xff]  }
  0xa6   : > { %3997 = vmatprep.mubr.bf16.mxu0 %v2297_v38  ;;  %4013 = vmatprep.subr.bf16.mxu0 %v4376_v49  ;;  %v2313_v9 = vor.u32 %v2312_v54, %v2309_v29  ;;  %v1078_v41 = vrot.slane %v1076_v34, 4  ;;  %v2319_v3 = vshll.u32 %v3530_v25, 16  ;;  %v2324_v12 = vshrl.u32 %v5066_v37, 16  ;;  %v3534_v22 = vld [vmem:[%s4682_s27 + $0x80] sm:$0xf8]  ;;  %v4383_v29 = vld [vmem:[%s5427_s1 + $0xf0] sm:$0xff]  }
  0xa7   : > { %3870 = vmatmul.mubr.bf16.gmra.mrb[4].mxu1 %v1066_v44  ;;  %v1081_v6 = vrot.slane %v1079_v63, 5  ;;  %v2318_v61 = vrot.slane %v2316_v1, 3  ;;  %v2327_v14 = vshll.u32 %v5066_v37, 16  ;;  %v1074_v46 = vor.u32 %v1073_v13, %v1070_v21  ;;  %v4398_v62 = vld [vmem:[%s4682_s27 + $0x60] sm:$0xf0]  ;;  %v4384_v54 = vld [vmem:[%s5427_s1 + $0x1f0] sm:$0xff]  }
  0xa8   : > { %3886 = vmatpush3.bf16.msra.mxu1 %v4375_v26  ;;  %v2314_v11 = vsel %vm465_vm1, %v2305_v31, %v2313_v9  ;;  %v2321_v15 = vrot.slane %v2319_v3, 4  ;;  %v1085_v36 = vshrl.u32 %v4397_v7, 16  ;;  %v2326_v24 = vrot.slane %v2324_v12, 3  ;;  %v5104_v44 = vld [vmem:[%s4682_s27 + $0x88] sm:$0xf] }
  0xa9   : > { %3887 = vmatprep.subr.bf16.mxu1 %v4377_v57  ;;  %4014 = vmatpush3.bf16.msra.mxu0 %v4376_v49  ;;  %v1082_v50 = vor.u32 %v1081_v6, %v1078_v41  ;;  %v2329_v2 = vrot.slane %v2327_v14, 4  ;;  %v1088_v26 = vshll.u32 %v4397_v7, 16  ;;  %v1093_v30 = vshrl.u32 %v995_v8, 16  ;;  %v997_v9 = vld [vmem:[%s4682_s27 + $0x78] sm:$0x1f] }
  0xaa   : > { %4015 = vmatprep.subr.bf16.mxu0 %v4378_v33  ;;  %3998 = vmatmul.mubr.bf16.gmra.mrb[4].mxu0 %v2314_v11  ;;  %v2322_v28 = vor.u32 %v2321_v15, %v2318_v61  ;;  %v1087_v39 = vrot.slane %v1085_v36, 4  ;;  %v1096_v17 = vshll.u32 %v995_v8, 16  ;;  %v2333_v49 = vshrl.u32 %v3532_v4, 16  ;;  %v4385_v6 = vld [vmem:[%s5427_s1 + $0xf8] sm:$0xff]   ;;  %v4399_v36 = vld [vmem:[%s4682_s27 + $0x70] sm:$0xf0] }
  0xab   : > { %v1083_v40 = vsel %vm998_vm2, %v1074_v46, %v1082_v50  ;;  %v2330_v47 = vor.u32 %v2329_v2, %v2326_v24  ;;  %v1090_v16 = vrot.slane %v1088_v26, 5  ;;  %v1095_v27 = vrot.slane %v1093_v30, 4  ;;  %v4386_v24 = vld [vmem:[%s5427_s1 + $0x1f8] sm:$0xff]  }
  0xac   : > { %3888 = vmatpush3.bf16.msra.mxu1 %v4377_v57  ;;  %3873 = vmatprep.mubr.bf16.mxu1 %v1083_v40  ;;  %v1098_v53 = vrot.slane %v1096_v17, 5  ;;  %v2336_v57 = vshll.u32 %v3532_v4, 16  ;;  %v2341_v58 = vshrl.u32 %v5080_v10, 16  ;;  %v2344_v35 = vshll.u32 %v5080_v10, 16  ;;  %v5120_v30 = vld [vmem:[%s4682_s27 + $0x98] sm:$0xf] }
  0xad   : > { %3889 = vmatprep.subr.bf16.mxu1 %v4379_v43  ;;  %4016 = vmatpush3.bf16.msra.mxu0 %v4378_v33  ;;  %v2331_v59 = vsel %vm465_vm1, %v2322_v28, %v2330_v47  ;;  %v1091_v60 = vor.u32 %v1090_v16, %v1087_v39  ;;  %v2335_v33 = vrot.slane %v2333_v49, 3  ;;  %v1102_v51 = vshrl.u32 %v4398_v62, 16  ;;  %v5126_v16 = vld [vmem:[%s5427_s1 + $0x200] sm:$0xff]  }
  0xae   : > { %4017 = vmatprep.subr.bf16.mxu0 %v4380_v5  ;;  %4001 = vmatprep.mubr.bf16.mxu0 %v2331_v59  ;;  %v1099_v48 = vor.u32 %v1098_v53, %v1095_v27  ;;  %v2338_v25 = vrot.slane %v2336_v57, 4  ;;  %v2343_v38 = vrot.slane %v2341_v58, 3  ;;  %v2346_v21 = vrot.slane %v2344_v35, 4  ;;  %v3416_v53 = vld [vmem:[%s4682_s27 + $0x10] sm:$0xf8] }
  0xaf   : > { %v1105_v42 = vshll.u32 %v4398_v62, 16  ;;  %v1110_v34 = vshrl.u32 %v996_v52, 16  ;;  %v1104_v1 = vrot.slane %v1102_v51, 4  ;;  %v2350_v8 = vshrl.u32 %v3534_v22, 16  ;;  %v5130_v57 = vld [vmem:[%s4682_s27 + $0x20] sm:$0xf0] }
  0xb0   : > { %3890 = vmatpush3.bf16.msra.mxu1 %v4379_v43  ;;  %v1113_v43 = vshll.u32 %v996_v52, 16  ;;  %v1100_v31 = vsel %vm998_vm2, %v1091_v60, %v1099_v48  ;;  %v2339_v63 = vor.u32 %v2338_v25, %v2335_v33  ;;  %v2347_v13 = vor.u32 %v2346_v21, %v2343_v38  ;;  %v3418_v38 = vld [vmem:[%s4682_s27 + $0x20] sm:$0xf8] }
  0xb1   : > { %3891 = vmatprep.subr.bf16.mxu1 %v4381_v32  ;;  %4018 = vmatpush3.bf16.msra.mxu0 %v4380_v5  ;;  %v1107_v41 = vrot.slane %v1105_v42, 5  ;;  %v1112_v3 = vrot.slane %v1110_v34, 4  ;;  %v3536_v5 = vld [vmem:[%s4682_s27 + $0x90] sm:$0xf8]  ;;  %v2352_v61 = vrot.slane %v2350_v8, 3  ;;  %v2353_v12 = vshll.u32 %v3534_v22, 16 }
  0xb2   : > { %4019 = vmatprep.subr.bf16.mxu0 %v4382_v23  ;;  %3874 = vmatmul.mubr.bf16.gmra.mrb[8].mxu1 %v1100_v31  ;;  %v1115_v4 = vrot.slane %v1113_v43, 5  ;;  %v2358_v14 = vshrl.u32 %v5104_v44, 16  ;;  %v2361_v11 = vshll.u32 %v5104_v44, 16  ;;  %v2348_v46 = vsel %vm465_vm1, %v2339_v63, %v2347_v13  ;;  %v4400_v34 = vld [vmem:[%s4682_s27 + $0x18] sm:$0xf] }
  0xb3   : > { %v1108_v15 = vor.u32 %v1107_v41, %v1104_v1  ;;  %v1119_v50 = vshrl.u32 %v4399_v36, 16  ;;  %4002 = vmatmul.mubr.bf16.gmra.mrb[8].mxu0 %v2348_v46  ;;  %v2355_v2 = vrot.slane %v2353_v12, 4  ;;  %v1122_v39 = vshll.u32 %v4399_v36, 16  ;;  %v5138_v63 = vld [vmem:[%s4682_s27 + $0x30] sm:$0xf0] }
  0xb4   : > { %3892 = vmatpush3.bf16.msra.mxu1 %v4381_v32  ;;  %v1116_v7 = vor.u32 %v1115_v4, %v1112_v3  ;;  %v2360_v26 = vrot.slane %v2358_v14, 3  ;;  %v2363_v28 = vrot.slane %v2361_v11, 4  ;;  %v1127_v40 = vshrl.u32 %v997_v9, 16  ;;  %v3420_v41 = vld [vmem:[%s4682_s27 + $0x30] sm:$0xf8] }
  0xb5   : > { %4020 = vmatpush3.bf16.msra.mxu0 %v4382_v23  ;;  %3893 = vmatprep.subr.bf16.mxu1 %v4383_v29  ;;  %v1121_v32 = vrot.slane %v1119_v50, 4  ;;  %v1130_v47 = vshll.u32 %v997_v9, 16  ;;  %v2356_v49 = vor.u32 %v2355_v2, %v2352_v61  ;;  %v1124_v52 = vrot.slane %v1122_v39, 5  ;;  %v5146_v61 = vld [vmem:[%s4682_s27 + $0x40] sm:$0xf0] }
  0xb6   : > { %4021 = vmatprep.subr.bf16.mxu0 %v4384_v54  ;;  %v1117_v17 = vsel %vm998_vm2, %v1108_v15, %v1116_v7  ;;  %v2364_v23 = vor.u32 %v2363_v28, %v2360_v26  ;;  %v2367_v27 = vshrl.u32 %v3536_v5, 16  ;;  %v1129_v58 = vrot.slane %v1127_v40, 4  ;;  %v3422_v15 = vld [vmem:[%s4682_s27 + $0x40] sm:$0xf8]  ;;  %v4401_v40 = vld [vmem:[%s4682_s27 + $0x38] sm:$0xf] }
  0xb7   : > { %3877 = vmatprep.mubr.bf16.mxu1 %v1117_v17  ;;  %v1132_v22 = vrot.slane %v1130_v47, 5  ;;  %v2370_v59 = vshll.u32 %v3536_v5, 16  ;;  %v2375_v60 = vshrl.u32 %v5120_v30, 16  ;;  %v1125_v35 = vor.u32 %v1124_v52, %v1121_v32 }
  0xb8   : > { %3894 = vmatpush3.bf16.msra.mxu1 %v4383_v29  ;;  %v2365_v33 = vsel %vm465_vm1, %v2356_v49, %v2364_v23  ;;  %v2369_v48 = vrot.slane %v2367_v27, 3  ;;  %v2378_v25 = vshll.u32 %v5120_v30, 16  ;;  %v1342_v21 = vshrl.u32 %v3416_v53, 16 }
  0xb9   : > { %4022 = vmatpush3.bf16.msra.mxu0 %v4384_v54  ;;  %3895 = vmatprep.subr.bf16.mxu1 %v4385_v6  ;;  %v1133_v62 = vor.u32 %v1132_v22, %v1129_v58  ;;  %v2372_v51 = vrot.slane %v2370_v59, 4  ;;  %v2377_v29 = vrot.slane %v2375_v60, 3  ;;  %v1345_v54 = vshll.u32 %v3416_v53, 16  ;;  %v5164_v53 = vld [vmem:[%s4682_s27 + $0x50] sm:$0xf0] }
  0xba   : > { %4023 = vmatprep.subr.bf16.mxu0 %v4386_v24  ;;  %4005 = vmatprep.mubr.bf16.mxu0 %v2365_v33  ;;  %v2380_v42 = vrot.slane %v2378_v25, 4  ;;  %v1350_v43 = vshrl.u32 %v4400_v34, 16  ;;  %v1353_v31 = vshll.u32 %v4400_v34, 16  ;;  %v1344_v9 = vrot.slane %v1342_v21, 3  ;;  %v3424_v33 = vld [vmem:[%s4682_s27 + $0x50] sm:$0xf8] }
  0xbb   : > { %v1134_v1 = vsel %vm998_vm2, %v1125_v35, %v1133_v62  ;;  %v2373_v8 = vor.u32 %v2372_v51, %v2369_v48  ;;  %v2593_v13 = vrot.slane %v5130_v57, 4  ;;  %v1347_v4 = vrot.slane %v1345_v54, 4 }
  0xbc   : > { %3896 = vmatpush3.bf16.msra.mxu1 %v4385_v6  ;;  %v2381_v3 = vor.u32 %v2380_v42, %v2377_v29  ;;  %v1352_v5 = vrot.slane %v1350_v43, 3  ;;  %v1355_v6 = vrot.slane %v1353_v31, 4  ;;  %v2594_v12 = vrot.slane %v4989_v0, 4 }
  0xbd   : > { %4024 = vmatpush3.bf16.msra.mxu0 %v4386_v24  ;;  %4073 = vmatprep.subr.bf16.mxu1 %v5126_v16  ;;  %v1359_v14 = vshrl.u32 %v3418_v38, 16  ;;  %v1362_v11 = vshll.u32 %v3418_v38, 16  ;;  %v2596_v46 = vrot.slane %v5138_v63, 4  ;;  %v1348_v36 = vor.u32 %v1347_v4, %v1344_v9  ;;  %v4402_v38 = vld [vmem:[%s4682_s27 + $0x48] sm:$0xf] }
  0xbe   : > { %3878 = vmatmul.mubr.bf16.gmra.mrb[12].mxu1 %v1134_v1  ;;  %4041 = vmatprep.subr.bf16.mxu0 %v5126_v16  ;;  %v2382_v7 = vsel %vm465_vm1, %v2373_v8, %v2381_v3  ;;  %v1356_v50 = vor.u32 %v1355_v6, %v1352_v5  ;;  %v2597_v24 = vrot.slane %v5001_v18, 4  ;;  %v2595_v2 = vsel %vm650_vm0, %v2593_v13, %v2594_v12  ;;  %v5160_v18 = vld [vmem:[%s5427_s1 + $0x208] sm:$0xff]   ;;  %v5184_v8 = vld [vmem:[%s4682_s27 + $0x60] sm:$0xf0] }
  0xbf   : > { %4006 = vmatmul.mubr.bf16.gmra.mrb[12].mxu0 %v2382_v7  ;;  %v1361_v26 = vrot.slane %v1359_v14, 3  ;;  %v1364_v28 = vrot.slane %v1362_v11, 4  ;;  %v1376_v39 = vshrl.u32 %v3420_v41, 16  ;;  %v1379_v32 = vshll.u32 %v3420_v41, 16  ;;  %v4403_v41 = vld [vmem:[%s4682_s27 + $0x58] sm:$0xf] }
  0xc0   : > { %v1357_v0 = vsel %vm465_vm1, %v1348_v36, %v1356_v50  ;;  %4025 = vmatprep.mubr.bf16.mxu0 %v2595_v2  ;;  %v2598_v17 = vsel %vm650_vm0, %v2596_v46, %v2597_v24  ;;  %v1384_v47 = vshrl.u32 %v4401_v40, 16  ;;  %v1387_v52 = vshll.u32 %v4401_v40, 16  ;;  %v3426_v5 = vld [vmem:[%s4682_s27 + $0x60] sm:$0xf8]  ;;  %v3567_v46 = vld [vmem:[%s4682_s27 + $0x70] sm:$0xf0] }
  0xc1   : > { %3897 = vmatprep.mubr.bf16.mxu1 %v1357_v0  ;;  %v1365_v49 = vor.u32 %v1364_v28, %v1361_v26  ;;  %v1378_v23 = vrot.slane %v1376_v39, 3  ;;  %v2599_v27 = vrot.slane %v5146_v61, 4  ;;  %v1381_v58 = vrot.slane %v1379_v32, 4  ;;  %v4404_v0 = vld [vmem:[%s4682_s27 + $0x68] sm:$0xf] }
  0xc2   : > { %v1386_v22 = vrot.slane %v1384_v47, 3  ;;  %v2600_v59 = vrot.slane %v5025_v55, 4  ;;  %v1393_v60 = vshrl.u32 %v3422_v15, 16  ;;  %v1389_v48 = vrot.slane %v1387_v52, 4  ;;  %v3428_v40 = vld [vmem:[%s4682_s27 + $0x70] sm:$0xf8] }
  0xc3   : > { %v1374_v35 = vsel %vm465_vm1, %v1365_v49, %v1373_v56  ;;  %v1396_v25 = vshll.u32 %v3422_v15, 16  ;;  %v1401_v62 = vshrl.u32 %v4402_v38, 16  ;;  %v1382_v51 = vor.u32 %v1381_v58, %v1378_v23  ;;  %v5179_v56 = vld [vmem:[%s5427_s1 + $0x210] sm:$0xff]  }
  0xc4   : > { %v2601_v29 = vsel %vm650_vm0, %v2599_v27, %v2600_v59  ;;  %v1395_v21 = vrot.slane %v1393_v60, 3  ;;  %v1404_v42 = vshll.u32 %v4402_v38, 16  ;;  %v1390_v55 = vor.u32 %v1389_v48, %v1386_v22  ;;  %v5212_v59 = vld [vmem:[%s4682_s27 + $0x80] sm:$0xf0] }
  0xc5   : > { %v1398_v54 = vrot.slane %v1396_v25, 4  ;;  %v1403_v19 = vrot.slane %v1401_v62, 3  ;;  %v2602_v20 = vrot.slane %v5164_v53, 4  ;;  %v2603_v43 = vrot.slane %v5038_v45, 4  ;;  %v5194_v45 = vld [vmem:[%s5427_s1 + $0x218] sm:$0xff]  }
  0xc6   : > { %3898 = vmatmul.mubr.bf16.vlgmr.msra.gmra.mrb[0].mxu1 %v1374_v35  ;;  %v1406_v34 = vrot.slane %v1404_v42, 4  ;;  %v1410_v31 = vshrl.u32 %v3424_v33, 16  ;;  %v1413_v1 = vshll.u32 %v3424_v33, 16  ;;  %v1391_v9 = vsel %vm465_vm1, %v1382_v51, %v1390_v55  ;;  %v4391_v33 = vld [vmem:[%s5427_s1 + $0x220] sm:$0xff]   ;;  %v4405_v62 = vld [vmem:[%s4682_s27 + $0x78] sm:$0xf] }
  0xc7   : > { %4081 = vmatpush3.bf16.msra.mxu1 %v5126_v16  ;;  %4026 = vmatmul.mubr.bf16.vlgmr.msra.gmra.mrb[0].mxu0 %v2598_v17  ;;  %v1399_v13 = vor.u32 %v1398_v54, %v1395_v21  ;;  %v1418_v3 = vshrl.u32 %v4403_v41, 16  ;;  %v1421_v4 = vshll.u32 %v4403_v41, 16  ;;  %v2604_v12 = vsel %vm650_vm0, %v2602_v20, %v2603_v43  ;;  %v4406_v41 = vld [vmem:[%s4682_s27 + $0x88] sm:$0xf] }
  0xc8   : > { %4074 = vmatprep.subr.bf16.mxu1 %v5160_v18  ;;  %4042 = vmatpush3.bf16.msra.mxu0 %v5126_v16  ;;  %v1407_v6 = vor.u32 %v1406_v34, %v1403_v19  ;;  %v1412_v14 = vrot.slane %v1410_v31, 3  ;;  %v1415_v11 = vrot.slane %v1413_v1, 4  ;;  %v2605_v7 = vrot.slane %v5184_v8, 4  ;;  %v5228_v19 = vld [vmem:[%s4682_s27 + $0x90] sm:$0xf0]  ;;  %v4392_v31 = vld [vmem:[%s5427_s1 + $0x228] sm:$0xff]  }
  0xc9   : > { %3901 = vmatprep.mubr.bf16.mxu1 %v1391_v9  ;;  %4043 = vmatprep.subr.bf16.mxu0 %v5160_v18  ;;  %v1420_v15 = vrot.slane %v1418_v3, 3  ;;  %v1423_v16 = vrot.slane %v1421_v4, 4  ;;  %v2606_v36 = vrot.slane %v5066_v37, 4  ;;  %v1427_v2 = vshrl.u32 %v3426_v5, 16 }
  0xca   : > { %4029 = vmatprep.mubr.bf16.mxu0 %v2601_v29  ;;  %v1408_v50 = vsel %vm465_vm1, %v1399_v13, %v1407_v6  ;;  %v1416_v24 = vor.u32 %v1415_v11, %v1412_v14  ;;  %v1430_v26 = vshll.u32 %v3426_v5, 16  ;;  %v1435_v17 = vshrl.u32 %v4404_v0, 16  ;;  %v3430_v29 = vld [vmem:[%s4682_s27 + $0x80] sm:$0xf8]  ;;  %v3594_v14 = vld [vmem:[%s4682_s27 + $0x28] sm:$0x1f] }
  0xcb   : > { %4082 = vmatpush3.bf16.msra.mxu1 %v5160_v18  ;;  %v1424_v28 = vor.u32 %v1423_v16, %v1420_v15  ;;  %v2607_v39 = vsel %vm650_vm0, %v2605_v7, %v2606_v36  ;;  %v1438_v32 = vshll.u32 %v4404_v0, 16  ;;  %v1429_v37 = vrot.slane %v1427_v2, 3 }
  0xcc   : > { %4075 = vmatprep.subr.bf16.mxu1 %v5179_v56  ;;  %4044 = vmatpush3.bf16.msra.mxu0 %v5160_v18  ;;  %v1432_v47 = vrot.slane %v1430_v26, 4  ;;  %v2608_v49 = vrot.slane %v3567_v46, 4  ;;  %v2609_v23 = vrot.slane %v5080_v10, 4  ;;  %v1437_v27 = vrot.slane %v1435_v17, 3 }
  0xcd   : > { %4045 = vmatprep.subr.bf16.mxu0 %v5179_v56  ;;  %v1425_v52 = vsel %vm465_vm1, %v1416_v24, %v1424_v28  ;;  %v1440_v58 = vrot.slane %v1438_v32, 4  ;;  %v2897_v22 = vshrl.u32 %v3567_v46, 16  ;;  %v2900_v10 = vshll.u32 %v3567_v46, 16 }
  0xce   : > { %3902 = vmatmul.mubr.bf16.gmra.mrb[4].mxu1 %v1408_v50  ;;  %v1433_v18 = vor.u32 %v1432_v47, %v1429_v37  ;;  %v2610_v60 = vsel %vm650_vm0, %v2608_v49, %v2609_v23  ;;  %v1444_v35 = vshrl.u32 %v3428_v40, 16  ;;  %v1447_v38 = vshll.u32 %v3428_v40, 16  ;;  %v3595_v49 = vld [vmem:[%s4682_s27 + $0x38] sm:$0x1f] }
  0xcf   : > { %4083 = vmatpush3.bf16.msra.mxu1 %v5179_v56  ;;  %3905 = vmatprep.mubr.bf16.mxu1 %v1425_v52  ;;  %v1441_v48 = vor.u32 %v1440_v58, %v1437_v27  ;;  %v5219_v25 = vrot.slane %v2897_v22, 4  ;;  %v1452_v51 = vshrl.u32 %v4405_v62, 16  ;;  %v5224_v21 = vrot.slane %v2900_v10, 5  ;;  %v4394_v22 = vld [vmem:[%s5427_s1 + $0x238] sm:$0xff]  }
  0xd0   : > { %4076 = vmatprep.subr.bf16.mxu1 %v5194_v45  ;;  %4030 = vmatmul.mubr.bf16.gmra.mrb[4].mxu0 %v2604_v12  ;;  %v1446_v42 = vrot.slane %v1444_v35, 3  ;;  %v1455_v55 = vshll.u32 %v4405_v62, 16  ;;  %v2611_v54 = vrot.slane %v5212_v59, 4  ;;  %v1449_v34 = vrot.slane %v1447_v38, 4  ;;  %v3599_v62 = vld [vmem:[%s4682_s27 + $0x78] sm:$0x1f] }
  0xd1   : > { %4046 = vmatpush3.bf16.msra.mxu0 %v5179_v56  ;;  %4033 = vmatprep.mubr.bf16.mxu0 %v2607_v39  ;;  %v1442_v20 = vsel %vm465_vm1, %v1433_v18, %v1441_v48  ;;  %v1454_v43 = vrot.slane %v1452_v51, 3  ;;  %v2612_v56 = vrot.slane %v5104_v44, 4  ;;  %v1461_v9 = vshrl.u32 %v3430_v29, 16  ;;  %v3598_v39 = vld [vmem:[%s4682_s27 + $0x68] sm:$0x1f] }
  0xd2   : > { %4047 = vmatprep.subr.bf16.mxu0 %v5194_v45  ;;  %v1457_v1 = vrot.slane %v1455_v55, 4  ;;  %v1464_v13 = vshll.u32 %v3430_v29, 16  ;;  %v1469_v3 = vshrl.u32 %v4406_v41, 16  ;;  %v1450_v4 = vor.u32 %v1449_v34, %v1446_v42 }
  0xd3   : > { %4084 = vmatpush3.bf16.msra.mxu1 %v5194_v45  ;;  %v2613_v5 = vsel %vm650_vm0, %v2611_v54, %v2612_v56  ;;  %v1472_v6 = vshll.u32 %v4406_v41, 16  ;;  %v2614_v12 = vrot.slane %v5228_v19, 4  ;;  %v1463_v11 = vrot.slane %v1461_v9, 3  ;;  %v3596_v54 = vld [vmem:[%s4682_s27 + $0x48] sm:$0x1f] }
  0xd4   : > { %4077 = vmatprep.subr.bf16.mxu1 %v4391_v33  ;;  %v1458_v44 = vor.u32 %v1457_v1, %v1454_v43  ;;  %v1466_v46 = vrot.slane %v1464_v13, 4  ;;  %v1471_v15 = vrot.slane %v1469_v3, 3  ;;  %v2615_v7 = vrot.slane %v5120_v30, 4 }
  0xd5   : > { %4048 = vmatpush3.bf16.msra.mxu0 %v5194_v45  ;;  %v1474_v16 = vrot.slane %v1472_v6, 4  ;;  %v2812_v36 = vshrl.u32 %v5130_v57, 16  ;;  %v2815_v50 = vshll.u32 %v5130_v57, 16  ;;  %v4393_v45 = vld [vmem:[%s5427_s1 + $0x230] sm:$0xff]   ;;  %v2820_v26 = vshrl.u32 %v3594_v14, 16 }
  0xd6   : > { %3906 = vmatmul.mubr.bf16.gmra.mrb[8].mxu1 %v1442_v20  ;;  %4049 = vmatprep.subr.bf16.mxu0 %v4391_v33  ;;  %v1459_v24 = vsel %vm465_vm1, %v1450_v4, %v1458_v44  ;;  %v1467_v2 = vor.u32 %v1466_v46, %v1463_v11  ;;  %v2823_v28 = vshll.u32 %v3594_v14, 16  ;;  %v2616_v30 = vsel %vm650_vm0, %v2614_v12, %v2615_v7 }
  0xd7   : > { %4085 = vmatpush3.bf16.msra.mxu1 %v4391_v33  ;;  %3909 = vmatprep.mubr.bf16.mxu1 %v1459_v24  ;;  %v1475_v0 = vor.u32 %v1474_v16, %v1471_v15  ;;  %v2814_v17 = vrot.slane %v2812_v36, 4  ;;  %v2817_v32 = vrot.slane %v2815_v50, 5  ;;  %v2822_v57 = vrot.slane %v2820_v26, 4  ;;  %v3597_v36 = vld [vmem:[%s4682_s27 + $0x58] sm:$0x1f] }
  0xd8   : > { %4078 = vmatprep.subr.bf16.mxu1 %v4392_v31  ;;  %4034 = vmatmul.mubr.bf16.gmra.mrb[8].mxu0 %v2610_v60  ;;  %v2825_v40 = vrot.slane %v2823_v28, 5  ;;  %v2880_v37 = vshrl.u32 %v5184_v8, 16  ;;  %v2883_v47 = vshll.u32 %v5184_v8, 16  ;;  %v2888_v27 = vshrl.u32 %v3598_v39, 16 }
  0xd9   : > { %4050 = vmatpush3.bf16.msra.mxu0 %v4391_v33  ;;  %4037 = vmatprep.mubr.bf16.mxu0 %v2613_v5  ;;  %v1476_v23 = vsel %vm465_vm1, %v1467_v2, %v1475_v0  ;;  %v2818_v52 = vor.u32 %v2817_v32, %v2814_v17  ;;  %v2891_v58 = vshll.u32 %v3598_v39, 16  ;;  %v2829_v8 = vshrl.u32 %v5138_v63, 16  ;;  %v3600_v5 = vld [vmem:[%s4682_s27 + $0x88] sm:$0x1f] }
  0xda   : > { %4051 = vmatprep.subr.bf16.mxu0 %v4392_v31  ;;  %v2826_v18 = vor.u32 %v2825_v40, %v2822_v57  ;;  %v2882_v60 = vrot.slane %v2880_v37, 4  ;;  %v2885_v10 = vrot.slane %v2883_v47, 5  ;;  %v2890_v33 = vrot.slane %v2888_v27, 4  ;;  %v3601_v57 = vld [vmem:[%s4682_s27 + $0x98] sm:$0x1f]  ;;  %s4407_s27 = scalar_lea.vmem %s5365_s13, 2048 }
  0xdb   : > { %4086 = vmatpush3.bf16.msra.mxu1 %v4392_v31  ;;  %v2893_v35 = vrot.slane %v2891_v58, 5  ;;  %v2832_v48 = vshll.u32 %v5138_v63, 16  ;;  %v2837_v38 = vshrl.u32 %v3595_v49, 16  ;;  %v2831_v42 = vrot.slane %v2829_v8, 4  ;;  %p4408_p0 = scmp.ne.s32.totalorder %s5365_s13, %s4407_s27  ;;  %p4415_p5 = scmp.lt.s32.totalorder %s4413_s10, %s4407_s27 }
  0xdc   : > { %4079 = vmatprep.subr.bf16.mxu1 %v4393_v45  ;;  %v2827_v51 = vsel %vm998_vm2, %v2818_v52, %v2826_v18  ;;  %v2886_v29 = vor.u32 %v2885_v10, %v2882_v60  ;;  %v2840_v55 = vshll.u32 %v3595_v49, 16  ;;  %v2903_v56 = vor.u32 %v5224_v21, %v5219_v25 }
  0xdd   : > { %4052 = vmatpush3.bf16.msra.mxu0 %v4392_v31  ;;  %v2894_v20 = vor.u32 %v2893_v35, %v2890_v33  ;;  %v2834_v34 = vrot.slane %v2832_v48, 5  ;;  %v2839_v43 = vrot.slane %v2837_v38, 4  ;;  %v2905_v1 = vshrl.u32 %v3599_v62, 16  ;;  %p4409_p1 = pnand %p4408_p0, %p4583_p3  ;;  %p4416_p6 = por %p4415_p5, %p4414_p4 }
  0xde   : > { %3910 = vmatmul.mubr.bf16.gmra.mrb[12].mxu1 %v1476_v23  ;;  %4053 = vmatprep.subr.bf16.mxu0 %v4393_v45  ;;  %v2842_v63 = vrot.slane %v2840_v55, 5  ;;  %v2908_v31 = vshll.u32 %v3599_v62, 16  ;;  %v2846_v9 = vshrl.u32 %v5146_v61, 16  ;;  %v2849_v3 = vshll.u32 %v5146_v61, 16 }
  0xdf   : > { %4087 = vmatpush3.bf16.msra.mxu1 %v4393_v45  ;;  %v2895_v13 = vsel %vm998_vm2, %v2886_v29, %v2894_v20  ;;  %v2835_v41 = vor.u32 %v2834_v34, %v2831_v42  ;;  %v2854_v4 = vshrl.u32 %v3596_v54, 16  ;;  %v2907_v12 = vrot.slane %v2905_v1, 4  ;;  %p4410_p2 = pneg %p4409_p1 }
  0xe0   : > { %4080 = vmatprep.subr.bf16.mxu1 %v4394_v22  ;;  %4038 = vmatmul.mubr.bf16.gmra.mrb[12].mxu0 %v2616_v30  ;;  %v2843_v6 = vor.u32 %v2842_v63, %v2839_v43  ;;  %v2910_v25 = vrot.slane %v2908_v31, 5  ;;  %v2848_v21 = vrot.slane %v2846_v9, 4  ;;  %v2851_v14 = vrot.slane %v2849_v3, 5 }
  0xe1   : > { %4054 = vmatpush3.bf16.msra.mxu0 %v4393_v45  ;;  %4057 = vmatprep.mubr.bf16.mxu0 %v2827_v51  ;;  %v2856_v44 = vrot.slane %v2854_v4, 4  ;;  %v2857_v11 = vshll.u32 %v3596_v54, 16  ;;  %v2914_v46 = vshrl.u32 %v5212_v59, 16  ;;  %v2917_v16 = vshll.u32 %v5212_v59, 16  ;;  %p4417_p7 = pnand %p4416_p6, %p4410_p2 }
  0xe2   : > { %4055 = vmatprep.subr.bf16.mxu0 %v4394_v22  ;;  %4065 = vmatprep.mubr.bf16.mxu1 %v2895_v13  ;;  %v2844_v15 = vsel %vm998_vm2, %v2835_v41, %v2843_v6  ;;  %v2911_v61 = vor.u32 %v2910_v25, %v2907_v12  ;;  %v2922_v7 = vshrl.u32 %v3600_v5, 16  ;;  %v2852_v50 = vor.u32 %v2851_v14, %v2848_v21 }
  0xe3   : > { %4088 = vmatpush3.bf16.msra.mxu1 %v4394_v22  ;;  %v2859_v24 = vrot.slane %v2857_v11, 5  ;;  %v2916_v2 = vrot.slane %v2914_v46, 4  ;;  %v2925_v45 = vshll.u32 %v3600_v5, 16  ;;  %v2919_v28 = vrot.slane %v2917_v16, 5 }
  0xe4   : > { %v2912_v26 = vsel %vm998_vm2, %v2903_v56, %v2911_v61  ;;  %v2924_v39 = vrot.slane %v2922_v7, 4  ;;  %v2863_v0 = vshrl.u32 %v5164_v53, 16  ;;  %v2866_v32 = vshll.u32 %v5164_v53, 16 }
  0xe5   : > { %4056 = vmatpush3.bf16.msra.mxu0 %v4394_v22  ;;  %v2860_v30 = vor.u32 %v2859_v24, %v2856_v44  ;;  %v2927_v17 = vrot.slane %v2925_v45, 5  ;;  %v2871_v59 = vshrl.u32 %v3597_v36, 16  ;;  %v2920_v40 = vor.u32 %v2919_v28, %v2916_v2 }
  0xe6   : > { %4066 = vmatmul.mubr.bf16.vlgmr.msra.gmra.mrb[16].mxu1 %v2912_v26  ;;  %v2865_v37 = vrot.slane %v2863_v0, 4  ;;  %v2874_v47 = vshll.u32 %v3597_v36, 16  ;;  %v2931_v49 = vshrl.u32 %v5228_v19, 16  ;;  %v2868_v27 = vrot.slane %v2866_v32, 5  ;;  %v5300_v26 = vld [vmem:[%s5428_s2] ss:$0 sm:$0xff] }
  0xe7   : > { %v2861_v23 = vsel %vm998_vm2, %v2852_v50, %v2860_v30  ;;  %v2928_v52 = vor.u32 %v2927_v17, %v2924_v39  ;;  %v2873_v58 = vrot.slane %v2871_v59, 4  ;;  %v2934_v60 = vshll.u32 %v5228_v19, 16  ;;  %v5305_v17 = vld [vmem:[%s5429_s3] ss:$0 sm:$0xff] }
  0xe8   : > { %4058 = vmatmul.mubr.bf16.vlgmr.msra.gmra.mrb[0].mxu0 %v2844_v15  ;;  %v2876_v22 = vrot.slane %v2874_v47, 5  ;;  %v2933_v18 = vrot.slane %v2931_v49, 4  ;;  %v2939_v10 = vshrl.u32 %v3601_v57, 16  ;;  %v2869_v8 = vor.u32 %v2868_v27, %v2865_v37 }
  0xe9   : > { %4061 = vmatprep.mubr.bf16.mxu0 %v2861_v23  ;;  %v2929_v53 = vsel %vm998_vm2, %v2920_v40, %v2928_v52  ;;  %v2942_v33 = vshll.u32 %v3601_v57, 16  ;;  %v2936_v48 = vrot.slane %v2934_v60, 5 }
  0xea   : > { %4069 = vmatprep.mubr.bf16.mxu1 %v2929_v53  ;;  %v2877_v35 = vor.u32 %v2876_v22, %v2873_v58  ;;  %v2941_v38 = vrot.slane %v2939_v10, 4 }
  0xeb   : > { %v2944_v62 = vrot.slane %v2942_v33, 5  ;;  %v2937_v29 = vor.u32 %v2936_v48, %v2933_v18 }
  0xec   : > { %v2878_v51 = vsel %vm998_vm2, %v2869_v8, %v2877_v35 }
  0xed   : > { %v2945_v42 = vor.u32 %v2944_v62, %v2941_v38 }
  0xef   : > { %v2946_v55 = vsel %vm998_vm2, %v2937_v29, %v2945_v42 }
  0xf0   : > { %4062 = vmatmul.mubr.bf16.gmra.mrb[4].mxu0 %v2878_v51  ;;  %4070 = vmatmul.mubr.bf16.gmra.mrb[20].mxu1 %v2946_v55 }
 0x199   : > { %v3899_v54 = vpop.f32.mrb[0].mxu1 }
 0x19a   : > { %v1584_v19 = vpop.f32.mrb[1].mxu1 }
 0x19b   : > { %v3900_v20 = vpop.f32.mrb[2].mxu1 }
 0x19c   : > { %v1587_v34 = vpop.f32.mrb[3].mxu1 }
 0x1a1   : > { %v5283_v43 = vpop.f32.mrb[4].mxu1 }
 0x1a2   : > { %v5285_v56 = vpop.f32.mrb[5].mxu1 }
 0x1a3   : > { %v5287_v63 = vpop.f32.mrb[6].mxu1 }
 0x1a4   : > { %v5289_v1 = vpop.f32.mrb[7].mxu1 }
 0x1a9   : > { %v3907_v31 = vpop.f32.mrb[8].mxu1 }
 0x1aa   : > { %v1616_v9 = vpop.f32.mrb[9].mxu1 }
 0x1ab   : > { %v3908_v13 = vpop.f32.mrb[10].mxu1  ;;  %v4035_v41 = vpop.f32.mrb[8].mxu0 }
 0x1ac   : > { %v1619_v3 = vpop.f32.mrb[11].mxu1  ;;  %v4097_v4 = vadd.f32 %v4035_v41, %v3907_v31  ;;  %v2756_v5 = vpop.f32.mrb[9].mxu0 }
 0x1ad   : > { %v4099_v6 = vadd.f32 %v2756_v5, %v1616_v9  ;;  %v4036_v12 = vpop.f32.mrb[10].mxu0 }
 0x1ae   : > { %v4101_v25 = vadd.f32 %v4036_v12, %v3908_v13  ;;  %v2759_v21 = vpop.f32.mrb[11].mxu0 }
 0x1af   : > { %v4103_v14 = vadd.f32 %v2759_v21, %v1619_v3 }
 0x1b1   : > { %v3911_v44 = vpop.f32.mrb[12].mxu1 }
 0x1b2   : > { %v1632_v11 = vpop.f32.mrb[13].mxu1 }
 0x1b3   : > { %v3912_v46 = vpop.f32.mrb[14].mxu1  ;;  %v4039_v15 = vpop.f32.mrb[12].mxu0 }
 0x1b4   : > { %v1635_v61 = vpop.f32.mrb[15].mxu1  ;;  %v4105_v16 = vadd.f32 %v4039_v15, %v3911_v44  ;;  %v2772_v7 = vpop.f32.mrb[13].mxu0 }
 0x1b5   : > { %v5291_v36 = vadd.f32 %v2772_v7, %v1632_v11  ;;  %v4040_v50 = vpop.f32.mrb[14].mxu0 }
 0x1b6   : > { %v5293_v24 = vadd.f32 %v4040_v50, %v3912_v46  ;;  %v2775_v2 = vpop.f32.mrb[15].mxu0 }
 0x1b7   : > { %v5295_v45 = vadd.f32 %v2775_v2, %v1635_v61 }
 0x1b9   : > { %v4067_v28 = vpop.f32.mrb[16].mxu1 }
 0x1ba   : > { %v4098_v39 = vadd.f32 %v4097_v4, %v4067_v28  ;;  %v3086_v0 = vpop.f32.mrb[17].mxu1 }
 0x1bb   : > { %v4059_v30 = vpop.f32.mrb[0].mxu0  ;;  %v4100_v32 = vadd.f32 %v4099_v6, %v3086_v0  ;;  %v4068_v59 = vpop.f32.mrb[18].mxu1 }
 0x1bc   : > { %v4089_v57 = vadd.f32 %v4059_v30, %v3899_v54  ;;  %v3150_v40 = vmul.f32 %v4098_v39, %v5300_v26  ;;  %v3054_v37 = vpop.f32.mrb[1].mxu0  ;;  %v4102_v47 = vadd.f32 %v4101_v25, %v4068_v59  ;;  %v3089_v49 = vpop.f32.mrb[19].mxu1 }
 0x1bd   : > { %v4090_v23 = vadd.f32 %v3054_v37, %v1584_v19  ;;  %v3148_v52 = vmul.f32 %v4100_v32, %v5300_v26  ;;  %v4060_v27 = vpop.f32.mrb[2].mxu0  ;;  %v4104_v58 = vadd.f32 %v4103_v14, %v3089_v49 }
 0x1be   : > { %v3142_v22 = vmul.f32 %v4089_v57, %v5300_v26  ;;  %v3173_v18 = vadd.f32 %v5305_v17, %v3150_v40  ;;  %v4091_v60 = vadd.f32 %v4060_v27, %v3900_v20  ;;  %v3151_v10 = vmul.f32 %v4102_v47, %v5300_v26  ;;  %v3057_v53 = vpop.f32.mrb[3].mxu0 }
 0x1bf   : > { %v3140_v8 = vmul.f32 %v4090_v23, %v5300_v26  ;;  %v3171_v33 = vadd.f32 %v5305_v17, %v3148_v52  ;;  %v4092_v35 = vadd.f32 %v3057_v53, %v1587_v34  ;;  %v3149_v48 = vmul.f32 %v4104_v58, %v5300_v26 }
 0x1c0   : > { %v3165_v38 = vadd.f32 %v5305_v17, %v3142_v22  ;;  %v3189_v62 = vmax.f32 %v3173_v18, 0.0  ;;  %v3143_v51 = vmul.f32 %v4091_v60, %v5300_v26  ;;  %v3174_v29 = vadd.f32 %v5305_v17, %v3151_v10 }
 0x1c1   : > { %v3163_v42 = vadd.f32 %v5305_v17, %v3140_v8  ;;  %v3187_v55 = vmax.f32 %v3171_v33, 0.0  ;;  %v3141_v54 = vmul.f32 %v4092_v35, %v5300_v26  ;;  %v3172_v19 = vadd.f32 %v5305_v17, %v3149_v48 }
 0x1c2   : > { %v3181_v20 = vmax.f32 %v3165_v38, 0.0  ;;  %3205 = vst [vmem:[%s4613_s23 + $0x50] sm:$0xff] %v3189_v62  ;;  %v3166_v34 = vadd.f32 %v5305_v17, %v3143_v51  ;;  %v3190_v31 = vmax.f32 %v3174_v29, 0.0 }
 0x1c3   : > { %v3179_v9 = vmax.f32 %v3163_v42, 0.0  ;;  %3203 = vst [vmem:[%s4613_s23 + $0x40] sm:$0xff] %v3187_v55  ;;  %v3164_v13 = vadd.f32 %v5305_v17, %v3141_v54  ;;  %v3188_v41 = vmax.f32 %v3172_v19, 0.0  ;;  %v4063_v3 = vpop.f32.mrb[4].mxu0  ;;  %v4071_v6 = vpop.f32.mrb[20].mxu1 }
 0x1c4   : > { %3197 = vst [vmem:[%s4613_s23 + $0x10] sm:$0xff] %v3181_v20  ;;  %v3182_v4 = vmax.f32 %v3166_v34, 0.0  ;;  %3206 = vst [vmem:[%s4613_s23 + $0x58] sm:$0xff] %v3190_v31  ;;  %v4093_v5 = vadd.f32 %v4063_v3, %v5283_v43  ;;  %v3070_v12 = vpop.f32.mrb[5].mxu0  ;;  %v4106_v21 = vadd.f32 %v4105_v16, %v4071_v6  ;;  %v3102_v44 = vpop.f32.mrb[21].mxu1 }
 0x1c5   : > { %3195 = vst [vmem:[%s4613_s23] sm:$0xff] %v3179_v9  ;;  %v3180_v25 = vmax.f32 %v3164_v13, 0.0  ;;  %3204 = vst [vmem:[%s4613_s23 + $0x48] sm:$0xff] %v3188_v41  ;;  %v4094_v14 = vadd.f32 %v3070_v12, %v5285_v56  ;;  %v4064_v11 = vpop.f32.mrb[6].mxu0  ;;  %v4108_v15 = vadd.f32 %v5291_v36, %v3102_v44  ;;  %v4072_v61 = vpop.f32.mrb[22].mxu1 }
 0x1c6   : > { %3198 = vst [vmem:[%s4613_s23 + $0x18] sm:$0xff] %v3182_v4  ;;  %v3146_v46 = vmul.f32 %v4093_v5, %v5300_v26  ;;  %v4095_v43 = vadd.f32 %v4064_v11, %v5287_v63  ;;  %v3073_v7 = vpop.f32.mrb[7].mxu0  ;;  %v3154_v50 = vmul.f32 %v4106_v21, %v5300_v26  ;;  %v4110_v16 = vadd.f32 %v5293_v24, %v4072_v61  ;;  %v3105_v28 = vpop.f32.mrb[23].mxu1 }
 0x1c7   : > { %3196 = vst [vmem:[%s4613_s23 + $0x8] sm:$0xff] %v3180_v25  ;;  %v3144_v2 = vmul.f32 %v4094_v14, %v5300_v26  ;;  %v4096_v56 = vadd.f32 %v3073_v7, %v5289_v1  ;;  %v3152_v36 = vmul.f32 %v4108_v15, %v5300_v26  ;;  %v4112_v0 = vadd.f32 %v5295_v45, %v3105_v28 }
 0x1c8   : > { %v3169_v39 = vadd.f32 %v5305_v17, %v3146_v46  ;;  %v3147_v63 = vmul.f32 %v4095_v43, %v5300_v26  ;;  %v3177_v30 = vadd.f32 %v5305_v17, %v3154_v50  ;;  %v3155_v24 = vmul.f32 %v4110_v16, %v5300_v26 }
 0x1c9   : > { %v3167_v32 = vadd.f32 %v5305_v17, %v3144_v2  ;;  %v3145_v1 = vmul.f32 %v4096_v56, %v5300_v26  ;;  %v3175_v57 = vadd.f32 %v5305_v17, %v3152_v36  ;;  %v3153_v37 = vmul.f32 %v4112_v0, %v5300_v26 }
 0x1ca   : > { %v3185_v59 = vmax.f32 %v3169_v39, 0.0  ;;  %v3170_v40 = vadd.f32 %v5305_v17, %v3147_v63  ;;  %v3193_v45 = vmax.f32 %v3177_v30, 0.0  ;;  %v3178_v49 = vadd.f32 %v5305_v17, %v3155_v24 }
 0x1cb   : > { %v3183_v47 = vmax.f32 %v3167_v32, 0.0  ;;  %v3168_v23 = vadd.f32 %v5305_v17, %v3145_v1  ;;  %v3191_v52 = vmax.f32 %v3175_v57, 0.0  ;;  %v3176_v58 = vadd.f32 %v5305_v17, %v3153_v37 }
 0x1cc   : > { %3201 = vst [vmem:[%s4613_s23 + $0x30] sm:$0xff] %v3185_v59  ;;  %v3186_v27 = vmax.f32 %v3170_v40, 0.0  ;;  %3209 = vst [vmem:[%s4613_s23 + $0x70] sm:$0xff] %v3193_v45  ;;  %v3194_v26 = vmax.f32 %v3178_v49, 0.0 }
 0x1cd   : > { %3199 = vst [vmem:[%s4613_s23 + $0x20] sm:$0xff] %v3183_v47  ;;  %v3184_v22 = vmax.f32 %v3168_v23, 0.0  ;;  %3207 = vst [vmem:[%s4613_s23 + $0x60] sm:$0xff] %v3191_v52  ;;  %v3192_v18 = vmax.f32 %v3176_v58, 0.0 }
 0x1ce   : > { %3202 = vst [vmem:[%s4613_s23 + $0x38] sm:$0xff] %v3186_v27  ;;  %3210 = vst [vmem:[%s4613_s23 + $0x78] sm:$0xff] %v3194_v26 }
 0x1cf   : > { %3200 = vst [vmem:[%s4613_s23 + $0x28] sm:$0xff] %v3184_v22  ;;  %3208 = vst [vmem:[%s4613_s23 + $0x68] sm:$0xff] %v3192_v18 }
 0x1d0   : > { %4420 = shalt.err (!%p4417_p7)
}
 0x1d1   : > { %s4421_s8 = scalar_lea.hbm %s5363_s30, 2048  ;;  %s4425_s12 = scalar_lea.hbm %s5430_s4, 8192 }
 0x1d2   : > { %p4422_p9 = scmp.ne.s32.totalorder %s5363_s30, %s4421_s8  ;;  %p4426_p12 = scmp.lt.u32.totalorder %s5363_s30, %s5430_s4 }
 0x1d3   : > { %p4427_p13 = scmp.lt.u32.totalorder %s4425_s12, %s4421_s8  ;;  %p4429_p1 = scmp.lt.u32.totalorder %s4421_s8, %s5363_s30 }
 0x1d4   : > { %p4423_p10 = pnand %p4422_p9, %p4583_p3 }
 0x1d5   : > { %p4428_p0 = por %p4427_p13, %p4426_p12 }
 0x1d6   : > { %p4424_p11 = pneg %p4423_p10 }
 0x1d7   : > { %p4430_p2 = por %p4429_p1, %p4428_p0 }
 0x1d9   : > { %p4431_p4 = pnand %p4430_p2, %p4424_p11 }
 0x1db   : > { %4434 = shalt.err (!%p4431_p4)
}
 0x1dc   : > { %s4505_s14 = smov 128   ;;  %s4506_s24 = smov 8  }
 0x1dd   : > { %4217 = dma.vmem_to_hbm [thread:$0]  (%p4583_p3), %s5365_s13, 2048, %s5363_s30, %s5374_s5, %s4505_s14, %s4505_s14, %s4506_s24  }
 0x1de PF: > { %p4223_p5 = scmp.ge.s32.totalorder %s4501_s22, 2  ;;  %s3243_s27 = sand.u32 1, %s4473_s15  }
 0x1df   : > { %s3244_s6 = scalar_lea.sflag [#allocation4], %s3243_s27 }
 0x1e0   : > { %p4220_p6 = pnand %p4223_p5, %p4592_p8 }
 0x1e2   : > { %4468 = dma.done.wait (!%p4220_p6), %s3244_s6, 2048  }
 0x1e3   : > { %4470 = vsyncadd (!%p4220_p6), %s3244_s6, 4294965248  ;;  %s17_s22 = sadd.s32 1, %s4501_s22   ;;  %s5433_s15 = smov %s4477_s16 }
 0x1e4   : > { %p14_p7 = scmp.ge.s32.totalorder %s17_s22, 6   ;;  %s5434_s16 = smov %s4481_s17 }
 0x1e5   : > { %s5435_s17 = smov %s4601_s7  ;;  %s5436_s18 = smov %s4493_s20 }
 0x1e6   : > { %s5437_s19 = smov %s4497_s21  ;;  %s5438_s20 = smov %s5441_s25 }
 0x1e7   : > { %s5439_s21 = smov %s5445_s26  ;;  %16 = sbr.rel (!%p14_p7) target bundleno = 5 (0x5), region = 87 }
 0x1ee   :  { %3249 = vsyncpa [#allocation4], 1 }
 0x1ef   :  { %3251 = vsyncpa [#allocation4 + $0x1], 1 }

// kernel: up_forward.4
= control target key start
LH: loop header
LB: loop body
LE: loop exit
PB: predicated region body
PF: predicated region fallthrough
CT: control target
= control target key end

     0   :  { %s8596_s21 = smov 0   ;;  %s8598_s22 = smov 0   ;;  %s10156_s0 = inlined_call_operand.vmem [shape: bf16[2,16,16,128], index: 0, kind: input, shape index: {}]   ;;  %s10157_s1 = inlined_call_operand.vmem [shape: bf16[2,16,16,128], index: 1, kind: input, shape index: {}]   ;;  %s10158_s2 = inlined_call_operand.vmem [shape: bf16[9,128,128], index: 2, kind: input, shape index: {}]   ;;  %s10159_s3 = inlined_call_operand.vmem [shape: bf16[9,128,128], index: 3, kind: input, shape index: {}]   ;;  %s10160_s4 = inlined_call_operand.vmem [shape: f32[1,128], index: 4, kind: input, shape index: {}]   ;;  %s10161_s5 = inlined_call_operand.vmem [shape: f32[1,128], index: 5, kind: input, shape index: {}]   ;;  %s10162_s6 = inlined_call_operand.vmem [shape: bf16[2,16,16,128], index: 6, kind: output, shape index: {}]  }
   0x1   :  { %s8600_s23 = smov 0   ;;  %s8602_s24 = smov 0  }
   0x2   :  { %s8604_s25 = smov 0  }
   0x3 LB: > { %s25_s26 = sadd.s32 1, %s8550_s23  ;;  %s28_s27 = sadd.s32 1, %s8554_s24  ;;  %s8558_s25 = sphi %s8604_s25, %s16_s25   ;;  %s8554_s24 = sphi %s8602_s24, %s10166_s24   ;;  %s8550_s23 = sphi %s8600_s23, %s10165_s23   ;;  %s8546_s22 = sphi %s8598_s22, %s10164_s22   ;;  %s8542_s21 = sphi %s8596_s21, %s10163_s21  }
   0x4   : > { %p26_p0 = scmp.ge.s32.totalorder %s25_s26, 2  ;;  %p6427_p1 = scmp.ge.s32.totalorder %s8558_s25, 1 }
   0x5   : > { %p236_p2 = scmp.lt.s32.totalorder %s8558_s25, 5 }
   0x6   : > { %s10168_s26 = smov (%p26_p0, %s25_s26), 0  ;;  %s10170_s27 = smov (!%p26_p0, %s28_s27), %s8554_s24 }
   0x7   : > { %p237_p3 = pnand %p6427_p1, %p236_p2  ;;  %p30_p4 = scmp.ge.s32.totalorder %s10170_s27, 2 }
   0x8   : > { %p276_p5 = scmp.lt.s32.totalorder (!%p237_p3), %s8546_s22, 1  ;;  %s6432_s28 = sshll.u32 (!%p237_p3), %s8542_s21, 3 }
   0x9   : > { %s10172_s27 = smov (%p30_p4, %s10170_s27), 0  ;;  %240 = sbr.rel (%p237_p3) target bundleno = 647 (0x287), region = 44 }
   0xa   : > { %p289_p6 = scmp.lt.s32.totalorder (!%p237_p3), %s6432_s28, 15  ;;  %p6436_p7 = scmp.ne.s32.totalorder (!%p237_p3), %s8542_s21, 0 }
  0x10   : > { %s10174_s22 = smov (!%p276_p5, %s8546_s22), 1  ;;  %s10176_s28 = smov (!%p289_p6, %s6432_s28), 15 }
  0x11   : > { %s7061_s29 = sshll.u32 %s10174_s22, 7  ;;  %s6434_s30 = sshll.u32 %s10174_s22, 5  ;;  %v8560_v1 = vmov (!%p6436_p7), 0  }
  0x12   : > { %s8632_s9 = scalar_lea.vmem %s10156_s0, %s7061_s29  ;;  %s8637_s12 = scalar_lea.vmem %s10157_s1, %s7061_s29  ;;  %304 = vst [vmem:[#allocation2 + $0x10] sm:$0xff] (!%p6436_p7), %v8560_v1  ;;  %302 = vst [vmem:[#allocation2] sm:$0xff] (!%p6436_p7), %v8560_v1 }
  0x13   : > { %s6433_s13 = sshll.u32 %s10176_s28, 1  ;;  %301 = sbr.rel (%p6436_p7) target bundleno = 86 (0x56), region = 48  ;;  %v8646_v0 = vld [vmem:[%s8632_s9] ss:$0 sps:$4 sm:$0xff] (!%p6436_p7)   ;;  %303 = vst [vmem:[#allocation2 + $0x8] sm:$0xff] (!%p6436_p7), %v8560_v1  ;;  %305 = vst [vmem:[#allocation2 + $0x18] sm:$0xff] (!%p6436_p7), %v8560_v1 }
  0x14   : > { %s293_s14 = sadd.s32 %s6434_s30, %s6433_s13  ;;  %306 = vst [vmem:[#allocation2 + $0x20] sm:$0xff] (!%p6436_p7), %v8560_v1  ;;  %307 = vst [vmem:[#allocation2 + $0x28] sm:$0xff] (!%p6436_p7), %v8560_v1  ;;  %v8311_v2 = vld [vmem:[%s8632_s9 + $0x4] ss:$0 sps:$4 sm:$0xff] (!%p6436_p7)   ;;  %v8312_v3 = vld [vmem:[%s8632_s9 + $0x8] ss:$0 sps:$4 sm:$0xff] (!%p6436_p7)  }
  0x15   : > { %s6435_s15 = sshll.u32 %s293_s14, 2  ;;  %308 = vst [vmem:[#allocation2 + $0x30] sm:$0xff] (!%p6436_p7), %v8560_v1  ;;  %309 = vst [vmem:[#allocation2 + $0x38] sm:$0xff] (!%p6436_p7), %v8560_v1  ;;  %v8313_v4 = vld [vmem:[%s8632_s9 + $0xc] ss:$0 sps:$4 sm:$0xff] (!%p6436_p7)  }
  0x16   : > { %s8642_s18 = scalar_lea.vmem %s10162_s6, %s6435_s15  ;;  %310 = vst [vmem:[#allocation2 + $0x40] sm:$0xff] (!%p6436_p7), %v8560_v1  ;;  %311 = vst [vmem:[#allocation2 + $0x48] sm:$0xff] (!%p6436_p7), %v8560_v1  ;;  %v8314_v5 = vld [vmem:[%s8632_s9 + $0x10] ss:$0 sps:$4 sm:$0xff] (!%p6436_p7)   ;;  %v8315_v6 = vld [vmem:[%s8632_s9 + $0x14] ss:$0 sps:$4 sm:$0xff] (!%p6436_p7)  }
  0x17   : > { %312 = vst [vmem:[#allocation2 + $0x50] sm:$0xff] (!%p6436_p7), %v8560_v1  ;;  %313 = vst [vmem:[#allocation2 + $0x58] sm:$0xff] (!%p6436_p7), %v8560_v1  ;;  %v8316_v7 = vld [vmem:[%s8632_s9 + $0x18] ss:$0 sps:$4 sm:$0xff] (!%p6436_p7)   ;;  %v8317_v8 = vld [vmem:[%s8632_s9 + $0x1c] ss:$0 sps:$4 sm:$0xff] (!%p6436_p7)  }
  0x18   : > { %314 = vst [vmem:[#allocation2 + $0x60] sm:$0xff] (!%p6436_p7), %v8560_v1  ;;  %315 = vst [vmem:[#allocation2 + $0x68] sm:$0xff] (!%p6436_p7), %v8560_v1  ;;  %v8318_v9 = vld [vmem:[%s8632_s9 + $0x20] ss:$0 sps:$4 sm:$0xff] (!%p6436_p7)   ;;  %v8319_v10 = vld [vmem:[%s8632_s9 + $0x24] ss:$0 sps:$4 sm:$0xff] (!%p6436_p7)  }
  0x19   : > { %316 = vst [vmem:[#allocation2 + $0x70] sm:$0xff] (!%p6436_p7), %v8560_v1  ;;  %317 = vst [vmem:[#allocation2 + $0x78] sm:$0xff] (!%p6436_p7), %v8560_v1  ;;  %v8320_v11 = vld [vmem:[%s8632_s9 + $0x28] ss:$0 sps:$4 sm:$0xff] (!%p6436_p7)   ;;  %v8321_v12 = vld [vmem:[%s8632_s9 + $0x2c] ss:$0 sps:$4 sm:$0xff] (!%p6436_p7)  }
  0x1a   : > { %318 = vst [vmem:[#allocation2 + $0x80] sm:$0xff] %v8560_v1  ;;  %319 = vst [vmem:[#allocation2 + $0x88] sm:$0xff] %v8560_v1  ;;  %v8322_v13 = vld [vmem:[%s8632_s9 + $0x30] ss:$0 sps:$4 sm:$0xff]   ;;  %v8323_v14 = vld [vmem:[%s8632_s9 + $0x34] ss:$0 sps:$4 sm:$0xff]  }
  0x1b   : > { %320 = vst [vmem:[#allocation2 + $0x90] sm:$0xff] %v8560_v1  ;;  %321 = vst [vmem:[#allocation2 + $0x98] sm:$0xff] %v8560_v1  ;;  %v8324_v15 = vld [vmem:[%s8632_s9 + $0x38] ss:$0 sps:$4 sm:$0xff]   ;;  %v8325_v16 = vld [vmem:[%s8632_s9 + $0x3c] ss:$0 sps:$4 sm:$0xff]  }
  0x1c   : > { %322 = vst [vmem:[#allocation2 + $0xa0] sm:$0xff] %v8560_v1  ;;  %323 = vst [vmem:[#allocation2 + $0xa8] sm:$0xff] %v8560_v1  ;;  %v8326_v17 = vld [vmem:[%s8632_s9 + $0x40] ss:$0 sps:$4 sm:$0xff]   ;;  %v8327_v18 = vld [vmem:[%s8632_s9 + $0x44] ss:$0 sps:$4 sm:$0xff]  }
  0x1d   : > { %324 = vst [vmem:[#allocation2 + $0xb0] sm:$0xff] %v8560_v1  ;;  %325 = vst [vmem:[#allocation2 + $0xb8] sm:$0xff] %v8560_v1  ;;  %v8328_v19 = vld [vmem:[%s8632_s9 + $0x48] ss:$0 sps:$4 sm:$0xff]   ;;  %v8329_v20 = vld [vmem:[%s8632_s9 + $0x4c] ss:$0 sps:$4 sm:$0xff]  }
  0x1e   : > { %326 = vst [vmem:[#allocation2 + $0xc0] sm:$0xff] %v8560_v1  ;;  %327 = vst [vmem:[#allocation2 + $0xc8] sm:$0xff] %v8560_v1  ;;  %v8330_v21 = vld [vmem:[%s8632_s9 + $0x50] ss:$0 sps:$4 sm:$0xff]   ;;  %v8331_v22 = vld [vmem:[%s8632_s9 + $0x54] ss:$0 sps:$4 sm:$0xff]  }
  0x1f   : > { %328 = vst [vmem:[#allocation2 + $0xd0] sm:$0xff] %v8560_v1  ;;  %329 = vst [vmem:[#allocation2 + $0xd8] sm:$0xff] %v8560_v1  ;;  %v8332_v23 = vld [vmem:[%s8632_s9 + $0x58] ss:$0 sps:$4 sm:$0xff]   ;;  %v8333_v24 = vld [vmem:[%s8632_s9 + $0x5c] ss:$0 sps:$4 sm:$0xff]  }
  0x20   : > { %330 = vst [vmem:[#allocation2 + $0xe0] sm:$0xff] %v8560_v1  ;;  %331 = vst [vmem:[#allocation2 + $0xe8] sm:$0xff] %v8560_v1  ;;  %v8334_v25 = vld [vmem:[%s8632_s9 + $0x60] ss:$0 sps:$4 sm:$0xff]   ;;  %v8335_v26 = vld [vmem:[%s8632_s9 + $0x64] ss:$0 sps:$4 sm:$0xff]  }
  0x21   : > { %332 = vst [vmem:[#allocation2 + $0xf0] sm:$0xff] %v8560_v1  ;;  %333 = vst [vmem:[#allocation2 + $0xf8] sm:$0xff] %v8560_v1  ;;  %v8336_v27 = vld [vmem:[%s8632_s9 + $0x68] ss:$0 sps:$4 sm:$0xff]   ;;  %v8337_v28 = vld [vmem:[%s8632_s9 + $0x6c] ss:$0 sps:$4 sm:$0xff]  }
  0x22   : > { %334 = vst [vmem:[#allocation2 + $0x100] sm:$0xff] %v8560_v1  ;;  %335 = vst [vmem:[#allocation2 + $0x108] sm:$0xff] %v8560_v1  ;;  %v8338_v29 = vld [vmem:[%s8632_s9 + $0x70] ss:$0 sps:$4 sm:$0xff]   ;;  %v8339_v30 = vld [vmem:[%s8632_s9 + $0x74] ss:$0 sps:$4 sm:$0xff]  }
  0x23   : > { %336 = vst [vmem:[#allocation2 + $0x110] sm:$0xff] %v8560_v1  ;;  %337 = vst [vmem:[#allocation2 + $0x118] sm:$0xff] %v8560_v1  ;;  %v8340_v31 = vld [vmem:[%s8632_s9 + $0x78] ss:$0 sps:$4 sm:$0xff]   ;;  %v8341_v32 = vld [vmem:[%s8632_s9 + $0x7c] ss:$0 sps:$4 sm:$0xff]  }
  0x24   : > { %531 = vst [vmem:[#allocation3] sm:$0xff] %v8560_v1  ;;  %532 = vst [vmem:[#allocation3 + $0x8] sm:$0xff] %v8560_v1  ;;  %v8342_v33 = vld [vmem:[%s8637_s12] ss:$0 sps:$4 sm:$0xff]   ;;  %v8343_v34 = vld [vmem:[%s8637_s12 + $0x4] ss:$0 sps:$4 sm:$0xff]  }
  0x25   : > { %533 = vst [vmem:[#allocation3 + $0x10] sm:$0xff] %v8560_v1  ;;  %534 = vst [vmem:[#allocation3 + $0x18] sm:$0xff] %v8560_v1  ;;  %v8344_v35 = vld [vmem:[%s8637_s12 + $0x8] ss:$0 sps:$4 sm:$0xff]   ;;  %v8345_v36 = vld [vmem:[%s8637_s12 + $0xc] ss:$0 sps:$4 sm:$0xff]  }
  0x26   : > { %535 = vst [vmem:[#allocation3 + $0x20] sm:$0xff] %v8560_v1  ;;  %536 = vst [vmem:[#allocation3 + $0x28] sm:$0xff] %v8560_v1  ;;  %v8346_v37 = vld [vmem:[%s8637_s12 + $0x10] ss:$0 sps:$4 sm:$0xff]   ;;  %v8347_v38 = vld [vmem:[%s8637_s12 + $0x14] ss:$0 sps:$4 sm:$0xff]  }
  0x27   : > { %537 = vst [vmem:[#allocation3 + $0x30] sm:$0xff] %v8560_v1  ;;  %538 = vst [vmem:[#allocation3 + $0x38] sm:$0xff] %v8560_v1  ;;  %v8348_v39 = vld [vmem:[%s8637_s12 + $0x18] ss:$0 sps:$4 sm:$0xff]   ;;  %v8349_v40 = vld [vmem:[%s8637_s12 + $0x1c] ss:$0 sps:$4 sm:$0xff]  }
  0x28   : > { %539 = vst [vmem:[#allocation3 + $0x40] sm:$0xff] %v8560_v1  ;;  %540 = vst [vmem:[#allocation3 + $0x48] sm:$0xff] %v8560_v1  ;;  %v8350_v41 = vld [vmem:[%s8637_s12 + $0x20] ss:$0 sps:$4 sm:$0xff]   ;;  %v8351_v42 = vld [vmem:[%s8637_s12 + $0x24] ss:$0 sps:$4 sm:$0xff]  }
  0x29   : > { %541 = vst [vmem:[#allocation3 + $0x50] sm:$0xff] %v8560_v1  ;;  %542 = vst [vmem:[#allocation3 + $0x58] sm:$0xff] %v8560_v1  ;;  %v8352_v43 = vld [vmem:[%s8637_s12 + $0x28] ss:$0 sps:$4 sm:$0xff]   ;;  %v8353_v44 = vld [vmem:[%s8637_s12 + $0x2c] ss:$0 sps:$4 sm:$0xff]  }
  0x2a   : > { %543 = vst [vmem:[#allocation3 + $0x60] sm:$0xff] %v8560_v1  ;;  %544 = vst [vmem:[#allocation3 + $0x68] sm:$0xff] %v8560_v1  ;;  %v8354_v45 = vld [vmem:[%s8637_s12 + $0x30] ss:$0 sps:$4 sm:$0xff]   ;;  %v8355_v46 = vld [vmem:[%s8637_s12 + $0x34] ss:$0 sps:$4 sm:$0xff]  }
  0x2b   : > { %545 = vst [vmem:[#allocation3 + $0x70] sm:$0xff] %v8560_v1  ;;  %546 = vst [vmem:[#allocation3 + $0x78] sm:$0xff] %v8560_v1  ;;  %v8356_v47 = vld [vmem:[%s8637_s12 + $0x38] ss:$0 sps:$4 sm:$0xff]   ;;  %v8357_v48 = vld [vmem:[%s8637_s12 + $0x3c] ss:$0 sps:$4 sm:$0xff]  }
  0x2c   : > { %547 = vst [vmem:[#allocation3 + $0x80] sm:$0xff] %v8560_v1  ;;  %548 = vst [vmem:[#allocation3 + $0x88] sm:$0xff] %v8560_v1  ;;  %v8358_v49 = vld [vmem:[%s8637_s12 + $0x40] ss:$0 sps:$4 sm:$0xff]   ;;  %v8359_v50 = vld [vmem:[%s8637_s12 + $0x44] ss:$0 sps:$4 sm:$0xff]  }
  0x2d   : > { %549 = vst [vmem:[#allocation3 + $0x90] sm:$0xff] %v8560_v1  ;;  %550 = vst [vmem:[#allocation3 + $0x98] sm:$0xff] %v8560_v1  ;;  %v8360_v51 = vld [vmem:[%s8637_s12 + $0x48] ss:$0 sps:$4 sm:$0xff]   ;;  %v8361_v52 = vld [vmem:[%s8637_s12 + $0x4c] ss:$0 sps:$4 sm:$0xff]  }
  0x2e   : > { %551 = vst [vmem:[#allocation3 + $0xa0] sm:$0xff] %v8560_v1  ;;  %552 = vst [vmem:[#allocation3 + $0xa8] sm:$0xff] %v8560_v1  ;;  %v8362_v53 = vld [vmem:[%s8637_s12 + $0x50] ss:$0 sps:$4 sm:$0xff]   ;;  %v8363_v54 = vld [vmem:[%s8637_s12 + $0x54] ss:$0 sps:$4 sm:$0xff]  }
  0x2f   : > { %553 = vst [vmem:[#allocation3 + $0xb0] sm:$0xff] %v8560_v1  ;;  %554 = vst [vmem:[#allocation3 + $0xb8] sm:$0xff] %v8560_v1  ;;  %v8364_v55 = vld [vmem:[%s8637_s12 + $0x58] ss:$0 sps:$4 sm:$0xff]   ;;  %v8365_v56 = vld [vmem:[%s8637_s12 + $0x5c] ss:$0 sps:$4 sm:$0xff]  }
  0x30   : > { %555 = vst [vmem:[#allocation3 + $0xc0] sm:$0xff] %v8560_v1  ;;  %556 = vst [vmem:[#allocation3 + $0xc8] sm:$0xff] %v8560_v1  ;;  %v8366_v57 = vld [vmem:[%s8637_s12 + $0x60] ss:$0 sps:$4 sm:$0xff]   ;;  %v8367_v58 = vld [vmem:[%s8637_s12 + $0x64] ss:$0 sps:$4 sm:$0xff]  }
  0x31   : > { %557 = vst [vmem:[#allocation3 + $0xd0] sm:$0xff] %v8560_v1  ;;  %558 = vst [vmem:[#allocation3 + $0xd8] sm:$0xff] %v8560_v1  ;;  %v8368_v59 = vld [vmem:[%s8637_s12 + $0x68] ss:$0 sps:$4 sm:$0xff]   ;;  %v8369_v60 = vld [vmem:[%s8637_s12 + $0x6c] ss:$0 sps:$4 sm:$0xff]  }
  0x32   : > { %559 = vst [vmem:[#allocation3 + $0xe0] sm:$0xff] %v8560_v1  ;;  %560 = vst [vmem:[#allocation3 + $0xe8] sm:$0xff] %v8560_v1  ;;  %v8370_v61 = vld [vmem:[%s8637_s12 + $0x70] ss:$0 sps:$4 sm:$0xff]   ;;  %v8371_v62 = vld [vmem:[%s8637_s12 + $0x74] ss:$0 sps:$4 sm:$0xff]  }
  0x33   : > { %561 = vst [vmem:[#allocation3 + $0xf0] sm:$0xff] %v8560_v1  ;;  %562 = vst [vmem:[#allocation3 + $0xf8] sm:$0xff] %v8560_v1  ;;  %v8372_v63 = vld [vmem:[%s8637_s12 + $0x78] ss:$0 sps:$4 sm:$0xff]  }
  0x34   : > { %563 = vst [vmem:[#allocation3 + $0x100] sm:$0xff] %v8560_v1  ;;  %564 = vst [vmem:[#allocation3 + $0x108] sm:$0xff] %v8560_v1 }
  0x35   : > { %565 = vst [vmem:[#allocation3 + $0x110] sm:$0xff] %v8560_v1  ;;  %566 = vst [vmem:[#allocation3 + $0x118] sm:$0xff] %v8560_v1 }
  0x36   : > { %499 = vst [vmem:[#allocation2 + $0x10] sm:$0xf0] %v8646_v0  ;;  %500 = vst [vmem:[#allocation2 + $0x18] sm:$0xf] %v8311_v2  ;;  %v8373_v0 = vld [vmem:[%s8637_s12 + $0x7c] ss:$0 sps:$4 sm:$0xff]  }
  0x37   : > { %501 = vst [vmem:[#allocation2 + $0x20] sm:$0xf0] %v8312_v3  ;;  %502 = vst [vmem:[#allocation2 + $0x28] sm:$0xf] %v8313_v4 }
  0x38   : > { %503 = vst [vmem:[#allocation2 + $0x30] sm:$0xf0] %v8314_v5  ;;  %504 = vst [vmem:[#allocation2 + $0x38] sm:$0xf] %v8315_v6 }
  0x39   : > { %505 = vst [vmem:[#allocation2 + $0x40] sm:$0xf0] %v8316_v7  ;;  %506 = vst [vmem:[#allocation2 + $0x48] sm:$0xf] %v8317_v8 }
  0x3a   : > { %507 = vst [vmem:[#allocation2 + $0x50] sm:$0xf0] %v8318_v9  ;;  %508 = vst [vmem:[#allocation2 + $0x58] sm:$0xf] %v8319_v10 }
  0x3b   : > { %509 = vst [vmem:[#allocation2 + $0x60] sm:$0xf0] %v8320_v11  ;;  %510 = vst [vmem:[#allocation2 + $0x68] sm:$0xf] %v8321_v12 }
  0x3c   : > { %511 = vst [vmem:[#allocation2 + $0x70] sm:$0xf0] %v8322_v13  ;;  %512 = vst [vmem:[#allocation2 + $0x78] sm:$0xf] %v8323_v14 }
  0x3d   : > { %513 = vst [vmem:[#allocation2 + $0x80] sm:$0xf0] %v8324_v15  ;;  %514 = vst [vmem:[#allocation2 + $0x88] sm:$0xf] %v8325_v16 }
  0x3e   : > { %515 = vst [vmem:[#allocation2 + $0x90] sm:$0xf0] %v8326_v17  ;;  %516 = vst [vmem:[#allocation2 + $0x98] sm:$0xf] %v8327_v18 }
  0x3f   : > { %517 = vst [vmem:[#allocation2 + $0xa0] sm:$0xf0] %v8328_v19  ;;  %518 = vst [vmem:[#allocation2 + $0xa8] sm:$0xf] %v8329_v20 }
  0x40   : > { %519 = vst [vmem:[#allocation2 + $0xb0] sm:$0xf0] %v8330_v21  ;;  %520 = vst [vmem:[#allocation2 + $0xb8] sm:$0xf] %v8331_v22 }
  0x41   : > { %521 = vst [vmem:[#allocation2 + $0xc0] sm:$0xf0] %v8332_v23  ;;  %522 = vst [vmem:[#allocation2 + $0xc8] sm:$0xf] %v8333_v24 }
  0x42   : > { %523 = vst [vmem:[#allocation2 + $0xd0] sm:$0xf0] %v8334_v25  ;;  %524 = vst [vmem:[#allocation2 + $0xd8] sm:$0xf] %v8335_v26 }
  0x43   : > { %525 = vst [vmem:[#allocation2 + $0xe0] sm:$0xf0] %v8336_v27  ;;  %526 = vst [vmem:[#allocation2 + $0xe8] sm:$0xf] %v8337_v28 }
  0x44   : > { %527 = vst [vmem:[#allocation2 + $0xf0] sm:$0xf0] %v8338_v29  ;;  %528 = vst [vmem:[#allocation2 + $0xf8] sm:$0xf] %v8339_v30 }
  0x45   : > { %529 = vst [vmem:[#allocation2 + $0x100] sm:$0xf0] %v8340_v31  ;;  %530 = vst [vmem:[#allocation2 + $0x108] sm:$0xf] %v8341_v32 }
  0x46   : > { %728 = vst [vmem:[#allocation3 + $0x10] sm:$0xf0] %v8342_v33  ;;  %729 = vst [vmem:[#allocation3 + $0x18] sm:$0xf] %v8343_v34 }
  0x47   : > { %730 = vst [vmem:[#allocation3 + $0x20] sm:$0xf0] %v8344_v35  ;;  %731 = vst [vmem:[#allocation3 + $0x28] sm:$0xf] %v8345_v36 }
  0x48   : > { %732 = vst [vmem:[#allocation3 + $0x30] sm:$0xf0] %v8346_v37  ;;  %733 = vst [vmem:[#allocation3 + $0x38] sm:$0xf] %v8347_v38 }
  0x49   : > { %734 = vst [vmem:[#allocation3 + $0x40] sm:$0xf0] %v8348_v39  ;;  %735 = vst [vmem:[#allocation3 + $0x48] sm:$0xf] %v8349_v40 }
  0x4a   : > { %736 = vst [vmem:[#allocation3 + $0x50] sm:$0xf0] %v8350_v41  ;;  %737 = vst [vmem:[#allocation3 + $0x58] sm:$0xf] %v8351_v42 }
  0x4b   : > { %738 = vst [vmem:[#allocation3 + $0x60] sm:$0xf0] %v8352_v43  ;;  %739 = vst [vmem:[#allocation3 + $0x68] sm:$0xf] %v8353_v44 }
  0x4c   : > { %740 = vst [vmem:[#allocation3 + $0x70] sm:$0xf0] %v8354_v45  ;;  %741 = vst [vmem:[#allocation3 + $0x78] sm:$0xf] %v8355_v46 }
  0x4d   : > { %742 = vst [vmem:[#allocation3 + $0x80] sm:$0xf0] %v8356_v47  ;;  %743 = vst [vmem:[#allocation3 + $0x88] sm:$0xf] %v8357_v48 }
  0x4e   : > { %744 = vst [vmem:[#allocation3 + $0x90] sm:$0xf0] %v8358_v49  ;;  %745 = vst [vmem:[#allocation3 + $0x98] sm:$0xf] %v8359_v50 }
  0x4f   : > { %746 = vst [vmem:[#allocation3 + $0xa0] sm:$0xf0] %v8360_v51  ;;  %747 = vst [vmem:[#allocation3 + $0xa8] sm:$0xf] %v8361_v52 }
  0x50   : > { %748 = vst [vmem:[#allocation3 + $0xb0] sm:$0xf0] %v8362_v53  ;;  %749 = vst [vmem:[#allocation3 + $0xb8] sm:$0xf] %v8363_v54 }
  0x51   : > { %750 = vst [vmem:[#allocation3 + $0xc0] sm:$0xf0] %v8364_v55  ;;  %751 = vst [vmem:[#allocation3 + $0xc8] sm:$0xf] %v8365_v56 }
  0x52   : > { %752 = vst [vmem:[#allocation3 + $0xd0] sm:$0xf0] %v8366_v57  ;;  %753 = vst [vmem:[#allocation3 + $0xd8] sm:$0xf] %v8367_v58 }
  0x53   : > { %754 = vst [vmem:[#allocation3 + $0xe0] sm:$0xf0] %v8368_v59  ;;  %755 = vst [vmem:[#allocation3 + $0xe8] sm:$0xf] %v8369_v60 }
  0x54   : > { %756 = vst [vmem:[#allocation3 + $0xf0] sm:$0xf0] %v8370_v61  ;;  %757 = vst [vmem:[#allocation3 + $0xf8] sm:$0xf] %v8371_v62 }
  0x55   : > { %758 = vst [vmem:[#allocation3 + $0x100] sm:$0xf0] %v8372_v63  ;;  %759 = vst [vmem:[#allocation3 + $0x108] sm:$0xf] %v8373_v0 }
  0x56 PF: > { %v8374_v1 = vld [vmem:[%s10158_s2 + $0x40] sm:$0xff]   ;;  %v8376_v3 = vld [vmem:[%s10158_s2 + $0x48] sm:$0xff]   ;;  %v8378_v5 = vld [vmem:[%s10158_s2 + $0x50] sm:$0xff]   ;;  %s7064_s17 = sshll.u32 %s8542_s21, 7  ;;  %vm965_vm0 = vcmask 1043456  }
  0x57   : > { %v8375_v2 = vld [vmem:[%s10159_s3] sm:$0xff]   ;;  %7421 = vmatprep.subr.bf16.mxu1 %v8374_v1  ;;  %v8377_v4 = vld [vmem:[%s10159_s3 + $0x8] sm:$0xff]   ;;  %v8379_v6 = vld [vmem:[%s10159_s3 + $0x10] sm:$0xff]   ;;  %s8821_s8 = scalar_lea.vmem [#allocation2], %s7064_s17  ;;  %s8831_s9 = scalar_lea.vmem [#allocation3], %s7064_s17 }
  0x58   : > { %7709 = vmatprep.subr.bf16.mxu0 %v8375_v2  ;;  %7422 = vmatpush3.bf16.msra.mxu1 %v8374_v1  ;;  %v8380_v7 = vld [vmem:[%s10158_s2 + $0x58] sm:$0xff]   ;;  %v8382_v9 = vld [vmem:[%s10158_s2 + $0x60] sm:$0xff]   ;;  %v8384_v11 = vld [vmem:[%s10158_s2 + $0x68] sm:$0xff]   ;;  %vm780_vm1 = vsmask.f32 4352 }
  0x59   : > { %7710 = vmatpush3.bf16.msra.mxu0 %v8375_v2  ;;  %7423 = vmatprep.subr.bf16.mxu1 %v8376_v3  ;;  %v8381_v8 = vld [vmem:[%s10159_s3 + $0x18] sm:$0xff]   ;;  %v8383_v10 = vld [vmem:[%s10159_s3 + $0x20] sm:$0xff]   ;;  %v8385_v12 = vld [vmem:[%s10159_s3 + $0x28] sm:$0xff]   ;;  %vm1313_vm2 = vsmask.f32 3328 }
  0x5a   : > { %7711 = vmatprep.subr.bf16.mxu0 %v8377_v4  ;;  %v8386_v24 = vld [vmem:[%s10158_s2 + $0x70] sm:$0xff]   ;;  %v8388_v35 = vld [vmem:[%s10158_s2 + $0x78] sm:$0xff]   ;;  %v8390_v58 = vld [vmem:[%s10158_s2] sm:$0xff]  }
  0x5b   : > { %v8387_v33 = vld [vmem:[%s10159_s3 + $0x30] sm:$0xff]   ;;  %v8389_v46 = vld [vmem:[%s10159_s3 + $0x38] sm:$0xff]   ;;  %v8391_v61 = vld [vmem:[%s10159_s3 + $0x40] sm:$0xff]  }
  0x5c   : > { %7424 = vmatpush3.bf16.msra.mxu1 %v8376_v3  ;;  %v3450_v17 = vld [vmem:[%s8831_s9] sm:$0xf8]  ;;  %v8835_v18 = vld [vmem:[%s8831_s9 + $0x8] sm:$0xf]  ;;  %v3452_v40 = vld [vmem:[%s8831_s9 + $0x10] sm:$0xf8] }
  0x5d   : > { %7712 = vmatpush3.bf16.msra.mxu0 %v8377_v4  ;;  %7425 = vmatprep.subr.bf16.mxu1 %v8378_v5  ;;  %v8824_v13 = vld [vmem:[%s8821_s8 + $0x8] sm:$0xf]  ;;  %v8827_v14 = vld [vmem:[%s8821_s8] sm:$0xf0]  ;;  %v3467_v19 = vshrl.u32 %v3450_v17, 16  ;;  %v3470_v20 = vshll.u32 %v3450_v17, 16 }
  0x5e   : > { %7713 = vmatprep.subr.bf16.mxu0 %v8379_v6  ;;  %v966_v15 = vrot.slane %v8827_v14, 4  ;;  %v967_v16 = vrot.slane %v8824_v13, 4  ;;  %v3475_v21 = vshrl.u32 %v8835_v18, 16  ;;  %v3478_v22 = vshll.u32 %v8835_v18, 16  ;;  %v8840_v23 = vld [vmem:[%s8821_s8 + $0x18] sm:$0xf] }
  0x5f   : > { %v807_v26 = vshrl.u32 %v8840_v23, 16  ;;  %v810_v27 = vshll.u32 %v8840_v23, 16  ;;  %v8849_v28 = vld [vmem:[%s8821_s8 + $0x10] sm:$0xf0]  ;;  %v3469_v29 = vrot.slane %v3467_v19, 3  ;;  %v3472_v30 = vrot.slane %v3470_v20, 4 }
  0x60   : > { %7426 = vmatpush3.bf16.msra.mxu1 %v8378_v5  ;;  %v968_v25 = vsel %vm965_vm0, %v966_v15, %v967_v16  ;;  %v3477_v31 = vrot.slane %v3475_v21, 3  ;;  %v3480_v32 = vrot.slane %v3478_v22, 4  ;;  %v970_v34 = vrot.slane %v8840_v23, 4  ;;  %v8864_v41 = vld [vmem:[%s8831_s9 + $0x18] sm:$0xf]  ;;  %v8393_v20 = vld [vmem:[%s10159_s3 + $0x48] sm:$0xff]  }
  0x61   : > { %7714 = vmatpush3.bf16.msra.mxu0 %v8379_v6  ;;  %7427 = vmatprep.subr.bf16.mxu1 %v8380_v7  ;;  %v3473_v36 = vor.u32 %v3472_v30, %v3469_v29  ;;  %v8858_v38 = vrot.slane %v807_v26, 3  ;;  %v8860_v39 = vrot.slane %v810_v27, 4  ;;  %v969_v42 = vrot.slane %v8849_v28, 4  ;;  %v8876_v55 = vld [vmem:[%s8821_s8 + $0x28] sm:$0xf] }
  0x62   : > { %7715 = vmatprep.subr.bf16.mxu0 %v8381_v8  ;;  %7437 = vmatprep.mubr.bf16.mxu1 %v968_v25  ;;  %v3481_v37 = vor.u32 %v3480_v32, %v3477_v31  ;;  %v1332_v43 = vshrl.u32 %v8849_v28, 16  ;;  %v3484_v44 = vshrl.u32 %v3452_v40, 16  ;;  %v3487_v45 = vshll.u32 %v3452_v40, 16  ;;  %v8879_v56 = vld [vmem:[%s8821_s8 + $0x20] sm:$0xf0]  ;;  %v8395_v40 = vld [vmem:[%s10159_s3 + $0x50] sm:$0xff]  }
  0x63   : > { %v1335_v48 = vshll.u32 %v8849_v28, 16  ;;  %v3492_v49 = vshrl.u32 %v8864_v41, 16  ;;  %v3495_v50 = vshll.u32 %v8864_v41, 16  ;;  %v3454_v57 = vld [vmem:[%s8831_s9 + $0x20] sm:$0xf8]  ;;  %v972_v62 = vrot.slane %v8879_v56, 4 }
  0x64   : > { %7428 = vmatpush3.bf16.msra.mxu1 %v8380_v7  ;;  %v3482_v47 = vsel %vm780_vm1, %v3473_v36, %v3481_v37  ;;  %v3486_v51 = vrot.slane %v3484_v44, 3  ;;  %v3489_v52 = vrot.slane %v3487_v45, 4  ;;  %v8890_v63 = vld [vmem:[%s8831_s9 + $0x28] sm:$0xf]  ;;  %v3501_v0 = vshrl.u32 %v3454_v57, 16 }
  0x65   : > { %7716 = vmatpush3.bf16.msra.mxu0 %v8381_v8  ;;  %7429 = vmatprep.subr.bf16.mxu1 %v8382_v9  ;;  %v3494_v53 = vrot.slane %v3492_v49, 3  ;;  %v3497_v54 = vrot.slane %v3495_v50, 4  ;;  %v973_v1 = vrot.slane %v8876_v55, 4  ;;  %v3504_v2 = vshll.u32 %v3454_v57, 16  ;;  %v8896_v5 = vld [vmem:[%s8821_s8 + $0x38] sm:$0xf] }
  0x66   : > { %7717 = vmatprep.subr.bf16.mxu0 %v8383_v10  ;;  %7725 = vmatprep.mubr.bf16.mxu0 %v3482_v47  ;;  %v3490_v59 = vor.u32 %v3489_v52, %v3486_v51  ;;  %v3509_v3 = vshrl.u32 %v8890_v63, 16  ;;  %v3512_v4 = vshll.u32 %v8890_v63, 16  ;;  %v8898_v6 = vrot.slane %v1332_v43, 4  ;;  %v8901_v8 = vld [vmem:[%s8821_s8 + $0x30] sm:$0xf0]  ;;  %v8396_v47 = vld [vmem:[%s10158_s2 + $0x18] sm:$0xff]  }
  0x67   : > { %v3498_v60 = vor.u32 %v3497_v54, %v3494_v53  ;;  %v3503_v7 = vrot.slane %v3501_v0, 3  ;;  %v3456_v17 = vld [vmem:[%s8831_s9 + $0x30] sm:$0xf8]  ;;  %v8910_v19 = vld [vmem:[%s8831_s9 + $0x38] sm:$0xf]  ;;  %v974_v21 = vsel %vm965_vm0, %v972_v62, %v973_v1  ;;  %v976_v25 = vrot.slane %v8896_v5, 4 }
  0x68   : > { %7430 = vmatpush3.bf16.msra.mxu1 %v8382_v9  ;;  %v971_v9 = vsel %vm965_vm0, %v969_v42, %v970_v34  ;;  %v3514_v15 = vrot.slane %v3512_v4, 4  ;;  %v3521_v26 = vshll.u32 %v3456_v17, 16  ;;  %v3526_v27 = vshrl.u32 %v8910_v19, 16  ;;  %v8925_v37 = vld [vmem:[%s8821_s8 + $0x48] sm:$0xf]  ;;  %v8397_v54 = vld [vmem:[%s10159_s3 + $0x58] sm:$0xff]  }
  0x69   : > { %7718 = vmatpush3.bf16.msra.mxu0 %v8383_v10  ;;  %7431 = vmatprep.subr.bf16.mxu1 %v8384_v11  ;;  %v8392_v10 = vld [vmem:[%s10158_s2 + $0x8] sm:$0xff]   ;;  %v3499_v16 = vsel %vm780_vm1, %v3490_v59, %v3498_v60  ;;  %v3529_v29 = vshll.u32 %v8910_v19, 16  ;;  %v975_v31 = vrot.slane %v8901_v8, 4  ;;  %v8931_v42 = vld [vmem:[%s8821_s8 + $0x40] sm:$0xf0]  ;;  %v979_v43 = vrot.slane %v8925_v37, 4 }
  0x6a   : > { %7719 = vmatprep.subr.bf16.mxu0 %v8385_v12  ;;  %v3523_v34 = vrot.slane %v3521_v26, 4  ;;  %v3458_v44 = vld [vmem:[%s8831_s9 + $0x40] sm:$0xf8]  ;;  %v978_v49 = vrot.slane %v8931_v42, 4  ;;  %v8940_v50 = vld [vmem:[%s8831_s9 + $0x48] sm:$0xf] }
  0x6b   : > { %v3531_v36 = vrot.slane %v3529_v29, 4  ;;  %v3535_v51 = vshrl.u32 %v3458_v44, 16  ;;  %v8943_v52 = vld [vmem:[%s8821_s8 + $0x58] sm:$0xf]  ;;  %v977_v53 = vsel %vm965_vm0, %v975_v31, %v976_v25  ;;  %v3538_v57 = vshll.u32 %v3458_v44, 16 }
  0x6c   : > { %7432 = vmatpush3.bf16.msra.mxu1 %v8384_v11  ;;  %v3506_v11 = vrot.slane %v3504_v2, 4  ;;  %v3546_v59 = vshll.u32 %v8940_v50, 16  ;;  %v8952_v60 = vld [vmem:[%s8821_s8 + $0x50] sm:$0xf0]  ;;  %v982_v0 = vrot.slane %v8943_v52, 4 }
  0x6d   : > { %7720 = vmatpush3.bf16.msra.mxu0 %v8385_v12  ;;  %7433 = vmatprep.subr.bf16.mxu1 %v8386_v24  ;;  %v3511_v12 = vrot.slane %v3509_v3, 3  ;;  %v3537_v62 = vrot.slane %v3535_v51, 3  ;;  %v3540_v1 = vrot.slane %v3538_v57, 4  ;;  %v981_v4 = vrot.slane %v8952_v60, 4  ;;  %v8972_v29 = vld [vmem:[%s8821_s8 + $0x68] sm:$0xf] }
  0x6e   : > { %7721 = vmatprep.subr.bf16.mxu0 %v8387_v33  ;;  %v3507_v22 = vor.u32 %v3506_v11, %v3503_v7  ;;  %v3548_v3 = vrot.slane %v3546_v59, 4  ;;  %v3460_v7 = vld [vmem:[%s8831_s9 + $0x50] sm:$0xf8]  ;;  %v8963_v11 = vld [vmem:[%s8831_s9 + $0x58] sm:$0xf] }
  0x6f   : > { %v3515_v23 = vor.u32 %v3514_v15, %v3511_v12  ;;  %v3552_v12 = vshrl.u32 %v3460_v7, 16  ;;  %v3555_v15 = vshll.u32 %v3460_v7, 16  ;;  %v8988_v44 = vld [vmem:[%s8831_s9 + $0x68] sm:$0xf]  ;;  %v9004_v7 = vld [vmem:[%s8831_s9 + $0x78] sm:$0xf] }
  0x70   : > { %7434 = vmatpush3.bf16.msra.mxu1 %v8386_v24  ;;  %v3518_v24 = vshrl.u32 %v3456_v17, 16  ;;  %v3580_v51 = vshll.u32 %v8988_v44, 16 }
  0x71   : > { %7722 = vmatpush3.bf16.msra.mxu0 %v8387_v33  ;;  %7435 = vmatprep.subr.bf16.mxu1 %v8388_v35  ;;  %v3516_v30 = vsel %vm780_vm1, %v3507_v22, %v3515_v23  ;;  %v8394_v33 = vld [vmem:[%s10158_s2 + $0x10] sm:$0xff]   ;;  %v8399_v22 = vld [vmem:[%s10159_s3 + $0x60] sm:$0xff]   ;;  %v3554_v23 = vrot.slane %v3552_v12, 3 }
  0x72   : > { %7723 = vmatprep.subr.bf16.mxu0 %v8389_v46  ;;  %v3520_v32 = vrot.slane %v3518_v24, 3  ;;  %v3557_v24 = vrot.slane %v3555_v15, 4 }
  0x74   : > { %7436 = vmatpush3.bf16.msra.mxu1 %v8388_v35  ;;  %v3528_v35 = vrot.slane %v3526_v27, 3  ;;  %v3524_v45 = vor.u32 %v3523_v34, %v3520_v32  ;;  %v3558_v31 = vor.u32 %v3557_v24, %v3554_v23  ;;  %v8400_v32 = vld [vmem:[%s10158_s2 + $0x28] sm:$0xff]   ;;  %v985_v34 = vrot.slane %v8972_v29, 4 }
  0x75   : > { %7724 = vmatpush3.bf16.msra.mxu0 %v8389_v46  ;;  %7453 = vmatprep.subr.bf16.mxu1 %v8390_v58 }
  0x76   : > { %7741 = vmatprep.subr.bf16.mxu0 %v8391_v61  ;;  %v3532_v46 = vor.u32 %v3531_v36, %v3528_v35  ;;  %v3462_v35 = vld [vmem:[%s8831_s9 + $0x60] sm:$0xf8] }
  0x77   : > { %7438 = vmatmul.mubr.bf16.vlgmr.msra.gmra.mrb[0].mxu1 %v971_v9  ;;  %v980_v9 = vsel %vm965_vm0, %v978_v49, %v979_v43  ;;  %v3577_v49 = vshrl.u32 %v8988_v44, 16 }
  0x78   : > { %7726 = vmatmul.mubr.bf16.vlgmr.msra.gmra.mrb[0].mxu0 %v3499_v16  ;;  %7454 = vmatpush3.bf16.msra.mxu1 %v8390_v58  ;;  %v3543_v58 = vshrl.u32 %v8940_v50, 16  ;;  %v3541_v16 = vor.u32 %v3540_v1, %v3537_v62 }
  0x79   : > { %7742 = vmatpush3.bf16.msra.mxu0 %v8391_v61  ;;  %7455 = vmatprep.subr.bf16.mxu1 %v8392_v10  ;;  %v3533_v61 = vsel %vm780_vm1, %v3524_v45, %v3532_v46  ;;  %v3569_v45 = vshrl.u32 %v3462_v35, 16  ;;  %v3572_v46 = vshll.u32 %v3462_v35, 16  ;;  %v3579_v62 = vrot.slane %v3577_v49, 3 }
  0x7a   : > { %7743 = vmatprep.subr.bf16.mxu0 %v8393_v20  ;;  %7441 = vmatprep.mubr.bf16.mxu1 %v974_v21  ;;  %v3545_v2 = vrot.slane %v3543_v58, 3  ;;  %v3563_v21 = vshll.u32 %v8963_v11, 16 }
  0x7b   : > { %7729 = vmatprep.mubr.bf16.mxu0 %v3516_v30  ;;  %v983_v30 = vsel %vm965_vm0, %v981_v4, %v982_v0  ;;  %v3571_v59 = vrot.slane %v3569_v45, 3 }
  0x7c   : > { %7456 = vmatpush3.bf16.msra.mxu1 %v8392_v10  ;;  %v8398_v10 = vld [vmem:[%s10158_s2 + $0x20] sm:$0xff]   ;;  %v3549_v17 = vor.u32 %v3548_v3, %v3545_v2  ;;  %v3565_v27 = vrot.slane %v3563_v21, 4  ;;  %v8402_v2 = vld [vmem:[%s10158_s2 + $0x30] sm:$0xff]  }
  0x7d   : > { %7744 = vmatpush3.bf16.msra.mxu0 %v8393_v20  ;;  %7457 = vmatprep.subr.bf16.mxu1 %v8394_v33  ;;  %v3560_v20 = vshrl.u32 %v8963_v11, 16  ;;  %v3464_v3 = vld [vmem:[%s8831_s9 + $0x70] sm:$0xf8] }
  0x7e   : > { %7745 = vmatprep.subr.bf16.mxu0 %v8395_v40  ;;  %v3550_v25 = vsel %vm780_vm1, %v3541_v16, %v3549_v17  ;;  %v3589_v12 = vshll.u32 %v3464_v3, 16  ;;  %v3594_v16 = vshrl.u32 %v9004_v7, 16  ;;  %v3597_v17 = vshll.u32 %v9004_v7, 16 }
  0x7f   : > { %7442 = vmatmul.mubr.bf16.gmra.mrb[4].mxu1 %v977_v53  ;;  %v3562_v26 = vrot.slane %v3560_v20, 3  ;;  %v8993_v53 = vld [vmem:[%s8821_s8 + $0x78] sm:$0xf]  ;;  %v9010_v20 = vrot.slane %v1335_v48, 5 }
  0x80   : > { %7730 = vmatmul.mubr.bf16.gmra.mrb[4].mxu0 %v3533_v61  ;;  %7458 = vmatpush3.bf16.msra.mxu1 %v8394_v33  ;;  %v8979_v33 = vld [vmem:[%s8821_s8 + $0x60] sm:$0xf0]  ;;  %v3574_v61 = vrot.slane %v3572_v46, 4  ;;  %v988_v1 = vrot.slane %v8993_v53, 4  ;;  %v3591_v21 = vrot.slane %v3589_v12, 4  ;;  %v3596_v24 = vrot.slane %v3594_v16, 3 }
  0x81   : > { %7746 = vmatpush3.bf16.msra.mxu0 %v8395_v40  ;;  %7459 = vmatprep.subr.bf16.mxu1 %v8396_v47  ;;  %v3566_v36 = vor.u32 %v3565_v27, %v3562_v26  ;;  %v8401_v40 = vld [vmem:[%s10159_s3 + $0x68] sm:$0xff]   ;;  %v984_v43 = vrot.slane %v8979_v33, 4  ;;  %v8404_v26 = vld [vmem:[%s10158_s2 + $0x38] sm:$0xff]   ;;  %v764_v27 = vld [vmem:[%s8821_s8] sm:$0xf8] }
  0x82   : > { %7747 = vmatprep.subr.bf16.mxu0 %v8397_v54  ;;  %7445 = vmatprep.mubr.bf16.mxu1 %v980_v9  ;;  %v3575_v4 = vor.u32 %v3574_v61, %v3571_v59  ;;  %v3586_v9 = vshrl.u32 %v3464_v3, 16  ;;  %v766_v46 = vld [vmem:[%s8821_s8 + $0x10] sm:$0xf8]  ;;  %v8406_v61 = vld [vmem:[%s10158_s2 + $0x80] sm:$0xff]  }
  0x83   : > { %7733 = vmatprep.mubr.bf16.mxu0 %v3550_v25  ;;  %v3567_v57 = vsel %vm780_vm1, %v3558_v31, %v3566_v36  ;;  %v986_v58 = vsel %vm965_vm0, %v984_v43, %v985_v34  ;;  %v3599_v25 = vrot.slane %v3597_v17, 4  ;;  %v793_v31 = vshll.u32 %v8824_v13, 16  ;;  %v9024_v34 = vld [vmem:[%s8831_s9] sm:$0xf0]  ;;  %v8405_v36 = vld [vmem:[%s10159_s3 + $0x78] sm:$0xff]  }
  0x84   : > { %7460 = vmatpush3.bf16.msra.mxu1 %v8396_v47  ;;  %v948_v47 = vld [vmem:[%s8821_s8 + $0x70] sm:$0xf0]  ;;  %v782_v43 = vshrl.u32 %v764_v27, 16  ;;  %v3811_v45 = vrot.slane %v9024_v34, 4  ;;  %v802_v59 = vshll.u32 %v766_v46, 16 }
  0x85   : > { %7748 = vmatpush3.bf16.msra.mxu0 %v8397_v54  ;;  %7461 = vmatprep.subr.bf16.mxu1 %v8398_v10  ;;  %v3582_v54 = vrot.slane %v3580_v51, 4  ;;  %v987_v0 = vrot.slane %v948_v47, 4  ;;  %v3600_v35 = vor.u32 %v3599_v25, %v3596_v24  ;;  %v795_v51 = vrot.slane %v793_v31, 4  ;;  %v9056_v24 = vld [vmem:[%s8831_s9 + $0x20] sm:$0xf0] }
  0x86   : > { %7749 = vmatprep.subr.bf16.mxu0 %v8399_v22  ;;  %v799_v47 = vshrl.u32 %v766_v46, 16  ;;  %v3818_v25 = vrot.slane %v8890_v63, 4  ;;  %v844_v46 = vshll.u32 %v8896_v5, 16 }
  0x87   : > { %7446 = vmatmul.mubr.bf16.gmra.mrb[8].mxu1 %v983_v30  ;;  %v3583_v15 = vor.u32 %v3582_v54, %v3579_v62  ;;  %v989_v28 = vsel %vm965_vm0, %v987_v0, %v988_v1  ;;  %v790_v30 = vshrl.u32 %v8824_v13, 16  ;;  %v3812_v13 = vrot.slane %v8835_v18, 4  ;;  %v9038_v1 = vld [vmem:[%s8831_s9 + $0x10] sm:$0xf0] }
  0x88   : > { %7734 = vmatmul.mubr.bf16.gmra.mrb[8].mxu0 %v3567_v57  ;;  %7462 = vmatpush3.bf16.msra.mxu1 %v8398_v10  ;;  %v3588_v10 = vrot.slane %v3586_v9, 3  ;;  %v784_v57 = vrot.slane %v782_v43, 3  ;;  %v801_v0 = vrot.slane %v799_v47, 3  ;;  %v3815_v18 = vrot.slane %v8864_v41, 4 }
  0x89   : > { %7750 = vmatpush3.bf16.msra.mxu0 %v8399_v22  ;;  %7463 = vmatprep.subr.bf16.mxu1 %v8400_v32  ;;  %v8403_v22 = vld [vmem:[%s10159_s3 + $0x70] sm:$0xff]   ;;  %v3584_v23 = vsel %vm780_vm1, %v3575_v4, %v3583_v15  ;;  %v792_v49 = vrot.slane %v790_v30, 3  ;;  %v3813_v54 = vsel %vm965_vm0, %v3811_v45, %v3812_v13  ;;  %v804_v4 = vrot.slane %v802_v59, 4 }
  0x8a   : > { %7751 = vmatprep.subr.bf16.mxu0 %v8401_v40  ;;  %7449 = vmatprep.mubr.bf16.mxu1 %v986_v58  ;;  %v3592_v48 = vor.u32 %v3591_v21, %v3588_v10  ;;  %v813_v9 = vor.u32 %v8860_v39, %v8858_v38  ;;  %v3814_v12 = vrot.slane %v9038_v1, 4  ;;  %v824_v15 = vshrl.u32 %v8876_v55, 16  ;;  %v8408_v38 = vld [vmem:[%s10158_s2 + $0x88] sm:$0xff]   ;;  %v768_v39 = vld [vmem:[%s8821_s8 + $0x20] sm:$0xf8] }
  0x8b   : > { %7737 = vmatprep.mubr.bf16.mxu0 %v3584_v23  ;;  %v796_v62 = vor.u32 %v795_v51, %v792_v49  ;;  %v805_v16 = vor.u32 %v804_v4, %v801_v0  ;;  %v827_v10 = vshll.u32 %v8876_v55, 16  ;;  %v816_v21 = vshrl.u32 %v768_v39, 16  ;;  %v9069_v49 = vld [vmem:[%s8831_s9 + $0x30] sm:$0xf0] }
  0x8c   : > { %7464 = vmatpush3.bf16.msra.mxu1 %v8400_v32  ;;  %v785_v32 = vshll.u32 %v764_v27, 16  ;;  %v3816_v17 = vsel %vm965_vm0, %v3814_v12, %v3815_v18  ;;  %v826_v23 = vrot.slane %v824_v15, 3  ;;  %v3817_v55 = vrot.slane %v9056_v24, 4  ;;  %v9088_v15 = vld [vmem:[%s8831_s9 + $0x40] sm:$0xf0] }
  0x8d   : > { %7752 = vmatpush3.bf16.msra.mxu0 %v8401_v40  ;;  %7465 = vmatprep.subr.bf16.mxu1 %v8402_v2  ;;  %v3601_v40 = vsel %vm780_vm1, %v3592_v48, %v3600_v35  ;;  %v8409_v48 = vld [vmem:[%s10159_s3 + $0x88] sm:$0xff]   ;;  %v829_v27 = vrot.slane %v827_v10, 4  ;;  %v841_v30 = vshrl.u32 %v8896_v5, 16  ;;  %v818_v31 = vrot.slane %v816_v21, 3 }
  0x8e   : > { %7753 = vmatprep.subr.bf16.mxu0 %v8403_v22  ;;  %v787_v58 = vrot.slane %v785_v32, 4  ;;  %v3819_v32 = vsel %vm965_vm0, %v3817_v55, %v3818_v25  ;;  %v3821_v59 = vrot.slane %v8910_v19, 4  ;;  %v8412_v19 = vld [vmem:[%s10158_s2 + $0x98] sm:$0xff]   ;;  %v861_v4 = vshll.u32 %v8925_v37, 16  ;;  %v9101_v55 = vld [vmem:[%s8831_s9 + $0x50] sm:$0xf0] }
  0x8f   : > { %7450 = vmatmul.mubr.bf16.gmra.mrb[12].mxu1 %v989_v28  ;;  %v814_v28 = vsel %vm780_vm1, %v805_v16, %v813_v9  ;;  %v843_v45 = vrot.slane %v841_v30, 3  ;;  %v875_v10 = vshrl.u32 %v8943_v52, 16 }
  0x90   : > { %7738 = vmatmul.mubr.bf16.gmra.mrb[12].mxu0 %v3601_v40  ;;  %7466 = vmatpush3.bf16.msra.mxu1 %v8402_v2  ;;  %v788_v3 = vor.u32 %v787_v58, %v784_v57  ;;  %v8407_v2 = vld [vmem:[%s10159_s3 + $0x80] sm:$0xff]   ;;  %v8410_v40 = vld [vmem:[%s10158_s2 + $0x90] sm:$0xff]   ;;  %v3820_v57 = vrot.slane %v9069_v49, 4  ;;  %v846_v58 = vrot.slane %v844_v46, 4  ;;  %v892_v46 = vshrl.u32 %v8972_v29, 16 }
  0x91   : > { %7754 = vmatpush3.bf16.msra.mxu0 %v8403_v22  ;;  %7467 = vmatprep.subr.bf16.mxu1 %v8404_v26  ;;  %v819_v22 = vshll.u32 %v768_v39, 16  ;;  %v863_v39 = vrot.slane %v861_v4, 4 }
  0x92   : > { %7755 = vmatprep.subr.bf16.mxu0 %v8405_v36  ;;  %7757 = vmatprep.mubr.bf16.mxu0 %v3813_v54  ;;  %v797_v41 = vsel %vm780_vm1, %v788_v3, %v796_v62  ;;  %v8411_v62 = vld [vmem:[%s10159_s3 + $0x90] sm:$0xff]   ;;  %v858_v54 = vshrl.u32 %v8925_v37, 16  ;;  %v847_v0 = vor.u32 %v846_v58, %v843_v45  ;;  %v3822_v18 = vsel %vm965_vm0, %v3820_v57, %v3821_v59  ;;  %v772_v3 = vld [vmem:[%s8821_s8 + $0x40] sm:$0xf8] }
  0x93   : > { %7469 = vmatprep.mubr.bf16.mxu1 %v797_v41  ;;  %v821_v35 = vrot.slane %v819_v22, 4  ;;  %v850_v9 = vshrl.u32 %v772_v3, 16  ;;  %v853_v12 = vshll.u32 %v772_v3, 16  ;;  %v3824_v41 = vrot.slane %v8940_v50, 4  ;;  %v8415_v45 = vld [vmem:[%s10159_s3 + $0xa0] sm:$0xff]  }
  0x94   : > { %7468 = vmatpush3.bf16.msra.mxu1 %v8404_v26  ;;  %v770_v26 = vld [vmem:[%s8821_s8 + $0x30] sm:$0xf8]  ;;  %v3823_v37 = vrot.slane %v9088_v15, 4  ;;  %v894_v59 = vrot.slane %v892_v46, 3  ;;  %v4033_v46 = vshll.u32 %v9024_v34, 16 }
  0x95   : > { %7756 = vmatpush3.bf16.msra.mxu0 %v8405_v36  ;;  %7485 = vmatprep.subr.bf16.mxu1 %v8406_v61  ;;  %v833_v43 = vshrl.u32 %v770_v26, 16  ;;  %v836_v63 = vshll.u32 %v770_v26, 16  ;;  %v830_v36 = vor.u32 %v829_v27, %v826_v23  ;;  %v822_v51 = vor.u32 %v821_v35, %v818_v31  ;;  %v8414_v35 = vld [vmem:[%s10158_s2 + $0xa0] sm:$0xff]  }
  0x96   : > { %7773 = vmatprep.subr.bf16.mxu0 %v8407_v2  ;;  %v852_v21 = vrot.slane %v850_v9, 3  ;;  %v855_v22 = vrot.slane %v853_v12, 4  ;;  %v878_v27 = vshll.u32 %v8943_v52, 16 }
  0x97   : > { %7470 = vmatmul.mubr.bf16.vlgmr.msra.gmra.mrb[0].mxu1 %v814_v28  ;;  %v835_v13 = vrot.slane %v833_v43, 3  ;;  %v838_v47 = vrot.slane %v836_v63, 4  ;;  %v831_v5 = vsel %vm780_vm1, %v822_v51, %v830_v36  ;;  %v3825_v28 = vsel %vm965_vm0, %v3823_v37, %v3824_v41 }
  0x98   : > { %7758 = vmatmul.mubr.bf16.vlgmr.msra.gmra.mrb[0].mxu0 %v3816_v17  ;;  %7486 = vmatpush3.bf16.msra.mxu1 %v8406_v61  ;;  %v8413_v17 = vld [vmem:[%s10159_s3 + $0x98] sm:$0xff]   ;;  %v856_v26 = vor.u32 %v855_v22, %v852_v21  ;;  %v3826_v43 = vrot.slane %v9101_v55, 4  ;;  %v880_v63 = vrot.slane %v878_v27, 4  ;;  %v3827_v36 = vrot.slane %v8963_v11, 4  ;;  %v8416_v11 = vld [vmem:[%s10158_s2 + $0xa8] sm:$0xff]  }
  0x99   : > { %7774 = vmatpush3.bf16.msra.mxu0 %v8407_v2  ;;  %7487 = vmatprep.subr.bf16.mxu1 %v8408_v38  ;;  %v839_v61 = vor.u32 %v838_v47, %v835_v13  ;;  %v860_v2 = vrot.slane %v858_v54, 3  ;;  %v776_v47 = vld [vmem:[%s8821_s8 + $0x60] sm:$0xf8]  ;;  %v8417_v54 = vld [vmem:[%s10159_s3 + $0xa8] sm:$0xff]  }
  0x9a   : > { %7775 = vmatprep.subr.bf16.mxu0 %v8409_v48  ;;  %7761 = vmatprep.mubr.bf16.mxu0 %v3819_v32  ;;  %v3828_v13 = vsel %vm965_vm0, %v3826_v43, %v3827_v36  ;;  %v884_v57 = vshrl.u32 %v776_v47, 16  ;;  %v887_v58 = vshll.u32 %v776_v47, 16 }
  0x9b   : > { %7473 = vmatprep.mubr.bf16.mxu1 %v831_v5  ;;  %v848_v16 = vsel %vm780_vm1, %v839_v61, %v847_v0  ;;  %v864_v25 = vor.u32 %v863_v39, %v860_v2  ;;  %v9120_v5 = vld [vmem:[%s8831_s9 + $0x60] sm:$0xf0]  ;;  %v3830_v61 = vrot.slane %v8988_v44, 4 }
  0x9c   : > { %7488 = vmatpush3.bf16.msra.mxu1 %v8408_v38  ;;  %v774_v38 = vld [vmem:[%s8821_s8 + $0x50] sm:$0xf8]  ;;  %v886_v3 = vrot.slane %v884_v57, 3  ;;  %v889_v4 = vrot.slane %v887_v58, 4 }
  0x9d   : > { %7776 = vmatpush3.bf16.msra.mxu0 %v8409_v48  ;;  %7489 = vmatprep.subr.bf16.mxu1 %v8410_v40  ;;  %v867_v23 = vshrl.u32 %v774_v38, 16  ;;  %v870_v50 = vshll.u32 %v774_v38, 16  ;;  %v877_v48 = vrot.slane %v875_v10, 3  ;;  %v865_v52 = vsel %vm780_vm1, %v856_v26, %v864_v25  ;;  %v8418_v10 = vld [vmem:[%s10158_s2 + $0xb0] sm:$0xff]   ;;  %v1305_v26 = vld [vmem:[%s8821_s8 + $0x8] sm:$0x1f] }
  0x9e   : > { %7777 = vmatprep.subr.bf16.mxu0 %v8411_v62  ;;  %v890_v39 = vor.u32 %v889_v4, %v886_v3  ;;  %v8419_v25 = vld [vmem:[%s10159_s3 + $0xb0] sm:$0xff]   ;;  %v1323_v43 = vshrl.u32 %v1305_v26, 16  ;;  %v4022_v3 = vld [vmem:[%s8831_s9 + $0x18] sm:$0x1f]  ;;  %v4047_v4 = vshrl.u32 %v9038_v1, 16 }
  0x9f   : > { %7474 = vmatmul.mubr.bf16.gmra.mrb[4].mxu1 %v848_v16  ;;  %v869_v30 = vrot.slane %v867_v23, 3  ;;  %v872_v31 = vrot.slane %v870_v50, 4  ;;  %v881_v51 = vor.u32 %v880_v63, %v877_v48  ;;  %v912_v16 = vshll.u32 %v8993_v53, 16 }
  0xa0   : > { %7762 = vmatmul.mubr.bf16.gmra.mrb[4].mxu0 %v3822_v18  ;;  %7490 = vmatpush3.bf16.msra.mxu1 %v8410_v40  ;;  %v895_v40 = vshll.u32 %v8972_v29, 16  ;;  %v3829_v29 = vrot.slane %v9120_v5, 4  ;;  %v778_v18 = vld [vmem:[%s8821_s8 + $0x70] sm:$0xf8]  ;;  %v3833_v23 = vrot.slane %v9004_v7, 4  ;;  %v1338_v7 = vor.u32 %v9010_v20, %v8898_v6  ;;  %v8425_v6 = vld [vmem:[%s10159_s3 + $0xc8] sm:$0xff]  }
  0xa1   : > { %7778 = vmatpush3.bf16.msra.mxu0 %v8411_v62  ;;  %7491 = vmatprep.subr.bf16.mxu1 %v8412_v19  ;;  %v873_v32 = vor.u32 %v872_v31, %v869_v30  ;;  %v901_v9 = vshrl.u32 %v778_v18, 16  ;;  %v904_v44 = vshll.u32 %v778_v18, 16  ;;  %v914_v22 = vrot.slane %v912_v16, 4  ;;  %v8420_v31 = vld [vmem:[%s10158_s2 + $0xb8] sm:$0xff]  }
  0xa2   : > { %7779 = vmatprep.subr.bf16.mxu0 %v8413_v17  ;;  %7765 = vmatprep.mubr.bf16.mxu0 %v3825_v28  ;;  %v897_v0 = vrot.slane %v895_v40, 4  ;;  %v3831_v2 = vsel %vm965_vm0, %v3829_v29, %v3830_v61  ;;  %v1315_v28 = vshrl.u32 %v8827_v14, 16  ;;  %v1318_v30 = vshll.u32 %v8827_v14, 16  ;;  %v8421_v14 = vld [vmem:[%s10159_s3 + $0xb8] sm:$0xff]  }
  0xa3   : > { %7477 = vmatprep.mubr.bf16.mxu1 %v865_v52  ;;  %v882_v62 = vsel %vm780_vm1, %v873_v32, %v881_v51  ;;  %v903_v37 = vrot.slane %v901_v9, 3  ;;  %v906_v38 = vrot.slane %v904_v44, 4  ;;  %v1326_v63 = vshll.u32 %v1305_v26, 16  ;;  %v4021_v32 = vld [vmem:[%s8831_s9 + $0x8] sm:$0x1f]  ;;  %v8423_v44 = vld [vmem:[%s10159_s3 + $0xc0] sm:$0xff]  }
  0xa4   : > { %7492 = vmatpush3.bf16.msra.mxu1 %v8412_v19  ;;  %v909_v19 = vshrl.u32 %v8993_v53, 16  ;;  %v898_v12 = vor.u32 %v897_v0, %v894_v59  ;;  %v1320_v52 = vrot.slane %v1318_v30, 5  ;;  %v1325_v51 = vrot.slane %v1323_v43, 4  ;;  %v1306_v40 = vld [vmem:[%s8821_s8 + $0x18] sm:$0x1f] }
  0xa5   : > { %7780 = vmatpush3.bf16.msra.mxu0 %v8413_v17  ;;  %7493 = vmatprep.subr.bf16.mxu1 %v8414_v35  ;;  %v9133_v17 = vld [vmem:[%s8831_s9 + $0x70] sm:$0xf0]  ;;  %v907_v50 = vor.u32 %v906_v38, %v903_v37  ;;  %v4041_v47 = vshll.u32 %v4021_v32, 16  ;;  %v4035_v59 = vrot.slane %v4033_v46, 5  ;;  %v1340_v61 = vshrl.u32 %v1306_v40, 16 }
  0xa6   : > { %7781 = vmatprep.subr.bf16.mxu0 %v8415_v45  ;;  %v911_v41 = vrot.slane %v909_v19, 3  ;;  %v3832_v21 = vrot.slane %v9133_v17, 4  ;;  %v899_v53 = vsel %vm780_vm1, %v890_v39, %v898_v12  ;;  %v1343_v29 = vshll.u32 %v1306_v40, 16 }
  0xa7   : > { %7478 = vmatmul.mubr.bf16.gmra.mrb[8].mxu1 %v882_v62  ;;  %v4043_v0 = vrot.slane %v4041_v47, 5  ;;  %v1342_v19 = vrot.slane %v1340_v61, 4  ;;  %v4050_v9 = vshll.u32 %v9038_v1, 16  ;;  %v4055_v16 = vshrl.u32 %v4022_v3, 16 }
  0xa8   : > { %7766 = vmatmul.mubr.bf16.gmra.mrb[8].mxu0 %v3828_v13  ;;  %7494 = vmatpush3.bf16.msra.mxu1 %v8414_v35  ;;  %v915_v48 = vor.u32 %v914_v22, %v911_v41  ;;  %v3834_v27 = vsel %vm965_vm0, %v3832_v21, %v3833_v23  ;;  %v1317_v35 = vrot.slane %v1315_v28, 4  ;;  %v1328_v13 = vrot.slane %v1326_v63, 5  ;;  %v1307_v28 = vld [vmem:[%s8821_s8 + $0x28] sm:$0x1f] }
  0xa9   : > { %7782 = vmatpush3.bf16.msra.mxu0 %v8415_v45  ;;  %7495 = vmatprep.subr.bf16.mxu1 %v8416_v11  ;;  %v4030_v45 = vshrl.u32 %v9024_v34, 16  ;;  %v8422_v34 = vld [vmem:[%s10158_s2 + $0xc0] sm:$0xff]   ;;  %v1345_v41 = vrot.slane %v1343_v29, 5  ;;  %v4049_v39 = vrot.slane %v4047_v4, 4  ;;  %v4052_v37 = vrot.slane %v4050_v9, 5  ;;  %v8428_v29 = vld [vmem:[%s10158_s2 + $0xd8] sm:$0xff]  }
  0xaa   : > { %7783 = vmatprep.subr.bf16.mxu0 %v8417_v54  ;;  %7769 = vmatprep.mubr.bf16.mxu0 %v3831_v2  ;;  %v916_v36 = vsel %vm780_vm1, %v907_v50, %v915_v48  ;;  %v1321_v57 = vor.u32 %v1320_v52, %v1317_v35  ;;  %v1329_v62 = vor.u32 %v1328_v13, %v1325_v51  ;;  %v4058_v38 = vshll.u32 %v4022_v3, 16  ;;  %v4023_v35 = vld [vmem:[%s8831_s9 + $0x28] sm:$0x1f] }
  0xab   : > { %7481 = vmatprep.mubr.bf16.mxu1 %v899_v53  ;;  %v4032_v58 = vrot.slane %v4030_v45, 4  ;;  %v1349_v1 = vshrl.u32 %v8879_v56, 16  ;;  %v1346_v22 = vor.u32 %v1345_v41, %v1342_v19  ;;  %v4057_v23 = vrot.slane %v4055_v16, 4 }
  0xac   : > { %7496 = vmatpush3.bf16.msra.mxu1 %v8416_v11  ;;  %v4038_v11 = vshrl.u32 %v4021_v32, 16  ;;  %v1330_v12 = vsel %vm1313_vm2, %v1321_v57, %v1329_v62  ;;  %v1352_v53 = vshll.u32 %v8879_v56, 16  ;;  %v4053_v50 = vor.u32 %v4052_v37, %v4049_v39  ;;  %v8429_v39 = vld [vmem:[%s10159_s3 + $0xd8] sm:$0xff]  }
  0xad   : > { %7784 = vmatpush3.bf16.msra.mxu0 %v8417_v54  ;;  %7497 = vmatprep.subr.bf16.mxu1 %v8418_v10  ;;  %v4036_v18 = vor.u32 %v4035_v59, %v4032_v58  ;;  %v1351_v48 = vrot.slane %v1349_v1, 4  ;;  %v1357_v30 = vshrl.u32 %v1307_v28, 16  ;;  %v4064_v43 = vshrl.u32 %v9056_v24, 16  ;;  %v4024_v58 = vld [vmem:[%s8831_s9 + $0x38] sm:$0x1f]  ;;  %v8427_v59 = vld [vmem:[%s10159_s3 + $0xd0] sm:$0xff]  }
  0xae   : > { %7785 = vmatprep.subr.bf16.mxu0 %v8419_v25  ;;  %v4040_v54 = vrot.slane %v4038_v11, 4  ;;  %v1354_v26 = vrot.slane %v1352_v53, 5  ;;  %v4067_v63 = vshll.u32 %v9056_v24, 16  ;;  %v4075_v32 = vshll.u32 %v4023_v35, 16  ;;  %v8426_v24 = vld [vmem:[%s10158_s2 + $0xd0] sm:$0xff]  }
  0xaf   : > { %7482 = vmatmul.mubr.bf16.gmra.mrb[12].mxu1 %v916_v36  ;;  %v4072_v36 = vshrl.u32 %v4023_v35, 16  ;;  %v4066_v46 = vrot.slane %v4064_v43, 4  ;;  %v1366_v40 = vshrl.u32 %v8901_v8, 16  ;;  %v1369_v57 = vshll.u32 %v8901_v8, 16  ;;  %v8431_v43 = vld [vmem:[%s10159_s3 + $0xe0] sm:$0xff]  }
  0xb0   : > { %7770 = vmatmul.mubr.bf16.gmra.mrb[12].mxu0 %v3834_v27  ;;  %7498 = vmatpush3.bf16.msra.mxu1 %v8418_v10  ;;  %v4044_v2 = vor.u32 %v4043_v0, %v4040_v54  ;;  %v8424_v10 = vld [vmem:[%s10158_s2 + $0xc8] sm:$0xff]   ;;  %v1347_v27 = vsel %vm1313_vm2, %v1338_v7, %v1346_v22  ;;  %v1355_v20 = vor.u32 %v1354_v26, %v1351_v48  ;;  %v1359_v7 = vrot.slane %v1357_v30, 4  ;;  %v1310_v30 = vld [vmem:[%s8821_s8 + $0x58] sm:$0x1f] }
  0xb1   : > { %7786 = vmatpush3.bf16.msra.mxu0 %v8419_v25  ;;  %7499 = vmatprep.subr.bf16.mxu1 %v8420_v31  ;;  %v4060_v25 = vrot.slane %v4058_v38, 5  ;;  %v4069_v51 = vrot.slane %v4067_v63, 5  ;;  %v4074_v13 = vrot.slane %v4072_v36, 4  ;;  %v4077_v47 = vrot.slane %v4075_v32, 5 }
  0xb2   : > { %7787 = vmatprep.subr.bf16.mxu0 %v8421_v14  ;;  %7501 = vmatprep.mubr.bf16.mxu1 %v1330_v12  ;;  %v4045_v21 = vsel %vm1313_vm2, %v4036_v18, %v4044_v2  ;;  %v4081_v0 = vshrl.u32 %v9069_v49, 16  ;;  %v1368_v18 = vrot.slane %v1366_v40, 4  ;;  %v1371_v19 = vrot.slane %v1369_v57, 5 }
  0xb3   : > { %7789 = vmatprep.mubr.bf16.mxu0 %v4045_v21  ;;  %v4061_v56 = vor.u32 %v4060_v25, %v4057_v23  ;;  %v4070_v61 = vor.u32 %v4069_v51, %v4066_v46  ;;  %v4078_v8 = vor.u32 %v4077_v47, %v4074_v13  ;;  %v4089_v41 = vshrl.u32 %v4024_v58, 16  ;;  %v8430_v21 = vld [vmem:[%s10158_s2 + $0xe0] sm:$0xff]   ;;  %v4025_v25 = vld [vmem:[%s8831_s9 + $0x48] sm:$0x1f] }
  0xb4   : > { %7500 = vmatpush3.bf16.msra.mxu1 %v8420_v31  ;;  %v1360_v31 = vshll.u32 %v1307_v28, 16  ;;  %v4083_v9 = vrot.slane %v4081_v0, 4  ;;  %v1372_v2 = vor.u32 %v1371_v19, %v1368_v18  ;;  %v4092_v16 = vshll.u32 %v4024_v58, 16  ;;  %v1311_v18 = vld [vmem:[%s8821_s8 + $0x68] sm:$0x1f] }
  0xb5   : > { %7788 = vmatpush3.bf16.msra.mxu0 %v8421_v14  ;;  %7517 = vmatprep.subr.bf16.mxu1 %v8422_v34  ;;  %v1308_v14 = vld [vmem:[%s8821_s8 + $0x38] sm:$0x1f]  ;;  %v4062_v45 = vsel %vm1313_vm2, %v4053_v50, %v4061_v56  ;;  %v4079_v12 = vsel %vm1313_vm2, %v4070_v61, %v4078_v8  ;;  %v1383_v1 = vshrl.u32 %v8931_v42, 16  ;;  %v4091_v22 = vrot.slane %v4089_v41, 4 }
  0xb6   : > { %7805 = vmatprep.subr.bf16.mxu0 %v8423_v44  ;;  %v1362_v52 = vrot.slane %v1360_v31, 5  ;;  %v1374_v62 = vshrl.u32 %v1308_v14, 16  ;;  %v1377_v54 = vshll.u32 %v1308_v14, 16  ;;  %v4094_v23 = vrot.slane %v4092_v16, 5 }
  0xb7   : > { %7502 = vmatmul.mubr.bf16.vlgmr.msra.gmra.mrb[0].mxu1 %v1347_v27  ;;  %v1385_v27 = vrot.slane %v1383_v1, 4  ;;  %v4098_v56 = vshrl.u32 %v9088_v15, 16  ;;  %v4101_v36 = vshll.u32 %v9088_v15, 16  ;;  %v4106_v14 = vshrl.u32 %v4025_v25, 16  ;;  %v8518_v15 = vld [vmem:[%s8821_s8 + $0x50] sm:$0xf0] }
  0xb8   : > { %7518 = vmatpush3.bf16.msra.mxu1 %v8422_v34  ;;  %7790 = vmatmul.mubr.bf16.vlgmr.msra.gmra.mrb[0].mxu0 %v4062_v45  ;;  %v1363_v11 = vor.u32 %v1362_v52, %v1359_v7  ;;  %v1376_v3 = vrot.slane %v1374_v62, 4  ;;  %v1379_v4 = vrot.slane %v1377_v54, 5  ;;  %v8432_v7 = vld [vmem:[%s10158_s2 + $0xe8] sm:$0xff]   ;;  %v1400_v46 = vshrl.u32 %v8952_v60, 16 }
  0xb9   : > { %7519 = vmatprep.subr.bf16.mxu1 %v8424_v10  ;;  %7806 = vmatpush3.bf16.msra.mxu0 %v8423_v44  ;;  %v4084_v44 = vshll.u32 %v9069_v49, 16  ;;  %v1386_v49 = vshll.u32 %v8931_v42, 16  ;;  %v4095_v42 = vor.u32 %v4094_v23, %v4091_v22  ;;  %v4100_v45 = vrot.slane %v4098_v56, 4 }
  0xba   : > { %7807 = vmatprep.subr.bf16.mxu0 %v8425_v6  ;;  %v1364_v34 = vsel %vm1313_vm2, %v1355_v20, %v1363_v11  ;;  %7793 = vmatprep.mubr.bf16.mxu0 %v4079_v12  ;;  %v1380_v37 = vor.u32 %v1379_v4, %v1376_v3  ;;  %v4026_v20 = vld [vmem:[%s8831_s9 + $0x58] sm:$0x1f]  ;;  %v4103_v51 = vrot.slane %v4101_v36, 5  ;;  %v4108_v13 = vrot.slane %v4106_v14, 4  ;;  %v8434_v12 = vld [vmem:[%s10158_s2 + $0xf0] sm:$0xff]  }
  0xbb   : > { %7505 = vmatprep.mubr.bf16.mxu1 %v1364_v34  ;;  %v4086_v38 = vrot.slane %v4084_v44, 5  ;;  %v1388_v26 = vrot.slane %v1386_v49, 5  ;;  %v1403_v11 = vshll.u32 %v8518_v15, 16  ;;  %v1402_v40 = vrot.slane %v1400_v46, 4  ;;  %v4027_v44 = vld [vmem:[%s8831_s9 + $0x68] sm:$0x1f] }
  0xbc   : > { %7520 = vmatpush3.bf16.msra.mxu1 %v8424_v10  ;;  %v1309_v10 = vld [vmem:[%s8821_s8 + $0x48] sm:$0x1f]  ;;  %v1381_v28 = vsel %vm1313_vm2, %v1372_v2, %v1380_v37  ;;  %v1408_v57 = vshrl.u32 %v1310_v30, 16  ;;  %v1411_v58 = vshll.u32 %v1310_v30, 16  ;;  %v4104_v60 = vor.u32 %v4103_v51, %v4100_v45  ;;  %v8437_v14 = vld [vmem:[%s10159_s3 + $0xf8] sm:$0xff]  }
  0xbd   : > { %7521 = vmatprep.subr.bf16.mxu1 %v8426_v24  ;;  %7808 = vmatpush3.bf16.msra.mxu0 %v8425_v6  ;;  %v1391_v53 = vshrl.u32 %v1309_v10, 16  ;;  %v1394_v50 = vshll.u32 %v1309_v10, 16  ;;  %v4087_v48 = vor.u32 %v4086_v38, %v4083_v9  ;;  %v1389_v63 = vor.u32 %v1388_v26, %v1385_v27 }
  0xbe   : > { %7809 = vmatprep.subr.bf16.mxu0 %v8427_v59  ;;  %v4109_v6 = vshll.u32 %v4025_v25, 16  ;;  %v1405_v62 = vrot.slane %v1403_v11, 5  ;;  %v4115_v54 = vshrl.u32 %v9101_v55, 16  ;;  %v1410_v0 = vrot.slane %v1408_v57, 4  ;;  %v6562_v11 = vld [vmem:[%s8821_s8 + $0x10] sm:$0xf8] }
  0xbf   : > { %7506 = vmatmul.mubr.bf16.gmra.mrb[4].mxu1 %v1381_v28  ;;  %v1393_v31 = vrot.slane %v1391_v53, 4  ;;  %v1396_v35 = vrot.slane %v1394_v50, 5  ;;  %v4096_v52 = vsel %vm1313_vm2, %v4087_v48, %v4095_v42  ;;  %v4118_v34 = vshll.u32 %v9101_v55, 16  ;;  %v1312_v53 = vld [vmem:[%s8821_s8 + $0x78] sm:$0x1f] }
  0xc0   : > { %7522 = vmatpush3.bf16.msra.mxu1 %v8426_v24  ;;  %7794 = vmatmul.mubr.bf16.gmra.mrb[4].mxu0 %v4096_v52  ;;  %v4111_v24 = vrot.slane %v4109_v6, 5  ;;  %v4123_v8 = vshrl.u32 %v4026_v20, 16  ;;  %v1406_v3 = vor.u32 %v1405_v62, %v1402_v40  ;;  %v4117_v4 = vrot.slane %v4115_v54, 4  ;;  %v9271_v40 = vld [vmem:[%s10159_s3 + $0x100] sm:$0xff]  }
  0xc1   : > { %7523 = vmatprep.subr.bf16.mxu1 %v8428_v29  ;;  %7810 = vmatpush3.bf16.msra.mxu0 %v8427_v59  ;;  %v1397_v32 = vor.u32 %v1396_v35, %v1393_v31  ;;  %v8433_v59 = vld [vmem:[%s10159_s3 + $0xe8] sm:$0xff]   ;;  %v4126_v9 = vshll.u32 %v4026_v20, 16  ;;  %v4120_v41 = vrot.slane %v4118_v34, 5  ;;  %v1417_v16 = vshrl.u32 %v8979_v33, 16  ;;  %v4028_v31 = vld [vmem:[%s8831_s9 + $0x78] sm:$0x1f] }
  0xc2   : > { %7811 = vmatprep.subr.bf16.mxu0 %v8429_v39  ;;  %v4112_v61 = vor.u32 %v4111_v24, %v4108_v13  ;;  %v4125_v55 = vrot.slane %v4123_v8, 4  ;;  %v1420_v38 = vshll.u32 %v8979_v33, 16  ;;  %v1425_v10 = vshrl.u32 %v1311_v18, 16  ;;  %v8436_v33 = vld [vmem:[%s10158_s2 + $0xf8] sm:$0xff]   ;;  %v6831_v34 = vld [vmem:[%s8831_s9 + $0x10] sm:$0xf8] }
  0xc3   : > { %v1398_v47 = vsel %vm1313_vm2, %v1389_v63, %v1397_v32  ;;  %v4128_v37 = vrot.slane %v4126_v9, 5  ;;  %v1428_v1 = vshll.u32 %v1311_v18, 16  ;;  %v1419_v22 = vrot.slane %v1417_v16, 4  ;;  %v8519_v63 = vld [vmem:[%s8821_s8 + $0x70] sm:$0xf0] }
  0xc4   : > { %7524 = vmatpush3.bf16.msra.mxu1 %v8428_v29  ;;  %7509 = vmatprep.mubr.bf16.mxu1 %v1398_v47  ;;  %v1413_v29 = vrot.slane %v1411_v58, 5  ;;  %v4113_v19 = vsel %vm1313_vm2, %v4104_v60, %v4112_v61  ;;  %v4132_v23 = vshrl.u32 %v9120_v5, 16  ;;  %v1422_v25 = vrot.slane %v1420_v38, 5  ;;  %v9266_v47 = vld [vmem:[%s10158_s2 + $0x100] sm:$0xff]   ;;  %v9275_v61 = vld [vmem:[%s8821_s8 + $0x18] sm:$0xf] }
  0xc5   : > { %7525 = vmatprep.subr.bf16.mxu1 %v8430_v21  ;;  %7812 = vmatpush3.bf16.msra.mxu0 %v8429_v39  ;;  %v8435_v39 = vld [vmem:[%s10159_s3 + $0xf0] sm:$0xff]   ;;  %v4129_v50 = vor.u32 %v4128_v37, %v4125_v55  ;;  %v1427_v28 = vrot.slane %v1425_v10, 4  ;;  %v1430_v48 = vrot.slane %v1428_v1, 5  ;;  %v4135_v26 = vshll.u32 %v9120_v5, 16  ;;  %v9280_v8 = vld [vmem:[%s8831_s9 + $0x18] sm:$0xf] }
  0xc6   : > { %7813 = vmatprep.subr.bf16.mxu0 %v8431_v43  ;;  %7797 = vmatprep.mubr.bf16.mxu0 %v4113_v19  ;;  %v1414_v2 = vor.u32 %v1413_v29, %v1410_v0  ;;  %v4134_v27 = vrot.slane %v4132_v23, 4  ;;  %v4140_v30 = vshrl.u32 %v4027_v44, 16  ;;  %v4143_v42 = vshll.u32 %v4027_v44, 16  ;;  %v9288_v37 = vld [vmem:[%s8821_s8 + $0x28] sm:$0xf] }
  0xc7   : > { %v1423_v56 = vor.u32 %v1422_v25, %v1419_v22  ;;  %v1434_v36 = vshrl.u32 %v8519_v63, 16  ;;  %v4137_v6 = vrot.slane %v4135_v26, 5  ;;  %v1437_v5 = vshll.u32 %v8519_v63, 16  ;;  %v9295_v25 = vld [vmem:[%s8831_s9 + $0x28] sm:$0xf] }
  0xc8   : > { %7526 = vmatpush3.bf16.msra.mxu1 %v8430_v21  ;;  %v1415_v49 = vsel %vm1313_vm2, %v1406_v3, %v1414_v2  ;;  %v4121_v21 = vor.u32 %v4120_v41, %v4117_v4  ;;  %v4142_v20 = vrot.slane %v4140_v30, 4  ;;  %v1442_v45 = vshrl.u32 %v1312_v53, 16 }
  0xc9   : > { %7527 = vmatprep.subr.bf16.mxu1 %v8432_v7  ;;  %7814 = vmatpush3.bf16.msra.mxu0 %v8431_v43  ;;  %v1431_v43 = vor.u32 %v1430_v48, %v1427_v28  ;;  %v1436_v32 = vrot.slane %v1434_v36, 4  ;;  %v1445_v46 = vshll.u32 %v1312_v53, 16  ;;  %v4138_v51 = vor.u32 %v4137_v6, %v4134_v27 }
  0xca   : > { %7815 = vmatprep.subr.bf16.mxu0 %v8433_v59  ;;  %7510 = vmatmul.mubr.bf16.gmra.mrb[8].mxu1 %v1415_v49  ;;  %v4130_v35 = vsel %vm1313_vm2, %v4121_v21, %v4129_v50  ;;  %v1439_v24 = vrot.slane %v1437_v5, 5  ;;  %v4149_v15 = vshrl.u32 %v9133_v17, 16  ;;  %v1444_v57 = vrot.slane %v1442_v45, 4  ;;  %v6833_v21 = vld [vmem:[%s8831_s9 + $0x20] sm:$0xf8] }
  0xcb   : > { %7798 = vmatmul.mubr.bf16.gmra.mrb[8].mxu0 %v4130_v35  ;;  %v1432_v52 = vsel %vm1313_vm2, %v1423_v56, %v1431_v43  ;;  %v1447_v58 = vrot.slane %v1445_v46, 5  ;;  %v4157_v60 = vshrl.u32 %v4028_v31, 16  ;;  %v4160_v29 = vshll.u32 %v4028_v31, 16  ;;  %v9304_v46 = vld [vmem:[%s8821_s8 + $0x38] sm:$0xf] }
  0xcc   : > { %7528 = vmatpush3.bf16.msra.mxu1 %v8432_v7  ;;  %v4145_v7 = vrot.slane %v4143_v42, 5  ;;  %7513 = vmatprep.mubr.bf16.mxu1 %v1432_v52  ;;  %v1440_v54 = vor.u32 %v1439_v24, %v1436_v32  ;;  %v4151_v0 = vrot.slane %v4149_v15, 4  ;;  %v1660_v9 = vshll.u32 %v6562_v11, 16 }
  0xcd   : > { %7529 = vmatprep.subr.bf16.mxu1 %v8434_v12  ;;  %7816 = vmatpush3.bf16.msra.mxu0 %v8433_v59  ;;  %v4152_v59 = vshll.u32 %v9133_v17, 16  ;;  %v1448_v18 = vor.u32 %v1447_v58, %v1444_v57  ;;  %v4159_v3 = vrot.slane %v4157_v60, 4  ;;  %v1657_v17 = vshrl.u32 %v6562_v11, 16  ;;  %v6835_v11 = vld [vmem:[%s8831_s9 + $0x30] sm:$0xf8] }
  0xce   : > { %7817 = vmatprep.subr.bf16.mxu0 %v8435_v39  ;;  %v4146_v13 = vor.u32 %v4145_v7, %v4142_v20  ;;  %v4162_v4 = vrot.slane %v4160_v29, 5  ;;  %v1665_v44 = vshrl.u32 %v9275_v61, 16  ;;  %v4370_v16 = vshrl.u32 %v6831_v34, 16  ;;  %v6566_v7 = vld [vmem:[%s8821_s8 + $0x30] sm:$0xf8] }
  0xcf   : > { %v4154_v19 = vrot.slane %v4152_v59, 5  ;;  %v1449_v2 = vsel %vm1313_vm2, %v1440_v54, %v1448_v18  ;;  %v1659_v55 = vrot.slane %v1657_v17, 3  ;;  %v1662_v10 = vrot.slane %v1660_v9, 4  ;;  %v9310_v57 = vld [vmem:[%s8831_s9 + $0x38] sm:$0xf] }
  0xd0   : > { %7530 = vmatpush3.bf16.msra.mxu1 %v8434_v12  ;;  %v4147_v62 = vsel %vm1313_vm2, %v4138_v51, %v4146_v13  ;;  %v1668_v12 = vshll.u32 %v9275_v61, 16  ;;  %v4163_v38 = vor.u32 %v4162_v4, %v4159_v3  ;;  %v1667_v1 = vrot.slane %v1665_v44, 3  ;;  %v9320_v44 = vld [vmem:[%s8821_s8 + $0x48] sm:$0xf] }
  0xd1   : > { %7531 = vmatprep.subr.bf16.mxu1 %v8436_v33  ;;  %7818 = vmatpush3.bf16.msra.mxu0 %v8435_v39  ;;  %v4155_v41 = vor.u32 %v4154_v19, %v4151_v0  ;;  %v6564_v39 = vld [vmem:[%s8821_s8 + $0x20] sm:$0xf8]  ;;  %v4372_v22 = vrot.slane %v4370_v16, 3  ;;  %v4373_v23 = vshll.u32 %v6831_v34, 16  ;;  %v4378_v53 = vshrl.u32 %v9280_v8, 16 }
  0xd2   : > { %7819 = vmatprep.subr.bf16.mxu0 %v8437_v14  ;;  %7801 = vmatprep.mubr.bf16.mxu0 %v4147_v62  ;;  %v1670_v49 = vrot.slane %v1668_v12, 4  ;;  %v4381_v50 = vshll.u32 %v9280_v8, 16  ;;  %v1663_v48 = vor.u32 %v1662_v10, %v1659_v55  ;;  %v1674_v27 = vshrl.u32 %v6564_v39, 16  ;;  %v8440_v62 = vld [vmem:[%s10158_s2 + $0x108] sm:$0xff]   ;;  %v6568_v0 = vld [vmem:[%s8821_s8 + $0x40] sm:$0xf8] }
  0xd3   : > { %7514 = vmatmul.mubr.bf16.gmra.mrb[12].mxu1 %v1449_v2  ;;  %v4164_v28 = vsel %vm1313_vm2, %v4155_v41, %v4163_v38  ;;  %v4375_v26 = vrot.slane %v4373_v23, 4  ;;  %v4380_v30 = vrot.slane %v4378_v53, 3  ;;  %v1677_v31 = vshll.u32 %v6564_v39, 16  ;;  %v8441_v2 = vld [vmem:[%s10159_s3 + $0x108] sm:$0xff]   ;;  %v6837_v39 = vld [vmem:[%s8831_s9 + $0x40] sm:$0xf8] }
  0xd4   : > { %7532 = vmatpush3.bf16.msra.mxu1 %v8436_v33  ;;  %v1671_v33 = vor.u32 %v1670_v49, %v1667_v1  ;;  %7802 = vmatmul.mubr.bf16.gmra.mrb[12].mxu0 %v4164_v28  ;;  %v4383_v42 = vrot.slane %v4381_v50, 4  ;;  %v1676_v56 = vrot.slane %v1674_v27, 3  ;;  %v1682_v43 = vshrl.u32 %v9288_v37, 16  ;;  %v8442_v28 = vld [vmem:[%s10158_s2 + $0x110] sm:$0xff]  }
  0xd5   : > { %7549 = vmatprep.subr.bf16.mxu1 %v9266_v47  ;;  %7820 = vmatpush3.bf16.msra.mxu0 %v8437_v14  ;;  %v1685_v63 = vshll.u32 %v9288_v37, 16  ;;  %v4376_v36 = vor.u32 %v4375_v26, %v4372_v22  ;;  %v1679_v6 = vrot.slane %v1677_v31, 4  ;;  %v4387_v20 = vshrl.u32 %v6833_v21, 16  ;;  %v8443_v26 = vld [vmem:[%s10159_s3 + $0x110] sm:$0xff]  }
  0xd6   : > { %7837 = vmatprep.subr.bf16.mxu0 %v9271_v40  ;;  %v1672_v35 = vsel %vm780_vm1, %v1663_v48, %v1671_v33  ;;  %v4384_v14 = vor.u32 %v4383_v42, %v4380_v30  ;;  %v1684_v5 = vrot.slane %v1682_v43, 3  ;;  %v4390_v32 = vshll.u32 %v6833_v21, 16  ;;  %v9330_v21 = vld [vmem:[%s8831_s9 + $0x48] sm:$0xf] }
  0xd7   : > { %7533 = vmatprep.mubr.bf16.mxu1 %v1672_v35  ;;  %v1687_v52 = vrot.slane %v1685_v63, 4  ;;  %v4395_v45 = vshrl.u32 %v9295_v25, 16  ;;  %v1680_v13 = vor.u32 %v1679_v6, %v1676_v56  ;;  %v4389_v24 = vrot.slane %v4387_v20, 3  ;;  %v8444_v56 = vld [vmem:[%s10158_s2 + $0x118] sm:$0xff]  }
  0xd8   : > { %v4385_v51 = vsel %vm780_vm1, %v4376_v36, %v4384_v14  ;;  %v4398_v15 = vshll.u32 %v9295_v25, 16  ;;  %v4392_v59 = vrot.slane %v4390_v32, 4  ;;  %v1691_v54 = vshrl.u32 %v6566_v7, 16 }
  0xd9   : > { %7821 = vmatprep.mubr.bf16.mxu0 %v4385_v51  ;;  %v1688_v58 = vor.u32 %v1687_v52, %v1684_v5  ;;  %v4397_v60 = vrot.slane %v4395_v45, 3  ;;  %v1694_v34 = vshll.u32 %v6566_v7, 16  ;;  %v1699_v18 = vshrl.u32 %v9304_v46, 16  ;;  %v9349_v52 = vld [vmem:[%s8821_s8 + $0x58] sm:$0xf] }
  0xda   : > { %v4400_v29 = vrot.slane %v4398_v15, 4  ;;  %v1702_v19 = vshll.u32 %v9304_v46, 16  ;;  %v4393_v17 = vor.u32 %v4392_v59, %v4389_v24  ;;  %v1693_v4 = vrot.slane %v1691_v54, 3  ;;  %v8445_v24 = vld [vmem:[%s10159_s3 + $0x118] sm:$0xff]   ;;  %v6839_v15 = vld [vmem:[%s8831_s9 + $0x50] sm:$0xf8] }
  0xdb   : > { %v1689_v3 = vsel %vm780_vm1, %v1680_v13, %v1688_v58  ;;  %v4404_v9 = vshrl.u32 %v6835_v11, 16  ;;  %v1696_v41 = vrot.slane %v1694_v34, 4  ;;  %v1701_v55 = vrot.slane %v1699_v18, 3  ;;  %v8446_v54 = vld [vmem:[%s10158_s2 + $0x120] sm:$0xff]  }
  0xdc   : > { %7534 = vmatmul.mubr.bf16.vlgmr.msra.gmra.mrb[0].mxu1 %v1689_v3  ;;  %v4401_v12 = vor.u32 %v4400_v29, %v4397_v60  ;;  %v1704_v16 = vrot.slane %v1702_v19, 4  ;;  %v4407_v10 = vshll.u32 %v6835_v11, 16  ;;  %v4412_v1 = vshrl.u32 %v9310_v57, 16  ;;  %v6572_v19 = vld [vmem:[%s8821_s8 + $0x60] sm:$0xf8] }
  0xdd   : > { %7550 = vmatpush3.bf16.msra.mxu1 %v9266_v47  ;;  %v4406_v38 = vrot.slane %v4404_v9, 3  ;;  %v4415_v49 = vshll.u32 %v9310_v57, 16  ;;  %v1697_v23 = vor.u32 %v1696_v41, %v1693_v4  ;;  %v1708_v50 = vshrl.u32 %v6568_v0, 16 }
  0xde   : > { %v4402_v22 = vsel %vm780_vm1, %v4393_v17, %v4401_v12  ;;  %7551 = vmatprep.subr.bf16.mxu1 %v8440_v62  ;;  %v1705_v53 = vor.u32 %v1704_v16, %v1701_v55  ;;  %v4409_v47 = vrot.slane %v4407_v10, 4  ;;  %v4414_v48 = vrot.slane %v4412_v1, 3  ;;  %v9368_v12 = vld [vmem:[%s8821_s8 + $0x68] sm:$0xf] }
  0xdf   : > { %7822 = vmatmul.mubr.bf16.vlgmr.msra.gmra.mrb[0].mxu0 %v4402_v22  ;;  %v4417_v33 = vrot.slane %v4415_v49, 4  ;;  %v1711_v27 = vshll.u32 %v6568_v0, 16  ;;  %v1710_v42 = vrot.slane %v1708_v50, 3  ;;  %v1716_v31 = vshrl.u32 %v9320_v44, 16 }
  0xe0   : > { %7838 = vmatpush3.bf16.msra.mxu0 %v9271_v40  ;;  %v1706_v30 = vsel %vm780_vm1, %v1697_v23, %v1705_v53  ;;  %v1719_v35 = vshll.u32 %v9320_v44, 16  ;;  %v4410_v43 = vor.u32 %v4409_v47, %v4406_v38  ;;  %v4421_v14 = vshrl.u32 %v6837_v39, 16  ;;  %v6570_v40 = vld [vmem:[%s8821_s8 + $0x50] sm:$0xf8]  ;;  %v8447_v38 = vld [vmem:[%s10159_s3 + $0x120] sm:$0xff]  }
  0xe1   : > { %7839 = vmatprep.subr.bf16.mxu0 %v8441_v2  ;;  %7552 = vmatpush3.bf16.msra.mxu1 %v8440_v62  ;;  %v4418_v63 = vor.u32 %v4417_v33, %v4414_v48  ;;  %v1713_v36 = vrot.slane %v1711_v27, 4  ;;  %v1718_v6 = vrot.slane %v1716_v31, 3  ;;  %v4424_v7 = vshll.u32 %v6837_v39, 16  ;;  %v9358_v62 = vld [vmem:[%s8831_s9 + $0x58] sm:$0xf]  ;;  %v8448_v48 = vld [vmem:[%s10158_s2 + $0x128] sm:$0xff]  }
  0xe2   : > { %7537 = vmatprep.mubr.bf16.mxu1 %v1706_v30  ;;  %v1721_v20 = vrot.slane %v1719_v35, 4  ;;  %7553 = vmatprep.subr.bf16.mxu1 %v8442_v28  ;;  %v4429_v5 = vshrl.u32 %v9330_v21, 16  ;;  %v4423_v51 = vrot.slane %v4421_v14, 3  ;;  %v4432_v13 = vshll.u32 %v9330_v21, 16  ;;  %v6841_v39 = vld [vmem:[%s8831_s9 + $0x60] sm:$0xf8] }
  0xe3   : > { %v4419_v32 = vsel %vm780_vm1, %v4410_v43, %v4418_v63  ;;  %v1714_v45 = vor.u32 %v1713_v36, %v1710_v42  ;;  %v4426_v58 = vrot.slane %v4424_v7, 4  ;;  %v1725_v60 = vshrl.u32 %v6570_v40, 16  ;;  %v9377_v23 = vld [vmem:[%s8831_s9 + $0x68] sm:$0xf] }
  0xe4   : > { %7840 = vmatpush3.bf16.msra.mxu0 %v8441_v2  ;;  %7825 = vmatprep.mubr.bf16.mxu0 %v4419_v32  ;;  %v1722_v11 = vor.u32 %v1721_v20, %v1718_v6  ;;  %v4431_v59 = vrot.slane %v4429_v5, 3  ;;  %v4434_v0 = vrot.slane %v4432_v13, 4  ;;  %v1728_v29 = vshll.u32 %v6570_v40, 16  ;;  %v8449_v43 = vld [vmem:[%s10159_s3 + $0x128] sm:$0xff]   ;;  %v9392_v6 = vld [vmem:[%s10158_s2 + $0x130] sm:$0xff]  }
  0xe5   : > { %7841 = vmatprep.subr.bf16.mxu0 %v8443_v26  ;;  %7554 = vmatpush3.bf16.msra.mxu1 %v8442_v28  ;;  %v1733_v34 = vshrl.u32 %v9349_v52, 16  ;;  %v1736_v18 = vshll.u32 %v9349_v52, 16  ;;  %v4427_v17 = vor.u32 %v4426_v58, %v4423_v51  ;;  %v1727_v4 = vrot.slane %v1725_v60, 3  ;;  %v6843_v58 = vld [vmem:[%s8831_s9 + $0x70] sm:$0xf8] }
  0xe6   : > { %v1723_v3 = vsel %vm780_vm1, %v1714_v45, %v1722_v11  ;;  %7555 = vmatprep.subr.bf16.mxu1 %v8444_v56  ;;  %v4438_v9 = vshrl.u32 %v6839_v15, 16  ;;  %v4435_v2 = vor.u32 %v4434_v0, %v4431_v59  ;;  %v1730_v41 = vrot.slane %v1728_v29, 4  ;;  %v6574_v45 = vld [vmem:[%s8821_s8 + $0x70] sm:$0xf8]  ;;  %v9399_v11 = vld [vmem:[%s8821_s8 + $0x78] sm:$0xf] }
  0xe7   : > { %7538 = vmatmul.mubr.bf16.gmra.mrb[4].mxu1 %v1723_v3  ;;  %v1735_v55 = vrot.slane %v1733_v34, 3  ;;  %v1738_v16 = vrot.slane %v1736_v18, 4  ;;  %v4441_v1 = vshll.u32 %v6839_v15, 16  ;;  %v4446_v49 = vshrl.u32 %v9358_v62, 16  ;;  %v9403_v34 = vld [vmem:[%s8831_s9 + $0x78] sm:$0xf] }
  0xe8   : > { %7842 = vmatpush3.bf16.msra.mxu0 %v8443_v26  ;;  %v4440_v10 = vrot.slane %v4438_v9, 3  ;;  %v4449_v22 = vshll.u32 %v9358_v62, 16  ;;  %v4436_v53 = vsel %vm780_vm1, %v4427_v17, %v4435_v2  ;;  %v1731_v50 = vor.u32 %v1730_v41, %v1727_v4  ;;  %v6576_v4 = vld [vmem:[%s8821_s8 + $0x80] sm:$0xf8] }
  0xe9   : > { %7843 = vmatprep.subr.bf16.mxu0 %v8445_v24  ;;  %7556 = vmatpush3.bf16.msra.mxu1 %v8444_v56  ;;  %v1739_v28 = vor.u32 %v1738_v16, %v1735_v55  ;;  %v1742_v47 = vshrl.u32 %v6572_v19, 16  ;;  %v4443_v33 = vrot.slane %v4441_v1, 4  ;;  %v4448_v27 = vrot.slane %v4446_v49, 3  ;;  %v9413_v16 = vld [vmem:[%s8821_s8 + $0x88] sm:$0xf]  ;;  %v8452_v49 = vld [vmem:[%s10158_s2 + $0x138] sm:$0xff]  }
  0xea   : > { %7826 = vmatmul.mubr.bf16.gmra.mrb[4].mxu0 %v4436_v53  ;;  %v4451_v26 = vrot.slane %v4449_v22, 4  ;;  %v1745_v30 = vshll.u32 %v6572_v19, 16  ;;  %7557 = vmatprep.subr.bf16.mxu1 %v8446_v54  ;;  %v1750_v35 = vshrl.u32 %v9368_v12, 16  ;;  %v1753_v56 = vshll.u32 %v9368_v12, 16 }
  0xeb   : > { %v1740_v42 = vsel %vm780_vm1, %v1731_v50, %v1739_v28  ;;  %v1744_v31 = vrot.slane %v1742_v47, 3  ;;  %v4444_v63 = vor.u32 %v4443_v33, %v4440_v10  ;;  %v4455_v40 = vshrl.u32 %v6841_v39, 16  ;;  %v6845_v47 = vld [vmem:[%s8831_s9 + $0x80] sm:$0xf8] }
  0xec   : > { %7844 = vmatpush3.bf16.msra.mxu0 %v8445_v24  ;;  %7541 = vmatprep.mubr.bf16.mxu1 %v1740_v42  ;;  %v4452_v36 = vor.u32 %v4451_v26, %v4448_v27  ;;  %v1747_v14 = vrot.slane %v1745_v30, 4  ;;  %v1752_v20 = vrot.slane %v1750_v35, 3  ;;  %v1755_v7 = vrot.slane %v1753_v56, 4  ;;  %v9424_v30 = vld [vmem:[%s8831_s9 + $0x88] sm:$0xf]  ;;  %v8453_v42 = vld [vmem:[%s10159_s3 + $0x138] sm:$0xff]  }
  0xed   : > { %v4458_v5 = vshll.u32 %v6841_v39, 16  ;;  %v4463_v32 = vshrl.u32 %v9377_v23, 16  ;;  %7845 = vmatprep.subr.bf16.mxu0 %v8447_v38  ;;  %7558 = vmatpush3.bf16.msra.mxu1 %v8446_v54  ;;  %v4457_v24 = vrot.slane %v4455_v40, 3  ;;  %v4466_v15 = vshll.u32 %v9377_v23, 16  ;;  %v8451_v54 = vld [vmem:[%s10159_s3 + $0x130] sm:$0xff]  }
  0xee   : > { %v4453_v51 = vsel %vm780_vm1, %v4444_v63, %v4452_v36  ;;  %v1748_v13 = vor.u32 %v1747_v14, %v1744_v31  ;;  %7559 = vmatprep.subr.bf16.mxu1 %v8448_v48  ;;  %v1756_v59 = vor.u32 %v1755_v7, %v1752_v20  ;;  %v1759_v29 = vshrl.u32 %v6574_v45, 16  ;;  %v9436_v20 = vld [vmem:[%s10158_s2 + $0x140] sm:$0xff]  }
  0xef   : > { %7829 = vmatprep.mubr.bf16.mxu0 %v4453_v51  ;;  %v4460_v60 = vrot.slane %v4458_v5, 4  ;;  %v4465_v0 = vrot.slane %v4463_v32, 3  ;;  %v4468_v18 = vrot.slane %v4466_v15, 4  ;;  %v1762_v19 = vshll.u32 %v6574_v45, 16  ;;  %v9441_v51 = vld [vmem:[%s10159_s3 + $0x140] sm:$0xff]  }
  0xf0   : > { %7846 = vmatpush3.bf16.msra.mxu0 %v8447_v38  ;;  %v1767_v3 = vshrl.u32 %v9399_v11, 16  ;;  %v1770_v17 = vshll.u32 %v9399_v11, 16  ;;  %v1757_v9 = vsel %vm780_vm1, %v1748_v13, %v1756_v59  ;;  %v1761_v41 = vrot.slane %v1759_v29, 3  ;;  %v9447_v29 = vld [vmem:[%s8821_s8 + $0x10] sm:$0xf0] }
  0xf1   : > { %v4461_v2 = vor.u32 %v4460_v60, %v4457_v24  ;;  %7847 = vmatprep.subr.bf16.mxu0 %v8449_v43  ;;  %7560 = vmatpush3.bf16.msra.mxu1 %v8448_v48  ;;  %v4472_v55 = vshrl.u32 %v6843_v58, 16  ;;  %v4469_v39 = vor.u32 %v4468_v18, %v4465_v0  ;;  %v1764_v38 = vrot.slane %v1762_v19, 4  ;;  %v9450_v18 = vld [vmem:[%s8831_s9 + $0x10] sm:$0xf0] }
  0xf2   : > { %7542 = vmatmul.mubr.bf16.gmra.mrb[8].mxu1 %v1757_v9  ;;  %v1769_v10 = vrot.slane %v1767_v3, 3  ;;  %v1772_v1 = vrot.slane %v1770_v17, 4  ;;  %7561 = vmatprep.subr.bf16.mxu1 %v9392_v6  ;;  %v4475_v53 = vshll.u32 %v6843_v58, 16  ;;  %v4480_v50 = vshrl.u32 %v9403_v34, 16 }
  0xf3   : > { %v4474_v22 = vrot.slane %v4472_v55, 3  ;;  %v4483_v28 = vshll.u32 %v9403_v34, 16  ;;  %v4470_v48 = vsel %vm780_vm1, %v4461_v2, %v4469_v39  ;;  %v1765_v33 = vor.u32 %v1764_v38, %v1761_v41 }
  0xf4   : > { %7848 = vmatpush3.bf16.msra.mxu0 %v8449_v43  ;;  %v1773_v27 = vor.u32 %v1772_v1, %v1769_v10  ;;  %v1776_v26 = vshrl.u32 %v6576_v4, 16  ;;  %v4477_v31 = vrot.slane %v4475_v53, 4  ;;  %v4482_v35 = vrot.slane %v4480_v50, 3 }
  0xf5   : > { %7830 = vmatmul.mubr.bf16.gmra.mrb[8].mxu0 %v4470_v48  ;;  %v4485_v56 = vrot.slane %v4483_v28, 4  ;;  %v1779_v63 = vshll.u32 %v6576_v4, 16  ;;  %7849 = vmatprep.subr.bf16.mxu0 %v8451_v54  ;;  %v1784_v43 = vshrl.u32 %v9413_v16, 16  ;;  %v1787_v40 = vshll.u32 %v9413_v16, 16  ;;  %v9472_v28 = vld [vmem:[%s8821_s8 + $0x30] sm:$0xf0] }
  0xf6   : > { %v1774_v36 = vsel %vm780_vm1, %v1765_v33, %v1773_v27  ;;  %v1778_v14 = vrot.slane %v1776_v26, 3  ;;  %7562 = vmatpush3.bf16.msra.mxu1 %v9392_v6  ;;  %v4478_v7 = vor.u32 %v4477_v31, %v4474_v22  ;;  %v4489_v45 = vshrl.u32 %v6845_v47, 16  ;;  %v9476_v48 = vld [vmem:[%s8831_s9 + $0x30] sm:$0xf0] }
  0xf7   : > { %7545 = vmatprep.mubr.bf16.mxu1 %v1774_v36  ;;  %v4486_v5 = vor.u32 %v4485_v56, %v4482_v35  ;;  %v1781_v32 = vrot.slane %v1779_v63, 4  ;;  %7563 = vmatprep.subr.bf16.mxu1 %v8452_v49  ;;  %v1786_v13 = vrot.slane %v1784_v43, 3  ;;  %v1789_v6 = vrot.slane %v1787_v40, 4  ;;  %v9491_v56 = vld [vmem:[%s8831_s9 + $0x40] sm:$0xf0] }
  0xf8   : > { %v4492_v24 = vshll.u32 %v6845_v47, 16  ;;  %v4497_v15 = vshrl.u32 %v9424_v30, 16  ;;  %7850 = vmatpush3.bf16.msra.mxu0 %v8451_v54  ;;  %v4491_v60 = vrot.slane %v4489_v45, 3  ;;  %v4500_v0 = vshll.u32 %v9424_v30, 16  ;;  %v9454_v54 = vld [vmem:[%s8821_s8 + $0x20] sm:$0xf0] }
  0xf9   : > { %v4487_v58 = vsel %vm780_vm1, %v4478_v7, %v4486_v5  ;;  %v1782_v59 = vor.u32 %v1781_v32, %v1778_v14  ;;  %7851 = vmatprep.subr.bf16.mxu0 %v8453_v42  ;;  %v1790_v19 = vor.u32 %v1789_v6, %v1786_v13  ;;  %v2002_v4 = vrot.slane %v9447_v29, 4  ;;  %v9503_v43 = vld [vmem:[%s8821_s8 + $0x50] sm:$0xf0]  ;;  %v9513_v45 = vld [vmem:[%s8821_s8 + $0x60] sm:$0xf0] }
  0xfa   : > { %7833 = vmatprep.mubr.bf16.mxu0 %v4487_v58  ;;  %v4494_v3 = vrot.slane %v4492_v24, 4  ;;  %v4499_v17 = vrot.slane %v4497_v15, 3  ;;  %7564 = vmatpush3.bf16.msra.mxu1 %v8452_v49  ;;  %v4502_v9 = vrot.slane %v4500_v0, 4  ;;  %v2003_v2 = vrot.slane %v9275_v61, 4  ;;  %v9464_v61 = vld [vmem:[%s8831_s9 + $0x20] sm:$0xf0] }
  0xfb   : > { %v4715_v41 = vrot.slane %v9450_v18, 4  ;;  %v4716_v55 = vrot.slane %v9280_v8, 4  ;;  %7581 = vmatprep.subr.bf16.mxu1 %v9436_v20  ;;  %v1791_v39 = vsel %vm780_vm1, %v1782_v59, %v1790_v19  ;;  %v2005_v10 = vrot.slane %v9454_v54, 4  ;;  %v9510_v32 = vld [vmem:[%s8831_s9 + $0x50] sm:$0xf0] }
  0xfc   : > { %v4495_v38 = vor.u32 %v4494_v3, %v4491_v60  ;;  %7852 = vmatpush3.bf16.msra.mxu0 %v8453_v42  ;;  %7546 = vmatmul.mubr.bf16.gmra.mrb[12].mxu1 %v1791_v39  ;;  %v4503_v1 = vor.u32 %v4502_v9, %v4499_v17  ;;  %v2004_v49 = vsel %vm965_vm0, %v2002_v4, %v2003_v2  ;;  %v2006_v22 = vrot.slane %v9288_v37, 4  ;;  %v8456_v37 = vld [vmem:[%s10158_s2 + $0x148] sm:$0xff]   ;;  %v9542_v17 = vld [vmem:[%s8831_s9 + $0x70] sm:$0xf0]  ;;  %v9545_v4 = vld [vmem:[%s8821_s8 + $0x80] sm:$0xf0] }
  0xfd   : > { %7869 = vmatprep.subr.bf16.mxu0 %v9441_v51  ;;  %7565 = vmatprep.mubr.bf16.mxu1 %v2004_v49  ;;  %v4717_v8 = vsel %vm965_vm0, %v4715_v41, %v4716_v55  ;;  %v2009_v53 = vrot.slane %v9304_v46, 4  ;;  %v2008_v47 = vrot.slane %v9472_v28, 4  ;;  %v4718_v33 = vrot.slane %v9464_v61, 4  ;;  %v9484_v46 = vld [vmem:[%s8821_s8 + $0x40] sm:$0xf0] }
  0xfe   : > { %v4504_v50 = vsel %vm780_vm1, %v4495_v38, %v4503_v1  ;;  %v4719_v27 = vrot.slane %v9295_v25, 4  ;;  %v2007_v26 = vsel %vm965_vm0, %v2005_v10, %v2006_v22  ;;  %v4721_v42 = vrot.slane %v9476_v48, 4  ;;  %v8457_v25 = vld [vmem:[%s10159_s3 + $0x148] sm:$0xff]   ;;  %v9556_v55 = vld [vmem:[%s8831_s9 + $0x80] sm:$0xf0] }
  0xff   : > { %7834 = vmatmul.mubr.bf16.gmra.mrb[12].mxu0 %v4504_v50  ;;  %v4722_v31 = vrot.slane %v9310_v57, 4  ;;  %v2010_v35 = vsel %vm965_vm0, %v2008_v47, %v2009_v53  ;;  %v2011_v36 = vrot.slane %v9484_v46, 4  ;;  %v2012_v14 = vrot.slane %v9320_v44, 4  ;;  %v8458_v57 = vld [vmem:[%s10158_s2 + $0x150] sm:$0xff]   ;;  %v8462_v39 = vld [vmem:[%s10158_s2 + $0x160] sm:$0xff]   ;;  %v8464_v22 = vld [vmem:[%s10158_s2 + $0x168] sm:$0xff]  }
 0x100   : > { %7853 = vmatprep.mubr.bf16.mxu0 %v4717_v8  ;;  %v4720_v63 = vsel %vm965_vm0, %v4718_v33, %v4719_v27  ;;  %v4724_v7 = vrot.slane %v9491_v56, 4  ;;  %v4725_v5 = vrot.slane %v9330_v21, 4  ;;  %v2015_v44 = vrot.slane %v9349_v52, 4  ;;  %v9523_v21 = vld [vmem:[%s8831_s9 + $0x60] sm:$0xf0]  ;;  %v8460_v52 = vld [vmem:[%s10158_s2 + $0x158] sm:$0xff]  }
 0x101   : > { %v4723_v40 = vsel %vm965_vm0, %v4721_v42, %v4722_v31  ;;  %v4728_v13 = vrot.slane %v9358_v62, 4  ;;  %v2014_v6 = vrot.slane %v9503_v43, 4  ;;  %v2018_v24 = vrot.slane %v9368_v12, 4  ;;  %v8463_v10 = vld [vmem:[%s10159_s3 + $0x160] sm:$0xff]   ;;  %v6634_v33 = vld [vmem:[%s8821_s8 + $0x18] sm:$0x1f] }
 0x102   : > { %v4727_v62 = vrot.slane %v9510_v32, 4  ;;  %v2017_v15 = vrot.slane %v9513_v45, 4  ;;  %v2013_v58 = vsel %vm965_vm0, %v2011_v36, %v2012_v14  ;;  %v4730_v12 = vrot.slane %v9523_v21, 4  ;;  %v6903_v42 = vld [vmem:[%s8831_s9 + $0x18] sm:$0x1f] }
 0x103   : > { %v4731_v59 = vrot.slane %v9377_v23, 4  ;;  %v2021_v60 = vrot.slane %v9399_v11, 4  ;;  %v4734_v0 = vrot.slane %v9403_v34, 4  ;;  %v2016_v19 = vsel %vm965_vm0, %v2014_v6, %v2015_v44  ;;  %v8461_v34 = vld [vmem:[%s10159_s3 + $0x158] sm:$0xff]   ;;  %v6635_v14 = vld [vmem:[%s8821_s8 + $0x28] sm:$0x1f] }
 0x104   : > { %7566 = vmatmul.mubr.bf16.vlgmr.msra.gmra.mrb[0].mxu1 %v2007_v26  ;;  %v2024_v9 = vrot.slane %v9413_v16, 4  ;;  %v4726_v23 = vsel %vm965_vm0, %v4724_v7, %v4725_v5  ;;  %v4733_v2 = vrot.slane %v9542_v17, 4  ;;  %v2023_v11 = vrot.slane %v9545_v4, 4  ;;  %v8465_v5 = vld [vmem:[%s10159_s3 + $0x168] sm:$0xff]  }
 0x105   : > { %7582 = vmatpush3.bf16.msra.mxu1 %v9436_v20  ;;  %7569 = vmatprep.mubr.bf16.mxu1 %v2010_v35  ;;  %v8459_v20 = vld [vmem:[%s10159_s3 + $0x150] sm:$0xff]   ;;  %v4729_v41 = vsel %vm965_vm0, %v4727_v62, %v4728_v13  ;;  %v2019_v16 = vsel %vm965_vm0, %v2017_v15, %v2018_v24  ;;  %v4732_v38 = vsel %vm965_vm0, %v4730_v12, %v4731_v59  ;;  %v4737_v49 = vrot.slane %v9424_v30, 4 }
 0x106   : > { %7583 = vmatprep.subr.bf16.mxu1 %v8456_v37  ;;  %v2221_v8 = vshrl.u32 %v9447_v29, 16  ;;  %v4735_v53 = vsel %vm965_vm0, %v4733_v2, %v4734_v0  ;;  %v9574_v50 = vsel %vm965_vm0, %v2023_v11, %v2024_v9  ;;  %v4736_v47 = vrot.slane %v9556_v55, 4 }
 0x107   : > { %7854 = vmatmul.mubr.bf16.vlgmr.msra.gmra.mrb[0].mxu0 %v4720_v63  ;;  %v2224_v27 = vshll.u32 %v9447_v29, 16  ;;  %v2232_v26 = vshll.u32 %v6634_v33, 16  ;;  %v4934_v31 = vshrl.u32 %v9450_v18, 16  ;;  %v4942_v63 = vshrl.u32 %v6903_v42, 16 }
 0x108   : > { %7870 = vmatpush3.bf16.msra.mxu0 %v9441_v51  ;;  %7857 = vmatprep.mubr.bf16.mxu0 %v4723_v40  ;;  %v9535_v51 = vld [vmem:[%s8821_s8 + $0x70] sm:$0xf0]  ;;  %v2223_v30 = vrot.slane %v2221_v8, 4  ;;  %v4945_v36 = vshll.u32 %v6903_v42, 16  ;;  %v2238_v29 = vshrl.u32 %v9454_v54, 16  ;;  %v2241_v62 = vshll.u32 %v9454_v54, 16 }
 0x109   : > { %7871 = vmatprep.subr.bf16.mxu0 %v8457_v25  ;;  %7584 = vmatpush3.bf16.msra.mxu1 %v8456_v37  ;;  %v2020_v3 = vrot.slane %v9535_v51, 4  ;;  %v2229_v37 = vshrl.u32 %v6634_v33, 16  ;;  %v2226_v35 = vrot.slane %v2224_v27, 5  ;;  %v2234_v40 = vrot.slane %v2232_v26, 5  ;;  %v8467_v54 = vld [vmem:[%s10159_s3 + $0x170] sm:$0xff]  }
 0x10a   : > { %7585 = vmatprep.subr.bf16.mxu1 %v8458_v57  ;;  %v4936_v7 = vrot.slane %v4934_v31, 4  ;;  %v4947_v6 = vrot.slane %v4945_v36, 5  ;;  %v2246_v15 = vshrl.u32 %v6635_v14, 16  ;;  %v4951_v0 = vshrl.u32 %v9464_v61, 16  ;;  %v6636_v8 = vld [vmem:[%s8821_s8 + $0x38] sm:$0x1f] }
 0x10b   : > { %v2022_v1 = vsel %vm965_vm0, %v2020_v3, %v2021_v60  ;;  %v2227_v44 = vor.u32 %v2226_v35, %v2223_v30  ;;  %v2249_v60 = vshll.u32 %v6635_v14, 16  ;;  %v2243_v3 = vrot.slane %v2241_v62, 5 }
 0x10c   : > { %7872 = vmatpush3.bf16.msra.mxu0 %v8457_v25  ;;  %7570 = vmatmul.mubr.bf16.gmra.mrb[4].mxu1 %v2013_v58  ;;  %v4937_v25 = vshll.u32 %v9450_v18, 16  ;;  %v8466_v18 = vld [vmem:[%s10158_s2 + $0x170] sm:$0xff]   ;;  %v6904_v58 = vld [vmem:[%s8831_s9 + $0x28] sm:$0x1f]  ;;  %v2248_v9 = vrot.slane %v2246_v15, 4  ;;  %v2263_v27 = vshrl.u32 %v6636_v8, 16 }
 0x10d   : > { %7873 = vmatprep.subr.bf16.mxu0 %v8459_v20  ;;  %7586 = vmatpush3.bf16.msra.mxu1 %v8458_v57  ;;  %v2231_v57 = vrot.slane %v2229_v37, 4  ;;  %v2251_v11 = vrot.slane %v2249_v60, 5  ;;  %v2266_v30 = vshll.u32 %v6636_v8, 16  ;;  %v6905_v37 = vld [vmem:[%s8831_s9 + $0x38] sm:$0x1f]  ;;  %v4968_v35 = vshrl.u32 %v9476_v48, 16 }
 0x10e   : > { %7587 = vmatprep.subr.bf16.mxu1 %v8460_v52  ;;  %7573 = vmatprep.mubr.bf16.mxu1 %v2016_v19  ;;  %v4939_v13 = vrot.slane %v4937_v25, 5  ;;  %v4738_v19 = vsel %vm965_vm0, %v4736_v47, %v4737_v49  ;;  %v2258_v47 = vshll.u32 %v9472_v28, 16  ;;  %v6637_v25 = vld [vmem:[%s8821_s8 + $0x48] sm:$0x1f]  ;;  %v2265_v36 = vrot.slane %v2263_v27, 4 }
 0x10f   : > { %7858 = vmatmul.mubr.bf16.gmra.mrb[4].mxu0 %v4726_v23  ;;  %v2235_v24 = vor.u32 %v2234_v40, %v2231_v57  ;;  %v4954_v23 = vshll.u32 %v9464_v61, 16  ;;  %v4962_v61 = vshll.u32 %v6904_v58, 16  ;;  %v2268_v14 = vrot.slane %v2266_v30, 5 }
 0x110   : > { %7874 = vmatpush3.bf16.msra.mxu0 %v8459_v20  ;;  %7861 = vmatprep.mubr.bf16.mxu0 %v4729_v41  ;;  %v4944_v20 = vrot.slane %v4942_v63, 4  ;;  %v4940_v12 = vor.u32 %v4939_v13, %v4936_v7  ;;  %v4959_v41 = vshrl.u32 %v6904_v58, 16  ;;  %v2260_v31 = vrot.slane %v2258_v47, 5  ;;  %v8471_v13 = vld [vmem:[%s10159_s3 + $0x180] sm:$0xff]  }
 0x111   : > { %7875 = vmatprep.subr.bf16.mxu0 %v8461_v34  ;;  %7588 = vmatpush3.bf16.msra.mxu1 %v8460_v52  ;;  %v2240_v52 = vrot.slane %v2238_v29, 4  ;;  %v2236_v2 = vsel %vm1313_vm2, %v2227_v44, %v2235_v24  ;;  %v4964_v33 = vrot.slane %v4962_v61, 5  ;;  %v4971_v57 = vshll.u32 %v9476_v48, 16 }
 0x112   : > { %7589 = vmatprep.subr.bf16.mxu1 %v8462_v39  ;;  %v4948_v59 = vor.u32 %v4947_v6, %v4944_v20  ;;  %v4961_v49 = vrot.slane %v4959_v41, 4  ;;  %v4970_v7 = vrot.slane %v4968_v35, 4  ;;  %v4976_v29 = vshrl.u32 %v6905_v37, 16  ;;  %v6639_v35 = vld [vmem:[%s8821_s8 + $0x68] sm:$0x1f] }
 0x113   : > { %v2269_v20 = vor.u32 %v2268_v14, %v2265_v36  ;;  %v4973_v6 = vrot.slane %v4971_v57, 5  ;;  %v2272_v48 = vshrl.u32 %v9484_v46, 16  ;;  %v2275_v62 = vshll.u32 %v9484_v46, 16  ;;  %v8476_v14 = vld [vmem:[%s10158_s2 + $0x198] sm:$0xff]  }
 0x114   : > { %7876 = vmatpush3.bf16.msra.mxu0 %v8461_v34  ;;  %7574 = vmatmul.mubr.bf16.gmra.mrb[8].mxu1 %v2019_v16  ;;  %v4953_v34 = vrot.slane %v4951_v0, 4  ;;  %v4949_v16 = vsel %vm1313_vm2, %v4940_v12, %v4948_v59  ;;  %v4965_v63 = vor.u32 %v4964_v33, %v4961_v49  ;;  %v4978_v24 = vrot.slane %v4976_v29, 4  ;;  %v8472_v0 = vld [vmem:[%s10158_s2 + $0x188] sm:$0xff]  }
 0x115   : > { %7877 = vmatprep.subr.bf16.mxu0 %v8463_v10  ;;  %7590 = vmatpush3.bf16.msra.mxu1 %v8462_v39  ;;  %v2244_v39 = vor.u32 %v2243_v3, %v2240_v52  ;;  %v2280_v15 = vshrl.u32 %v6637_v25, 16  ;;  %v4974_v12 = vor.u32 %v4973_v6, %v4970_v7  ;;  %v2274_v59 = vrot.slane %v2272_v48, 4  ;;  %v6908_v7 = vld [vmem:[%s8831_s9 + $0x68] sm:$0x1f] }
 0x116   : > { %7591 = vmatprep.subr.bf16.mxu1 %v8464_v22  ;;  %7577 = vmatprep.mubr.bf16.mxu1 %v2022_v1  ;;  %v2252_v1 = vor.u32 %v2251_v11, %v2248_v9  ;;  %v2283_v60 = vshll.u32 %v6637_v25, 16  ;;  %v2277_v3 = vrot.slane %v2275_v62, 5  ;;  %v2289_v61 = vshrl.u32 %v9503_v43, 16 }
 0x117   : > { %7862 = vmatmul.mubr.bf16.gmra.mrb[8].mxu0 %v4732_v38  ;;  %v4956_v38 = vrot.slane %v4954_v23, 5  ;;  %v2282_v9 = vrot.slane %v2280_v15, 4  ;;  %v4985_v23 = vshrl.u32 %v9491_v56, 16  ;;  %v2309_v6 = vshll.u32 %v9513_v45, 16  ;;  %v8477_v15 = vld [vmem:[%s10159_s3 + $0x198] sm:$0xff]  }
 0x118   : > { %7878 = vmatpush3.bf16.msra.mxu0 %v8463_v10  ;;  %7865 = vmatprep.mubr.bf16.mxu0 %v4735_v53  ;;  %v8468_v10 = vld [vmem:[%s10158_s2 + $0x178] sm:$0xff]   ;;  %v2255_v53 = vshrl.u32 %v9472_v28, 16  ;;  %v2253_v26 = vsel %vm1313_vm2, %v2244_v39, %v2252_v1  ;;  %v2285_v46 = vrot.slane %v2283_v60, 5  ;;  %v2291_v47 = vrot.slane %v2289_v61, 4 }
 0x119   : > { %7879 = vmatprep.subr.bf16.mxu0 %v8465_v5  ;;  %7592 = vmatpush3.bf16.msra.mxu1 %v8464_v22  ;;  %v4957_v22 = vor.u32 %v4956_v38, %v4953_v34  ;;  %v8469_v28 = vld [vmem:[%s10159_s3 + $0x178] sm:$0xff]   ;;  %v8473_v34 = vld [vmem:[%s10159_s3 + $0x188] sm:$0xff]   ;;  %v4987_v39 = vrot.slane %v4985_v23, 4  ;;  %v2314_v48 = vshrl.u32 %v6639_v35, 16  ;;  %v2317_v62 = vshll.u32 %v6639_v35, 16 }
 0x11a   : > { %7593 = vmatprep.subr.bf16.mxu1 %v8466_v18  ;;  %v2257_v42 = vrot.slane %v2255_v53, 4  ;;  %v6638_v38 = vld [vmem:[%s8821_s8 + $0x58] sm:$0x1f]  ;;  %v5019_v60 = vshrl.u32 %v9523_v21, 16 }
 0x11b   : > { %v4966_v44 = vsel %vm1313_vm2, %v4957_v22, %v4965_v63  ;;  %v6907_v53 = vld [vmem:[%s8831_s9 + $0x58] sm:$0x1f]  ;;  %v2292_v22 = vshll.u32 %v9503_v43, 16  ;;  %v2297_v33 = vshrl.u32 %v6638_v38, 16  ;;  %v2300_v27 = vshll.u32 %v6638_v38, 16 }
 0x11c   : > { %7880 = vmatpush3.bf16.msra.mxu0 %v8465_v5  ;;  %7578 = vmatmul.mubr.bf16.gmra.mrb[12].mxu1 %v9574_v50  ;;  %v8470_v50 = vld [vmem:[%s10158_s2 + $0x180] sm:$0xff]   ;;  %v2261_v40 = vor.u32 %v2260_v31, %v2257_v42  ;;  %v4979_v5 = vshll.u32 %v6905_v37, 16  ;;  %v8475_v42 = vld [vmem:[%s10159_s3 + $0x190] sm:$0xff]   ;;  %v5002_v31 = vshrl.u32 %v9510_v32, 16  ;;  %v5005_v63 = vshll.u32 %v9510_v32, 16 }
 0x11d   : > { %7881 = vmatprep.subr.bf16.mxu0 %v8467_v54  ;;  %7594 = vmatpush3.bf16.msra.mxu1 %v8466_v18  ;;  %v6906_v18 = vld [vmem:[%s8831_s9 + $0x48] sm:$0x1f]  ;;  %v2294_v25 = vrot.slane %v2292_v22, 5  ;;  %v2302_v43 = vrot.slane %v2300_v27, 5  ;;  %v6640_v23 = vld [vmem:[%s8821_s8 + $0x78] sm:$0x1f] }
 0x11e   : > { %7595 = vmatprep.subr.bf16.mxu1 %v8468_v10  ;;  %7597 = vmatprep.mubr.bf16.mxu1 %v2236_v2  ;;  %v4981_v52 = vrot.slane %v4979_v5, 5  ;;  %v2270_v58 = vsel %vm1313_vm2, %v2261_v40, %v2269_v20  ;;  %v4993_v2 = vshrl.u32 %v6906_v18, 16  ;;  %v4996_v11 = vshll.u32 %v6906_v18, 16  ;;  %v6909_v38 = vld [vmem:[%s8831_s9 + $0x78] sm:$0x1f]  ;;  %v8480_v22 = vld [vmem:[%s10158_s2 + $0x1a8] sm:$0xff]  }
 0x11f   : > { %7866 = vmatmul.mubr.bf16.gmra.mrb[12].mxu0 %v4738_v19  ;;  %v5004_v57 = vrot.slane %v5002_v31, 4  ;;  %v5013_v40 = vshll.u32 %v6907_v53, 16  ;;  %v2295_v29 = vor.u32 %v2294_v25, %v2291_v47  ;;  %v5044_v31 = vshrl.u32 %v6909_v38, 16  ;;  %v8481_v25 = vld [vmem:[%s10159_s3 + $0x1a8] sm:$0xff]  }
 0x120   : > { %7882 = vmatpush3.bf16.msra.mxu0 %v8467_v54  ;;  %7885 = vmatprep.mubr.bf16.mxu0 %v4949_v16  ;;  %v4982_v19 = vor.u32 %v4981_v52, %v4978_v24  ;;  %v4988_v54 = vshll.u32 %v9491_v56, 16  ;;  %v2278_v16 = vor.u32 %v2277_v3, %v2274_v59  ;;  %v8474_v56 = vld [vmem:[%s10158_s2 + $0x190] sm:$0xff]   ;;  %v4995_v49 = vrot.slane %v4993_v2, 4 }
 0x121   : > { %7883 = vmatprep.subr.bf16.mxu0 %v8469_v28  ;;  %7596 = vmatpush3.bf16.msra.mxu1 %v8468_v10  ;;  %v2286_v10 = vor.u32 %v2285_v46, %v2282_v9  ;;  %v4998_v8 = vrot.slane %v4996_v11, 5  ;;  %v5015_v32 = vrot.slane %v5013_v40, 5  ;;  %v2316_v59 = vrot.slane %v2314_v48, 4 }
 0x122   : > { %7613 = vmatprep.subr.bf16.mxu1 %v8470_v50  ;;  %v4983_v41 = vsel %vm1313_vm2, %v4974_v12, %v4982_v19  ;;  %v4990_v1 = vrot.slane %v4988_v54, 5  ;;  %v2311_v12 = vrot.slane %v2309_v6, 5  ;;  %v5022_v19 = vshll.u32 %v9523_v21, 16  ;;  %v8479_v21 = vld [vmem:[%s10159_s3 + $0x1a0] sm:$0xff]  }
 0x123   : > { %v2287_v30 = vsel %vm1313_vm2, %v2278_v16, %v2286_v10  ;;  %v5027_v3 = vshrl.u32 %v6908_v7, 16  ;;  %v5030_v9 = vshll.u32 %v6908_v7, 16  ;;  %v5021_v2 = vrot.slane %v5019_v60, 4  ;;  %v6910_v7 = vld [vmem:[%s8831_s9 + $0x88] sm:$0x1f] }
 0x124   : > { %7884 = vmatpush3.bf16.msra.mxu0 %v8469_v28  ;;  %7598 = vmatmul.mubr.bf16.vlgmr.msra.gmra.mrb[0].mxu1 %v2253_v26  ;;  %v4991_v37 = vor.u32 %v4990_v1, %v4987_v39  ;;  %v4999_v26 = vor.u32 %v4998_v8, %v4995_v49  ;;  %v2299_v28 = vrot.slane %v2297_v33, 4  ;;  %v2323_v11 = vshrl.u32 %v9535_v51, 16  ;;  %v6641_v49 = vld [vmem:[%s8821_s8 + $0x88] sm:$0x1f] }
 0x125   : > { %7901 = vmatprep.subr.bf16.mxu0 %v8471_v13  ;;  %7614 = vmatpush3.bf16.msra.mxu1 %v8470_v50  ;;  %v5010_v50 = vshrl.u32 %v6907_v53, 16  ;;  %v5029_v16 = vrot.slane %v5027_v3, 4  ;;  %v5032_v39 = vrot.slane %v5030_v9, 5  ;;  %v2326_v10 = vshll.u32 %v9535_v51, 16  ;;  %v9706_v3 = vld [vmem:[%s8831_s9 + $0x28] sm:$0xf] }
 0x126   : > { %7615 = vmatprep.subr.bf16.mxu1 %v8472_v0  ;;  %7601 = vmatprep.mubr.bf16.mxu1 %v2270_v58  ;;  %v5000_v36 = vsel %vm1313_vm2, %v4991_v37, %v4999_v26  ;;  %v2303_v5 = vor.u32 %v2302_v43, %v2299_v28  ;;  %v2325_v61 = vrot.slane %v2323_v11, 4  ;;  %v2334_v1 = vshll.u32 %v6640_v23, 16 }
 0x127   : > { %7886 = vmatmul.mubr.bf16.vlgmr.msra.gmra.mrb[0].mxu0 %v4966_v44  ;;  %v5007_v44 = vrot.slane %v5005_v63, 5  ;;  %v5012_v20 = vrot.slane %v5010_v50, 4  ;;  %v5033_v47 = vor.u32 %v5032_v39, %v5029_v16  ;;  %v5036_v33 = vshrl.u32 %v9542_v17, 16  ;;  %v9715_v39 = vld [vmem:[%s8821_s8 + $0x38] sm:$0xf] }
 0x128   : > { %7902 = vmatpush3.bf16.msra.mxu0 %v8471_v13  ;;  %7889 = vmatprep.mubr.bf16.mxu0 %v4983_v41  ;;  %v2306_v13 = vshrl.u32 %v9513_v45, 16  ;;  %v2304_v18 = vsel %vm1313_vm2, %v2295_v29, %v2303_v5  ;;  %v8478_v45 = vld [vmem:[%s10158_s2 + $0x1a0] sm:$0xff]   ;;  %v5024_v41 = vrot.slane %v5022_v19, 5  ;;  %v2328_v27 = vrot.slane %v2326_v10, 5 }
 0x129   : > { %7903 = vmatprep.subr.bf16.mxu0 %v8473_v34  ;;  %7616 = vmatpush3.bf16.msra.mxu1 %v8472_v0  ;;  %v5008_v24 = vor.u32 %v5007_v44, %v5004_v57  ;;  %v5016_v58 = vor.u32 %v5015_v32, %v5012_v20  ;;  %v2319_v0 = vrot.slane %v2317_v62, 5  ;;  %v2336_v37 = vrot.slane %v2334_v1, 5  ;;  %v8483_v20 = vld [vmem:[%s10159_s3 + $0x1b0] sm:$0xff]   ;;  %v6668_v32 = vld [vmem:[%s8821_s8 + $0x20] sm:$0xf8] }
 0x12a   : > { %7617 = vmatprep.subr.bf16.mxu1 %v8474_v56  ;;  %v2308_v52 = vrot.slane %v2306_v13, 4  ;;  %v5025_v53 = vor.u32 %v5024_v41, %v5021_v2  ;;  %v5039_v26 = vshll.u32 %v9542_v17, 16  ;;  %v5047_v35 = vshll.u32 %v6909_v38, 16  ;;  %v6670_v2 = vld [vmem:[%s8821_s8 + $0x30] sm:$0xf8] }
 0x12b   : > { %v5017_v46 = vsel %vm1313_vm2, %v5008_v24, %v5016_v58  ;;  %v2329_v28 = vor.u32 %v2328_v27, %v2325_v61  ;;  %v2340_v17 = vshrl.u32 %v9545_v4, 16  ;;  %v2343_v50 = vshll.u32 %v9545_v4, 16  ;;  %v8484_v24 = vld [vmem:[%s10158_s2 + $0x1b8] sm:$0xff]  }
 0x12c   : > { %7904 = vmatpush3.bf16.msra.mxu0 %v8473_v34  ;;  %7602 = vmatmul.mubr.bf16.gmra.mrb[4].mxu1 %v2287_v30  ;;  %v2312_v54 = vor.u32 %v2311_v12, %v2308_v52  ;;  %v2320_v34 = vor.u32 %v2319_v0, %v2316_v59  ;;  %v5034_v51 = vsel %vm1313_vm2, %v5025_v53, %v5033_v47  ;;  %v5041_v63 = vrot.slane %v5039_v26, 5  ;;  %v9700_v52 = vld [vmem:[%s8821_s8 + $0x28] sm:$0xf]  ;;  %v6937_v59 = vld [vmem:[%s8831_s9 + $0x20] sm:$0xf8] }
 0x12d   : > { %7905 = vmatprep.subr.bf16.mxu0 %v8475_v42  ;;  %7618 = vmatpush3.bf16.msra.mxu1 %v8474_v56  ;;  %v2331_v56 = vshrl.u32 %v6640_v23, 16  ;;  %v5049_v57 = vrot.slane %v5047_v35, 5  ;;  %v2348_v40 = vshrl.u32 %v6641_v49, 16  ;;  %v2342_v44 = vrot.slane %v2340_v17, 4  ;;  %v6939_v47 = vld [vmem:[%s8831_s9 + $0x30] sm:$0xf8] }
 0x12e   : > { %7619 = vmatprep.subr.bf16.mxu1 %v8476_v14  ;;  %7605 = vmatprep.mubr.bf16.mxu1 %v2304_v18  ;;  %v2321_v8 = vsel %vm1313_vm2, %v2312_v54, %v2320_v34  ;;  %v2351_v13 = vshll.u32 %v6641_v49, 16  ;;  %v2345_v48 = vrot.slane %v2343_v50, 5  ;;  %v5053_v18 = vshrl.u32 %v9556_v55, 16  ;;  %v6672_v50 = vld [vmem:[%s8821_s8 + $0x40] sm:$0xf8] }
 0x12f   : > { %7890 = vmatmul.mubr.bf16.gmra.mrb[4].mxu0 %v5000_v36  ;;  %v2333_v30 = vrot.slane %v2331_v56, 4  ;;  %v8482_v36 = vld [vmem:[%s10158_s2 + $0x1b0] sm:$0xff]   ;;  %v2350_v4 = vrot.slane %v2348_v40, 4  ;;  %v5061_v58 = vshrl.u32 %v6910_v7, 16  ;;  %v5064_v12 = vshll.u32 %v6910_v7, 16  ;;  %v9721_v56 = vld [vmem:[%s10158_s2 + $0x1c0] sm:$0xff]  }
 0x130   : > { %7906 = vmatpush3.bf16.msra.mxu0 %v8475_v42  ;;  %7893 = vmatprep.mubr.bf16.mxu0 %v5017_v46  ;;  %v5038_v42 = vrot.slane %v5036_v33, 4  ;;  %v2353_v62 = vrot.slane %v2351_v13, 5  ;;  %v2346_v60 = vor.u32 %v2345_v48, %v2342_v44  ;;  %v5055_v0 = vrot.slane %v5053_v18, 4  ;;  %v9739_v44 = vld [vmem:[%s8821_s8 + $0x48] sm:$0xf] }
 0x131   : > { %7907 = vmatprep.subr.bf16.mxu0 %v8477_v15  ;;  %7620 = vmatpush3.bf16.msra.mxu1 %v8476_v14  ;;  %v2337_v43 = vor.u32 %v2336_v37, %v2333_v30  ;;  %v5046_v14 = vrot.slane %v5044_v31, 4  ;;  %v2563_v19 = vshrl.u32 %v6668_v32, 16  ;;  %v5063_v46 = vrot.slane %v5061_v58, 4  ;;  %v6941_v48 = vld [vmem:[%s8831_s9 + $0x40] sm:$0xf8] }
 0x132   : > { %7621 = vmatprep.subr.bf16.mxu1 %v8478_v45  ;;  %v5042_v5 = vor.u32 %v5041_v63, %v5038_v42  ;;  %v2354_v9 = vor.u32 %v2353_v62, %v2350_v4  ;;  %v5066_v54 = vrot.slane %v5064_v12, 5  ;;  %v2566_v34 = vshll.u32 %v6668_v32, 16 }
 0x133   : > { %v2338_v29 = vsel %vm1313_vm2, %v2329_v28, %v2337_v43  ;;  %v5050_v6 = vor.u32 %v5049_v57, %v5046_v14  ;;  %v2565_v11 = vrot.slane %v2563_v19, 3  ;;  %v2571_v41 = vshrl.u32 %v9700_v52, 16  ;;  %v9729_v43 = vld [vmem:[%s8831_s9 + $0x38] sm:$0xf]  ;;  %v8487_v57 = vld [vmem:[%s10159_s3 + $0x1c0] sm:$0xff]  }
 0x134   : > { %7908 = vmatpush3.bf16.msra.mxu0 %v8477_v15  ;;  %7606 = vmatmul.mubr.bf16.gmra.mrb[8].mxu1 %v2321_v8  ;;  %v5056_v15 = vshll.u32 %v9556_v55, 16  ;;  %v8485_v55 = vld [vmem:[%s10159_s3 + $0x1b8] sm:$0xff]   ;;  %v2574_v16 = vshll.u32 %v9700_v52, 16  ;;  %v5067_v61 = vor.u32 %v5066_v54, %v5063_v46  ;;  %v5274_v10 = vshrl.u32 %v6937_v59, 16  ;;  %v6674_v46 = vld [vmem:[%s8821_s8 + $0x50] sm:$0xf8] }
 0x135   : > { %7909 = vmatprep.subr.bf16.mxu0 %v8479_v21  ;;  %7622 = vmatpush3.bf16.msra.mxu1 %v8478_v45  ;;  %v5051_v45 = vsel %vm1313_vm2, %v5042_v5, %v5050_v6  ;;  %v2568_v1 = vrot.slane %v2566_v34, 4  ;;  %v2573_v49 = vrot.slane %v2571_v41, 3  ;;  %v5277_v53 = vshll.u32 %v6937_v59, 16  ;;  %v9759_v41 = vld [vmem:[%s8821_s8 + $0x58] sm:$0xf] }
 0x136   : > { %7623 = vmatprep.subr.bf16.mxu1 %v8480_v22  ;;  %7609 = vmatprep.mubr.bf16.mxu1 %v2338_v29  ;;  %v5058_v23 = vrot.slane %v5056_v15, 5  ;;  %v2576_v8 = vrot.slane %v2574_v16, 4  ;;  %v5276_v33 = vrot.slane %v5274_v10, 3  ;;  %v5282_v27 = vshrl.u32 %v9706_v3, 16  ;;  %v9746_v15 = vld [vmem:[%s8831_s9 + $0x48] sm:$0xf] }
 0x137   : > { %7894 = vmatmul.mubr.bf16.gmra.mrb[8].mxu0 %v5034_v51  ;;  %v5285_v30 = vshll.u32 %v9706_v3, 16  ;;  %v2569_v37 = vor.u32 %v2568_v1, %v2565_v11  ;;  %v5279_v51 = vrot.slane %v5277_v53, 4  ;;  %v2580_v42 = vshrl.u32 %v6670_v2, 16  ;;  %v8489_v11 = vld [vmem:[%s10159_s3 + $0x1c8] sm:$0xff]   ;;  %v6943_v10 = vld [vmem:[%s8831_s9 + $0x50] sm:$0xf8] }
 0x138   : > { %7910 = vmatpush3.bf16.msra.mxu0 %v8479_v21  ;;  %7897 = vmatprep.mubr.bf16.mxu0 %v5051_v45  ;;  %v2355_v21 = vsel %vm1313_vm2, %v2346_v60, %v2354_v9  ;;  %v5059_v38 = vor.u32 %v5058_v23, %v5055_v0  ;;  %v2577_v26 = vor.u32 %v2576_v8, %v2573_v49  ;;  %v5284_v31 = vrot.slane %v5282_v27, 3  ;;  %v8488_v60 = vld [vmem:[%s10158_s2 + $0x1c8] sm:$0xff]  }
 0x139   : > { %7911 = vmatprep.subr.bf16.mxu0 %v8481_v25  ;;  %7624 = vmatpush3.bf16.msra.mxu1 %v8480_v22  ;;  %v5287_v35 = vrot.slane %v5285_v30, 4  ;;  %v2588_v28 = vshrl.u32 %v9715_v39, 16  ;;  %v5280_v17 = vor.u32 %v5279_v51, %v5276_v33  ;;  %v2591_v14 = vshll.u32 %v9715_v39, 16 }
 0x13a   : > { %7625 = vmatprep.subr.bf16.mxu1 %v8482_v36  ;;  %v5068_v22 = vsel %vm1313_vm2, %v5059_v38, %v5067_v61  ;;  %v2578_v63 = vsel %vm780_vm1, %v2569_v37, %v2577_v26  ;;  %v5291_v5 = vshrl.u32 %v6939_v47, 16  ;;  %v5299_v32 = vshrl.u32 %v9729_v43, 16 }
 0x13b   : > { %v5288_v40 = vor.u32 %v5287_v35, %v5284_v31  ;;  %v2590_v29 = vrot.slane %v2588_v28, 3  ;;  %v2593_v13 = vrot.slane %v2591_v14, 4  ;;  %v5302_v6 = vshll.u32 %v9729_v43, 16 }
 0x13c   : > { %7912 = vmatpush3.bf16.msra.mxu0 %v8481_v25  ;;  %7610 = vmatmul.mubr.bf16.gmra.mrb[12].mxu1 %v2355_v21  ;;  %v2583_v25 = vshll.u32 %v6670_v2, 16  ;;  %v2597_v62 = vshrl.u32 %v6672_v50, 16  ;;  %v5301_v59 = vrot.slane %v5299_v32, 3  ;;  %v2600_v19 = vshll.u32 %v6672_v50, 16  ;;  %v9788_v32 = vld [vmem:[%s8821_s8 + $0x68] sm:$0xf] }
 0x13d   : > { %7913 = vmatprep.subr.bf16.mxu0 %v8483_v20  ;;  %7626 = vmatpush3.bf16.msra.mxu1 %v8482_v36  ;;  %v2582_v36 = vrot.slane %v2580_v42, 3  ;;  %v5289_v4 = vsel %vm780_vm1, %v5280_v17, %v5288_v40  ;;  %v2594_v58 = vor.u32 %v2593_v13, %v2590_v29  ;;  %v5304_v45 = vrot.slane %v5302_v6, 4  ;;  %v6676_v17 = vld [vmem:[%s8821_s8 + $0x60] sm:$0xf8]  ;;  %v8492_v40 = vld [vmem:[%s10158_s2 + $0x1d8] sm:$0xff]  }
 0x13e   : > { %7627 = vmatprep.subr.bf16.mxu1 %v8484_v24  ;;  %7629 = vmatprep.mubr.bf16.mxu1 %v2578_v63  ;;  %v2585_v7 = vrot.slane %v2583_v25, 4  ;;  %v2599_v0 = vrot.slane %v2597_v62, 3  ;;  %v2605_v9 = vshrl.u32 %v9739_v44, 16  ;;  %v2608_v23 = vshll.u32 %v9739_v44, 16  ;;  %v8491_v63 = vld [vmem:[%s10159_s3 + $0x1d0] sm:$0xff]  }
 0x13f   : > { %7898 = vmatmul.mubr.bf16.gmra.mrb[12].mxu0 %v5068_v22  ;;  %v5308_v34 = vshrl.u32 %v6941_v48, 16  ;;  %v2602_v16 = vrot.slane %v2600_v19, 4  ;;  %v5311_v61 = vshll.u32 %v6941_v48, 16  ;;  %v5316_v8 = vshrl.u32 %v9746_v15, 16  ;;  %v9770_v22 = vld [vmem:[%s8831_s9 + $0x58] sm:$0xf] }
 0x140   : > { %7914 = vmatpush3.bf16.msra.mxu0 %v8483_v20  ;;  %v5294_v20 = vshll.u32 %v6939_v47, 16  ;;  %v2586_v18 = vor.u32 %v2585_v7, %v2582_v36  ;;  %7917 = vmatprep.mubr.bf16.mxu0 %v5289_v4  ;;  %v2607_v21 = vrot.slane %v2605_v9, 3  ;;  %v2610_v38 = vrot.slane %v2608_v23, 4  ;;  %v8490_v47 = vld [vmem:[%s10158_s2 + $0x1d0] sm:$0xff]   ;;  %v9793_v62 = vld [vmem:[%s8831_s9 + $0x68] sm:$0xf] }
 0x141   : > { %7628 = vmatpush3.bf16.msra.mxu1 %v8484_v24  ;;  %7915 = vmatprep.subr.bf16.mxu0 %v8485_v55  ;;  %v5293_v24 = vrot.slane %v5291_v5, 3  ;;  %v5310_v49 = vrot.slane %v5308_v34, 3  ;;  %v5319_v53 = vshll.u32 %v9746_v15, 16  ;;  %v2603_v33 = vor.u32 %v2602_v16, %v2599_v0  ;;  %v9803_v34 = vld [vmem:[%s8821_s8 + $0x78] sm:$0xf]  ;;  %v8495_v16 = vld [vmem:[%s10159_s3 + $0x1e0] sm:$0xff]  }
 0x142   : > { %7645 = vmatprep.subr.bf16.mxu1 %v9721_v56  ;;  %v5296_v12 = vrot.slane %v5294_v20, 4  ;;  %v2595_v54 = vsel %vm780_vm1, %v2586_v18, %v2594_v58  ;;  %v2611_v27 = vor.u32 %v2610_v38, %v2607_v21  ;;  %v5313_v30 = vrot.slane %v5311_v61, 4  ;;  %v8493_v20 = vld [vmem:[%s10159_s3 + $0x1d8] sm:$0xff]  }
 0x143   : > { %v2614_v37 = vshrl.u32 %v6674_v46, 16  ;;  %v5321_v26 = vrot.slane %v5319_v53, 4  ;;  %v2617_v51 = vshll.u32 %v6674_v46, 16  ;;  %v2622_v42 = vshrl.u32 %v9759_v41, 16 }
 0x144   : > { %7916 = vmatpush3.bf16.msra.mxu0 %v8485_v55  ;;  %v5297_v2 = vor.u32 %v5296_v12, %v5293_v24  ;;  %v5305_v55 = vor.u32 %v5304_v45, %v5301_v59  ;;  %7630 = vmatmul.mubr.bf16.vlgmr.msra.gmra.mrb[0].mxu1 %v2595_v54  ;;  %v2612_v31 = vsel %vm780_vm1, %v2603_v33, %v2611_v27  ;;  %v2625_v28 = vshll.u32 %v9759_v41, 16  ;;  %v6945_v24 = vld [vmem:[%s8831_s9 + $0x60] sm:$0xf8]  ;;  %v9813_v33 = vld [vmem:[%s8831_s9 + $0x78] sm:$0xf]  ;;  %v8496_v27 = vld [vmem:[%s10158_s2 + $0x1e8] sm:$0xff]  }
 0x145   : > { %7933 = vmatprep.subr.bf16.mxu0 %v8487_v57  ;;  %7646 = vmatpush3.bf16.msra.mxu1 %v9721_v56  ;;  %v5318_v56 = vrot.slane %v5316_v8, 3  ;;  %v5314_v35 = vor.u32 %v5313_v30, %v5310_v49  ;;  %v2616_v25 = vrot.slane %v2614_v37, 3  ;;  %v2619_v14 = vrot.slane %v2617_v51, 4 }
 0x146   : > { %v5306_v1 = vsel %vm780_vm1, %v5297_v2, %v5305_v55  ;;  %7647 = vmatprep.subr.bf16.mxu1 %v8488_v60  ;;  %7633 = vmatprep.mubr.bf16.mxu1 %v2612_v31  ;;  %v5325_v50 = vshrl.u32 %v6943_v10, 16  ;;  %v2627_v7 = vrot.slane %v2625_v28, 4  ;;  %v5328_v29 = vshll.u32 %v6943_v10, 16 }
 0x147   : > { %7918 = vmatmul.mubr.bf16.vlgmr.msra.gmra.mrb[0].mxu0 %v5306_v1  ;;  %v5322_v36 = vor.u32 %v5321_v26, %v5318_v56  ;;  %v5333_v5 = vshrl.u32 %v9770_v22, 16  ;;  %v5336_v13 = vshll.u32 %v9770_v22, 16  ;;  %v2620_v48 = vor.u32 %v2619_v14, %v2616_v25  ;;  %v6947_v1 = vld [vmem:[%s8831_s9 + $0x70] sm:$0xf8] }
 0x148   : > { %7934 = vmatpush3.bf16.msra.mxu0 %v8487_v57  ;;  %v2624_v57 = vrot.slane %v2622_v42, 3  ;;  %v5327_v4 = vrot.slane %v5325_v50, 3  ;;  %v2631_v18 = vshrl.u32 %v6676_v17, 16  ;;  %v5330_v12 = vrot.slane %v5328_v29, 4  ;;  %v8498_v29 = vld [vmem:[%s10158_s2 + $0x1f0] sm:$0xff]  }
 0x149   : > { %7935 = vmatprep.subr.bf16.mxu0 %v8489_v11  ;;  %7648 = vmatpush3.bf16.msra.mxu1 %v8488_v60  ;;  %v5323_v6 = vsel %vm780_vm1, %v5314_v35, %v5322_v36  ;;  %v5335_v59 = vrot.slane %v5333_v5, 3  ;;  %v5338_v45 = vrot.slane %v5336_v13, 4  ;;  %v8494_v60 = vld [vmem:[%s10158_s2 + $0x1e0] sm:$0xff]   ;;  %v2634_v19 = vshll.u32 %v6676_v17, 16 }
 0x14a   : > { %7649 = vmatprep.subr.bf16.mxu1 %v8490_v47  ;;  %7921 = vmatprep.mubr.bf16.mxu0 %v5323_v6  ;;  %v2628_v58 = vor.u32 %v2627_v7, %v2624_v57  ;;  %v2633_v0 = vrot.slane %v2631_v18, 3  ;;  %v2639_v9 = vshrl.u32 %v9788_v32, 16  ;;  %v2642_v23 = vshll.u32 %v9788_v32, 16  ;;  %v6680_v36 = vld [vmem:[%s8821_s8 + $0x80] sm:$0xf8]  ;;  %v8497_v7 = vld [vmem:[%s10159_s3 + $0x1e8] sm:$0xff]  }
 0x14b   : > { %v5331_v54 = vor.u32 %v5330_v12, %v5327_v4  ;;  %v5339_v2 = vor.u32 %v5338_v45, %v5335_v59  ;;  %v5342_v55 = vshrl.u32 %v6945_v24, 16  ;;  %v2636_v21 = vrot.slane %v2634_v19, 4  ;;  %v6949_v12 = vld [vmem:[%s8831_s9 + $0x80] sm:$0xf8]  ;;  %v9836_v59 = vld [vmem:[%s8831_s9 + $0x88] sm:$0xf] }
 0x14c   : > { %7936 = vmatpush3.bf16.msra.mxu0 %v8489_v11  ;;  %v2629_v46 = vsel %vm780_vm1, %v2620_v48, %v2628_v58  ;;  %v6678_v11 = vld [vmem:[%s8821_s8 + $0x70] sm:$0xf8]  ;;  %v2641_v38 = vrot.slane %v2639_v9, 3  ;;  %v2644_v61 = vrot.slane %v2642_v23, 4  ;;  %v5345_v10 = vshll.u32 %v6945_v24, 16 }
 0x14d   : > { %7937 = vmatprep.subr.bf16.mxu0 %v8491_v63  ;;  %7650 = vmatpush3.bf16.msra.mxu1 %v8490_v47  ;;  %v5340_v49 = vsel %vm780_vm1, %v5331_v54, %v5339_v2  ;;  %v5344_v8 = vrot.slane %v5342_v55, 3  ;;  %v5350_v53 = vshrl.u32 %v9793_v62, 16  ;;  %v5353_v47 = vshll.u32 %v9793_v62, 16  ;;  %v9831_v48 = vld [vmem:[%s8821_s8 + $0x88] sm:$0xf] }
 0x14e   : > { %7651 = vmatprep.subr.bf16.mxu1 %v8492_v40  ;;  %7634 = vmatmul.mubr.bf16.gmra.mrb[4].mxu1 %v2629_v46  ;;  %v2637_v30 = vor.u32 %v2636_v21, %v2633_v0  ;;  %v2645_v37 = vor.u32 %v2644_v61, %v2641_v38  ;;  %v5347_v56 = vrot.slane %v5345_v10, 4  ;;  %v2648_v26 = vshrl.u32 %v6678_v11, 16  ;;  %v6682_v23 = vld [vmem:[%s8821_s8 + $0x90] sm:$0xf8]  ;;  %v9846_v61 = vld [vmem:[%s8821_s8 + $0x98] sm:$0xf] }
 0x14f   : > { %7922 = vmatmul.mubr.bf16.gmra.mrb[4].mxu0 %v5340_v49  ;;  %v5352_v51 = vrot.slane %v5350_v53, 3  ;;  %v5355_v42 = vrot.slane %v5353_v47, 4  ;;  %v2651_v31 = vshll.u32 %v6678_v11, 16  ;;  %v2656_v35 = vshrl.u32 %v9803_v34, 16  ;;  %v8500_v10 = vld [vmem:[%s10158_s2 + $0x1f8] sm:$0xff]  }
 0x150   : > { %7938 = vmatpush3.bf16.msra.mxu0 %v8491_v63  ;;  %v2646_v25 = vsel %vm780_vm1, %v2637_v30, %v2645_v37  ;;  %v5348_v28 = vor.u32 %v5347_v56, %v5344_v8  ;;  %v2650_v63 = vrot.slane %v2648_v26, 3  ;;  %v2659_v17 = vshll.u32 %v9803_v34, 16  ;;  %v6951_v47 = vld [vmem:[%s8831_s9 + $0x90] sm:$0xf8]  ;;  %v9856_v26 = vld [vmem:[%s8831_s9 + $0x98] sm:$0xf] }
 0x151   : > { %7939 = vmatprep.subr.bf16.mxu0 %v8493_v20  ;;  %7652 = vmatpush3.bf16.msra.mxu1 %v8492_v40  ;;  %v5356_v14 = vor.u32 %v5355_v42, %v5352_v51  ;;  %v2653_v57 = vrot.slane %v2651_v31, 4  ;;  %v2658_v50 = vrot.slane %v2656_v35, 3  ;;  %v5359_v40 = vshrl.u32 %v6947_v1, 16  ;;  %v8501_v51 = vld [vmem:[%s10159_s3 + $0x1f8] sm:$0xff]  }
 0x152   : > { %7653 = vmatprep.subr.bf16.mxu1 %v8494_v60  ;;  %7637 = vmatprep.mubr.bf16.mxu1 %v2646_v25  ;;  %v2661_v5 = vrot.slane %v2659_v17, 4  ;;  %v5362_v13 = vshll.u32 %v6947_v1, 16  ;;  %v5370_v6 = vshll.u32 %v9813_v33, 16  ;;  %v2665_v58 = vshrl.u32 %v6680_v36, 16 }
 0x153   : > { %v5357_v4 = vsel %vm780_vm1, %v5348_v28, %v5356_v14  ;;  %v2654_v18 = vor.u32 %v2653_v57, %v2650_v63  ;;  %v5361_v24 = vrot.slane %v5359_v40, 3  ;;  %v2668_v54 = vshll.u32 %v6680_v36, 16  ;;  %v9864_v28 = vld [vmem:[%s10158_s2 + $0x200] sm:$0xff]  }
 0x154   : > { %7940 = vmatpush3.bf16.msra.mxu0 %v8493_v20  ;;  %v5367_v20 = vshrl.u32 %v9813_v33, 16  ;;  %7925 = vmatprep.mubr.bf16.mxu0 %v5357_v4  ;;  %v2662_v45 = vor.u32 %v2661_v5, %v2658_v50  ;;  %v5364_v0 = vrot.slane %v5362_v13, 4  ;;  %v5372_v9 = vrot.slane %v5370_v6, 4  ;;  %v9870_v4 = vld [vmem:[%s8821_s8 + $0x20] sm:$0xf0] }
 0x155   : > { %7941 = vmatprep.subr.bf16.mxu0 %v8495_v16  ;;  %7654 = vmatpush3.bf16.msra.mxu1 %v8494_v60  ;;  %v8499_v60 = vld [vmem:[%s10159_s3 + $0x1f0] sm:$0xff]   ;;  %v2667_v46 = vrot.slane %v2665_v58, 3  ;;  %v2673_v2 = vshrl.u32 %v9831_v48, 16  ;;  %v2676_v55 = vshll.u32 %v9831_v48, 16  ;;  %v2670_v1 = vrot.slane %v2668_v54, 4 }
 0x156   : > { %7655 = vmatprep.subr.bf16.mxu1 %v8496_v27  ;;  %v5369_v19 = vrot.slane %v5367_v20, 3  ;;  %v2663_v11 = vsel %vm780_vm1, %v2654_v18, %v2662_v45  ;;  %v5365_v21 = vor.u32 %v5364_v0, %v5361_v24  ;;  %v5379_v53 = vshll.u32 %v6949_v12, 16  ;;  %v9880_v45 = vld [vmem:[%s8831_s9 + $0x20] sm:$0xf0] }
 0x157   : > { %7638 = vmatmul.mubr.bf16.gmra.mrb[8].mxu1 %v2663_v11  ;;  %v2675_v49 = vrot.slane %v2673_v2, 3  ;;  %v2678_v8 = vrot.slane %v2676_v55, 4  ;;  %v5387_v56 = vshll.u32 %v9836_v59, 16  ;;  %v2671_v42 = vor.u32 %v2670_v1, %v2667_v46 }
 0x158   : > { %7942 = vmatpush3.bf16.msra.mxu0 %v8495_v16  ;;  %v5373_v38 = vor.u32 %v5372_v9, %v5369_v19  ;;  %v5376_v16 = vshrl.u32 %v6949_v12, 16  ;;  %v5381_v35 = vrot.slane %v5379_v53, 4  ;;  %v2682_v25 = vshrl.u32 %v6682_v23, 16 }
 0x159   : > { %7943 = vmatprep.subr.bf16.mxu0 %v8497_v7  ;;  %7656 = vmatpush3.bf16.msra.mxu1 %v8496_v27  ;;  %v5384_v27 = vshrl.u32 %v9836_v59, 16  ;;  %v2679_v31 = vor.u32 %v2678_v8, %v2675_v49  ;;  %v5389_v17 = vrot.slane %v5387_v56, 4  ;;  %v2685_v36 = vshll.u32 %v6682_v23, 16  ;;  %v9893_v49 = vld [vmem:[%s8831_s9 + $0x30] sm:$0xf0] }
 0x15a   : > { %7657 = vmatprep.subr.bf16.mxu1 %v8498_v29  ;;  %v5374_v30 = vsel %vm780_vm1, %v5365_v21, %v5373_v38  ;;  %v5378_v37 = vrot.slane %v5376_v16, 3  ;;  %v2690_v14 = vshrl.u32 %v9846_v61, 16  ;;  %v2684_v40 = vrot.slane %v2682_v25, 3  ;;  %v9907_v56 = vld [vmem:[%s8831_s9 + $0x40] sm:$0xf0] }
 0x15b   : > { %7926 = vmatmul.mubr.bf16.gmra.mrb[8].mxu0 %v5374_v30  ;;  %v5386_v63 = vrot.slane %v5384_v27, 3  ;;  %v2680_v57 = vsel %vm780_vm1, %v2671_v42, %v2679_v31  ;;  %v2687_v13 = vrot.slane %v2685_v36, 4  ;;  %v5393_v6 = vshrl.u32 %v6951_v47, 16  ;;  %v9902_v30 = vld [vmem:[%s8821_s8 + $0x40] sm:$0xf0]  ;;  %v8504_v42 = vld [vmem:[%s10158_s2 + $0x208] sm:$0xff]  }
 0x15c   : > { %7944 = vmatpush3.bf16.msra.mxu0 %v8497_v7  ;;  %v5382_v50 = vor.u32 %v5381_v35, %v5378_v37  ;;  %v2693_v7 = vshll.u32 %v9846_v61, 16  ;;  %7641 = vmatprep.mubr.bf16.mxu1 %v2680_v57  ;;  %v2692_v20 = vrot.slane %v2690_v14, 3  ;;  %v5396_v24 = vshll.u32 %v6951_v47, 16  ;;  %v9918_v25 = vld [vmem:[%s8821_s8 + $0x50] sm:$0xf0] }
 0x15d   : > { %7945 = vmatprep.subr.bf16.mxu0 %v8499_v60  ;;  %7658 = vmatpush3.bf16.msra.mxu1 %v8498_v29  ;;  %v5390_v5 = vor.u32 %v5389_v17, %v5386_v63  ;;  %v9875_v29 = vld [vmem:[%s10159_s3 + $0x200] sm:$0xff]   ;;  %v5401_v58 = vshrl.u32 %v9856_v26, 16  ;;  %v5404_v12 = vshll.u32 %v9856_v26, 16  ;;  %v2688_v19 = vor.u32 %v2687_v13, %v2684_v40  ;;  %v9922_v17 = vld [vmem:[%s8831_s9 + $0x50] sm:$0xf0] }
 0x15e   : > { %7659 = vmatprep.subr.bf16.mxu1 %v8500_v10  ;;  %v2695_v18 = vrot.slane %v2693_v7, 4  ;;  %v5395_v9 = vrot.slane %v5393_v6, 3  ;;  %v2908_v23 = vrot.slane %v9870_v4, 4  ;;  %v5398_v54 = vrot.slane %v5396_v24, 4  ;;  %v9937_v40 = vld [vmem:[%s8831_s9 + $0x60] sm:$0xf0] }
 0x15f   : > { %v5391_v0 = vsel %vm780_vm1, %v5382_v50, %v5390_v5  ;;  %v5403_v2 = vrot.slane %v5401_v58, 3  ;;  %v5406_v55 = vrot.slane %v5404_v12, 4  ;;  %v2909_v11 = vrot.slane %v9700_v52, 4  ;;  %v9934_v50 = vld [vmem:[%s8821_s8 + $0x60] sm:$0xf0]  ;;  %v8507_v6 = vld [vmem:[%s10159_s3 + $0x210] sm:$0xff]  }
 0x160   : > { %7946 = vmatpush3.bf16.msra.mxu0 %v8499_v60  ;;  %v9885_v60 = vld [vmem:[%s8821_s8 + $0x30] sm:$0xf0]  ;;  %7929 = vmatprep.mubr.bf16.mxu0 %v5391_v0  ;;  %v2696_v46 = vor.u32 %v2695_v18, %v2692_v20  ;;  %v5619_v21 = vrot.slane %v9880_v45, 4  ;;  %v5620_v38 = vrot.slane %v9706_v3, 4  ;;  %v2912_v47 = vrot.slane %v9715_v39, 4  ;;  %v8508_v58 = vld [vmem:[%s10158_s2 + $0x218] sm:$0xff]  }
 0x161   : > { %7947 = vmatprep.subr.bf16.mxu0 %v8501_v51  ;;  %7660 = vmatpush3.bf16.msra.mxu1 %v8500_v10  ;;  %v5399_v10 = vor.u32 %v5398_v54, %v5395_v9  ;;  %v5407_v1 = vor.u32 %v5406_v55, %v5403_v2  ;;  %v2910_v8 = vsel %vm965_vm0, %v2908_v23, %v2909_v11  ;;  %v2911_v52 = vrot.slane %v9885_v60, 4  ;;  %v9940_v7 = vld [vmem:[%s8821_s8 + $0x70] sm:$0xf0]  ;;  %v8509_v23 = vld [vmem:[%s10159_s3 + $0x218] sm:$0xff]  }
 0x162   : > { %7677 = vmatprep.subr.bf16.mxu1 %v9864_v28  ;;  %v2697_v16 = vsel %vm780_vm1, %v2688_v19, %v2696_v46  ;;  %v5621_v53 = vsel %vm965_vm0, %v5619_v21, %v5620_v38  ;;  %v2914_v37 = vrot.slane %v9902_v30, 4  ;;  %v2915_v27 = vrot.slane %v9739_v44, 4  ;;  %v9978_v54 = vld [vmem:[%s8821_s8 + $0x90] sm:$0xf0] }
 0x163   : > { %7642 = vmatmul.mubr.bf16.gmra.mrb[12].mxu1 %v2697_v16  ;;  %v5408_v3 = vsel %vm780_vm1, %v5399_v10, %v5407_v1  ;;  %v5623_v39 = vrot.slane %v9729_v43, 4  ;;  %v5625_v31 = vrot.slane %v9907_v56, 4  ;;  %v5626_v35 = vrot.slane %v9746_v15, 4  ;;  %v8505_v43 = vld [vmem:[%s10159_s3 + $0x208] sm:$0xff]   ;;  %v8506_v15 = vld [vmem:[%s10158_s2 + $0x210] sm:$0xff]  }
 0x164   : > { %7948 = vmatpush3.bf16.msra.mxu0 %v8501_v51  ;;  %7661 = vmatprep.mubr.bf16.mxu1 %v2910_v8  ;;  %v5622_v51 = vrot.slane %v9893_v49, 4  ;;  %v2913_v44 = vsel %vm965_vm0, %v2911_v52, %v2912_v47  ;;  %v2916_v63 = vsel %vm965_vm0, %v2914_v37, %v2915_v27  ;;  %v2918_v14 = vrot.slane %v9759_v41, 4  ;;  %v9987_v16 = vld [vmem:[%s8831_s9 + $0x90] sm:$0xf0]  ;;  %v8510_v8 = vld [vmem:[%s10158_s2 + $0x220] sm:$0xff]  }
 0x165   : > { %7965 = vmatprep.subr.bf16.mxu0 %v9875_v29  ;;  %7930 = vmatmul.mubr.bf16.gmra.mrb[12].mxu0 %v5408_v3  ;;  %v5627_v57 = vsel %vm965_vm0, %v5625_v31, %v5626_v35  ;;  %v2917_v5 = vrot.slane %v9918_v25, 4  ;;  %v5628_v41 = vrot.slane %v9922_v17, 4  ;;  %v5629_v13 = vrot.slane %v9770_v22, 4  ;;  %v8512_v35 = vld [vmem:[%s10158_s2 + $0x228] sm:$0xff]  }
 0x166   : > { %7949 = vmatprep.mubr.bf16.mxu0 %v5621_v53  ;;  %v5624_v36 = vsel %vm965_vm0, %v5622_v51, %v5623_v39  ;;  %v2921_v20 = vrot.slane %v9788_v32, 4  ;;  %v2920_v18 = vrot.slane %v9934_v50, 4  ;;  %v5632_v24 = vrot.slane %v9793_v62, 4  ;;  %v8511_v53 = vld [vmem:[%s10159_s3 + $0x220] sm:$0xff]   ;;  %v6740_v51 = vld [vmem:[%s8821_s8 + $0x28] sm:$0x1f] }
 0x167   : > { %v5631_v22 = vrot.slane %v9937_v40, 4  ;;  %v2923_v32 = vrot.slane %v9940_v7, 4  ;;  %v2924_v12 = vrot.slane %v9803_v34, 4  ;;  %v5635_v62 = vrot.slane %v9813_v33, 4  ;;  %v9972_v34 = vld [vmem:[%s8821_s8 + $0x80] sm:$0xf0] }
 0x168   : > { %v2927_v19 = vrot.slane %v9831_v48, 4  ;;  %v5630_v9 = vsel %vm965_vm0, %v5628_v41, %v5629_v13  ;;  %v2922_v46 = vsel %vm965_vm0, %v2920_v18, %v2921_v20  ;;  %v9975_v33 = vld [vmem:[%s8831_s9 + $0x80] sm:$0xf0]  ;;  %v2926_v2 = vrot.slane %v9972_v34, 4  ;;  %v8513_v41 = vld [vmem:[%s10159_s3 + $0x228] sm:$0xff]  }
 0x169   : > { %v5637_v48 = vrot.slane %v9975_v33, 4  ;;  %v5638_v55 = vrot.slane %v9836_v59, 4  ;;  %v2929_v11 = vrot.slane %v9978_v54, 4  ;;  %v5633_v21 = vsel %vm965_vm0, %v5631_v22, %v5632_v24 }
 0x16a   : > { %v2930_v38 = vrot.slane %v9846_v61, 4  ;;  %v5641_v10 = vrot.slane %v9856_v26, 4  ;;  %v5640_v1 = vrot.slane %v9987_v16, 4  ;;  %v2925_v59 = vsel %vm965_vm0, %v2923_v32, %v2924_v12 }
 0x16b   : > { %7662 = vmatmul.mubr.bf16.vlgmr.msra.gmra.mrb[0].mxu1 %v2913_v44  ;;  %v3127_v61 = vshrl.u32 %v9870_v4, 16  ;;  %v2928_v52 = vsel %vm965_vm0, %v2926_v2, %v2927_v19  ;;  %v5639_v47 = vsel %vm965_vm0, %v5637_v48, %v5638_v55  ;;  %v3130_v3 = vshll.u32 %v9870_v4, 16  ;;  %v8514_v19 = vld [vmem:[%s10158_s2 + $0x230] sm:$0xff]  }
 0x16c   : > { %7678 = vmatpush3.bf16.msra.mxu1 %v9864_v28  ;;  %7665 = vmatprep.mubr.bf16.mxu1 %v2916_v63  ;;  %v9953_v28 = vld [vmem:[%s8831_s9 + $0x70] sm:$0xf0]  ;;  %v10004_v37 = vsel %vm965_vm0, %v2929_v11, %v2930_v38  ;;  %v10007_v27 = vsel %vm965_vm0, %v5640_v1, %v5641_v10  ;;  %v5838_v31 = vshrl.u32 %v9880_v45, 16  ;;  %v3135_v4 = vshrl.u32 %v6740_v51, 16 }
 0x16d   : > { %7950 = vmatmul.mubr.bf16.vlgmr.msra.gmra.mrb[0].mxu0 %v5624_v36  ;;  %7679 = vmatprep.subr.bf16.mxu1 %v8504_v42  ;;  %v5634_v0 = vrot.slane %v9953_v28, 4  ;;  %v3129_v39 = vrot.slane %v3127_v61, 4  ;;  %v3132_v44 = vrot.slane %v3130_v3, 5  ;;  %v3138_v63 = vshll.u32 %v6740_v51, 16  ;;  %v8515_v38 = vld [vmem:[%s10159_s3 + $0x230] sm:$0xff]  }
 0x16e   : > { %7966 = vmatpush3.bf16.msra.mxu0 %v9875_v29  ;;  %7953 = vmatprep.mubr.bf16.mxu0 %v5627_v57  ;;  %v2919_v29 = vsel %vm965_vm0, %v2917_v5, %v2918_v14  ;;  %v5841_v36 = vshll.u32 %v9880_v45, 16  ;;  %v3144_v5 = vshrl.u32 %v9885_v60, 16  ;;  %v3137_v20 = vrot.slane %v3135_v4, 4 }
 0x16f   : > { %7967 = vmatprep.subr.bf16.mxu0 %v8505_v43  ;;  %v5636_v26 = vsel %vm965_vm0, %v5634_v0, %v5635_v62  ;;  %v3133_v13 = vor.u32 %v3132_v44, %v3129_v39  ;;  %v3147_v32 = vshll.u32 %v9885_v60, 16  ;;  %v5858_v60 = vshll.u32 %v9893_v49, 16 }
 0x170   : > { %7680 = vmatpush3.bf16.msra.mxu1 %v8504_v42  ;;  %v7009_v42 = vld [vmem:[%s8831_s9 + $0x28] sm:$0x1f]  ;;  %v5843_v18 = vrot.slane %v5841_v36, 5  ;;  %v3146_v22 = vrot.slane %v3144_v5, 4  ;;  %v3164_v3 = vshll.u32 %v9902_v30, 16  ;;  %v5872_v4 = vshrl.u32 %v9907_v56, 16 }
 0x171   : > { %7681 = vmatprep.subr.bf16.mxu1 %v8506_v15  ;;  %v5846_v14 = vshrl.u32 %v7009_v42, 16  ;;  %v5849_v57 = vshll.u32 %v7009_v42, 16  ;;  %v7011_v42 = vld [vmem:[%s8831_s9 + $0x48] sm:$0x1f] }
 0x172   : > { %7968 = vmatpush3.bf16.msra.mxu0 %v8505_v43  ;;  %v5840_v43 = vrot.slane %v5838_v31, 4  ;;  %v3166_v36 = vrot.slane %v3164_v3, 5  ;;  %v5880_v5 = vshrl.u32 %v7011_v42, 16  ;;  %v5906_v3 = vshrl.u32 %v9937_v40, 16 }
 0x173   : > { %7666 = vmatmul.mubr.bf16.gmra.mrb[4].mxu1 %v2919_v29  ;;  %7969 = vmatprep.subr.bf16.mxu0 %v8507_v6  ;;  %v5848_v45 = vrot.slane %v5846_v14, 4  ;;  %v5851_v24 = vrot.slane %v5849_v57, 5  ;;  %v5875_v14 = vshll.u32 %v9907_v56, 16 }
 0x174   : > { %7682 = vmatpush3.bf16.msra.mxu1 %v8506_v15  ;;  %7669 = vmatprep.mubr.bf16.mxu1 %v2922_v46  ;;  %v6741_v15 = vld [vmem:[%s8821_s8 + $0x38] sm:$0x1f]  ;;  %v5844_v62 = vor.u32 %v5843_v18, %v5840_v43  ;;  %v5855_v46 = vshrl.u32 %v9893_v49, 16  ;;  %v3178_v18 = vshrl.u32 %v9918_v25, 16 }
 0x175   : > { %7954 = vmatmul.mubr.bf16.gmra.mrb[4].mxu0 %v5630_v9  ;;  %7683 = vmatprep.subr.bf16.mxu1 %v8508_v58  ;;  %v3152_v29 = vshrl.u32 %v6741_v15, 16  ;;  %v3155_v0 = vshll.u32 %v6741_v15, 16  ;;  %v5852_v9 = vor.u32 %v5851_v24, %v5848_v45  ;;  %v5874_v15 = vrot.slane %v5872_v4, 4 }
 0x176   : > { %7970 = vmatpush3.bf16.msra.mxu0 %v8507_v6  ;;  %7957 = vmatprep.mubr.bf16.mxu0 %v5633_v21  ;;  %v3140_v6 = vrot.slane %v3138_v63, 5  ;;  %v6742_v21 = vld [vmem:[%s8821_s8 + $0x48] sm:$0x1f]  ;;  %v8517_v63 = vld [vmem:[%s10159_s3 + $0x238] sm:$0xff]   ;;  %v5882_v45 = vrot.slane %v5880_v5, 4  ;;  %v5909_v4 = vshll.u32 %v9937_v40, 16 }
 0x177   : > { %7971 = vmatprep.subr.bf16.mxu0 %v8509_v23  ;;  %v3154_v48 = vrot.slane %v3152_v29, 4  ;;  %v3157_v55 = vrot.slane %v3155_v0, 5  ;;  %v5853_v10 = vsel %vm1313_vm2, %v5844_v62, %v5852_v9  ;;  %v3169_v51 = vshrl.u32 %v6742_v21, 16 }
 0x178   : > { %7684 = vmatpush3.bf16.msra.mxu1 %v8508_v58  ;;  %v7010_v58 = vld [vmem:[%s8831_s9 + $0x38] sm:$0x1f]  ;;  %v3141_v12 = vor.u32 %v3140_v6, %v3137_v20  ;;  %v3172_v39 = vshll.u32 %v6742_v21, 16  ;;  %v5877_v6 = vrot.slane %v5875_v14, 5  ;;  %v5889_v9 = vshrl.u32 %v9922_v17, 16 }
 0x179   : > { %7685 = vmatprep.subr.bf16.mxu1 %v8510_v8  ;;  %v5863_v11 = vshrl.u32 %v7010_v58, 16  ;;  %v3158_v49 = vor.u32 %v3157_v55, %v3154_v48  ;;  %v3212_v14 = vshrl.u32 %v9940_v7, 16  ;;  %v3215_v5 = vshll.u32 %v9940_v7, 16 }
 0x17a   : > { %7972 = vmatpush3.bf16.msra.mxu0 %v8509_v23  ;;  %v3149_v23 = vrot.slane %v3147_v32, 5  ;;  %v3142_v2 = vsel %vm1313_vm2, %v3133_v13, %v3141_v12  ;;  %v3174_v43 = vrot.slane %v3172_v39, 5  ;;  %v6743_v13 = vld [vmem:[%s8821_s8 + $0x58] sm:$0x1f]  ;;  %v3180_v12 = vrot.slane %v3178_v18, 4 }
 0x17b   : > { %7670 = vmatmul.mubr.bf16.gmra.mrb[8].mxu1 %v2925_v59  ;;  %7973 = vmatprep.subr.bf16.mxu0 %v8511_v53  ;;  %v5857_v59 = vrot.slane %v5855_v46, 4  ;;  %v5865_v61 = vrot.slane %v5863_v11, 4  ;;  %v7012_v32 = vld [vmem:[%s8831_s9 + $0x58] sm:$0x1f]  ;;  %v3186_v62 = vshrl.u32 %v6743_v13, 16  ;;  %v5892_v46 = vshll.u32 %v9922_v17, 16 }
 0x17c   : > { %7686 = vmatpush3.bf16.msra.mxu1 %v8510_v8  ;;  %7673 = vmatprep.mubr.bf16.mxu1 %v2928_v52  ;;  %v3150_v1 = vor.u32 %v3149_v23, %v3146_v22  ;;  %v5860_v8 = vrot.slane %v5858_v60, 5  ;;  %v8516_v52 = vld [vmem:[%s10158_s2 + $0x238] sm:$0xff]   ;;  %v3181_v22 = vshll.u32 %v9918_v25, 16  ;;  %v5897_v60 = vshrl.u32 %v7012_v32, 16  ;;  %v6744_v25 = vld [vmem:[%s8821_s8 + $0x68] sm:$0x1f] }
 0x17d   : > { %7958 = vmatmul.mubr.bf16.gmra.mrb[8].mxu0 %v5636_v26  ;;  %7687 = vmatprep.subr.bf16.mxu1 %v8512_v35  ;;  %v5866_v26 = vshll.u32 %v7010_v58, 16  ;;  %v3188_v23 = vrot.slane %v3186_v62, 4  ;;  %v5891_v21 = vrot.slane %v5889_v9, 4  ;;  %v3198_v17 = vshll.u32 %v9934_v50, 16 }
 0x17e   : > { %7974 = vmatpush3.bf16.msra.mxu0 %v8511_v53  ;;  %7961 = vmatprep.mubr.bf16.mxu0 %v5639_v47  ;;  %v3161_v53 = vshrl.u32 %v9902_v30, 16  ;;  %v5861_v47 = vor.u32 %v5860_v8, %v5857_v59  ;;  %v3159_v31 = vsel %vm1313_vm2, %v3150_v1, %v3158_v49  ;;  %v3171_v30 = vrot.slane %v3169_v51, 4 }
 0x17f   : > { %7975 = vmatprep.subr.bf16.mxu0 %v8513_v41  ;;  %v3183_v0 = vrot.slane %v3181_v22, 5  ;;  %v3195_v59 = vshrl.u32 %v9934_v50, 16  ;;  %v3203_v49 = vshrl.u32 %v6744_v25, 16  ;;  %v3200_v39 = vrot.slane %v3198_v17, 5 }
 0x180   : > { %7688 = vmatpush3.bf16.msra.mxu1 %v8512_v35  ;;  %v5868_v35 = vrot.slane %v5866_v26, 5  ;;  %v3163_v44 = vrot.slane %v3161_v53, 4  ;;  %v3175_v20 = vor.u32 %v3174_v43, %v3171_v30  ;;  %v7013_v26 = vld [vmem:[%s8831_s9 + $0x68] sm:$0x1f]  ;;  %v5908_v50 = vrot.slane %v5906_v3, 4 }
 0x181   : > { %7689 = vmatprep.subr.bf16.mxu1 %v8514_v19  ;;  %v3184_v55 = vor.u32 %v3183_v0, %v3180_v12  ;;  %v5917_v43 = vshll.u32 %v7013_v26, 16  ;;  %v3229_v0 = vshrl.u32 %v9972_v34, 16  ;;  %v3246_v3 = vshrl.u32 %v9978_v54, 16 }
 0x182   : > { %7976 = vmatpush3.bf16.msra.mxu0 %v8513_v41  ;;  %v5869_v57 = vor.u32 %v5868_v35, %v5865_v61  ;;  %v5883_v41 = vshll.u32 %v7011_v42, 16  ;;  %v3206_v61 = vshll.u32 %v6744_v25, 16  ;;  %v3205_v42 = vrot.slane %v3203_v49, 4  ;;  %v6745_v35 = vld [vmem:[%s8821_s8 + $0x78] sm:$0x1f] }
 0x183   : > { %7674 = vmatmul.mubr.bf16.gmra.mrb[12].mxu1 %v10004_v37  ;;  %7977 = vmatprep.subr.bf16.mxu0 %v8515_v38  ;;  %v3167_v37 = vor.u32 %v3166_v36, %v3163_v44  ;;  %v3223_v18 = vshll.u32 %v6745_v35, 16 }
 0x184   : > { %7690 = vmatpush3.bf16.msra.mxu1 %v8514_v19  ;;  %7693 = vmatprep.mubr.bf16.mxu1 %v3142_v2  ;;  %v5870_v56 = vsel %vm1313_vm2, %v5861_v47, %v5869_v57  ;;  %v5885_v24 = vrot.slane %v5883_v41, 5  ;;  %v3189_v19 = vshll.u32 %v6743_v13, 16  ;;  %v5900_v2 = vshll.u32 %v7012_v32, 16  ;;  %v7014_v13 = vld [vmem:[%s8831_s9 + $0x78] sm:$0x1f] }
 0x185   : > { %7962 = vmatmul.mubr.bf16.gmra.mrb[12].mxu0 %v10007_v27  ;;  %7691 = vmatprep.subr.bf16.mxu1 %v8516_v52  ;;  %v3176_v58 = vsel %vm1313_vm2, %v3167_v37, %v3175_v20  ;;  %v5878_v27 = vor.u32 %v5877_v6, %v5874_v15  ;;  %v3197_v47 = vrot.slane %v3195_v59, 4  ;;  %v5911_v57 = vrot.slane %v5909_v4, 5 }
 0x186   : > { %7978 = vmatpush3.bf16.msra.mxu0 %v8515_v38  ;;  %7981 = vmatprep.mubr.bf16.mxu0 %v5853_v10  ;;  %v5886_v29 = vor.u32 %v5885_v24, %v5882_v45  ;;  %v3191_v11 = vrot.slane %v3189_v19, 5  ;;  %v5894_v38 = vrot.slane %v5892_v46, 5  ;;  %v5899_v10 = vrot.slane %v5897_v60, 4 }
 0x187   : > { %7979 = vmatprep.subr.bf16.mxu0 %v8517_v63  ;;  %v5902_v1 = vrot.slane %v5900_v2, 5  ;;  %v3201_v36 = vor.u32 %v3200_v39, %v3197_v47  ;;  %v3220_v41 = vshrl.u32 %v6745_v35, 16  ;;  %v5919_v20 = vrot.slane %v5917_v43, 5  ;;  %v7016_v35 = vld [vmem:[%s8831_s9 + $0x98] sm:$0x1f] }
 0x188   : > { %7692 = vmatpush3.bf16.msra.mxu1 %v8516_v52  ;;  %v5887_v48 = vsel %vm1313_vm2, %v5878_v27, %v5886_v29  ;;  %v3192_v8 = vor.u32 %v3191_v11, %v3188_v23  ;;  %v5895_v53 = vor.u32 %v5894_v38, %v5891_v21  ;;  %v3214_v6 = vrot.slane %v3212_v14, 4  ;;  %v6746_v27 = vld [vmem:[%s8821_s8 + $0x88] sm:$0x1f] }
 0x189   : > { %v5903_v52 = vor.u32 %v5902_v1, %v5899_v10  ;;  %v5912_v40 = vor.u32 %v5911_v57, %v5908_v50  ;;  %v3222_v45 = vrot.slane %v3220_v41, 4  ;;  %v5923_v24 = vshrl.u32 %v9953_v28, 16 }
 0x18a   : > { %7980 = vmatpush3.bf16.msra.mxu0 %v8517_v63  ;;  %v3193_v51 = vsel %vm1313_vm2, %v3184_v55, %v3192_v8  ;;  %v5914_v63 = vshrl.u32 %v7013_v26, 16  ;;  %v3225_v32 = vrot.slane %v3223_v18, 5  ;;  %v5931_v7 = vshrl.u32 %v7014_v13, 16 }
 0x18b   : > { %7694 = vmatmul.mubr.bf16.vlgmr.msra.gmra.mrb[0].mxu1 %v3159_v31  ;;  %v3208_v31 = vrot.slane %v3206_v61, 5  ;;  %v5904_v44 = vsel %vm1313_vm2, %v5895_v53, %v5903_v52  ;;  %v5925_v62 = vrot.slane %v5923_v24, 4  ;;  %v5934_v29 = vshll.u32 %v7014_v13, 16  ;;  %v6747_v53 = vld [vmem:[%s8821_s8 + $0x98] sm:$0x1f] }
 0x18c   : > { %7697 = vmatprep.mubr.bf16.mxu1 %v3176_v58  ;;  %v5916_v15 = vrot.slane %v5914_v63, 4  ;;  %v5926_v58 = vshll.u32 %v9953_v28, 16  ;;  %v3226_v9 = vor.u32 %v3225_v32, %v3222_v45  ;;  %v5933_v46 = vrot.slane %v5931_v7, 4  ;;  %v10094_v7 = vld [vmem:[%s10160_s4] ss:$0 sm:$0xff] }
 0x18d   : > { %7982 = vmatmul.mubr.bf16.vlgmr.msra.gmra.mrb[0].mxu0 %v5870_v56  ;;  %v3209_v30 = vor.u32 %v3208_v31, %v3205_v42  ;;  %v3217_v56 = vrot.slane %v3215_v5, 5  ;;  %v5936_v60 = vrot.slane %v5934_v29, 5  ;;  %v3231_v2 = vrot.slane %v3229_v0, 4  ;;  %v10099_v0 = vld [vmem:[%s10161_s5] ss:$0 sm:$0xff] }
 0x18e   : > { %7985 = vmatprep.mubr.bf16.mxu0 %v5887_v48  ;;  %v5920_v22 = vor.u32 %v5919_v20, %v5916_v15  ;;  %v5928_v23 = vrot.slane %v5926_v58, 5  ;;  %v3232_v28 = vshll.u32 %v9972_v34, 16  ;;  %v3237_v25 = vshrl.u32 %v6746_v27, 16  ;;  %v7015_v48 = vld [vmem:[%s8831_s9 + $0x88] sm:$0x1f] }
 0x18f   : > { %v3210_v37 = vsel %vm1313_vm2, %v3201_v36, %v3209_v30  ;;  %v3218_v12 = vor.u32 %v3217_v56, %v3214_v6  ;;  %v3240_v21 = vshll.u32 %v6746_v27, 16  ;;  %v5940_v38 = vshrl.u32 %v9975_v33, 16 }
 0x190   : > { %v5921_v19 = vsel %vm1313_vm2, %v5912_v40, %v5920_v22  ;;  %v5929_v11 = vor.u32 %v5928_v23, %v5925_v62  ;;  %v5937_v10 = vor.u32 %v5936_v60, %v5933_v46  ;;  %v3234_v1 = vrot.slane %v3232_v28, 5 }
 0x191   : > { %v3227_v55 = vsel %vm1313_vm2, %v3218_v12, %v3226_v9  ;;  %v3239_v59 = vrot.slane %v3237_v25, 4  ;;  %v5943_v8 = vshll.u32 %v9975_v33, 16  ;;  %v3242_v17 = vrot.slane %v3240_v21, 5 }
 0x192   : > { %v5942_v49 = vrot.slane %v5940_v38, 4  ;;  %v5948_v61 = vshrl.u32 %v7015_v48, 16  ;;  %v5951_v26 = vshll.u32 %v7015_v48, 16  ;;  %v5938_v34 = vsel %vm1313_vm2, %v5929_v11, %v5937_v10 }
 0x193   : > { %7698 = vmatmul.mubr.bf16.gmra.mrb[4].mxu1 %v3193_v51  ;;  %v3235_v52 = vor.u32 %v3234_v1, %v3231_v2  ;;  %v5945_v47 = vrot.slane %v5943_v8, 5  ;;  %v3243_v51 = vor.u32 %v3242_v17, %v3239_v59  ;;  %v3249_v31 = vshll.u32 %v9978_v54, 16 }
 0x194   : > { %7701 = vmatprep.mubr.bf16.mxu1 %v3210_v37  ;;  %v5950_v39 = vrot.slane %v5948_v61, 4  ;;  %v5953_v42 = vrot.slane %v5951_v26, 5  ;;  %v3254_v50 = vshrl.u32 %v6747_v53, 16  ;;  %v3257_v4 = vshll.u32 %v6747_v53, 16 }
 0x195   : > { %7986 = vmatmul.mubr.bf16.gmra.mrb[4].mxu0 %v5904_v44  ;;  %v5946_v33 = vor.u32 %v5945_v47, %v5942_v49  ;;  %v3248_v44 = vrot.slane %v3246_v3, 4  ;;  %v3244_v63 = vsel %vm1313_vm2, %v3235_v52, %v3243_v51  ;;  %v3251_v30 = vrot.slane %v3249_v31, 5 }
 0x196   : > { %7989 = vmatprep.mubr.bf16.mxu0 %v5921_v19  ;;  %v5954_v36 = vor.u32 %v5953_v42, %v5950_v39  ;;  %v5957_v43 = vshrl.u32 %v9987_v16, 16  ;;  %v3256_v14 = vrot.slane %v3254_v50, 4  ;;  %v3259_v57 = vrot.slane %v3257_v4, 5 }
 0x197   : > { %v5960_v15 = vshll.u32 %v9987_v16, 16  ;;  %v5965_v5 = vshrl.u32 %v7016_v35, 16  ;;  %v3252_v41 = vor.u32 %v3251_v30, %v3248_v44  ;;  %v5968_v37 = vshll.u32 %v7016_v35, 16 }
 0x198   : > { %v5955_v54 = vsel %vm1313_vm2, %v5946_v33, %v5954_v36  ;;  %v5959_v13 = vrot.slane %v5957_v43, 4  ;;  %v3260_v20 = vor.u32 %v3259_v57, %v3256_v14 }
 0x199   : > { %v5962_v6 = vrot.slane %v5960_v15, 5  ;;  %v5967_v18 = vrot.slane %v5965_v5, 4  ;;  %v5970_v40 = vrot.slane %v5968_v37, 5 }
 0x19a   : > { %v3261_v56 = vsel %vm1313_vm2, %v3252_v41, %v3260_v20 }
 0x19b   : > { %7702 = vmatmul.mubr.bf16.gmra.mrb[8].mxu1 %v3227_v55  ;;  %v5963_v45 = vor.u32 %v5962_v6, %v5959_v13  ;;  %v5971_v24 = vor.u32 %v5970_v40, %v5967_v18 }
 0x19c   : > { %7705 = vmatprep.mubr.bf16.mxu1 %v3244_v63 }
 0x19d   : > { %7990 = vmatmul.mubr.bf16.gmra.mrb[8].mxu0 %v5938_v34  ;;  %v5972_v22 = vsel %vm1313_vm2, %v5963_v45, %v5971_v24 }
 0x19e   : > { %7993 = vmatprep.mubr.bf16.mxu0 %v5955_v54 }
 0x1a3   : > { %7706 = vmatmul.mubr.bf16.gmra.mrb[12].mxu1 %v3261_v56 }
 0x1a5   : > { %7994 = vmatmul.mubr.bf16.gmra.mrb[12].mxu0 %v5972_v22 }
 0x25e   : > { %v7695_v16 = vpop.f32.mrb[0].mxu1 }
 0x25f   : > { %v3369_v32 = vpop.f32.mrb[1].mxu1 }
 0x260   : > { %v7983_v58 = vpop.f32.mrb[0].mxu0  ;;  %v7696_v27 = vpop.f32.mrb[2].mxu1 }
 0x261   : > { %v7997_v12 = vadd.f32 %v7983_v58, %v7695_v16  ;;  %v6080_v62 = vpop.f32.mrb[1].mxu0  ;;  %v3372_v29 = vpop.f32.mrb[3].mxu1 }
 0x262   : > { %v7998_v19 = vadd.f32 %v6080_v62, %v3369_v32  ;;  %v7984_v9 = vpop.f32.mrb[2].mxu0 }
 0x263   : > { %v6168_v23 = vmul.f32 %v7997_v12, %v10094_v7  ;;  %v7999_v46 = vadd.f32 %v7984_v9, %v7696_v27  ;;  %v6083_v60 = vpop.f32.mrb[3].mxu0 }
 0x264   : > { %v6166_v2 = vmul.f32 %v7998_v19, %v10094_v7  ;;  %v8000_v28 = vadd.f32 %v6083_v60, %v3372_v29 }
 0x265   : > { %v6191_v25 = vadd.f32 %v10099_v0, %v6168_v23  ;;  %v6169_v48 = vmul.f32 %v7999_v46, %v10094_v7 }
 0x266   : > { %v6189_v55 = vadd.f32 %v10099_v0, %v6166_v2  ;;  %v6167_v11 = vmul.f32 %v8000_v28, %v10094_v7  ;;  %v7699_v21 = vpop.f32.mrb[4].mxu1 }
 0x267   : > { %v6192_v38 = vadd.f32 %v10099_v0, %v6169_v48  ;;  %v3385_v10 = vpop.f32.mrb[5].mxu1  ;;  %v6207_v17 = vmax.f32 %v6191_v25, 0.0 }
 0x268   : > { %v6190_v1 = vadd.f32 %v10099_v0, %v6167_v11  ;;  %v7987_v59 = vpop.f32.mrb[4].mxu0  ;;  %v7700_v8 = vpop.f32.mrb[6].mxu1  ;;  %v6205_v34 = vmax.f32 %v6189_v55, 0.0 }
 0x269   : > { %v6208_v49 = vmax.f32 %v6192_v38, 0.0  ;;  %v8001_v61 = vadd.f32 %v7987_v59, %v7699_v21  ;;  %v6096_v26 = vpop.f32.mrb[5].mxu0  ;;  %v3388_v53 = vpop.f32.mrb[7].mxu1 }
 0x26a   : > { %v6206_v52 = vmax.f32 %v6190_v1, 0.0  ;;  %v8002_v47 = vadd.f32 %v6096_v26, %v3385_v10  ;;  %v7988_v3 = vpop.f32.mrb[6].mxu0 }
 0x26b   : > { %v7094_v51 = vpack.c.bf16 %v6208_v49, %v6207_v17  ;;  %v6172_v39 = vmul.f32 %v8001_v61, %v10094_v7  ;;  %v8003_v42 = vadd.f32 %v7988_v3, %v7700_v8  ;;  %v6099_v31 = vpop.f32.mrb[7].mxu0 }
 0x26c   : > { %v7089_v35 = vpack.c.bf16 %v6206_v52, %v6205_v34  ;;  %v6170_v33 = vmul.f32 %v8002_v47, %v10094_v7  ;;  %v8004_v44 = vadd.f32 %v6099_v31, %v3388_v53 }
 0x26d   : > { %7126 = vst [vmem:[%s8642_s18 + $0x8] sm:$0xff] %v7094_v51   ;;  %v6195_v50 = vadd.f32 %v10099_v0, %v6172_v39  ;;  %v6173_v4 = vmul.f32 %v8003_v42, %v10094_v7 }
 0x26e   : > { %7090 = vst [vmem:[%s8642_s18] sm:$0xff] %v7089_v35   ;;  %v6193_v63 = vadd.f32 %v10099_v0, %v6170_v33  ;;  %v6171_v36 = vmul.f32 %v8004_v44, %v10094_v7  ;;  %v7703_v30 = vpop.f32.mrb[8].mxu1 }
 0x26f   : > { %v6196_v43 = vadd.f32 %v10099_v0, %v6173_v4  ;;  %v3401_v14 = vpop.f32.mrb[9].mxu1  ;;  %v6211_v54 = vmax.f32 %v6195_v50, 0.0 }
 0x270   : > { %v6194_v57 = vadd.f32 %v10099_v0, %v6171_v36  ;;  %v7991_v15 = vpop.f32.mrb[8].mxu0  ;;  %v7704_v5 = vpop.f32.mrb[10].mxu1  ;;  %v6209_v6 = vmax.f32 %v6193_v63, 0.0 }
 0x271   : > { %v6212_v41 = vmax.f32 %v6196_v43, 0.0  ;;  %v8005_v13 = vadd.f32 %v7991_v15, %v7703_v30  ;;  %v6112_v37 = vpop.f32.mrb[9].mxu0  ;;  %v3404_v20 = vpop.f32.mrb[11].mxu1 }
 0x272   : > { %v6210_v18 = vmax.f32 %v6194_v57, 0.0  ;;  %v8006_v40 = vadd.f32 %v6112_v37, %v3401_v14  ;;  %v7992_v56 = vpop.f32.mrb[10].mxu0 }
 0x273   : > { %v7104_v45 = vpack.c.bf16 %v6212_v41, %v6211_v54  ;;  %v6176_v24 = vmul.f32 %v8005_v13, %v10094_v7  ;;  %v8007_v22 = vadd.f32 %v7992_v56, %v7704_v5  ;;  %v6115_v16 = vpop.f32.mrb[11].mxu0 }
 0x274   : > { %v7099_v32 = vpack.c.bf16 %v6210_v18, %v6209_v6  ;;  %v6174_v58 = vmul.f32 %v8006_v40, %v10094_v7  ;;  %v8008_v27 = vadd.f32 %v6115_v16, %v3404_v20 }
 0x275   : > { %7128 = vst [vmem:[%s8642_s18 + $0x18] sm:$0xff] %v7104_v45   ;;  %v6199_v12 = vadd.f32 %v10099_v0, %v6176_v24  ;;  %v6177_v62 = vmul.f32 %v8007_v22, %v10094_v7 }
 0x276   : > { %7127 = vst [vmem:[%s8642_s18 + $0x10] sm:$0xff] %v7099_v32   ;;  %v6197_v29 = vadd.f32 %v10099_v0, %v6174_v58  ;;  %v6175_v19 = vmul.f32 %v8008_v27, %v10094_v7  ;;  %v7707_v23 = vpop.f32.mrb[12].mxu1 }
 0x277   : > { %v6200_v9 = vadd.f32 %v10099_v0, %v6177_v62  ;;  %v3417_v60 = vpop.f32.mrb[13].mxu1  ;;  %v6215_v2 = vmax.f32 %v6199_v12, 0.0 }
 0x278   : > { %v6198_v46 = vadd.f32 %v10099_v0, %v6175_v19  ;;  %v7708_v25 = vpop.f32.mrb[14].mxu1  ;;  %v6213_v48 = vmax.f32 %v6197_v29, 0.0  ;;  %v7995_v11 = vpop.f32.mrb[12].mxu0 }
 0x279   : > { %v6216_v28 = vmax.f32 %v6200_v9, 0.0  ;;  %v3420_v21 = vpop.f32.mrb[15].mxu1  ;;  %v8009_v10 = vadd.f32 %v7995_v11, %v7707_v23  ;;  %v6128_v1 = vpop.f32.mrb[13].mxu0 }
 0x27a   : > { %v6214_v55 = vmax.f32 %v6198_v46, 0.0  ;;  %v8010_v8 = vadd.f32 %v6128_v1, %v3417_v60  ;;  %v7996_v17 = vpop.f32.mrb[14].mxu0 }
 0x27b   : > { %v7114_v38 = vpack.c.bf16 %v6216_v28, %v6215_v2  ;;  %v6180_v49 = vmul.f32 %v8009_v10, %v10094_v7  ;;  %v8011_v61 = vadd.f32 %v7996_v17, %v7708_v25  ;;  %v6131_v26 = vpop.f32.mrb[15].mxu0 }
 0x27c   : > { %v7109_v59 = vpack.c.bf16 %v6214_v55, %v6213_v48  ;;  %v6178_v53 = vmul.f32 %v8010_v8, %v10094_v7  ;;  %v8012_v34 = vadd.f32 %v6131_v26, %v3420_v21 }
 0x27d   : > { %7130 = vst [vmem:[%s8642_s18 + $0x28] sm:$0xff] %v7114_v38   ;;  %v6203_v52 = vadd.f32 %v10099_v0, %v6180_v49  ;;  %v6181_v47 = vmul.f32 %v8011_v61, %v10094_v7 }
 0x27e   : > { %7129 = vst [vmem:[%s8642_s18 + $0x20] sm:$0xff] %v7109_v59   ;;  %v6201_v3 = vadd.f32 %v10099_v0, %v6178_v53  ;;  %v6179_v51 = vmul.f32 %v8012_v34, %v10094_v7 }
 0x27f   : > { %v6204_v39 = vadd.f32 %v10099_v0, %v6181_v47  ;;  %v6219_v31 = vmax.f32 %v6203_v52, 0.0 }
 0x280   : > { %v6202_v42 = vadd.f32 %v10099_v0, %v6179_v51  ;;  %v6217_v33 = vmax.f32 %v6201_v3, 0.0 }
 0x281   : > { %v6220_v35 = vmax.f32 %v6204_v39, 0.0 }
 0x282   : > { %v6218_v44 = vmax.f32 %v6202_v42, 0.0 }
 0x283   : > { %v7124_v50 = vpack.c.bf16 %v6220_v35, %v6219_v31 }
 0x284   : > { %v7119_v4 = vpack.c.bf16 %v6218_v44, %v6217_v33 }
 0x285   : > { %7132 = vst [vmem:[%s8642_s18 + $0x38] sm:$0xff] %v7124_v50  }
 0x286   : > { %7131 = vst [vmem:[%s8642_s18 + $0x30] sm:$0xff] %v7119_v4  }
 0x287 PF: > { %s16_s25 = sadd.s32 1, %s8558_s25   ;;  %s10163_s21 = smov %s8550_s23 }
 0x288   : > { %p13_p8 = scmp.ge.s32.totalorder %s16_s25, 6   ;;  %s10164_s22 = smov %s8554_s24 }
 0x289   : > { %s10165_s23 = smov %s10168_s26  ;;  %s10166_s24 = smov %s10172_s27 }
 0x28a   :  { %15 = sbr.rel (!%p13_p8) target bundleno = 3 (0x3), region = 105 }

</bundles_post_ra>
